<compile_context>
chip_gen: v7x
topology: tpu7x:2x2x1
jax: 0.10.0
libtpu: 0.0.40
codegen_flags: <defaults>
</compile_context>

<pallas_src>
import functools

import jax
import jax.numpy as jnp
from jax.experimental import pallas as pl
from jax.experimental.pallas import tpu as pltpu

# Indices whose outputs Vgg16.forward collects.
COLLECT = {3, 7, 8, 15, 22}

# torchvision vgg19(pretrained=True).features[:33], layer by layer.
VGG19_FEATURES = (
    ("conv", 3, 64), ("relu",), ("conv", 64, 64), ("relu",), ("pool",),
    ("conv", 64, 128), ("relu",), ("conv", 128, 128), ("relu",), ("pool",),
    ("conv", 128, 256), ("relu",), ("conv", 256, 256), ("relu",),
    ("conv", 256, 256), ("relu",), ("conv", 256, 256), ("relu",), ("pool",),
    ("conv", 256, 512), ("relu",), ("conv", 512, 512), ("relu",),
    ("conv", 512, 512), ("relu",), ("conv", 512, 512), ("relu",), ("pool",),
    ("conv", 512, 512), ("relu",), ("conv", 512, 512), ("relu",),
    ("conv", 512, 512),
)
assert len(VGG19_FEATURES) == 33

# Batch grid axis is independent -> "parallel" (lets v7x shard steps over its
# two TensorCores).  VMEM limit kept below v7x's 64 MiB physical capacity.
_CPARAMS = pltpu.CompilerParams(
    dimension_semantics=("parallel",),
    vmem_limit_bytes=48 * 1024 * 1024,
)


# ----------------------------- Pallas kernels --------------------------------

def _conv3x3_kernel(x_ref, w_ref, b_ref, o_ref, xpad_ref, *,
                    H, W, TH, apply_relu, apply_pool):
    """Fused 3x3 / stride-1 / pad-1 conv (+bias, optional ReLU, optional pool).

    x_ref:    (1, H, W, Cin)   f32 input image (unpadded)
    w_ref:    (3, 3, Cin, Cout) bf16 HWIO weights
    b_ref:    (1, Cout)        f32 bias
    o_ref:    (1, H*W, Cout)   f32   (or (1, H//2, W//2, Cout) when pooled)
    xpad_ref: (H+2, W, Cin)    bf16 VMEM scratch (H-halo padded copy of image)
    """
    cin = x_ref.shape[-1]
    cout = w_ref.shape[-1]

    # H-halo padded bf16 copy of the image in VMEM.  All stores are offset only
    # along the untiled leading (row) axis, so they stay aligned.
    zrow = jnp.zeros((1, W, cin), jnp.bfloat16)
    xpad_ref[0:1] = zrow
    xpad_ref[H + 1:H + 2] = zrow
    xpad_ref[1:H + 1] = x_ref[0].astype(jnp.bfloat16)

    # The W halo is handled by rolling the per-tap matmul result by +-1 output
    # position (pltpu.roll matches jnp.roll: out[j] = in[j - shift]) and
    # zeroing the contributions that would cross the left / right image edge.
    col = jax.lax.broadcasted_iota(jnp.int32, (TH * W, 1), 0) % W
    not_left_edge = col != 0          # left tap contributes only when x > 0
    not_right_edge = col != W - 1     # right tap contributes only when x < W-1

    # Row tiles keep the f32 accumulator small and give the MXU M = TH*W rows.
    for r0 in range(0, H, TH):
        acc = jnp.zeros((TH * W, cout), jnp.float32)
        for dy in range(3):
            # One aligned slab load shared by the three horizontal taps.
            xs = xpad_ref[r0 + dy:r0 + dy + TH].reshape(TH * W, cin)
            y_c = jnp.dot(xs, w_ref[dy, 1], preferred_element_type=jnp.float32)
            y_l = jnp.dot(xs, w_ref[dy, 0], preferred_element_type=jnp.float32)
            y_r = jnp.dot(xs, w_ref[dy, 2], preferred_element_type=jnp.float32)
            acc = acc + y_c
            acc = acc + jnp.where(not_left_edge,
                                  pltpu.roll(y_l, 1, axis=0), 0.0)
            acc = acc + jnp.where(not_right_edge,
                                  pltpu.roll(y_r, TH * W - 1, axis=0), 0.0)
        acc = acc + b_ref[...]                       # (1, Cout) broadcasts
        if apply_relu:
            acc = jnp.maximum(acc, 0.0)
        if apply_pool:
            a = acc.reshape(TH // 2, 2, W // 2, 2, cout)
            m = jnp.maximum(a[:, 0], a[:, 1])        # (TH//2, W//2, 2, Cout)
            m = jnp.maximum(m[:, :, 0], m[:, :, 1])  # (TH//2, W//2, Cout)
            o_ref[0, r0 // 2:r0 // 2 + TH // 2] = m.astype(o_ref.dtype)
        else:
            o_ref[0, r0 * W:(r0 + TH) * W, :] = acc.astype(o_ref.dtype)


def conv3x3(x_nhwc, w, b, *, apply_relu, apply_pool=False):
    """Fused conv3x3(+ReLU)(+maxpool2x2). Weights `w` are bf16 HWIO."""
    N, H, W, cin = x_nhwc.shape
    cout = w.shape[-1]
    TH = min(H, 8)                                   # row tile (even, divides H)

    if apply_pool:
        out_shape = jax.ShapeDtypeStruct((N, H // 2, W // 2, cout), jnp.float32)
        out_spec = pl.BlockSpec((1, H // 2, W // 2, cout),
                                lambda n: (n, 0, 0, 0))
        out_elems = N * (H // 2) * (W // 2) * cout
    else:
        out_shape = jax.ShapeDtypeStruct((N, H * W, cout), jnp.float32)
        out_spec = pl.BlockSpec((1, H * W, cout), lambda n: (n, 0, 0))
        out_elems = N * H * W * cout

    cost = pl.CostEstimate(
        flops=2 * N * H * W * 9 * cin * cout,
        transcendentals=0,
        bytes_accessed=x_nhwc.size * 4 + w.size * 2 + b.size * 4 + out_elems * 4,
    )

    kern = functools.partial(_conv3x3_kernel, H=H, W=W, TH=TH,
                             apply_relu=apply_relu, apply_pool=apply_pool)
    y = pl.pallas_call(
        kern,
        out_shape=out_shape,
        grid=(N,),
        in_specs=[
            pl.BlockSpec((1, H, W, cin), lambda n: (n, 0, 0, 0)),
            pl.BlockSpec((3, 3, cin, cout), lambda n: (0, 0, 0, 0)),
            pl.BlockSpec((1, cout), lambda n: (0, 0)),
        ],
        out_specs=out_spec,
        scratch_shapes=[pltpu.VMEM((H + 2, W, cin), jnp.bfloat16)],
        compiler_params=_CPARAMS,
        cost_estimate=cost,
    )(x_nhwc, w, b.reshape(1, cout))
    if not apply_pool:
        y = y.reshape(N, H, W, cout)   # free: same row-major linearization
    return y


def _relu_kernel(x_ref, o_ref):
    o_ref[...] = jnp.maximum(x_ref[...], 0.0).astype(o_ref.dtype)


def relu(x_nhwc):
    """Standalone ReLU — only used where the pre-ReLU conv output is collected."""
    N, H, W, C = x_nhwc.shape
    return pl.pallas_call(
        _relu_kernel,
        out_shape=jax.ShapeDtypeStruct(x_nhwc.shape, x_nhwc.dtype),
        grid=(N,),
        in_specs=[pl.BlockSpec((1, H, W, C), lambda n: (n, 0, 0, 0))],
        out_specs=pl.BlockSpec((1, H, W, C), lambda n: (n, 0, 0, 0)),
        compiler_params=_CPARAMS,
    )(x_nhwc)


def _maxpool_kernel(x_ref, o_ref, *, H, W):
    C = x_ref.shape[-1]
    x = x_ref[0]                                   # (H, W, C)
    r = x.reshape(H // 2, 2, W // 2, 2, C)
    m = jnp.maximum(r[:, 0], r[:, 1])              # (H//2, W//2, 2, C)
    m = jnp.maximum(m[:, :, 0], m[:, :, 1])        # (H//2, W//2, C)
    o_ref[0] = m.astype(o_ref.dtype)


def maxpool2x2(x_nhwc):
    """Standalone 2x2/stride-2 maxpool — only where the ReLU output is collected."""
    N, H, W, C = x_nhwc.shape
    kern = functools.partial(_maxpool_kernel, H=H, W=W)
    return pl.pallas_call(
        kern,
        out_shape=jax.ShapeDtypeStruct((N, H // 2, W // 2, C), x_nhwc.dtype),
        grid=(N,),
        in_specs=[pl.BlockSpec((1, H, W, C), lambda n: (n, 0, 0, 0))],
        out_specs=pl.BlockSpec((1, H // 2, W // 2, C),
                               lambda n: (n, 0, 0, 0)),
        compiler_params=_CPARAMS,
    )(x_nhwc)


# --------------------------- parameters & forward ----------------------------

def init_params(key):
    """Deterministic synthetic VGG19 conv weights (bf16) matching real shapes."""
    # TODO(synk): torchvision's pretrained ImageNet weights are not loadable
    # here; deterministic synthetic weights with identical shapes are used.
    params = []
    for layer in VGG19_FEATURES:
        if layer[0] != "conv":
            continue
        _, cin, cout = layer
        key, kw, kb = jax.random.split(key, 3)
        std = (2.0 / (9 * cin)) ** 0.5
        w = (jax.random.normal(kw, (3, 3, cin, cout), jnp.float32) * std)
        b = jax.random.normal(kb, (cout,), jnp.float32) * 0.01
        params.append((w.astype(jnp.bfloat16), b))
    return params


def vgg_forward(x_nchw, params):
    """Mirrors Vgg16.forward: run features[:33], collect ii in {3,7,8,15,22}."""
    x = jnp.transpose(x_nchw, (0, 2, 3, 1))        # NCHW -> NHWC
    results = []
    n_layers = len(VGG19_FEATURES)
    pi = 0
    ii = 0
    while ii < n_layers:
        kind = VGG19_FEATURES[ii][0]
        if kind == "conv":
            w, b = params[pi]
            pi += 1
            # Fuse the following ReLU (and 2x2 maxpool) unless an intermediate
            # result inside the fused range has to be collected.
            fuse_relu = (ii + 1 < n_layers
                         and VGG19_FEATURES[ii + 1][0] == "relu"
                         and ii not in COLLECT)
            fuse_pool = (fuse_relu and ii + 2 < n_layers
                         and VGG19_FEATURES[ii + 2][0] == "pool"
                         and (ii + 1) not in COLLECT)
            x = conv3x3(x, w, b, apply_relu=fuse_relu, apply_pool=fuse_pool)
            consumed = 1 + int(fuse_relu) + int(fuse_pool)
        elif kind == "relu":
            x = relu(x)
            consumed = 1
        else:                                      # 2x2 max-pool, stride 2
            x = maxpool2x2(x)
            consumed = 1
        # By construction only the last op of a fused block can be collected.
        for j in range(ii, ii + consumed):
            if j in COLLECT:
                results.append(jnp.transpose(x, (0, 3, 1, 2)))  # back to NCHW
        ii += consumed
    return results


# ---------------------------------- main --------------------------------------

if __name__ == "__main__":
    key = jax.random.PRNGKey(0)
    kx, kp = jax.random.split(key)
    x = jax.random.normal(kx, (2, 3, 32, 32), jnp.float32)   # NCHW, like PyTorch
    params = init_params(kp)

    # Sanity-check the fused Pallas conv against XLA's conv on the first layer
    # (both sides use the same bf16-rounded operands, f32 accumulation).
    w0, b0 = params[0]
    x_nhwc = jnp.transpose(x, (0, 2, 3, 1))
    got = conv3x3(x_nhwc, w0, b0, apply_relu=False)
    ref = jax.lax.conv_general_dilated(
        x_nhwc.astype(jnp.bfloat16).astype(jnp.float32),
        w0.astype(jnp.float32),
        window_strides=(1, 1), padding=((1, 1), (1, 1)),
        dimension_numbers=("NHWC", "HWIO", "NHWC"),
        precision=jax.lax.Precision.HIGHEST) + b0[None, None, None, :]
    assert jnp.allclose(got, ref, rtol=1e-3, atol=1e-3), "conv3x3 mismatch"

    fwd = jax.jit(vgg_forward)
    outs = fwd(x, params)
    outs = [jax.block_until_ready(o) for o in outs]

    expected = [(2, 64, 32, 32), (2, 128, 16, 16), (2, 128, 16, 16),
                (2, 256, 8, 8), (2, 512, 4, 4)]
    assert [tuple(o.shape) for o in outs] == expected, \
        [tuple(o.shape) for o in outs]
    print("KERNEL_OK")
</pallas_src>

<mosaic_0001>
module attributes {stable_mosaic.version = 11 : i64} {
  func.func @_conv3x3_kernel(%arg0: i32, %arg1: memref<1x32x32x3xf32, #tpu.memory_space<vmem>>, %arg2: memref<3x3x3x64xbf16, #tpu.memory_space<vmem>>, %arg3: memref<1x64xf32, #tpu.memory_space<vmem>>, %arg4: memref<1x1024x64xf32, #tpu.memory_space<vmem>>, %arg5: memref<34x32x3xbf16, #tpu.memory_space<vmem>>) attributes {dimension_semantics = [#tpu.dimension_semantics<parallel>], iteration_bounds = array<i64: 2>, scalar_prefetch = 0 : i64, scratch_operands = 1 : i64, tpu.core_type = #tpu.core_type<tc>, window_params = [{transform_indices = @transform_0, window_bounds = array<i64: 1, 32, 32, 3>}, {pipeline_mode = #tpu.pipeline_mode<synchronous>, transform_indices = @transform_1, window_bounds = array<i64: 3, 3, 3, 64>}, {pipeline_mode = #tpu.pipeline_mode<synchronous>, transform_indices = @transform_2, window_bounds = array<i64: 1, 64>}, {transform_indices = @transform_3, window_bounds = array<i64: 1, 1024, 64>}]} {
    %cst = arith.constant 0.000000e+00 : bf16
    %0 = vector.broadcast %cst : bf16 to vector<1x32x3xbf16>
    %c0 = arith.constant 0 : index
    %c0_0 = arith.constant 0 : index
    %c0_1 = arith.constant 0 : index
    %1 = vector.load %arg5[%c0, %c0_0, %c0_1] : memref<34x32x3xbf16, #tpu.memory_space<vmem>>, vector<1x32x3xbf16>
    tpu.vector_store %arg5[%c0, %c0_0, %c0_1], %0 {strides = array<i32>} : memref<34x32x3xbf16, #tpu.memory_space<vmem>>, vector<1x32x3xbf16>,
    %c33 = arith.constant 33 : index
    %c0_2 = arith.constant 0 : index
    %c0_3 = arith.constant 0 : index
    %2 = vector.load %arg5[%c33, %c0_2, %c0_3] : memref<34x32x3xbf16, #tpu.memory_space<vmem>>, vector<1x32x3xbf16>
    tpu.vector_store %arg5[%c33, %c0_2, %c0_3], %0 {strides = array<i32>} : memref<34x32x3xbf16, #tpu.memory_space<vmem>>, vector<1x32x3xbf16>,
    %c0_4 = arith.constant 0 : index
    %c0_5 = arith.constant 0 : index
    %c0_6 = arith.constant 0 : index
    %c0_7 = arith.constant 0 : index
    %3 = vector.load %arg1[%c0_4, %c0_5, %c0_6, %c0_7] : memref<1x32x32x3xf32, #tpu.memory_space<vmem>>, vector<1x32x32x3xf32>
    %4 = vector.shape_cast %3 : vector<1x32x32x3xf32> to vector<32x32x3xf32>
    %5 = arith.truncf %4 : vector<32x32x3xf32> to vector<32x32x3xbf16>
    %c1 = arith.constant 1 : index
    %c0_8 = arith.constant 0 : index
    %c0_9 = arith.constant 0 : index
    %6 = vector.load %arg5[%c1, %c0_8, %c0_9] : memref<34x32x3xbf16, #tpu.memory_space<vmem>>, vector<32x32x3xbf16>
    tpu.vector_store %arg5[%c1, %c0_8, %c0_9], %5 {strides = array<i32>} : memref<34x32x3xbf16, #tpu.memory_space<vmem>>, vector<32x32x3xbf16>,
    %7 = tpu.iota {dimensions = array<i32: 0>} : vector<256x1xi32>
    %c32_i32 = arith.constant 32 : i32
    %c0_i32 = arith.constant 0 : i32
    %8 = arith.cmpi eq, %c32_i32, %c0_i32 : i32
    %c1_i32 = arith.constant 1 : i32
    %9 = arith.select %8, %c1_i32, %c32_i32 : i32
    %10 = vector.broadcast %9 : i32 to vector<256x1xi32>
    %11 = arith.remsi %7, %10 : vector<256x1xi32>
    %c0_i32_10 = arith.constant 0 : i32
    %12 = vector.broadcast %c0_i32_10 : i32 to vector<256x1xi32>
    %13 = arith.cmpi ne, %11, %12 : vector<256x1xi32>
    %c0_i32_11 = arith.constant 0 : i32
    %14 = vector.broadcast %c0_i32_11 : i32 to vector<256x1xi32>
    %15 = arith.cmpi slt, %11, %14 : vector<256x1xi32>
    %c0_i32_12 = arith.constant 0 : i32
    %16 = arith.cmpi slt, %9, %c0_i32_12 : i32
    %17 = vector.broadcast %16 : i1 to vector<256x1xi1>
    %18 = vector.broadcast %17 : vector<256x1xi1> to vector<256x1xi1>
    %19 = arith.xori %15, %18 : vector<256x1xi1>
    %20 = arith.andi %19, %13 : vector<256x1xi1>
    %21 = vector.broadcast %9 : i32 to vector<256x1xi32>
    %22 = arith.addi %11, %21 : vector<256x1xi32>
    %23 = arith.select %20, %22, %11 : vector<256x1xi1>, vector<256x1xi32>
    %c0_i32_13 = arith.constant 0 : i32
    %24 = vector.broadcast %c0_i32_13 : i32 to vector<256x1xi32>
    %25 = arith.cmpi ne, %23, %24 : vector<256x1xi32>
    %c31_i32 = arith.constant 31 : i32
    %26 = vector.broadcast %c31_i32 : i32 to vector<256x1xi32>
    %27 = arith.cmpi ne, %23, %26 : vector<256x1xi32>
    %cst_14 = arith.constant 0.000000e+00 : f32
    %28 = vector.broadcast %cst_14 : f32 to vector<256x64xf32>
    %c0_15 = arith.constant 0 : index
    %c0_16 = arith.constant 0 : index
    %c0_17 = arith.constant 0 : index
    %29 = vector.load %arg5[%c0_15, %c0_16, %c0_17] : memref<34x32x3xbf16, #tpu.memory_space<vmem>>, vector<8x32x3xbf16>
    %30 = vector.shape_cast %29 : vector<8x32x3xbf16> to vector<256x3xbf16>
    %c0_18 = arith.constant 0 : index
    %c1_19 = arith.constant 1 : index
    %c0_20 = arith.constant 0 : index
    %c0_21 = arith.constant 0 : index
    %31 = vector.load %arg2[%c0_18, %c1_19, %c0_20, %c0_21] : memref<3x3x3x64xbf16, #tpu.memory_space<vmem>>, vector<1x1x3x64xbf16>
    %32 = vector.shape_cast %31 : vector<1x1x3x64xbf16> to vector<3x64xbf16>
    %cst_22 = arith.constant dense<0.000000e+00> : vector<256x64xf32>
    %33 = tpu.matmul %30, %32, %cst_22 {dimension_numbers = #tpu.dot_dimension_numbers<[1], [0], [0], [1], [0, 0, 1, 1], [], []>} : vector<256x3xbf16>, vector<3x64xbf16>, vector<256x64xf32> -> vector<256x64xf32>
    %c0_23 = arith.constant 0 : index
    %c0_24 = arith.constant 0 : index
    %c0_25 = arith.constant 0 : index
    %c0_26 = arith.constant 0 : index
    %34 = vector.load %arg2[%c0_23, %c0_24, %c0_25, %c0_26] : memref<3x3x3x64xbf16, #tpu.memory_space<vmem>>, vector<1x1x3x64xbf16>
    %35 = vector.shape_cast %34 : vector<1x1x3x64xbf16> to vector<3x64xbf16>
    %cst_27 = arith.constant dense<0.000000e+00> : vector<256x64xf32>
    %36 = tpu.matmul %30, %35, %cst_27 {dimension_numbers = #tpu.dot_dimension_numbers<[1], [0], [0], [1], [0, 0, 1, 1], [], []>} : vector<256x3xbf16>, vector<3x64xbf16>, vector<256x64xf32> -> vector<256x64xf32>
    %c0_28 = arith.constant 0 : index
    %c2 = arith.constant 2 : index
    %c0_29 = arith.constant 0 : index
    %c0_30 = arith.constant 0 : index
    %37 = vector.load %arg2[%c0_28, %c2, %c0_29, %c0_30] : memref<3x3x3x64xbf16, #tpu.memory_space<vmem>>, vector<1x1x3x64xbf16>
    %38 = vector.shape_cast %37 : vector<1x1x3x64xbf16> to vector<3x64xbf16>
    %cst_31 = arith.constant dense<0.000000e+00> : vector<256x64xf32>
    %39 = tpu.matmul %30, %38, %cst_31 {dimension_numbers = #tpu.dot_dimension_numbers<[1], [0], [0], [1], [0, 0, 1, 1], [], []>} : vector<256x3xbf16>, vector<3x64xbf16>, vector<256x64xf32> -> vector<256x64xf32>
    %40 = arith.addf %28, %33 : vector<256x64xf32>
    %c1_i32_32 = arith.constant 1 : i32
    %41 = tpu.dynamic_rotate %36 by %c1_i32_32 dim 0 : vector<256x64xf32>, i32 -> vector<256x64xf32>
    %cst_33 = arith.constant 0.000000e+00 : f32
    %42 = vector.shape_cast %25 : vector<256x1xi1> to vector<256x1xi1>
    %43 = vector.broadcast %42 : vector<256x1xi1> to vector<256x64xi1>
    %44 = vector.broadcast %cst_33 : f32 to vector<256x64xf32>
    %45 = arith.select %43, %41, %44 : vector<256x64xi1>, vector<256x64xf32>
    %46 = arith.addf %40, %45 : vector<256x64xf32>
    %c255_i32 = arith.constant 255 : i32
    %47 = tpu.dynamic_rotate %39 by %c255_i32 dim 0 : vector<256x64xf32>, i32 -> vector<256x64xf32>
    %cst_34 = arith.constant 0.000000e+00 : f32
    %48 = vector.shape_cast %27 : vector<256x1xi1> to vector<256x1xi1>
    %49 = vector.broadcast %48 : vector<256x1xi1> to vector<256x64xi1>
    %50 = vector.broadcast %cst_34 : f32 to vector<256x64xf32>
    %51 = arith.select %49, %47, %50 : vector<256x64xi1>, vector<256x64xf32>
    %52 = arith.addf %46, %51 : vector<256x64xf32>
    %c1_35 = arith.constant 1 : index
    %c0_36 = arith.constant 0 : index
    %c0_37 = arith.constant 0 : index
    %53 = vector.load %arg5[%c1_35, %c0_36, %c0_37] : memref<34x32x3xbf16, #tpu.memory_space<vmem>>, vector<8x32x3xbf16>
    %54 = vector.shape_cast %53 : vector<8x32x3xbf16> to vector<256x3xbf16>
    %c1_38 = arith.constant 1 : index
    %c1_39 = arith.constant 1 : index
    %c0_40 = arith.constant 0 : index
    %c0_41 = arith.constant 0 : index
    %55 = vector.load %arg2[%c1_38, %c1_39, %c0_40, %c0_41] : memref<3x3x3x64xbf16, #tpu.memory_space<vmem>>, vector<1x1x3x64xbf16>
    %56 = vector.shape_cast %55 : vector<1x1x3x64xbf16> to vector<3x64xbf16>
    %cst_42 = arith.constant dense<0.000000e+00> : vector<256x64xf32>
    %57 = tpu.matmul %54, %56, %cst_42 {dimension_numbers = #tpu.dot_dimension_numbers<[1], [0], [0], [1], [0, 0, 1, 1], [], []>} : vector<256x3xbf16>, vector<3x64xbf16>, vector<256x64xf32> -> vector<256x64xf32>
    %c1_43 = arith.constant 1 : index
    %c0_44 = arith.constant 0 : index
    %c0_45 = arith.constant 0 : index
    %c0_46 = arith.constant 0 : index
    %58 = vector.load %arg2[%c1_43, %c0_44, %c0_45, %c0_46] : memref<3x3x3x64xbf16, #tpu.memory_space<vmem>>, vector<1x1x3x64xbf16>
    %59 = vector.shape_cast %58 : vector<1x1x3x64xbf16> to vector<3x64xbf16>
    %cst_47 = arith.constant dense<0.000000e+00> : vector<256x64xf32>
    %60 = tpu.matmul %54, %59, %cst_47 {dimension_numbers = #tpu.dot_dimension_numbers<[1], [0], [0], [1], [0, 0, 1, 1], [], []>} : vector<256x3xbf16>, vector<3x64xbf16>, vector<256x64xf32> -> vector<256x64xf32>
    %c1_48 = arith.constant 1 : index
    %c2_49 = arith.constant 2 : index
    %c0_50 = arith.constant 0 : index
    %c0_51 = arith.constant 0 : index
    %61 = vector.load %arg2[%c1_48, %c2_49, %c0_50, %c0_51] : memref<3x3x3x64xbf16, #tpu.memory_space<vmem>>, vector<1x1x3x64xbf16>
    %62 = vector.shape_cast %61 : vector<1x1x3x64xbf16> to vector<3x64xbf16>
    %cst_52 = arith.constant dense<0.000000e+00> : vector<256x64xf32>
    %63 = tpu.matmul %54, %62, %cst_52 {dimension_numbers = #tpu.dot_dimension_numbers<[1], [0], [0], [1], [0, 0, 1, 1], [], []>} : vector<256x3xbf16>, vector<3x64xbf16>, vector<256x64xf32> -> vector<256x64xf32>
    %64 = arith.addf %52, %57 : vector<256x64xf32>
    %c1_i32_53 = arith.constant 1 : i32
    %65 = tpu.dynamic_rotate %60 by %c1_i32_53 dim 0 : vector<256x64xf32>, i32 -> vector<256x64xf32>
    %cst_54 = arith.constant 0.000000e+00 : f32
    %66 = vector.shape_cast %25 : vector<256x1xi1> to vector<256x1xi1>
    %67 = vector.broadcast %66 : vector<256x1xi1> to vector<256x64xi1>
    %68 = vector.broadcast %cst_54 : f32 to vector<256x64xf32>
    %69 = arith.select %67, %65, %68 : vector<256x64xi1>, vector<256x64xf32>
    %70 = arith.addf %64, %69 : vector<256x64xf32>
    %c255_i32_55 = arith.constant 255 : i32
    %71 = tpu.dynamic_rotate %63 by %c255_i32_55 dim 0 : vector<256x64xf32>, i32 -> vector<256x64xf32>
    %cst_56 = arith.constant 0.000000e+00 : f32
    %72 = vector.shape_cast %27 : vector<256x1xi1> to vector<256x1xi1>
    %73 = vector.broadcast %72 : vector<256x1xi1> to vector<256x64xi1>
    %74 = vector.broadcast %cst_56 : f32 to vector<256x64xf32>
    %75 = arith.select %73, %71, %74 : vector<256x64xi1>, vector<256x64xf32>
    %76 = arith.addf %70, %75 : vector<256x64xf32>
    %c2_57 = arith.constant 2 : index
    %c0_58 = arith.constant 0 : index
    %c0_59 = arith.constant 0 : index
    %77 = vector.load %arg5[%c2_57, %c0_58, %c0_59] : memref<34x32x3xbf16, #tpu.memory_space<vmem>>, vector<8x32x3xbf16>
    %78 = vector.shape_cast %77 : vector<8x32x3xbf16> to vector<256x3xbf16>
    %c2_60 = arith.constant 2 : index
    %c1_61 = arith.constant 1 : index
    %c0_62 = arith.constant 0 : index
    %c0_63 = arith.constant 0 : index
    %79 = vector.load %arg2[%c2_60, %c1_61, %c0_62, %c0_63] : memref<3x3x3x64xbf16, #tpu.memory_space<vmem>>, vector<1x1x3x64xbf16>
    %80 = vector.shape_cast %79 : vector<1x1x3x64xbf16> to vector<3x64xbf16>
    %cst_64 = arith.constant dense<0.000000e+00> : vector<256x64xf32>
    %81 = tpu.matmul %78, %80, %cst_64 {dimension_numbers = #tpu.dot_dimension_numbers<[1], [0], [0], [1], [0, 0, 1, 1], [], []>} : vector<256x3xbf16>, vector<3x64xbf16>, vector<256x64xf32> -> vector<256x64xf32>
    %c2_65 = arith.constant 2 : index
    %c0_66 = arith.constant 0 : index
    %c0_67 = arith.constant 0 : index
    %c0_68 = arith.constant 0 : index
    %82 = vector.load %arg2[%c2_65, %c0_66, %c0_67, %c0_68] : memref<3x3x3x64xbf16, #tpu.memory_space<vmem>>, vector<1x1x3x64xbf16>
    %83 = vector.shape_cast %82 : vector<1x1x3x64xbf16> to vector<3x64xbf16>
    %cst_69 = arith.constant dense<0.000000e+00> : vector<256x64xf32>
    %84 = tpu.matmul %78, %83, %cst_69 {dimension_numbers = #tpu.dot_dimension_numbers<[1], [0], [0], [1], [0, 0, 1, 1], [], []>} : vector<256x3xbf16>, vector<3x64xbf16>, vector<256x64xf32> -> vector<256x64xf32>
    %c2_70 = arith.constant 2 : index
    %c2_71 = arith.constant 2 : index
    %c0_72 = arith.constant 0 : index
    %c0_73 = arith.constant 0 : index
    %85 = vector.load %arg2[%c2_70, %c2_71, %c0_72, %c0_73] : memref<3x3x3x64xbf16, #tpu.memory_space<vmem>>, vector<1x1x3x64xbf16>
    %86 = vector.shape_cast %85 : vector<1x1x3x64xbf16> to vector<3x64xbf16>
    %cst_74 = arith.constant dense<0.000000e+00> : vector<256x64xf32>
    %87 = tpu.matmul %78, %86, %cst_74 {dimension_numbers = #tpu.dot_dimension_numbers<[1], [0], [0], [1], [0, 0, 1, 1], [], []>} : vector<256x3xbf16>, vector<3x64xbf16>, vector<256x64xf32> -> vector<256x64xf32>
    %88 = arith.addf %76, %81 : vector<256x64xf32>
    %c1_i32_75 = arith.constant 1 : i32
    %89 = tpu.dynamic_rotate %84 by %c1_i32_75 dim 0 : vector<256x64xf32>, i32 -> vector<256x64xf32>
    %cst_76 = arith.constant 0.000000e+00 : f32
    %90 = vector.shape_cast %25 : vector<256x1xi1> to vector<256x1xi1>
    %91 = vector.broadcast %90 : vector<256x1xi1> to vector<256x64xi1>
    %92 = vector.broadcast %cst_76 : f32 to vector<256x64xf32>
    %93 = arith.select %91, %89, %92 : vector<256x64xi1>, vector<256x64xf32>
    %94 = arith.addf %88, %93 : vector<256x64xf32>
    %c255_i32_77 = arith.constant 255 : i32
    %95 = tpu.dynamic_rotate %87 by %c255_i32_77 dim 0 : vector<256x64xf32>, i32 -> vector<256x64xf32>
    %cst_78 = arith.constant 0.000000e+00 : f32
    %96 = vector.shape_cast %27 : vector<256x1xi1> to vector<256x1xi1>
    %97 = vector.broadcast %96 : vector<256x1xi1> to vector<256x64xi1>
    %98 = vector.broadcast %cst_78 : f32 to vector<256x64xf32>
    %99 = arith.select %97, %95, %98 : vector<256x64xi1>, vector<256x64xf32>
    %100 = arith.addf %94, %99 : vector<256x64xf32>
    %c0_79 = arith.constant 0 : index
    %c0_80 = arith.constant 0 : index
    %101 = vector.load %arg3[%c0_79, %c0_80] : memref<1x64xf32, #tpu.memory_space<vmem>>, vector<1x64xf32>
    %102 = vector.broadcast %101 : vector<1x64xf32> to vector<256x64xf32>
    %103 = arith.addf %100, %102 : vector<256x64xf32>
    %c0_81 = arith.constant 0 : index
    %c0_82 = arith.constant 0 : index
    %c0_83 = arith.constant 0 : index
    %104 = vector.load %arg4[%c0_81, %c0_82, %c0_83] : memref<1x1024x64xf32, #tpu.memory_space<vmem>>, vector<1x256x64xf32>
    %105 = vector.shape_cast %104 : vector<1x256x64xf32> to vector<256x64xf32>
    %106 = vector.shape_cast %103 : vector<256x64xf32> to vector<1x256x64xf32>
    tpu.vector_store %arg4[%c0_81, %c0_82, %c0_83], %106 {strides = array<i32>} : memref<1x1024x64xf32, #tpu.memory_space<vmem>>, vector<1x256x64xf32>,
    %cst_84 = arith.constant 0.000000e+00 : f32
    %107 = vector.broadcast %cst_84 : f32 to vector<256x64xf32>
    %c8 = arith.constant 8 : index
    %c0_85 = arith.constant 0 : index
    %c0_86 = arith.constant 0 : index
    %108 = vector.load %arg5[%c8, %c0_85, %c0_86] : memref<34x32x3xbf16, #tpu.memory_space<vmem>>, vector<8x32x3xbf16>
    %109 = vector.shape_cast %108 : vector<8x32x3xbf16> to vector<256x3xbf16>
    %c0_87 = arith.constant 0 : index
    %c1_88 = arith.constant 1 : index
    %c0_89 = arith.constant 0 : index
    %c0_90 = arith.constant 0 : index
    %110 = vector.load %arg2[%c0_87, %c1_88, %c0_89, %c0_90] : memref<3x3x3x64xbf16, #tpu.memory_space<vmem>>, vector<1x1x3x64xbf16>
    %111 = vector.shape_cast %110 : vector<1x1x3x64xbf16> to vector<3x64xbf16>
    %cst_91 = arith.constant dense<0.000000e+00> : vector<256x64xf32>
    %112 = tpu.matmul %109, %111, %cst_91 {dimension_numbers = #tpu.dot_dimension_numbers<[1], [0], [0], [1], [0, 0, 1, 1], [], []>} : vector<256x3xbf16>, vector<3x64xbf16>, vector<256x64xf32> -> vector<256x64xf32>
    %c0_92 = arith.constant 0 : index
    %c0_93 = arith.constant 0 : index
    %c0_94 = arith.constant 0 : index
    %c0_95 = arith.constant 0 : index
    %113 = vector.load %arg2[%c0_92, %c0_93, %c0_94, %c0_95] : memref<3x3x3x64xbf16, #tpu.memory_space<vmem>>, vector<1x1x3x64xbf16>
    %114 = vector.shape_cast %113 : vector<1x1x3x64xbf16> to vector<3x64xbf16>
    %cst_96 = arith.constant dense<0.000000e+00> : vector<256x64xf32>
    %115 = tpu.matmul %109, %114, %cst_96 {dimension_numbers = #tpu.dot_dimension_numbers<[1], [0], [0], [1], [0, 0, 1, 1], [], []>} : vector<256x3xbf16>, vector<3x64xbf16>, vector<256x64xf32> -> vector<256x64xf32>
    %c0_97 = arith.constant 0 : index
    %c2_98 = arith.constant 2 : index
    %c0_99 = arith.constant 0 : index
    %c0_100 = arith.constant 0 : index
    %116 = vector.load %arg2[%c0_97, %c2_98, %c0_99, %c0_100] : memref<3x3x3x64xbf16, #tpu.memory_space<vmem>>, vector<1x1x3x64xbf16>
    %117 = vector.shape_cast %116 : vector<1x1x3x64xbf16> to vector<3x64xbf16>
    %cst_101 = arith.constant dense<0.000000e+00> : vector<256x64xf32>
    %118 = tpu.matmul %109, %117, %cst_101 {dimension_numbers = #tpu.dot_dimension_numbers<[1], [0], [0], [1], [0, 0, 1, 1], [], []>} : vector<256x3xbf16>, vector<3x64xbf16>, vector<256x64xf32> -> vector<256x64xf32>
    %119 = arith.addf %107, %112 : vector<256x64xf32>
    %c1_i32_102 = arith.constant 1 : i32
    %120 = tpu.dynamic_rotate %115 by %c1_i32_102 dim 0 : vector<256x64xf32>, i32 -> vector<256x64xf32>
    %cst_103 = arith.constant 0.000000e+00 : f32
    %121 = vector.shape_cast %25 : vector<256x1xi1> to vector<256x1xi1>
    %122 = vector.broadcast %121 : vector<256x1xi1> to vector<256x64xi1>
    %123 = vector.broadcast %cst_103 : f32 to vector<256x64xf32>
    %124 = arith.select %122, %120, %123 : vector<256x64xi1>, vector<256x64xf32>
    %125 = arith.addf %119, %124 : vector<256x64xf32>
    %c255_i32_104 = arith.constant 255 : i32
    %126 = tpu.dynamic_rotate %118 by %c255_i32_104 dim 0 : vector<256x64xf32>, i32 -> vector<256x64xf32>
    %cst_105 = arith.constant 0.000000e+00 : f32
    %127 = vector.shape_cast %27 : vector<256x1xi1> to vector<256x1xi1>
    %128 = vector.broadcast %127 : vector<256x1xi1> to vector<256x64xi1>
    %129 = vector.broadcast %cst_105 : f32 to vector<256x64xf32>
    %130 = arith.select %128, %126, %129 : vector<256x64xi1>, vector<256x64xf32>
    %131 = arith.addf %125, %130 : vector<256x64xf32>
    %c9 = arith.constant 9 : index
    %c0_106 = arith.constant 0 : index
    %c0_107 = arith.constant 0 : index
    %132 = vector.load %arg5[%c9, %c0_106, %c0_107] : memref<34x32x3xbf16, #tpu.memory_space<vmem>>, vector<8x32x3xbf16>
    %133 = vector.shape_cast %132 : vector<8x32x3xbf16> to vector<256x3xbf16>
    %c1_108 = arith.constant 1 : index
    %c1_109 = arith.constant 1 : index
    %c0_110 = arith.constant 0 : index
    %c0_111 = arith.constant 0 : index
    %134 = vector.load %arg2[%c1_108, %c1_109, %c0_110, %c0_111] : memref<3x3x3x64xbf16, #tpu.memory_space<vmem>>, vector<1x1x3x64xbf16>
    %135 = vector.shape_cast %134 : vector<1x1x3x64xbf16> to vector<3x64xbf16>
    %cst_112 = arith.constant dense<0.000000e+00> : vector<256x64xf32>
    %136 = tpu.matmul %133, %135, %cst_112 {dimension_numbers = #tpu.dot_dimension_numbers<[1], [0], [0], [1], [0, 0, 1, 1], [], []>} : vector<256x3xbf16>, vector<3x64xbf16>, vector<256x64xf32> -> vector<256x64xf32>
    %c1_113 = arith.constant 1 : index
    %c0_114 = arith.constant 0 : index
    %c0_115 = arith.constant 0 : index
    %c0_116 = arith.constant 0 : index
    %137 = vector.load %arg2[%c1_113, %c0_114, %c0_115, %c0_116] : memref<3x3x3x64xbf16, #tpu.memory_space<vmem>>, vector<1x1x3x64xbf16>
    %138 = vector.shape_cast %137 : vector<1x1x3x64xbf16> to vector<3x64xbf16>
    %cst_117 = arith.constant dense<0.000000e+00> : vector<256x64xf32>
    %139 = tpu.matmul %133, %138, %cst_117 {dimension_numbers = #tpu.dot_dimension_numbers<[1], [0], [0], [1], [0, 0, 1, 1], [], []>} : vector<256x3xbf16>, vector<3x64xbf16>, vector<256x64xf32> -> vector<256x64xf32>
    %c1_118 = arith.constant 1 : index
    %c2_119 = arith.constant 2 : index
    %c0_120 = arith.constant 0 : index
    %c0_121 = arith.constant 0 : index
    %140 = vector.load %arg2[%c1_118, %c2_119, %c0_120, %c0_121] : memref<3x3x3x64xbf16, #tpu.memory_space<vmem>>, vector<1x1x3x64xbf16>
    %141 = vector.shape_cast %140 : vector<1x1x3x64xbf16> to vector<3x64xbf16>
    %cst_122 = arith.constant dense<0.000000e+00> : vector<256x64xf32>
    %142 = tpu.matmul %133, %141, %cst_122 {dimension_numbers = #tpu.dot_dimension_numbers<[1], [0], [0], [1], [0, 0, 1, 1], [], []>} : vector<256x3xbf16>, vector<3x64xbf16>, vector<256x64xf32> -> vector<256x64xf32>
    %143 = arith.addf %131, %136 : vector<256x64xf32>
    %c1_i32_123 = arith.constant 1 : i32
    %144 = tpu.dynamic_rotate %139 by %c1_i32_123 dim 0 : vector<256x64xf32>, i32 -> vector<256x64xf32>
    %cst_124 = arith.constant 0.000000e+00 : f32
    %145 = vector.shape_cast %25 : vector<256x1xi1> to vector<256x1xi1>
    %146 = vector.broadcast %145 : vector<256x1xi1> to vector<256x64xi1>
    %147 = vector.broadcast %cst_124 : f32 to vector<256x64xf32>
    %148 = arith.select %146, %144, %147 : vector<256x64xi1>, vector<256x64xf32>
    %149 = arith.addf %143, %148 : vector<256x64xf32>
    %c255_i32_125 = arith.constant 255 : i32
    %150 = tpu.dynamic_rotate %142 by %c255_i32_125 dim 0 : vector<256x64xf32>, i32 -> vector<256x64xf32>
    %cst_126 = arith.constant 0.000000e+00 : f32
    %151 = vector.shape_cast %27 : vector<256x1xi1> to vector<256x1xi1>
    %152 = vector.broadcast %151 : vector<256x1xi1> to vector<256x64xi1>
    %153 = vector.broadcast %cst_126 : f32 to vector<256x64xf32>
    %154 = arith.select %152, %150, %153 : vector<256x64xi1>, vector<256x64xf32>
    %155 = arith.addf %149, %154 : vector<256x64xf32>
    %c10 = arith.constant 10 : index
    %c0_127 = arith.constant 0 : index
    %c0_128 = arith.constant 0 : index
    %156 = vector.load %arg5[%c10, %c0_127, %c0_128] : memref<34x32x3xbf16, #tpu.memory_space<vmem>>, vector<8x32x3xbf16>
    %157 = vector.shape_cast %156 : vector<8x32x3xbf16> to vector<256x3xbf16>
    %c2_129 = arith.constant 2 : index
    %c1_130 = arith.constant 1 : index
    %c0_131 = arith.constant 0 : index
    %c0_132 = arith.constant 0 : index
    %158 = vector.load %arg2[%c2_129, %c1_130, %c0_131, %c0_132] : memref<3x3x3x64xbf16, #tpu.memory_space<vmem>>, vector<1x1x3x64xbf16>
    %159 = vector.shape_cast %158 : vector<1x1x3x64xbf16> to vector<3x64xbf16>
    %cst_133 = arith.constant dense<0.000000e+00> : vector<256x64xf32>
    %160 = tpu.matmul %157, %159, %cst_133 {dimension_numbers = #tpu.dot_dimension_numbers<[1], [0], [0], [1], [0, 0, 1, 1], [], []>} : vector<256x3xbf16>, vector<3x64xbf16>, vector<256x64xf32> -> vector<256x64xf32>
    %c2_134 = arith.constant 2 : index
    %c0_135 = arith.constant 0 : index
    %c0_136 = arith.constant 0 : index
    %c0_137 = arith.constant 0 : index
    %161 = vector.load %arg2[%c2_134, %c0_135, %c0_136, %c0_137] : memref<3x3x3x64xbf16, #tpu.memory_space<vmem>>, vector<1x1x3x64xbf16>
    %162 = vector.shape_cast %161 : vector<1x1x3x64xbf16> to vector<3x64xbf16>
    %cst_138 = arith.constant dense<0.000000e+00> : vector<256x64xf32>
    %163 = tpu.matmul %157, %162, %cst_138 {dimension_numbers = #tpu.dot_dimension_numbers<[1], [0], [0], [1], [0, 0, 1, 1], [], []>} : vector<256x3xbf16>, vector<3x64xbf16>, vector<256x64xf32> -> vector<256x64xf32>
    %c2_139 = arith.constant 2 : index
    %c2_140 = arith.constant 2 : index
    %c0_141 = arith.constant 0 : index
    %c0_142 = arith.constant 0 : index
    %164 = vector.load %arg2[%c2_139, %c2_140, %c0_141, %c0_142] : memref<3x3x3x64xbf16, #tpu.memory_space<vmem>>, vector<1x1x3x64xbf16>
    %165 = vector.shape_cast %164 : vector<1x1x3x64xbf16> to vector<3x64xbf16>
    %cst_143 = arith.constant dense<0.000000e+00> : vector<256x64xf32>
    %166 = tpu.matmul %157, %165, %cst_143 {dimension_numbers = #tpu.dot_dimension_numbers<[1], [0], [0], [1], [0, 0, 1, 1], [], []>} : vector<256x3xbf16>, vector<3x64xbf16>, vector<256x64xf32> -> vector<256x64xf32>
    %167 = arith.addf %155, %160 : vector<256x64xf32>
    %c1_i32_144 = arith.constant 1 : i32
    %168 = tpu.dynamic_rotate %163 by %c1_i32_144 dim 0 : vector<256x64xf32>, i32 -> vector<256x64xf32>
    %cst_145 = arith.constant 0.000000e+00 : f32
    %169 = vector.shape_cast %25 : vector<256x1xi1> to vector<256x1xi1>
    %170 = vector.broadcast %169 : vector<256x1xi1> to vector<256x64xi1>
    %171 = vector.broadcast %cst_145 : f32 to vector<256x64xf32>
    %172 = arith.select %170, %168, %171 : vector<256x64xi1>, vector<256x64xf32>
    %173 = arith.addf %167, %172 : vector<256x64xf32>
    %c255_i32_146 = arith.constant 255 : i32
    %174 = tpu.dynamic_rotate %166 by %c255_i32_146 dim 0 : vector<256x64xf32>, i32 -> vector<256x64xf32>
    %cst_147 = arith.constant 0.000000e+00 : f32
    %175 = vector.shape_cast %27 : vector<256x1xi1> to vector<256x1xi1>
    %176 = vector.broadcast %175 : vector<256x1xi1> to vector<256x64xi1>
    %177 = vector.broadcast %cst_147 : f32 to vector<256x64xf32>
    %178 = arith.select %176, %174, %177 : vector<256x64xi1>, vector<256x64xf32>
    %179 = arith.addf %173, %178 : vector<256x64xf32>
    %c0_148 = arith.constant 0 : index
    %c0_149 = arith.constant 0 : index
    %180 = vector.load %arg3[%c0_148, %c0_149] : memref<1x64xf32, #tpu.memory_space<vmem>>, vector<1x64xf32>
    %181 = vector.broadcast %180 : vector<1x64xf32> to vector<256x64xf32>
    %182 = arith.addf %179, %181 : vector<256x64xf32>
    %c0_150 = arith.constant 0 : index
    %c256 = arith.constant 256 : index
    %c0_151 = arith.constant 0 : index
    %183 = vector.load %arg4[%c0_150, %c256, %c0_151] : memref<1x1024x64xf32, #tpu.memory_space<vmem>>, vector<1x256x64xf32>
    %184 = vector.shape_cast %183 : vector<1x256x64xf32> to vector<256x64xf32>
    %185 = vector.shape_cast %182 : vector<256x64xf32> to vector<1x256x64xf32>
    tpu.vector_store %arg4[%c0_150, %c256, %c0_151], %185 {strides = array<i32>} : memref<1x1024x64xf32, #tpu.memory_space<vmem>>, vector<1x256x64xf32>,
    %cst_152 = arith.constant 0.000000e+00 : f32
    %186 = vector.broadcast %cst_152 : f32 to vector<256x64xf32>
    %c16 = arith.constant 16 : index
    %c0_153 = arith.constant 0 : index
    %c0_154 = arith.constant 0 : index
    %187 = vector.load %arg5[%c16, %c0_153, %c0_154] : memref<34x32x3xbf16, #tpu.memory_space<vmem>>, vector<8x32x3xbf16>
    %188 = vector.shape_cast %187 : vector<8x32x3xbf16> to vector<256x3xbf16>
    %c0_155 = arith.constant 0 : index
    %c1_156 = arith.constant 1 : index
    %c0_157 = arith.constant 0 : index
    %c0_158 = arith.constant 0 : index
    %189 = vector.load %arg2[%c0_155, %c1_156, %c0_157, %c0_158] : memref<3x3x3x64xbf16, #tpu.memory_space<vmem>>, vector<1x1x3x64xbf16>
    %190 = vector.shape_cast %189 : vector<1x1x3x64xbf16> to vector<3x64xbf16>
    %cst_159 = arith.constant dense<0.000000e+00> : vector<256x64xf32>
    %191 = tpu.matmul %188, %190, %cst_159 {dimension_numbers = #tpu.dot_dimension_numbers<[1], [0], [0], [1], [0, 0, 1, 1], [], []>} : vector<256x3xbf16>, vector<3x64xbf16>, vector<256x64xf32> -> vector<256x64xf32>
    %c0_160 = arith.constant 0 : index
    %c0_161 = arith.constant 0 : index
    %c0_162 = arith.constant 0 : index
    %c0_163 = arith.constant 0 : index
    %192 = vector.load %arg2[%c0_160, %c0_161, %c0_162, %c0_163] : memref<3x3x3x64xbf16, #tpu.memory_space<vmem>>, vector<1x1x3x64xbf16>
    %193 = vector.shape_cast %192 : vector<1x1x3x64xbf16> to vector<3x64xbf16>
    %cst_164 = arith.constant dense<0.000000e+00> : vector<256x64xf32>
    %194 = tpu.matmul %188, %193, %cst_164 {dimension_numbers = #tpu.dot_dimension_numbers<[1], [0], [0], [1], [0, 0, 1, 1], [], []>} : vector<256x3xbf16>, vector<3x64xbf16>, vector<256x64xf32> -> vector<256x64xf32>
    %c0_165 = arith.constant 0 : index
    %c2_166 = arith.constant 2 : index
    %c0_167 = arith.constant 0 : index
    %c0_168 = arith.constant 0 : index
    %195 = vector.load %arg2[%c0_165, %c2_166, %c0_167, %c0_168] : memref<3x3x3x64xbf16, #tpu.memory_space<vmem>>, vector<1x1x3x64xbf16>
    %196 = vector.shape_cast %195 : vector<1x1x3x64xbf16> to vector<3x64xbf16>
    %cst_169 = arith.constant dense<0.000000e+00> : vector<256x64xf32>
    %197 = tpu.matmul %188, %196, %cst_169 {dimension_numbers = #tpu.dot_dimension_numbers<[1], [0], [0], [1], [0, 0, 1, 1], [], []>} : vector<256x3xbf16>, vector<3x64xbf16>, vector<256x64xf32> -> vector<256x64xf32>
    %198 = arith.addf %186, %191 : vector<256x64xf32>
    %c1_i32_170 = arith.constant 1 : i32
    %199 = tpu.dynamic_rotate %194 by %c1_i32_170 dim 0 : vector<256x64xf32>, i32 -> vector<256x64xf32>
    %cst_171 = arith.constant 0.000000e+00 : f32
    %200 = vector.shape_cast %25 : vector<256x1xi1> to vector<256x1xi1>
    %201 = vector.broadcast %200 : vector<256x1xi1> to vector<256x64xi1>
    %202 = vector.broadcast %cst_171 : f32 to vector<256x64xf32>
    %203 = arith.select %201, %199, %202 : vector<256x64xi1>, vector<256x64xf32>
    %204 = arith.addf %198, %203 : vector<256x64xf32>
    %c255_i32_172 = arith.constant 255 : i32
    %205 = tpu.dynamic_rotate %197 by %c255_i32_172 dim 0 : vector<256x64xf32>, i32 -> vector<256x64xf32>
    %cst_173 = arith.constant 0.000000e+00 : f32
    %206 = vector.shape_cast %27 : vector<256x1xi1> to vector<256x1xi1>
    %207 = vector.broadcast %206 : vector<256x1xi1> to vector<256x64xi1>
    %208 = vector.broadcast %cst_173 : f32 to vector<256x64xf32>
    %209 = arith.select %207, %205, %208 : vector<256x64xi1>, vector<256x64xf32>
    %210 = arith.addf %204, %209 : vector<256x64xf32>
    %c17 = arith.constant 17 : index
    %c0_174 = arith.constant 0 : index
    %c0_175 = arith.constant 0 : index
    %211 = vector.load %arg5[%c17, %c0_174, %c0_175] : memref<34x32x3xbf16, #tpu.memory_space<vmem>>, vector<8x32x3xbf16>
    %212 = vector.shape_cast %211 : vector<8x32x3xbf16> to vector<256x3xbf16>
    %c1_176 = arith.constant 1 : index
    %c1_177 = arith.constant 1 : index
    %c0_178 = arith.constant 0 : index
    %c0_179 = arith.constant 0 : index
    %213 = vector.load %arg2[%c1_176, %c1_177, %c0_178, %c0_179] : memref<3x3x3x64xbf16, #tpu.memory_space<vmem>>, vector<1x1x3x64xbf16>
    %214 = vector.shape_cast %213 : vector<1x1x3x64xbf16> to vector<3x64xbf16>
    %cst_180 = arith.constant dense<0.000000e+00> : vector<256x64xf32>
    %215 = tpu.matmul %212, %214, %cst_180 {dimension_numbers = #tpu.dot_dimension_numbers<[1], [0], [0], [1], [0, 0, 1, 1], [], []>} : vector<256x3xbf16>, vector<3x64xbf16>, vector<256x64xf32> -> vector<256x64xf32>
    %c1_181 = arith.constant 1 : index
    %c0_182 = arith.constant 0 : index
    %c0_183 = arith.constant 0 : index
    %c0_184 = arith.constant 0 : index
    %216 = vector.load %arg2[%c1_181, %c0_182, %c0_183, %c0_184] : memref<3x3x3x64xbf16, #tpu.memory_space<vmem>>, vector<1x1x3x64xbf16>
    %217 = vector.shape_cast %216 : vector<1x1x3x64xbf16> to vector<3x64xbf16>
    %cst_185 = arith.constant dense<0.000000e+00> : vector<256x64xf32>
    %218 = tpu.matmul %212, %217, %cst_185 {dimension_numbers = #tpu.dot_dimension_numbers<[1], [0], [0], [1], [0, 0, 1, 1], [], []>} : vector<256x3xbf16>, vector<3x64xbf16>, vector<256x64xf32> -> vector<256x64xf32>
    %c1_186 = arith.constant 1 : index
    %c2_187 = arith.constant 2 : index
    %c0_188 = arith.constant 0 : index
    %c0_189 = arith.constant 0 : index
    %219 = vector.load %arg2[%c1_186, %c2_187, %c0_188, %c0_189] : memref<3x3x3x64xbf16, #tpu.memory_space<vmem>>, vector<1x1x3x64xbf16>
    %220 = vector.shape_cast %219 : vector<1x1x3x64xbf16> to vector<3x64xbf16>
    %cst_190 = arith.constant dense<0.000000e+00> : vector<256x64xf32>
    %221 = tpu.matmul %212, %220, %cst_190 {dimension_numbers = #tpu.dot_dimension_numbers<[1], [0], [0], [1], [0, 0, 1, 1], [], []>} : vector<256x3xbf16>, vector<3x64xbf16>, vector<256x64xf32> -> vector<256x64xf32>
    %222 = arith.addf %210, %215 : vector<256x64xf32>
    %c1_i32_191 = arith.constant 1 : i32
    %223 = tpu.dynamic_rotate %218 by %c1_i32_191 dim 0 : vector<256x64xf32>, i32 -> vector<256x64xf32>
    %cst_192 = arith.constant 0.000000e+00 : f32
    %224 = vector.shape_cast %25 : vector<256x1xi1> to vector<256x1xi1>
    %225 = vector.broadcast %224 : vector<256x1xi1> to vector<256x64xi1>
    %226 = vector.broadcast %cst_192 : f32 to vector<256x64xf32>
    %227 = arith.select %225, %223, %226 : vector<256x64xi1>, vector<256x64xf32>
    %228 = arith.addf %222, %227 : vector<256x64xf32>
    %c255_i32_193 = arith.constant 255 : i32
    %229 = tpu.dynamic_rotate %221 by %c255_i32_193 dim 0 : vector<256x64xf32>, i32 -> vector<256x64xf32>
    %cst_194 = arith.constant 0.000000e+00 : f32
    %230 = vector.shape_cast %27 : vector<256x1xi1> to vector<256x1xi1>
    %231 = vector.broadcast %230 : vector<256x1xi1> to vector<256x64xi1>
    %232 = vector.broadcast %cst_194 : f32 to vector<256x64xf32>
    %233 = arith.select %231, %229, %232 : vector<256x64xi1>, vector<256x64xf32>
    %234 = arith.addf %228, %233 : vector<256x64xf32>
    %c18 = arith.constant 18 : index
    %c0_195 = arith.constant 0 : index
    %c0_196 = arith.constant 0 : index
    %235 = vector.load %arg5[%c18, %c0_195, %c0_196] : memref<34x32x3xbf16, #tpu.memory_space<vmem>>, vector<8x32x3xbf16>
    %236 = vector.shape_cast %235 : vector<8x32x3xbf16> to vector<256x3xbf16>
    %c2_197 = arith.constant 2 : index
    %c1_198 = arith.constant 1 : index
    %c0_199 = arith.constant 0 : index
    %c0_200 = arith.constant 0 : index
    %237 = vector.load %arg2[%c2_197, %c1_198, %c0_199, %c0_200] : memref<3x3x3x64xbf16, #tpu.memory_space<vmem>>, vector<1x1x3x64xbf16>
    %238 = vector.shape_cast %237 : vector<1x1x3x64xbf16> to vector<3x64xbf16>
    %cst_201 = arith.constant dense<0.000000e+00> : vector<256x64xf32>
    %239 = tpu.matmul %236, %238, %cst_201 {dimension_numbers = #tpu.dot_dimension_numbers<[1], [0], [0], [1], [0, 0, 1, 1], [], []>} : vector<256x3xbf16>, vector<3x64xbf16>, vector<256x64xf32> -> vector<256x64xf32>
    %c2_202 = arith.constant 2 : index
    %c0_203 = arith.constant 0 : index
    %c0_204 = arith.constant 0 : index
    %c0_205 = arith.constant 0 : index
    %240 = vector.load %arg2[%c2_202, %c0_203, %c0_204, %c0_205] : memref<3x3x3x64xbf16, #tpu.memory_space<vmem>>, vector<1x1x3x64xbf16>
    %241 = vector.shape_cast %240 : vector<1x1x3x64xbf16> to vector<3x64xbf16>
    %cst_206 = arith.constant dense<0.000000e+00> : vector<256x64xf32>
    %242 = tpu.matmul %236, %241, %cst_206 {dimension_numbers = #tpu.dot_dimension_numbers<[1], [0], [0], [1], [0, 0, 1, 1], [], []>} : vector<256x3xbf16>, vector<3x64xbf16>, vector<256x64xf32> -> vector<256x64xf32>
    %c2_207 = arith.constant 2 : index
    %c2_208 = arith.constant 2 : index
    %c0_209 = arith.constant 0 : index
    %c0_210 = arith.constant 0 : index
    %243 = vector.load %arg2[%c2_207, %c2_208, %c0_209, %c0_210] : memref<3x3x3x64xbf16, #tpu.memory_space<vmem>>, vector<1x1x3x64xbf16>
    %244 = vector.shape_cast %243 : vector<1x1x3x64xbf16> to vector<3x64xbf16>
    %cst_211 = arith.constant dense<0.000000e+00> : vector<256x64xf32>
    %245 = tpu.matmul %236, %244, %cst_211 {dimension_numbers = #tpu.dot_dimension_numbers<[1], [0], [0], [1], [0, 0, 1, 1], [], []>} : vector<256x3xbf16>, vector<3x64xbf16>, vector<256x64xf32> -> vector<256x64xf32>
    %246 = arith.addf %234, %239 : vector<256x64xf32>
    %c1_i32_212 = arith.constant 1 : i32
    %247 = tpu.dynamic_rotate %242 by %c1_i32_212 dim 0 : vector<256x64xf32>, i32 -> vector<256x64xf32>
    %cst_213 = arith.constant 0.000000e+00 : f32
    %248 = vector.shape_cast %25 : vector<256x1xi1> to vector<256x1xi1>
    %249 = vector.broadcast %248 : vector<256x1xi1> to vector<256x64xi1>
    %250 = vector.broadcast %cst_213 : f32 to vector<256x64xf32>
    %251 = arith.select %249, %247, %250 : vector<256x64xi1>, vector<256x64xf32>
    %252 = arith.addf %246, %251 : vector<256x64xf32>
    %c255_i32_214 = arith.constant 255 : i32
    %253 = tpu.dynamic_rotate %245 by %c255_i32_214 dim 0 : vector<256x64xf32>, i32 -> vector<256x64xf32>
    %cst_215 = arith.constant 0.000000e+00 : f32
    %254 = vector.shape_cast %27 : vector<256x1xi1> to vector<256x1xi1>
    %255 = vector.broadcast %254 : vector<256x1xi1> to vector<256x64xi1>
    %256 = vector.broadcast %cst_215 : f32 to vector<256x64xf32>
    %257 = arith.select %255, %253, %256 : vector<256x64xi1>, vector<256x64xf32>
    %258 = arith.addf %252, %257 : vector<256x64xf32>
    %c0_216 = arith.constant 0 : index
    %c0_217 = arith.constant 0 : index
    %259 = vector.load %arg3[%c0_216, %c0_217] : memref<1x64xf32, #tpu.memory_space<vmem>>, vector<1x64xf32>
    %260 = vector.broadcast %259 : vector<1x64xf32> to vector<256x64xf32>
    %261 = arith.addf %258, %260 : vector<256x64xf32>
    %c0_218 = arith.constant 0 : index
    %c512 = arith.constant 512 : index
    %c0_219 = arith.constant 0 : index
    %262 = vector.load %arg4[%c0_218, %c512, %c0_219] : memref<1x1024x64xf32, #tpu.memory_space<vmem>>, vector<1x256x64xf32>
    %263 = vector.shape_cast %262 : vector<1x256x64xf32> to vector<256x64xf32>
    %264 = vector.shape_cast %261 : vector<256x64xf32> to vector<1x256x64xf32>
    tpu.vector_store %arg4[%c0_218, %c512, %c0_219], %264 {strides = array<i32>} : memref<1x1024x64xf32, #tpu.memory_space<vmem>>, vector<1x256x64xf32>,
    %cst_220 = arith.constant 0.000000e+00 : f32
    %265 = vector.broadcast %cst_220 : f32 to vector<256x64xf32>
    %c24 = arith.constant 24 : index
    %c0_221 = arith.constant 0 : index
    %c0_222 = arith.constant 0 : index
    %266 = vector.load %arg5[%c24, %c0_221, %c0_222] : memref<34x32x3xbf16, #tpu.memory_space<vmem>>, vector<8x32x3xbf16>
    %267 = vector.shape_cast %266 : vector<8x32x3xbf16> to vector<256x3xbf16>
    %c0_223 = arith.constant 0 : index
    %c1_224 = arith.constant 1 : index
    %c0_225 = arith.constant 0 : index
    %c0_226 = arith.constant 0 : index
    %268 = vector.load %arg2[%c0_223, %c1_224, %c0_225, %c0_226] : memref<3x3x3x64xbf16, #tpu.memory_space<vmem>>, vector<1x1x3x64xbf16>
    %269 = vector.shape_cast %268 : vector<1x1x3x64xbf16> to vector<3x64xbf16>
    %cst_227 = arith.constant dense<0.000000e+00> : vector<256x64xf32>
    %270 = tpu.matmul %267, %269, %cst_227 {dimension_numbers = #tpu.dot_dimension_numbers<[1], [0], [0], [1], [0, 0, 1, 1], [], []>} : vector<256x3xbf16>, vector<3x64xbf16>, vector<256x64xf32> -> vector<256x64xf32>
    %c0_228 = arith.constant 0 : index
    %c0_229 = arith.constant 0 : index
    %c0_230 = arith.constant 0 : index
    %c0_231 = arith.constant 0 : index
    %271 = vector.load %arg2[%c0_228, %c0_229, %c0_230, %c0_231] : memref<3x3x3x64xbf16, #tpu.memory_space<vmem>>, vector<1x1x3x64xbf16>
    %272 = vector.shape_cast %271 : vector<1x1x3x64xbf16> to vector<3x64xbf16>
    %cst_232 = arith.constant dense<0.000000e+00> : vector<256x64xf32>
    %273 = tpu.matmul %267, %272, %cst_232 {dimension_numbers = #tpu.dot_dimension_numbers<[1], [0], [0], [1], [0, 0, 1, 1], [], []>} : vector<256x3xbf16>, vector<3x64xbf16>, vector<256x64xf32> -> vector<256x64xf32>
    %c0_233 = arith.constant 0 : index
    %c2_234 = arith.constant 2 : index
    %c0_235 = arith.constant 0 : index
    %c0_236 = arith.constant 0 : index
    %274 = vector.load %arg2[%c0_233, %c2_234, %c0_235, %c0_236] : memref<3x3x3x64xbf16, #tpu.memory_space<vmem>>, vector<1x1x3x64xbf16>
    %275 = vector.shape_cast %274 : vector<1x1x3x64xbf16> to vector<3x64xbf16>
    %cst_237 = arith.constant dense<0.000000e+00> : vector<256x64xf32>
    %276 = tpu.matmul %267, %275, %cst_237 {dimension_numbers = #tpu.dot_dimension_numbers<[1], [0], [0], [1], [0, 0, 1, 1], [], []>} : vector<256x3xbf16>, vector<3x64xbf16>, vector<256x64xf32> -> vector<256x64xf32>
    %277 = arith.addf %265, %270 : vector<256x64xf32>
    %c1_i32_238 = arith.constant 1 : i32
    %278 = tpu.dynamic_rotate %273 by %c1_i32_238 dim 0 : vector<256x64xf32>, i32 -> vector<256x64xf32>
    %cst_239 = arith.constant 0.000000e+00 : f32
    %279 = vector.shape_cast %25 : vector<256x1xi1> to vector<256x1xi1>
    %280 = vector.broadcast %279 : vector<256x1xi1> to vector<256x64xi1>
    %281 = vector.broadcast %cst_239 : f32 to vector<256x64xf32>
    %282 = arith.select %280, %278, %281 : vector<256x64xi1>, vector<256x64xf32>
    %283 = arith.addf %277, %282 : vector<256x64xf32>
    %c255_i32_240 = arith.constant 255 : i32
    %284 = tpu.dynamic_rotate %276 by %c255_i32_240 dim 0 : vector<256x64xf32>, i32 -> vector<256x64xf32>
    %cst_241 = arith.constant 0.000000e+00 : f32
    %285 = vector.shape_cast %27 : vector<256x1xi1> to vector<256x1xi1>
    %286 = vector.broadcast %285 : vector<256x1xi1> to vector<256x64xi1>
    %287 = vector.broadcast %cst_241 : f32 to vector<256x64xf32>
    %288 = arith.select %286, %284, %287 : vector<256x64xi1>, vector<256x64xf32>
    %289 = arith.addf %283, %288 : vector<256x64xf32>
    %c25 = arith.constant 25 : index
    %c0_242 = arith.constant 0 : index
    %c0_243 = arith.constant 0 : index
    %290 = vector.load %arg5[%c25, %c0_242, %c0_243] : memref<34x32x3xbf16, #tpu.memory_space<vmem>>, vector<8x32x3xbf16>
    %291 = vector.shape_cast %290 : vector<8x32x3xbf16> to vector<256x3xbf16>
    %c1_244 = arith.constant 1 : index
    %c1_245 = arith.constant 1 : index
    %c0_246 = arith.constant 0 : index
    %c0_247 = arith.constant 0 : index
    %292 = vector.load %arg2[%c1_244, %c1_245, %c0_246, %c0_247] : memref<3x3x3x64xbf16, #tpu.memory_space<vmem>>, vector<1x1x3x64xbf16>
    %293 = vector.shape_cast %292 : vector<1x1x3x64xbf16> to vector<3x64xbf16>
    %cst_248 = arith.constant dense<0.000000e+00> : vector<256x64xf32>
    %294 = tpu.matmul %291, %293, %cst_248 {dimension_numbers = #tpu.dot_dimension_numbers<[1], [0], [0], [1], [0, 0, 1, 1], [], []>} : vector<256x3xbf16>, vector<3x64xbf16>, vector<256x64xf32> -> vector<256x64xf32>
    %c1_249 = arith.constant 1 : index
    %c0_250 = arith.constant 0 : index
    %c0_251 = arith.constant 0 : index
    %c0_252 = arith.constant 0 : index
    %295 = vector.load %arg2[%c1_249, %c0_250, %c0_251, %c0_252] : memref<3x3x3x64xbf16, #tpu.memory_space<vmem>>, vector<1x1x3x64xbf16>
    %296 = vector.shape_cast %295 : vector<1x1x3x64xbf16> to vector<3x64xbf16>
    %cst_253 = arith.constant dense<0.000000e+00> : vector<256x64xf32>
    %297 = tpu.matmul %291, %296, %cst_253 {dimension_numbers = #tpu.dot_dimension_numbers<[1], [0], [0], [1], [0, 0, 1, 1], [], []>} : vector<256x3xbf16>, vector<3x64xbf16>, vector<256x64xf32> -> vector<256x64xf32>
    %c1_254 = arith.constant 1 : index
    %c2_255 = arith.constant 2 : index
    %c0_256 = arith.constant 0 : index
    %c0_257 = arith.constant 0 : index
    %298 = vector.load %arg2[%c1_254, %c2_255, %c0_256, %c0_257] : memref<3x3x3x64xbf16, #tpu.memory_space<vmem>>, vector<1x1x3x64xbf16>
    %299 = vector.shape_cast %298 : vector<1x1x3x64xbf16> to vector<3x64xbf16>
    %cst_258 = arith.constant dense<0.000000e+00> : vector<256x64xf32>
    %300 = tpu.matmul %291, %299, %cst_258 {dimension_numbers = #tpu.dot_dimension_numbers<[1], [0], [0], [1], [0, 0, 1, 1], [], []>} : vector<256x3xbf16>, vector<3x64xbf16>, vector<256x64xf32> -> vector<256x64xf32>
    %301 = arith.addf %289, %294 : vector<256x64xf32>
    %c1_i32_259 = arith.constant 1 : i32
    %302 = tpu.dynamic_rotate %297 by %c1_i32_259 dim 0 : vector<256x64xf32>, i32 -> vector<256x64xf32>
    %cst_260 = arith.constant 0.000000e+00 : f32
    %303 = vector.shape_cast %25 : vector<256x1xi1> to vector<256x1xi1>
    %304 = vector.broadcast %303 : vector<256x1xi1> to vector<256x64xi1>
    %305 = vector.broadcast %cst_260 : f32 to vector<256x64xf32>
    %306 = arith.select %304, %302, %305 : vector<256x64xi1>, vector<256x64xf32>
    %307 = arith.addf %301, %306 : vector<256x64xf32>
    %c255_i32_261 = arith.constant 255 : i32
    %308 = tpu.dynamic_rotate %300 by %c255_i32_261 dim 0 : vector<256x64xf32>, i32 -> vector<256x64xf32>
    %cst_262 = arith.constant 0.000000e+00 : f32
    %309 = vector.shape_cast %27 : vector<256x1xi1> to vector<256x1xi1>
    %310 = vector.broadcast %309 : vector<256x1xi1> to vector<256x64xi1>
    %311 = vector.broadcast %cst_262 : f32 to vector<256x64xf32>
    %312 = arith.select %310, %308, %311 : vector<256x64xi1>, vector<256x64xf32>
    %313 = arith.addf %307, %312 : vector<256x64xf32>
    %c26 = arith.constant 26 : index
    %c0_263 = arith.constant 0 : index
    %c0_264 = arith.constant 0 : index
    %314 = vector.load %arg5[%c26, %c0_263, %c0_264] : memref<34x32x3xbf16, #tpu.memory_space<vmem>>, vector<8x32x3xbf16>
    %315 = vector.shape_cast %314 : vector<8x32x3xbf16> to vector<256x3xbf16>
    %c2_265 = arith.constant 2 : index
    %c1_266 = arith.constant 1 : index
    %c0_267 = arith.constant 0 : index
    %c0_268 = arith.constant 0 : index
    %316 = vector.load %arg2[%c2_265, %c1_266, %c0_267, %c0_268] : memref<3x3x3x64xbf16, #tpu.memory_space<vmem>>, vector<1x1x3x64xbf16>
    %317 = vector.shape_cast %316 : vector<1x1x3x64xbf16> to vector<3x64xbf16>
    %cst_269 = arith.constant dense<0.000000e+00> : vector<256x64xf32>
    %318 = tpu.matmul %315, %317, %cst_269 {dimension_numbers = #tpu.dot_dimension_numbers<[1], [0], [0], [1], [0, 0, 1, 1], [], []>} : vector<256x3xbf16>, vector<3x64xbf16>, vector<256x64xf32> -> vector<256x64xf32>
    %c2_270 = arith.constant 2 : index
    %c0_271 = arith.constant 0 : index
    %c0_272 = arith.constant 0 : index
    %c0_273 = arith.constant 0 : index
    %319 = vector.load %arg2[%c2_270, %c0_271, %c0_272, %c0_273] : memref<3x3x3x64xbf16, #tpu.memory_space<vmem>>, vector<1x1x3x64xbf16>
    %320 = vector.shape_cast %319 : vector<1x1x3x64xbf16> to vector<3x64xbf16>
    %cst_274 = arith.constant dense<0.000000e+00> : vector<256x64xf32>
    %321 = tpu.matmul %315, %320, %cst_274 {dimension_numbers = #tpu.dot_dimension_numbers<[1], [0], [0], [1], [0, 0, 1, 1], [], []>} : vector<256x3xbf16>, vector<3x64xbf16>, vector<256x64xf32> -> vector<256x64xf32>
    %c2_275 = arith.constant 2 : index
    %c2_276 = arith.constant 2 : index
    %c0_277 = arith.constant 0 : index
    %c0_278 = arith.constant 0 : index
    %322 = vector.load %arg2[%c2_275, %c2_276, %c0_277, %c0_278] : memref<3x3x3x64xbf16, #tpu.memory_space<vmem>>, vector<1x1x3x64xbf16>
    %323 = vector.shape_cast %322 : vector<1x1x3x64xbf16> to vector<3x64xbf16>
    %cst_279 = arith.constant dense<0.000000e+00> : vector<256x64xf32>
    %324 = tpu.matmul %315, %323, %cst_279 {dimension_numbers = #tpu.dot_dimension_numbers<[1], [0], [0], [1], [0, 0, 1, 1], [], []>} : vector<256x3xbf16>, vector<3x64xbf16>, vector<256x64xf32> -> vector<256x64xf32>
    %325 = arith.addf %313, %318 : vector<256x64xf32>
    %c1_i32_280 = arith.constant 1 : i32
    %326 = tpu.dynamic_rotate %321 by %c1_i32_280 dim 0 : vector<256x64xf32>, i32 -> vector<256x64xf32>
    %cst_281 = arith.constant 0.000000e+00 : f32
    %327 = vector.shape_cast %25 : vector<256x1xi1> to vector<256x1xi1>
    %328 = vector.broadcast %327 : vector<256x1xi1> to vector<256x64xi1>
    %329 = vector.broadcast %cst_281 : f32 to vector<256x64xf32>
    %330 = arith.select %328, %326, %329 : vector<256x64xi1>, vector<256x64xf32>
    %331 = arith.addf %325, %330 : vector<256x64xf32>
    %c255_i32_282 = arith.constant 255 : i32
    %332 = tpu.dynamic_rotate %324 by %c255_i32_282 dim 0 : vector<256x64xf32>, i32 -> vector<256x64xf32>
    %cst_283 = arith.constant 0.000000e+00 : f32
    %333 = vector.shape_cast %27 : vector<256x1xi1> to vector<256x1xi1>
    %334 = vector.broadcast %333 : vector<256x1xi1> to vector<256x64xi1>
    %335 = vector.broadcast %cst_283 : f32 to vector<256x64xf32>
    %336 = arith.select %334, %332, %335 : vector<256x64xi1>, vector<256x64xf32>
    %337 = arith.addf %331, %336 : vector<256x64xf32>
    %c0_284 = arith.constant 0 : index
    %c0_285 = arith.constant 0 : index
    %338 = vector.load %arg3[%c0_284, %c0_285] : memref<1x64xf32, #tpu.memory_space<vmem>>, vector<1x64xf32>
    %339 = vector.broadcast %338 : vector<1x64xf32> to vector<256x64xf32>
    %340 = arith.addf %337, %339 : vector<256x64xf32>
    %c0_286 = arith.constant 0 : index
    %c768 = arith.constant 768 : index
    %c0_287 = arith.constant 0 : index
    %341 = vector.load %arg4[%c0_286, %c768, %c0_287] : memref<1x1024x64xf32, #tpu.memory_space<vmem>>, vector<1x256x64xf32>
    %342 = vector.shape_cast %341 : vector<1x256x64xf32> to vector<256x64xf32>
    %343 = vector.shape_cast %340 : vector<256x64xf32> to vector<1x256x64xf32>
    tpu.vector_store %arg4[%c0_286, %c768, %c0_287], %343 {strides = array<i32>} : memref<1x1024x64xf32, #tpu.memory_space<vmem>>, vector<1x256x64xf32>,
    return
  }
  func.func @transform_0(%arg0: i32) -> (i32, i32, i32, i32) {
    %c0_i32 = arith.constant 0 : i32
    %c0_i32_0 = arith.constant 0 : i32
    %c0_i32_1 = arith.constant 0 : i32
    %c0_i32_2 = arith.constant 0 : i32
    return %arg0, %c0_i32, %c0_i32_0, %c0_i32_1 : i32, i32, i32, i32
  }
  func.func @transform_1(%arg0: i32) -> (i32, i32, i32, i32) {
    %c0_i32 = arith.constant 0 : i32
    %c0_i32_0 = arith.constant 0 : i32
    %c0_i32_1 = arith.constant 0 : i32
    %c0_i32_2 = arith.constant 0 : i32
    %c0_i32_3 = arith.constant 0 : i32
    return %c0_i32, %c0_i32_0, %c0_i32_1, %c0_i32_2 : i32, i32, i32, i32
  }
  func.func @transform_2(%arg0: i32) -> (i32, i32) {
    %c0_i32 = arith.constant 0 : i32
    %c0_i32_0 = arith.constant 0 : i32
    %c0_i32_1 = arith.constant 0 : i32
    return %c0_i32, %c0_i32_0 : i32, i32
  }
  func.func @transform_3(%arg0: i32) -> (i32, i32, i32) {
    %c0_i32 = arith.constant 0 : i32
    %c0_i32_0 = arith.constant 0 : i32
    %c0_i32_1 = arith.constant 0 : i32
    return %arg0, %c0_i32, %c0_i32_0 : i32, i32, i32
  }
}

</mosaic_0001>

<bundles_post_ra>
// kernel: tpu_custom_call.1
= control target key start
LH: loop header
LB: loop body
LE: loop exit
PB: predicated region body
PF: predicated region fallthrough
CT: control target
= control target key end

     0   :  { %s14627_s12 = smov 0   ;;  %s20656_s0 = inlined_call_operand.vmem [shape: f32[2,32,32,3], index: 0, kind: input, shape index: {}]   ;;  %s20657_s1 = inlined_call_operand.vmem [shape: bf16[3,3,3,64], index: 1, kind: input, shape index: {}]   ;;  %s20658_s2 = inlined_call_operand.vmem [shape: f32[1,64], index: 2, kind: input, shape index: {}]   ;;  %s20659_s3 = inlined_call_operand.vmem [shape: f32[2,1024,64], index: 3, kind: output, shape index: {}]  }
   0x1 LB: > { %s11316_s13 = sadd.s32 4294967295, %s14603_s12   ;;  %p11320_p0 = scmp.ge.s32.totalorder %s14603_s12, 1  ;;  %s14603_s12 = sphi %s14627_s12, %s13_s12  }
   0x2   : > { %p137_p1 = scmp.lt.s32.totalorder %s14603_s12, 3 }
   0x4   : > { %p138_p2 = pnand %p11320_p0, %p137_p1 }
   0x6   : > { %141 = sbr.rel (%p138_p2) target bundleno = 1482 (0x5ca), region = 32 }
   0xd   : > { %v934_v0 = vld [vmem:[%s20657_s1] sm:$0x3]  ;;  %vm983_vm0 = vcmask 1040384   ;;  %vm984_vm1 = vcmask 1041408   ;;  %vm20674_vm2 = vcmask 23552   ;;  %v14605_v1 = vmov 65535  }
   0xe   : > { %v985_v2 = vsel %vm983_vm0, 4294967295, %v14605_v1  ;;  %v11342_v3 = vld [vmem:[%s20657_s1 + $0x4] sm:$0x3]  ;;  %v11325_v4 = vld [vmem:[%s20657_s1 + $0x2] sm:$0x3]  ;;  %v14606_v6 = vmov 0  }
   0xf   : > { %v14644_v5 = vsel %vm984_vm1, %v985_v2, 0  ;;  %173 = vst.msk [vmem:[#allocation2] sm:$0xff] %vm20674_vm2, %v14606_v6  ;;  %177 = vst.msk [vmem:[#allocation2 + $0x218] sm:$0xff] %vm20674_vm2, %v14606_v6  ;;  %v11392_v7 = vld [vmem:[%s20657_s1 + $0x6] sm:$0x3]  ;;  %p161_p3 = scmp.lt.s32.totalorder %s11316_s13, 1 }
  0x10   : > { %174 = vst.msk [vmem:[#allocation2 + $0x8] sm:$0xff] %vm20674_vm2, %v14606_v6  ;;  %176 = vst.msk [vmem:[#allocation2 + $0x210] sm:$0xff] %vm20674_vm2, %v14606_v6  ;;  %v988_v8 = vand.u32 %v14644_v5, %v934_v0  ;;  %v1154_v9 = vand.u32 %v11342_v3, %v14644_v5  ;;  %v1479_v10 = vand.u32 %v11325_v4, %v14644_v5  ;;  %v11375_v12 = vld [vmem:[%s20657_s1 + $0x8] sm:$0x3]  ;;  %v11409_v13 = vld [vmem:[%s20657_s1 + $0xa] sm:$0x3] }
  0x11   : > { %v2068_v11 = vand.u32 %v11392_v7, %v14644_v5  ;;  %s22360_s13 = smov (!%p161_p3, %s11316_s13), 1  ;;  %v14682_v21 = vand.u32 %v11375_v12, %v14644_v5  ;;  %v14685_v22 = vand.u32 %v11409_v13, %v14644_v5 }
  0x12   : > { %12553 = vmatprep.subr.bf16.mxu0 %v988_v8  ;;  %12587 = vmatprep.subr.bf16.mxu1 %v1154_v9  ;;  %s11939_s22 = sshll.u32 %s22360_s13, 10 }
  0x13   : > { %12554 = vmatpush3.bf16.msra.mxu0 %v988_v8  ;;  %12588 = vmatpush3.bf16.msra.mxu1 %v1154_v9  ;;  %s14671_s29 = scalar_lea.vmem %s20656_s0, %s11939_s22  ;;  %s16379_s14 = scalar_lea.vmem %s20659_s3, %s11939_s22 }
  0x14   : > { %12621 = vmatprep.subr.bf16.mxu0 %v1479_v10  ;;  %12689 = vmatprep.subr.bf16.mxu1 %v2068_v11  ;;  %v178_v14 = vld [vmem:[%s14671_s29] sm:$0xff]  ;;  %v179_v15 = vld [vmem:[%s14671_s29 + $0x8] sm:$0xff]  ;;  %v180_v16 = vld [vmem:[%s14671_s29 + $0x10] sm:$0xff] }
  0x15   : > { %v306_v19 = vpack.c.bf16 %v179_v15, %v178_v14  ;;  %v181_v20 = vld [vmem:[%s14671_s29 + $0x18] sm:$0xff]  ;;  %v182_v24 = vld [vmem:[%s14671_s29 + $0x20] sm:$0xff]  ;;  %v183_v25 = vld [vmem:[%s14671_s29 + $0x28] sm:$0xff] }
  0x16   : > { %v14676_v17 = vld [vmem:[#allocation2] sm:$0xff]  ;;  %v307_v23 = vpack.c.bf16 %v181_v20, %v180_v16  ;;  %v184_v26 = vld [vmem:[%s14671_s29 + $0x30] sm:$0xff]  ;;  %v308_v27 = vpack.c.bf16 %v183_v25, %v182_v24  ;;  %v185_v28 = vld [vmem:[%s14671_s29 + $0x38] sm:$0xff] }
  0x17   : > { %v14678_v18 = vld [vmem:[#allocation2 + $0x8] sm:$0xff]  ;;  %12555 = vmatprep.mubr.msk.bf16.mxu0 %vm20674_vm2, %v14676_v17  ;;  %12589 = vmatprep.mubr.msk.bf16.mxu1 %vm20674_vm2, %v14676_v17  ;;  %371 = vst.msk [vmem:[#allocation2 + $0x10] sm:$0xff] %vm20674_vm2, %v306_v19  ;;  %v186_v29 = vld [vmem:[%s14671_s29 + $0x40] sm:$0xff]  ;;  %v309_v31 = vpack.c.bf16 %v185_v28, %v184_v26  ;;  %v188_v33 = vld [vmem:[%s14671_s29 + $0x50] sm:$0xff] }
  0x18   : > { %12556 = vmatmul.mubr.msk.bf16.vlgmr.msra.gmra.mrb[0].mxu0 %vm20674_vm2, %v14678_v18  ;;  %12590 = vmatmul.mubr.msk.bf16.vlgmr.msra.gmra.mrb[0].mxu1 %vm20674_vm2, %v14678_v18  ;;  %v187_v30 = vld [vmem:[%s14671_s29 + $0x48] sm:$0xff]  ;;  %372 = vst.msk [vmem:[#allocation2 + $0x18] sm:$0xff] %vm20674_vm2, %v307_v23  ;;  %v189_v34 = vld [vmem:[%s14671_s29 + $0x58] sm:$0xff]  ;;  %v190_v35 = vld [vmem:[%s14671_s29 + $0x60] sm:$0xff] }
  0x19   : > { %12622 = vmatpush3.bf16.msra.mxu0 %v1479_v10  ;;  %12690 = vmatpush3.bf16.msra.mxu1 %v2068_v11  ;;  %v310_v32 = vpack.c.bf16 %v187_v30, %v186_v29  ;;  %373 = vst.msk [vmem:[#allocation2 + $0x20] sm:$0xff] %vm20674_vm2, %v308_v27  ;;  %v311_v36 = vpack.c.bf16 %v189_v34, %v188_v33  ;;  %v191_v37 = vld [vmem:[%s14671_s29 + $0x68] sm:$0xff]  ;;  %v192_v38 = vld [vmem:[%s14671_s29 + $0x70] sm:$0xff]  ;;  %v193_v39 = vld [vmem:[%s14671_s29 + $0x78] sm:$0xff] }
  0x1a   : > { %12655 = vmatprep.subr.bf16.mxu0 %v14682_v21  ;;  %12723 = vmatprep.subr.bf16.mxu1 %v14685_v22  ;;  %374 = vst.msk [vmem:[#allocation2 + $0x28] sm:$0xff] %vm20674_vm2, %v309_v31  ;;  %v312_v40 = vpack.c.bf16 %v191_v37, %v190_v35  ;;  %v313_v41 = vpack.c.bf16 %v193_v39, %v192_v38  ;;  %v194_v42 = vld [vmem:[%s14671_s29 + $0x80] sm:$0xff]  ;;  %v195_v43 = vld [vmem:[%s14671_s29 + $0x88] sm:$0xff]  ;;  %v196_v44 = vld [vmem:[%s14671_s29 + $0x90] sm:$0xff] }
  0x1b   : > { %375 = vst.msk [vmem:[#allocation2 + $0x30] sm:$0xff] %vm20674_vm2, %v310_v32  ;;  %376 = vst.msk [vmem:[#allocation2 + $0x38] sm:$0xff] %vm20674_vm2, %v311_v36  ;;  %v314_v45 = vpack.c.bf16 %v195_v43, %v194_v42  ;;  %v197_v46 = vld [vmem:[%s14671_s29 + $0x98] sm:$0xff]  ;;  %v198_v47 = vld [vmem:[%s14671_s29 + $0xa0] sm:$0xff] }
  0x1c   : > { %v199_v48 = vld [vmem:[%s14671_s29 + $0xa8] sm:$0xff]  ;;  %377 = vst.msk [vmem:[#allocation2 + $0x40] sm:$0xff] %vm20674_vm2, %v312_v40  ;;  %378 = vst.msk [vmem:[#allocation2 + $0x48] sm:$0xff] %vm20674_vm2, %v313_v41  ;;  %v315_v49 = vpack.c.bf16 %v197_v46, %v196_v44  ;;  %v200_v51 = vld [vmem:[%s14671_s29 + $0xb0] sm:$0xff] }
  0x1d   : > { %v316_v50 = vpack.c.bf16 %v199_v48, %v198_v47  ;;  %v201_v52 = vld [vmem:[%s14671_s29 + $0xb8] sm:$0xff]  ;;  %v202_v53 = vld [vmem:[%s14671_s29 + $0xc0] sm:$0xff]  ;;  %379 = vst.msk [vmem:[#allocation2 + $0x50] sm:$0xff] %vm20674_vm2, %v314_v45  ;;  %v203_v55 = vld [vmem:[%s14671_s29 + $0xc8] sm:$0xff] }
  0x1e   : > { %v317_v54 = vpack.c.bf16 %v201_v52, %v200_v51  ;;  %v204_v56 = vld [vmem:[%s14671_s29 + $0xd0] sm:$0xff]  ;;  %v205_v57 = vld [vmem:[%s14671_s29 + $0xd8] sm:$0xff]  ;;  %380 = vst.msk [vmem:[#allocation2 + $0x58] sm:$0xff] %vm20674_vm2, %v315_v49  ;;  %v318_v59 = vpack.c.bf16 %v203_v55, %v202_v53  ;;  %v206_v61 = vld [vmem:[%s14671_s29 + $0xe0] sm:$0xff] }
  0x1f   : > { %v14730_v58 = vld [vmem:[#allocation2 + $0x10] sm:$0xff]  ;;  %381 = vst.msk [vmem:[#allocation2 + $0x60] sm:$0xff] %vm20674_vm2, %v316_v50  ;;  %v319_v60 = vpack.c.bf16 %v205_v57, %v204_v56  ;;  %v207_v62 = vld [vmem:[%s14671_s29 + $0xe8] sm:$0xff]  ;;  %v14740_v63 = vld [vmem:[#allocation2 + $0x18] sm:$0xff] }
  0x20   : > { %12559 = vmatprep.mubr.msk.bf16.mxu0 %vm20674_vm2, %v14730_v58  ;;  %12593 = vmatprep.mubr.msk.bf16.mxu1 %vm20674_vm2, %v14730_v58  ;;  %382 = vst.msk [vmem:[#allocation2 + $0x68] sm:$0xff] %vm20674_vm2, %v317_v54  ;;  %v320_v0 = vpack.c.bf16 %v207_v62, %v206_v61  ;;  %v208_v1 = vld [vmem:[%s14671_s29 + $0xf0] sm:$0xff]  ;;  %v209_v2 = vld [vmem:[%s14671_s29 + $0xf8] sm:$0xff]  ;;  %v14749_v3 = vld [vmem:[#allocation2 + $0x20] sm:$0xff] }
  0x21   : > { %12560 = vmatmul.mubr.msk.bf16.gmra.mrb[4].mxu0 %vm20674_vm2, %v14740_v63  ;;  %12594 = vmatmul.mubr.msk.bf16.gmra.mrb[4].mxu1 %vm20674_vm2, %v14740_v63  ;;  %383 = vst.msk [vmem:[#allocation2 + $0x70] sm:$0xff] %vm20674_vm2, %v318_v59  ;;  %384 = vst.msk [vmem:[#allocation2 + $0x78] sm:$0xff] %vm20674_vm2, %v319_v60  ;;  %v321_v4 = vpack.c.bf16 %v209_v2, %v208_v1  ;;  %v14759_v6 = vld [vmem:[#allocation2 + $0x28] sm:$0xff]  ;;  %v213_v25 = vld [vmem:[%s14671_s29 + $0x118] sm:$0xff] }
  0x22   : > { %12563 = vmatprep.mubr.msk.bf16.mxu0 %vm20674_vm2, %v14749_v3  ;;  %12597 = vmatprep.mubr.msk.bf16.mxu1 %vm20674_vm2, %v14749_v3  ;;  %385 = vst.msk [vmem:[#allocation2 + $0x80] sm:$0xff] %vm20674_vm2, %v320_v0  ;;  %v14761_v7 = vld [vmem:[#allocation2 + $0x30] sm:$0xff]  ;;  %v14771_v8 = vld [vmem:[#allocation2 + $0x38] sm:$0xff]  ;;  %v11426_v19 = vld [vmem:[%s20657_s1 + $0xe] sm:$0x3] }
  0x23   : > { %386 = vst.msk [vmem:[#allocation2 + $0x88] sm:$0xff] %vm20674_vm2, %v321_v4  ;;  %v14773_v9 = vld [vmem:[#allocation2 + $0x40] sm:$0xff]  ;;  %v14783_v10 = vld [vmem:[#allocation2 + $0x48] sm:$0xff]  ;;  %v2753_v23 = vand.u32 %v11426_v19, %v14644_v5  ;;  %v11460_v29 = vld [vmem:[%s20657_s1 + $0x10] sm:$0x3] }
  0x24   : > { %v14785_v11 = vld [vmem:[#allocation2 + $0x50] sm:$0xff]  ;;  %v11443_v20 = vld [vmem:[%s20657_s1 + $0xc] sm:$0x3]  ;;  %v3626_v30 = vld [vmem:[%s20657_s1] sm:$0x3]  ;;  %v14920_v31 = vand.u32 %v11460_v29, %v14644_v5 }
  0x25   : > { %v14795_v12 = vld [vmem:[#allocation2 + $0x58] sm:$0xff]  ;;  %v2919_v24 = vand.u32 %v11443_v20, %v14644_v5  ;;  %v14923_v32 = vand.u32 %v3626_v30, %v14644_v5  ;;  %v214_v33 = vld [vmem:[%s14671_s29 + $0x120] sm:$0xff]  ;;  %v215_v34 = vld [vmem:[%s14671_s29 + $0x128] sm:$0xff] }
  0x26   : > { %v14797_v13 = vld [vmem:[#allocation2 + $0x60] sm:$0xff]  ;;  %v324_v35 = vpack.c.bf16 %v215_v34, %v214_v33  ;;  %v216_v36 = vld [vmem:[%s14671_s29 + $0x130] sm:$0xff]  ;;  %v217_v37 = vld [vmem:[%s14671_s29 + $0x138] sm:$0xff] }
  0x27   : > { %v14807_v14 = vld [vmem:[#allocation2 + $0x68] sm:$0xff]  ;;  %v325_v38 = vpack.c.bf16 %v217_v37, %v216_v36  ;;  %v218_v39 = vld [vmem:[%s14671_s29 + $0x140] sm:$0xff]  ;;  %v220_v42 = vld [vmem:[%s14671_s29 + $0x150] sm:$0xff] }
  0x28   : > { %v14809_v15 = vld [vmem:[#allocation2 + $0x70] sm:$0xff]  ;;  %v14819_v16 = vld [vmem:[#allocation2 + $0x78] sm:$0xff]  ;;  %389 = vst.msk [vmem:[#allocation2 + $0xa0] sm:$0xff] %vm20674_vm2, %v324_v35  ;;  %v219_v40 = vld [vmem:[%s14671_s29 + $0x148] sm:$0xff] }
  0x29   : > { %12564 = vmatmul.mubr.msk.bf16.gmra.mrb[8].mxu0 %vm20674_vm2, %v14759_v6  ;;  %12598 = vmatmul.mubr.msk.bf16.gmra.mrb[8].mxu1 %vm20674_vm2, %v14759_v6  ;;  %v14891_v26 = vld [vmem:[#allocation2 + $0x80] sm:$0xff]  ;;  %390 = vst.msk [vmem:[#allocation2 + $0xa8] sm:$0xff] %vm20674_vm2, %v325_v38  ;;  %v326_v41 = vpack.c.bf16 %v219_v40, %v218_v39  ;;  %v221_v43 = vld [vmem:[%s14671_s29 + $0x158] sm:$0xff]  ;;  %v223_v46 = vld [vmem:[%s14671_s29 + $0x168] sm:$0xff] }
  0x2a   : > { %12567 = vmatprep.mubr.msk.bf16.mxu0 %vm20674_vm2, %v14761_v7  ;;  %12601 = vmatprep.mubr.msk.bf16.mxu1 %vm20674_vm2, %v14761_v7  ;;  %v14903_v28 = vld [vmem:[#allocation2 + $0x88] sm:$0xff]  ;;  %v327_v44 = vpack.c.bf16 %v221_v43, %v220_v42  ;;  %v222_v45 = vld [vmem:[%s14671_s29 + $0x160] sm:$0xff]  ;;  %v224_v48 = vld [vmem:[%s14671_s29 + $0x170] sm:$0xff] }
  0x2b   : > { %391 = vst.msk [vmem:[#allocation2 + $0xb0] sm:$0xff] %vm20674_vm2, %v326_v41  ;;  %v328_v47 = vpack.c.bf16 %v223_v46, %v222_v45  ;;  %v225_v49 = vld [vmem:[%s14671_s29 + $0x178] sm:$0xff]  ;;  %v226_v51 = vld [vmem:[%s14671_s29 + $0x180] sm:$0xff]  ;;  %v227_v52 = vld [vmem:[%s14671_s29 + $0x188] sm:$0xff] }
  0x2c   : > { %392 = vst.msk [vmem:[#allocation2 + $0xb8] sm:$0xff] %vm20674_vm2, %v327_v44  ;;  %v329_v50 = vpack.c.bf16 %v225_v49, %v224_v48  ;;  %v330_v53 = vpack.c.bf16 %v227_v52, %v226_v51  ;;  %v228_v54 = vld [vmem:[%s14671_s29 + $0x190] sm:$0xff]  ;;  %v229_v55 = vld [vmem:[%s14671_s29 + $0x198] sm:$0xff]  ;;  %v230_v57 = vld [vmem:[%s14671_s29 + $0x1a0] sm:$0xff] }
  0x2d   : > { %393 = vst.msk [vmem:[#allocation2 + $0xc0] sm:$0xff] %vm20674_vm2, %v328_v47  ;;  %v331_v56 = vpack.c.bf16 %v229_v55, %v228_v54  ;;  %v232_v60 = vld [vmem:[%s14671_s29 + $0x1b0] sm:$0xff]  ;;  %v233_v61 = vld [vmem:[%s14671_s29 + $0x1b8] sm:$0xff]  ;;  %v235_v0 = vld [vmem:[%s14671_s29 + $0x1c8] sm:$0xff] }
  0x2e   : > { %394 = vst.msk [vmem:[#allocation2 + $0xc8] sm:$0xff] %vm20674_vm2, %v329_v50  ;;  %395 = vst.msk [vmem:[#allocation2 + $0xd0] sm:$0xff] %vm20674_vm2, %v330_v53  ;;  %v333_v62 = vpack.c.bf16 %v233_v61, %v232_v60  ;;  %v236_v2 = vld [vmem:[%s14671_s29 + $0x1d0] sm:$0xff]  ;;  %v237_v4 = vld [vmem:[%s14671_s29 + $0x1d8] sm:$0xff] }
  0x2f   : > { %396 = vst.msk [vmem:[#allocation2 + $0xd8] sm:$0xff] %vm20674_vm2, %v331_v56  ;;  %v335_v19 = vpack.c.bf16 %v237_v4, %v236_v2  ;;  %v11495_v20 = vld [vmem:[%s20657_s1 + $0x4] sm:$0x3] }
  0x30   : > { %398 = vst.msk [vmem:[#allocation2 + $0xe8] sm:$0xff] %vm20674_vm2, %v333_v62 }
  0x31   : > { %12568 = vmatmul.mubr.msk.bf16.gmra.mrb[12].mxu0 %vm20674_vm2, %v14771_v8  ;;  %12602 = vmatmul.mubr.msk.bf16.gmra.mrb[12].mxu1 %vm20674_vm2, %v14771_v8  ;;  %400 = vst.msk [vmem:[#allocation2 + $0xf8] sm:$0xff] %vm20674_vm2, %v335_v19 }
  0x32   : > { %12571 = vmatprep.mubr.msk.bf16.mxu0 %vm20674_vm2, %v14773_v9  ;;  %12605 = vmatprep.mubr.msk.bf16.mxu1 %vm20674_vm2, %v14773_v9 }
  0x39   : > { %12572 = vmatmul.mubr.msk.bf16.gmra.mrb[16].mxu0 %vm20674_vm2, %v14783_v10  ;;  %12606 = vmatmul.mubr.msk.bf16.gmra.mrb[16].mxu1 %vm20674_vm2, %v14783_v10 }
  0x3a   : > { %12575 = vmatprep.mubr.msk.bf16.mxu0 %vm20674_vm2, %v14785_v11  ;;  %12609 = vmatprep.mubr.msk.bf16.mxu1 %vm20674_vm2, %v14785_v11 }
  0x41   : > { %12576 = vmatmul.mubr.msk.bf16.gmra.mrb[20].mxu0 %vm20674_vm2, %v14795_v12  ;;  %12610 = vmatmul.mubr.msk.bf16.gmra.mrb[20].mxu1 %vm20674_vm2, %v14795_v12 }
  0x42   : > { %12579 = vmatprep.mubr.msk.bf16.mxu0 %vm20674_vm2, %v14797_v13  ;;  %12613 = vmatprep.mubr.msk.bf16.mxu1 %vm20674_vm2, %v14797_v13 }
  0x49   : > { %12580 = vmatmul.mubr.msk.bf16.gmra.mrb[24].mxu0 %vm20674_vm2, %v14807_v14  ;;  %12614 = vmatmul.mubr.msk.bf16.gmra.mrb[24].mxu1 %vm20674_vm2, %v14807_v14 }
  0x4a   : > { %12583 = vmatprep.mubr.msk.bf16.mxu0 %vm20674_vm2, %v14809_v15  ;;  %12617 = vmatprep.mubr.msk.bf16.mxu1 %vm20674_vm2, %v14809_v15 }
  0x51   : > { %12584 = vmatmul.mubr.msk.bf16.gmra.mrb[28].mxu0 %vm20674_vm2, %v14819_v16  ;;  %12618 = vmatmul.mubr.msk.bf16.gmra.mrb[28].mxu1 %vm20674_vm2, %v14819_v16 }
  0x52   : > { %12623 = vmatprep.mubr.msk.bf16.mxu0 %vm20674_vm2, %v14676_v17  ;;  %12691 = vmatprep.mubr.msk.bf16.mxu1 %vm20674_vm2, %v14730_v58  ;;  %v210_v17 = vld [vmem:[%s14671_s29 + $0x100] sm:$0xff] }
  0x59   : > { %12624 = vmatmul.mubr.msk.bf16.vlgmr.msra.gmra.mrb[32].mxu0 %vm20674_vm2, %v14678_v18  ;;  %12692 = vmatmul.mubr.msk.bf16.vlgmr.msra.gmra.mrb[32].mxu1 %vm20674_vm2, %v14740_v63  ;;  %v211_v18 = vld [vmem:[%s14671_s29 + $0x108] sm:$0xff] }
  0x5a   : > { %12656 = vmatpush3.bf16.msra.mxu0 %v14682_v21  ;;  %12724 = vmatpush3.bf16.msra.mxu1 %v14685_v22  ;;  %v322_v21 = vpack.c.bf16 %v211_v18, %v210_v17  ;;  %v212_v22 = vld [vmem:[%s14671_s29 + $0x110] sm:$0xff]  ;;  %v435_v18 = vlaneseq }
  0x5b   : > { %12627 = vmatprep.mubr.msk.bf16.mxu0 %vm20674_vm2, %v14730_v58  ;;  %12695 = vmatprep.mubr.msk.bf16.mxu1 %vm20674_vm2, %v14749_v3  ;;  %v323_v27 = vpack.c.bf16 %v213_v25, %v212_v22 }
  0x5c   : > { %12757 = vmatprep.subr.bf16.mxu0 %v2753_v23  ;;  %12791 = vmatprep.subr.bf16.mxu1 %v2919_v24  ;;  %387 = vst.msk [vmem:[#allocation2 + $0x90] sm:$0xff] %vm20674_vm2, %v322_v21  ;;  %v15063_v21 = vshrl.u32 %v435_v18, 7 }
  0x5d   : > { %388 = vst.msk [vmem:[#allocation2 + $0x98] sm:$0xff] %vm20674_vm2, %v323_v27 }
  0x5e   : > { %vm20676_vm3 = vcmp.lt.s32.totalorder %v15063_v21, 7  ;;  %vm20675_vm4 = vcmp.lt.s32.totalorder %v15063_v21, 1  ;;  %v440_v35 = vadd.s32 32, %v15063_v21  ;;  %v443_v52 = vadd.s32 56, %v15063_v21 }
  0x5f   : > { %v444_v53 = vadd.s32 64, %v15063_v21 }
  0x60   : > { %v500_v50 = vand.u32 31, %v440_v35 }
  0x61   : > { %12628 = vmatmul.mubr.msk.bf16.gmra.mrb[36].mxu0 %vm20674_vm2, %v14740_v63  ;;  %12696 = vmatmul.mubr.msk.bf16.gmra.mrb[36].mxu1 %vm20674_vm2, %v14759_v6  ;;  %v528_v2 = vand.u32 31, %v444_v53 }
  0x62   : > { %12631 = vmatprep.mubr.msk.bf16.mxu0 %vm20674_vm2, %v14749_v3  ;;  %12699 = vmatprep.mubr.msk.bf16.mxu1 %vm20674_vm2, %v14761_v7  ;;  %vm15115_vm6 = vcmp.ne.s32.totalorder %v500_v50, 0 }
  0x63   : > { %vm15163_vm8 = vcmp.ne.s32.totalorder %v528_v2, 0 }
  0x69   : > { %12632 = vmatmul.mubr.msk.bf16.gmra.mrb[40].mxu0 %vm20674_vm2, %v14759_v6  ;;  %12700 = vmatmul.mubr.msk.bf16.gmra.mrb[40].mxu1 %vm20674_vm2, %v14771_v8 }
  0x6a   : > { %12635 = vmatprep.mubr.msk.bf16.mxu0 %vm20674_vm2, %v14761_v7  ;;  %12703 = vmatprep.mubr.msk.bf16.mxu1 %vm20674_vm2, %v14773_v9 }
  0x71   : > { %12636 = vmatmul.mubr.msk.bf16.gmra.mrb[44].mxu0 %vm20674_vm2, %v14771_v8  ;;  %12704 = vmatmul.mubr.msk.bf16.gmra.mrb[44].mxu1 %vm20674_vm2, %v14783_v10 }
  0x72   : > { %12639 = vmatprep.mubr.msk.bf16.mxu0 %vm20674_vm2, %v14773_v9  ;;  %12707 = vmatprep.mubr.msk.bf16.mxu1 %vm20674_vm2, %v14785_v11 }
  0x79   : > { %12640 = vmatmul.mubr.msk.bf16.gmra.mrb[48].mxu0 %vm20674_vm2, %v14783_v10  ;;  %12708 = vmatmul.mubr.msk.bf16.gmra.mrb[48].mxu1 %vm20674_vm2, %v14795_v12 }
  0x7a   : > { %12643 = vmatprep.mubr.msk.bf16.mxu0 %vm20674_vm2, %v14785_v11  ;;  %12711 = vmatprep.mubr.msk.bf16.mxu1 %vm20674_vm2, %v14797_v13 }
  0x81   : > { %12644 = vmatmul.mubr.msk.bf16.gmra.mrb[52].mxu0 %vm20674_vm2, %v14795_v12  ;;  %12712 = vmatmul.mubr.msk.bf16.gmra.mrb[52].mxu1 %vm20674_vm2, %v14807_v14 }
  0x82   : > { %12647 = vmatprep.mubr.msk.bf16.mxu0 %vm20674_vm2, %v14797_v13  ;;  %12715 = vmatprep.mubr.msk.bf16.mxu1 %vm20674_vm2, %v14809_v15 }
  0x89   : > { %12648 = vmatmul.mubr.msk.bf16.gmra.mrb[56].mxu0 %vm20674_vm2, %v14807_v14  ;;  %12716 = vmatmul.mubr.msk.bf16.gmra.mrb[56].mxu1 %vm20674_vm2, %v14819_v16 }
  0x8a   : > { %12651 = vmatprep.mubr.msk.bf16.mxu0 %vm20674_vm2, %v14809_v15  ;;  %12719 = vmatprep.mubr.msk.bf16.mxu1 %vm20674_vm2, %v14891_v26 }
  0x91   : > { %12652 = vmatmul.mubr.msk.bf16.gmra.mrb[60].mxu0 %vm20674_vm2, %v14819_v16  ;;  %12720 = vmatmul.mubr.msk.bf16.gmra.mrb[60].mxu1 %vm20674_vm2, %v14903_v28 }
  0x92   : > { %12657 = vmatprep.mubr.msk.bf16.mxu0 %vm20674_vm2, %v14730_v58  ;;  %12725 = vmatprep.mubr.msk.bf16.mxu1 %vm20674_vm2, %v14730_v58  ;;  %v231_v58 = vld [vmem:[%s14671_s29 + $0x1a8] sm:$0xff] }
  0x93   : > { %v332_v59 = vpack.c.bf16 %v231_v58, %v230_v57 }
  0x95   : > { %397 = vst.msk [vmem:[#allocation2 + $0xe0] sm:$0xff] %vm20674_vm2, %v332_v59  ;;  %v20836_v59 = vmov 0 }
  0x99   : > { %12658 = vmatmul.mubr.msk.bf16.vlgmr.msra.gmra.mrb[32].mxu0 %vm20674_vm2, %v14740_v63  ;;  %12726 = vmatmul.mubr.msk.bf16.vlgmr.msra.gmra.mrb[64].mxu1 %vm20674_vm2, %v14740_v63  ;;  %v234_v63 = vld [vmem:[%s14671_s29 + $0x1c0] sm:$0xff] }
  0x9a   : > { %12758 = vmatpush3.bf16.msra.mxu0 %v2753_v23  ;;  %12792 = vmatpush3.bf16.msra.mxu1 %v2919_v24  ;;  %v334_v1 = vpack.c.bf16 %v235_v0, %v234_v63  ;;  %v11478_v23 = vld [vmem:[%s20657_s1 + $0x2] sm:$0x3]  ;;  %v15034_v24 = vand.u32 %v11495_v20, %v14644_v5 }
  0x9b   : > { %12661 = vmatprep.mubr.msk.bf16.mxu0 %vm20674_vm2, %v14749_v3  ;;  %12729 = vmatprep.mubr.msk.bf16.mxu1 %vm20674_vm2, %v14749_v3  ;;  %v15037_v17 = vand.u32 %v11478_v23, %v14644_v5 }
  0x9c   : > { %12825 = vmatprep.subr.bf16.mxu0 %v14920_v31  ;;  %12859 = vmatprep.subr.bf16.mxu1 %v14923_v32  ;;  %399 = vst.msk [vmem:[#allocation2 + $0xf0] sm:$0xff] %vm20674_vm2, %v334_v1  ;;  %v521_v1 = vand.u32 31, %v443_v52 }
  0x9e   : > { %vm15159_vm7 = vcmp.ne.s32.totalorder %v521_v1, 31 }
  0xa1   : > { %12662 = vmatmul.mubr.msk.bf16.gmra.mrb[36].mxu0 %vm20674_vm2, %v14759_v6  ;;  %12730 = vmatmul.mubr.msk.bf16.gmra.mrb[68].mxu1 %vm20674_vm2, %v14759_v6 }
  0xa2   : > { %12665 = vmatprep.mubr.msk.bf16.mxu0 %vm20674_vm2, %v14761_v7  ;;  %12733 = vmatprep.mubr.msk.bf16.mxu1 %vm20674_vm2, %v14761_v7 }
  0xa9   : > { %12666 = vmatmul.mubr.msk.bf16.gmra.mrb[40].mxu0 %vm20674_vm2, %v14771_v8  ;;  %12734 = vmatmul.mubr.msk.bf16.gmra.mrb[72].mxu1 %vm20674_vm2, %v14771_v8 }
  0xaa   : > { %12669 = vmatprep.mubr.msk.bf16.mxu0 %vm20674_vm2, %v14773_v9  ;;  %12737 = vmatprep.mubr.msk.bf16.mxu1 %vm20674_vm2, %v14773_v9 }
  0xb1   : > { %12670 = vmatmul.mubr.msk.bf16.gmra.mrb[44].mxu0 %vm20674_vm2, %v14783_v10  ;;  %12738 = vmatmul.mubr.msk.bf16.gmra.mrb[76].mxu1 %vm20674_vm2, %v14783_v10 }
  0xb2   : > { %12673 = vmatprep.mubr.msk.bf16.mxu0 %vm20674_vm2, %v14785_v11  ;;  %12741 = vmatprep.mubr.msk.bf16.mxu1 %vm20674_vm2, %v14785_v11 }
  0xb9   : > { %12674 = vmatmul.mubr.msk.bf16.gmra.mrb[48].mxu0 %vm20674_vm2, %v14795_v12  ;;  %12742 = vmatmul.mubr.msk.bf16.gmra.mrb[80].mxu1 %vm20674_vm2, %v14795_v12 }
  0xba   : > { %12677 = vmatprep.mubr.msk.bf16.mxu0 %vm20674_vm2, %v14797_v13  ;;  %12745 = vmatprep.mubr.msk.bf16.mxu1 %vm20674_vm2, %v14797_v13 }
  0xc1   : > { %12678 = vmatmul.mubr.msk.bf16.gmra.mrb[52].mxu0 %vm20674_vm2, %v14807_v14  ;;  %12746 = vmatmul.mubr.msk.bf16.gmra.mrb[84].mxu1 %vm20674_vm2, %v14807_v14 }
  0xc2   : > { %12681 = vmatprep.mubr.msk.bf16.mxu0 %vm20674_vm2, %v14809_v15  ;;  %12749 = vmatprep.mubr.msk.bf16.mxu1 %vm20674_vm2, %v14809_v15 }
  0xc9   : > { %12682 = vmatmul.mubr.msk.bf16.gmra.mrb[56].mxu0 %vm20674_vm2, %v14819_v16  ;;  %12750 = vmatmul.mubr.msk.bf16.gmra.mrb[88].mxu1 %vm20674_vm2, %v14819_v16 }
  0xca   : > { %12685 = vmatprep.mubr.msk.bf16.mxu0 %vm20674_vm2, %v14891_v26  ;;  %12753 = vmatprep.mubr.msk.bf16.mxu1 %vm20674_vm2, %v14891_v26 }
  0xd1   : > { %12686 = vmatmul.mubr.msk.bf16.gmra.mrb[60].mxu0 %vm20674_vm2, %v14903_v28  ;;  %12754 = vmatmul.mubr.msk.bf16.gmra.mrb[92].mxu1 %vm20674_vm2, %v14903_v28 }
  0xd2   : > { %12759 = vmatprep.mubr.msk.bf16.mxu0 %vm20674_vm2, %v14749_v3  ;;  %12793 = vmatprep.mubr.msk.bf16.mxu1 %vm20674_vm2, %v14749_v3 }
  0xd9   : > { %12760 = vmatmul.mubr.msk.bf16.vlgmr.msra.gmra.mrb[32].mxu0 %vm20674_vm2, %v14759_v6  ;;  %12794 = vmatmul.mubr.msk.bf16.vlgmr.msra.gmra.mrb[96].mxu1 %vm20674_vm2, %v14759_v6 }
  0xda   : > { %12826 = vmatpush3.bf16.msra.mxu0 %v14920_v31  ;;  %12860 = vmatpush3.bf16.msra.mxu1 %v14923_v32  ;;  %v439_v31 = vadd.s32 24, %v15063_v21 }
  0xdb   : > { %12763 = vmatprep.mubr.msk.bf16.mxu0 %vm20674_vm2, %v14761_v7  ;;  %12797 = vmatprep.mubr.msk.bf16.mxu1 %vm20674_vm2, %v14761_v7 }
  0xdc   : > { %12893 = vmatprep.subr.bf16.mxu0 %v15034_v24  ;;  %12927 = vmatprep.subr.bf16.mxu1 %v15037_v17  ;;  %v493_v45 = vand.u32 31, %v439_v31 }
  0xde   : > { %vm15111_vm5 = vcmp.ne.s32.totalorder %v493_v45, 31 }
  0xdf   : > { %v20837_v59 = vsel %vm15111_vm5, 4294967295, %v20836_v59 }
  0xe0   : > { %20838 = vst [vmem:[#allocation3_spill] sm:$0xff] %v20837_v59 }
  0xe1   : > { %12764 = vmatmul.mubr.msk.bf16.gmra.mrb[36].mxu0 %vm20674_vm2, %v14771_v8  ;;  %12798 = vmatmul.mubr.msk.bf16.gmra.mrb[100].mxu1 %vm20674_vm2, %v14771_v8 }
  0xe2   : > { %12767 = vmatprep.mubr.msk.bf16.mxu0 %vm20674_vm2, %v14773_v9  ;;  %12801 = vmatprep.mubr.msk.bf16.mxu1 %vm20674_vm2, %v14773_v9 }
  0xe9   : > { %12768 = vmatmul.mubr.msk.bf16.gmra.mrb[40].mxu0 %vm20674_vm2, %v14783_v10  ;;  %12802 = vmatmul.mubr.msk.bf16.gmra.mrb[104].mxu1 %vm20674_vm2, %v14783_v10 }
  0xea   : > { %12771 = vmatprep.mubr.msk.bf16.mxu0 %vm20674_vm2, %v14785_v11  ;;  %12805 = vmatprep.mubr.msk.bf16.mxu1 %vm20674_vm2, %v14785_v11 }
  0xeb   : > { %v12557_v22 = vpop.f32.mrb[0].mxu0  ;;  %v12591_v25 = vpop.f32.mrb[0].mxu1 }
  0xec   : > { %v1644_v27 = vrot.slane %v12591_v25, 1  ;;  %v15069_v29 = vpop.f32.mrb[1].mxu0  ;;  %v15071_v30 = vpop.f32.mrb[1].mxu1  ;;  %v1319_v36 = vrot.slane %v12557_v22, 7  ;;  %v15120_v22 = vadd.s32 88, %v15063_v21 }
  0xed   : > { %v20661_v32 = vrot.slane %v15071_v30, 1  ;;  %v12558_v33 = vpop.f32.mrb[2].mxu0  ;;  %v12592_v34 = vpop.f32.mrb[2].mxu1  ;;  %v20660_v41 = vrot.slane %v15069_v29, 7 }
  0xee   : > { %v1320_v37 = vrot.slane %v12558_v33, 7  ;;  %v1645_v38 = vrot.slane %v12592_v34, 1  ;;  %v1027_v39 = vpop.f32.mrb[3].mxu0  ;;  %v1193_v40 = vpop.f32.mrb[3].mxu1 }
  0xef   : > { %v1318_v42 = vrot.slane %v1027_v39, 7  ;;  %v1643_v43 = vrot.slane %v1193_v40, 1 }
  0xf0   : > { %v1703_v44 = vsel %vm20676_vm3, %v1644_v27, %v1645_v38  ;;  %v1378_v46 = vsel %vm20675_vm4, %v1319_v36, %v1320_v37 }
  0xf1   : > { %v1380_v47 = vsel %vm20675_vm4, %v20660_v41, %v1318_v42  ;;  %v1704_v48 = vsel %vm20676_vm3, %v1643_v43, %v1644_v27  ;;  %v15093_v49 = vsel %vm20676_vm3, %v20661_v32, %v1643_v43  ;;  %12772 = vmatmul.mubr.msk.bf16.gmra.mrb[44].mxu0 %vm20674_vm2, %v14795_v12  ;;  %12806 = vmatmul.mubr.msk.bf16.gmra.mrb[108].mxu1 %vm20674_vm2, %v14795_v12 }
  0xf2   : > { %v15099_v51 = vadd.f32 %v1704_v48, %v1380_v47  ;;  %12775 = vmatprep.mubr.msk.bf16.mxu0 %vm20674_vm2, %v14797_v13  ;;  %12809 = vmatprep.mubr.msk.bf16.mxu1 %vm20674_vm2, %v14797_v13  ;;  %v1379_v54 = vsel %vm20675_vm4, %v1318_v42, %v1319_v36  ;;  %v20839_v13 = vmov 0 }
  0xf3   : > { %v15109_v55 = vadd.f32 %v1703_v44, %v1379_v54  ;;  %v20840_v13 = vsel %vm15115_vm6, 4294967295, %v20839_v13  ;;  %v20842_v54 = vmov 0 }
  0xf4   : > { %v12561_v56 = vpop.f32.mrb[4].mxu0  ;;  %v12595_v12 = vpop.f32.mrb[4].mxu1  ;;  %20841 = vst [vmem:[#allocation4_spill] sm:$0xff] %v20840_v13  ;;  %v20843_v54 = vsel %vm15159_vm7, 4294967295, %v20842_v54  ;;  %v15565_v13 = vld [vmem:[#allocation2 + $0xd8] sm:$0xff] }
  0xf5   : > { %v1648_v57 = vrot.slane %v12595_v12, 1  ;;  %v1040_v58 = vpop.f32.mrb[5].mxu0  ;;  %v1206_v60 = vpop.f32.mrb[5].mxu1  ;;  %v1323_v4 = vrot.slane %v12561_v56, 7  ;;  %20844 = vst [vmem:[#allocation5_spill] sm:$0xff] %v20843_v54  ;;  %v20845_v56 = vmov 0 }
  0xf6   : > { %v1321_v61 = vrot.slane %v1040_v58, 7  ;;  %v1646_v62 = vrot.slane %v1206_v60, 1  ;;  %v12562_v63 = vpop.f32.mrb[6].mxu0  ;;  %v12596_v0 = vpop.f32.mrb[6].mxu1  ;;  %v20846_v56 = vsel %vm15163_vm8, 4294967295, %v20845_v56  ;;  %v549_v60 = vand.u32 31, %v15120_v22 }
  0xf7   : > { %v1324_v19 = vrot.slane %v12562_v63, 7  ;;  %v1649_v20 = vrot.slane %v12596_v0, 1  ;;  %v1043_v23 = vpop.f32.mrb[7].mxu0  ;;  %v1209_v18 = vpop.f32.mrb[7].mxu1  ;;  %20847 = vst [vmem:[#allocation6_spill] sm:$0xff] %v20846_v56  ;;  %v15597_v56 = vld [vmem:[#allocation2 + $0xe8] sm:$0xff] }
  0xf8   : > { %v1702_v25 = vsel %vm20676_vm3, %v1645_v38, %v1646_v62  ;;  %v1322_v27 = vrot.slane %v1043_v23, 7  ;;  %v1377_v31 = vsel %vm20675_vm4, %v1320_v37, %v1321_v61  ;;  %v1647_v33 = vrot.slane %v1209_v18, 1  ;;  %20926 = vst [vmem:[#allocation28_spill] sm:$0xff] %v15597_v56 }
  0xf9   : > { %v1774_v34 = vsel %vm15111_vm5, %v1702_v25, 0.0  ;;  %v1699_v35 = vsel %vm20676_vm3, %v1648_v57, %v1649_v20  ;;  %v1450_v36 = vsel %vm15115_vm6, %v1377_v31, 0.0  ;;  %12776 = vmatmul.mubr.msk.bf16.gmra.mrb[48].mxu0 %vm20674_vm2, %v14807_v14  ;;  %12810 = vmatmul.mubr.msk.bf16.gmra.mrb[112].mxu1 %vm20674_vm2, %v14807_v14  ;;  %v1374_v38 = vsel %vm20675_vm4, %v1323_v4, %v1324_v19 }
  0xfa   : > { %v1376_v37 = vsel %vm20675_vm4, %v1321_v61, %v1322_v27  ;;  %v1700_v39 = vsel %vm20676_vm3, %v1647_v33, %v1648_v57  ;;  %v1701_v40 = vsel %vm20676_vm3, %v1646_v62, %v1647_v33  ;;  %12779 = vmatprep.mubr.msk.bf16.mxu0 %vm20674_vm2, %v14809_v15  ;;  %12813 = vmatprep.mubr.msk.bf16.mxu1 %vm20674_vm2, %v14809_v15  ;;  %v448_v14 = vadd.s32 96, %v15063_v21 }
  0xfb   : > { %v15149_v42 = vadd.f32 %v1701_v40, %v1450_v36  ;;  %v15151_v43 = vadd.f32 %v1700_v39, %v1376_v37  ;;  %v15153_v44 = vadd.f32 %v1774_v34, %v1378_v46  ;;  %v1375_v45 = vsel %vm20675_vm4, %v1322_v27, %v1323_v4 }
  0xfc   : > { %v12565_v47 = vpop.f32.mrb[8].mxu0  ;;  %v12599_v48 = vpop.f32.mrb[8].mxu1  ;;  %v15157_v50 = vadd.f32 %v1699_v35, %v1375_v45  ;;  %v556_v61 = vand.u32 31, %v448_v14  ;;  %v15169_v23 = vadd.s32 120, %v15063_v21  ;;  %vm15208_vm9 = vcmp.ne.s32.totalorder %v549_v60, 31 }
  0xfd   : > { %v1652_v52 = vrot.slane %v12599_v48, 1  ;;  %v1056_v53 = vpop.f32.mrb[9].mxu0  ;;  %v1222_v15 = vpop.f32.mrb[9].mxu1  ;;  %v1327_v62 = vrot.slane %v12565_v47, 7 }
  0xfe   : > { %v1325_v46 = vrot.slane %v1056_v53, 7  ;;  %v1650_v12 = vrot.slane %v1222_v15, 1  ;;  %v12566_v57 = vpop.f32.mrb[10].mxu0  ;;  %v12600_v58 = vpop.f32.mrb[10].mxu1  ;;  %v20848_v53 = vmov 0  ;;  %vm15212_vm10 = vcmp.ne.s32.totalorder %v556_v61, 0 }
  0xff   : > { %v1328_v63 = vrot.slane %v12566_v57, 7  ;;  %v1653_v0 = vrot.slane %v12600_v58, 1  ;;  %v1059_v4 = vpop.f32.mrb[11].mxu0  ;;  %v1225_v1 = vpop.f32.mrb[11].mxu1  ;;  %v20849_v53 = vsel %vm15208_vm9, 4294967295, %v20848_v53 }
 0x100   : > { %v1698_v2 = vsel %vm20676_vm3, %v1649_v20, %v1650_v12  ;;  %v1326_v18 = vrot.slane %v1059_v4, 7  ;;  %v1373_v25 = vsel %vm20675_vm4, %v1324_v19, %v1325_v46  ;;  %v1651_v27 = vrot.slane %v1225_v1, 1  ;;  %20850 = vst [vmem:[#allocation7_spill] sm:$0xff] %v20849_v53  ;;  %v15217_v1 = vld [vmem:[#allocation2 + $0x90] sm:$0xff] }
 0x101   : > { %v1778_v22 = vsel %vm15159_vm7, %v1698_v2, 0.0  ;;  %v1695_v31 = vsel %vm20676_vm3, %v1652_v52, %v1653_v0  ;;  %v1454_v33 = vsel %vm15163_vm8, %v1373_v25, 0.0  ;;  %12780 = vmatmul.mubr.msk.bf16.gmra.mrb[52].mxu0 %vm20674_vm2, %v14819_v16  ;;  %12814 = vmatmul.mubr.msk.bf16.gmra.mrb[116].mxu1 %vm20674_vm2, %v14819_v16  ;;  %v1370_v20 = vsel %vm20675_vm4, %v1327_v62, %v1328_v63 }
 0x102   : > { %v1372_v19 = vsel %vm20675_vm4, %v1325_v46, %v1326_v18  ;;  %v1696_v34 = vsel %vm20676_vm3, %v1651_v27, %v1652_v52  ;;  %v1697_v35 = vsel %vm20676_vm3, %v1650_v12, %v1651_v27  ;;  %12783 = vmatprep.mubr.msk.bf16.mxu0 %vm20674_vm2, %v14891_v26  ;;  %12817 = vmatprep.mubr.msk.bf16.mxu1 %vm20674_vm2, %v14891_v26  ;;  %v452_v16 = vadd.s32 128, %v15063_v21 }
 0x103   : > { %v15198_v36 = vadd.f32 %v1697_v35, %v1454_v33  ;;  %v15200_v37 = vadd.f32 %v1696_v34, %v1372_v19  ;;  %v15202_v39 = vadd.f32 %v1778_v22, %v1374_v38  ;;  %v1371_v40 = vsel %vm20675_vm4, %v1326_v18, %v1327_v62 }
 0x104   : > { %v12569_v14 = vpop.f32.mrb[12].mxu0  ;;  %v12603_v45 = vpop.f32.mrb[12].mxu1  ;;  %v15206_v47 = vadd.f32 %v1695_v31, %v1371_v40  ;;  %v20851_v46 = vmov 0  ;;  %v577_v38 = vand.u32 31, %v15169_v23  ;;  %v584_v4 = vand.u32 31, %v452_v16 }
 0x105   : > { %v1656_v48 = vrot.slane %v12603_v45, 1  ;;  %v1072_v52 = vpop.f32.mrb[13].mxu0  ;;  %v1238_v15 = vpop.f32.mrb[13].mxu1  ;;  %v20852_v46 = vsel %vm15212_vm10, 4294967295, %v20851_v46  ;;  %v1331_v2 = vrot.slane %v12569_v14, 7  ;;  %v455_v22 = vadd.s32 152, %v15063_v21 }
 0x106   : > { %20853 = vst [vmem:[#allocation8_spill] sm:$0xff] %v20852_v46  ;;  %v1329_v12 = vrot.slane %v1072_v52, 7  ;;  %v1654_v57 = vrot.slane %v1238_v15, 1  ;;  %v12570_v58 = vpop.f32.mrb[14].mxu0  ;;  %v12604_v62 = vpop.f32.mrb[14].mxu1  ;;  %v456_v14 = vadd.s32 160, %v15063_v21 }
 0x107   : > { %v1332_v18 = vrot.slane %v12570_v58, 7  ;;  %v1657_v60 = vrot.slane %v12604_v62, 1  ;;  %v1075_v25 = vpop.f32.mrb[15].mxu0  ;;  %v1241_v27 = vpop.f32.mrb[15].mxu1  ;;  %vm15255_vm11 = vcmp.ne.s32.totalorder %v577_v38, 31  ;;  %vm15261_vm12 = vcmp.ne.s32.totalorder %v584_v4, 0 }
 0x108   : > { %v1694_v61 = vsel %vm20676_vm3, %v1653_v0, %v1654_v57  ;;  %v1330_v31 = vrot.slane %v1075_v25, 7  ;;  %v1369_v23 = vsel %vm20675_vm4, %v1328_v63, %v1329_v12  ;;  %v1655_v33 = vrot.slane %v1241_v27, 1 }
 0x109   : > { %v1782_v19 = vsel %vm15208_vm9, %v1694_v61, 0.0  ;;  %v1691_v34 = vsel %vm20676_vm3, %v1656_v48, %v1657_v60  ;;  %v1458_v35 = vsel %vm15212_vm10, %v1369_v23, 0.0  ;;  %12784 = vmatmul.mubr.msk.bf16.gmra.mrb[56].mxu0 %vm20674_vm2, %v14903_v28  ;;  %12818 = vmatmul.mubr.msk.bf16.gmra.mrb[120].mxu1 %vm20674_vm2, %v14903_v28  ;;  %v1366_v0 = vsel %vm20675_vm4, %v1331_v2, %v1332_v18 }
 0x10a   : > { %v1368_v63 = vsel %vm20675_vm4, %v1329_v12, %v1330_v31  ;;  %v1692_v16 = vsel %vm20676_vm3, %v1655_v33, %v1656_v48  ;;  %v1693_v40 = vsel %vm20676_vm3, %v1654_v57, %v1655_v33  ;;  %12787 = vmatprep.mubr.msk.bf16.mxu0 %vm20674_vm2, %v15217_v1  ;;  %12821 = vmatprep.mubr.msk.bf16.mxu1 %vm20674_vm2, %v15217_v1  ;;  %v20854_v57 = vmov 0 }
 0x10b   : > { %v15247_v45 = vadd.f32 %v1693_v40, %v1458_v35  ;;  %v15249_v52 = vadd.f32 %v1692_v16, %v1368_v63  ;;  %v15251_v15 = vadd.f32 %v1782_v19, %v1370_v20  ;;  %v1367_v48 = vsel %vm20675_vm4, %v1330_v31, %v1331_v2  ;;  %v15265_v20 = vld [vmem:[#allocation2 + $0x98] sm:$0xff] }
 0x10c   : > { %v12573_v12 = vpop.f32.mrb[16].mxu0  ;;  %v12607_v58 = vpop.f32.mrb[16].mxu1  ;;  %v20855_v57 = vsel %vm15255_vm11, 4294967295, %v20854_v57  ;;  %v15259_v62 = vadd.f32 %v1691_v34, %v1367_v48  ;;  %v20857_v23 = vmov 0  ;;  %v605_v33 = vand.u32 31, %v455_v22 }
 0x10d   : > { %20856 = vst [vmem:[#allocation9_spill] sm:$0xff] %v20855_v57  ;;  %v1660_v25 = vrot.slane %v12607_v58, 1  ;;  %v1088_v27 = vpop.f32.mrb[17].mxu0  ;;  %v1254_v61 = vpop.f32.mrb[17].mxu1  ;;  %v20858_v23 = vsel %vm15261_vm12, 4294967295, %v20857_v23  ;;  %v612_v38 = vand.u32 31, %v456_v14 }
 0x10e   : > { %20859 = vst [vmem:[#allocation10_spill] sm:$0xff] %v20858_v23  ;;  %v1333_v19 = vrot.slane %v1088_v27, 7  ;;  %v1658_v2 = vrot.slane %v1254_v61, 1  ;;  %v12574_v31 = vpop.f32.mrb[18].mxu0  ;;  %v12608_v35 = vpop.f32.mrb[18].mxu1  ;;  %v15268_v63 = vadd.s32 184, %v15063_v21 }
 0x10f   : > { %v1335_v34 = vrot.slane %v12573_v12, 7  ;;  %v1336_v16 = vrot.slane %v12574_v31, 7  ;;  %v1661_v40 = vrot.slane %v12608_v35, 1  ;;  %v1091_v48 = vpop.f32.mrb[19].mxu0  ;;  %v1257_v58 = vpop.f32.mrb[19].mxu1  ;;  %v15271_v4 = vadd.s32 192, %v15063_v21 }
 0x110   : > { %v1690_v41 = vsel %vm20676_vm3, %v1657_v60, %v1658_v2  ;;  %v1334_v22 = vrot.slane %v1091_v48, 7  ;;  %v1365_v27 = vsel %vm20675_vm4, %v1332_v18, %v1333_v19  ;;  %v1659_v61 = vrot.slane %v1257_v58, 1 }
 0x111   : > { %v1786_v14 = vsel %vm15255_vm11, %v1690_v41, 0.0  ;;  %v1687_v12 = vsel %vm20676_vm3, %v1660_v25, %v1661_v40  ;;  %v1462_v31 = vsel %vm15261_vm12, %v1365_v27, 0.0  ;;  %12788 = vmatmul.mubr.msk.bf16.gmra.mrb[60].mxu0 %vm20674_vm2, %v15265_v20  ;;  %12822 = vmatmul.mubr.msk.bf16.gmra.mrb[124].mxu1 %vm20674_vm2, %v15265_v20  ;;  %v1362_v60 = vsel %vm20675_vm4, %v1335_v34, %v1336_v16 }
 0x112   : > { %v1364_v18 = vsel %vm20675_vm4, %v1333_v19, %v1334_v22  ;;  %v1688_v41 = vsel %vm20676_vm3, %v1659_v61, %v1660_v25  ;;  %v1689_v35 = vsel %vm20676_vm3, %v1658_v2, %v1659_v61  ;;  %vm15295_vm13 = vcmp.ne.s32.totalorder %v605_v33, 31  ;;  %12827 = vmatprep.mubr.msk.bf16.mxu0 %vm20674_vm2, %v14749_v3  ;;  %12861 = vmatprep.mubr.msk.bf16.mxu1 %vm20674_vm2, %v14891_v26  ;;  %v11545_v61 = vld [vmem:[%s20657_s1 + $0x6] sm:$0x3]  ;;  %v11528_v3 = vld [vmem:[%s20657_s1 + $0x8] sm:$0x3] }
 0x113   : > { %v20860_v48 = vmov 0  ;;  %v15303_v58 = vadd.f32 %v1689_v35, %v1462_v31  ;;  %v15305_v27 = vadd.f32 %v1688_v41, %v1364_v18  ;;  %v15307_v19 = vadd.f32 %v1786_v14, %v1366_v0 }
 0x114   : > { %v20861_v48 = vsel %vm15295_vm13, 4294967295, %v20860_v48  ;;  %v1363_v25 = vsel %vm20675_vm4, %v1334_v22, %v1335_v34  ;;  %v12577_v2 = vpop.f32.mrb[20].mxu0  ;;  %v12611_v33 = vpop.f32.mrb[20].mxu1  ;;  %vm15319_vm14 = vcmp.ne.s32.totalorder %v612_v38, 0  ;;  %v20864_v0 = vmov 0 }
 0x115   : > { %20862 = vst [vmem:[#allocation11_spill] sm:$0xff] %v20861_v48  ;;  %20863 = vst [vmem:[#allocation12_spill] sm:$0xff] %v15305_v27  ;;  %v15317_v26 = vadd.f32 %v1687_v12, %v1363_v25  ;;  %v1664_v31 = vrot.slane %v12611_v33, 1  ;;  %v1104_v18 = vpop.f32.mrb[21].mxu0  ;;  %v1270_v41 = vpop.f32.mrb[21].mxu1  ;;  %v20865_v0 = vsel %vm15319_vm14, 4294967295, %v20864_v0  ;;  %v15332_v59 = vand.u32 %v11545_v61, %v14644_v5 }
 0x116   : > { %20866 = vst [vmem:[#allocation13_spill] sm:$0xff] %v20865_v0  ;;  %v633_v34 = vand.u32 31, %v15268_v63  ;;  %v640_v22 = vand.u32 31, %v15271_v4  ;;  %v1337_v14 = vrot.slane %v1104_v18, 7  ;;  %v1662_v35 = vrot.slane %v1270_v41, 1  ;;  %v12578_v32 = vpop.f32.mrb[22].mxu0 }
 0x117   : > { %v12612_v57 = vpop.f32.mrb[22].mxu1  ;;  %v15326_v53 = vadd.s32 216, %v15063_v21  ;;  %v15329_v12 = vadd.s32 224, %v15063_v21  ;;  %v1340_v25 = vrot.slane %v12578_v32, 7  ;;  %v1107_v38 = vpop.f32.mrb[23].mxu0  ;;  %v15335_v63 = vand.u32 %v11528_v3, %v14644_v5 }
 0x118   : > { %v1665_v33 = vrot.slane %v12612_v57, 1  ;;  %v1273_v54 = vpop.f32.mrb[23].mxu1  ;;  %v1686_v4 = vsel %vm20676_vm3, %v1661_v40, %v1662_v35  ;;  %v1338_v18 = vrot.slane %v1107_v38, 7  ;;  %v1361_v41 = vsel %vm20675_vm4, %v1336_v16, %v1337_v14 }
 0x119   : > { %v1663_v27 = vrot.slane %v1273_v54, 1  ;;  %v1790_v32 = vsel %vm15295_vm13, %v1686_v4, 0.0  ;;  %v1466_v61 = vsel %vm15319_vm14, %v1361_v41, 0.0  ;;  %12828 = vmatmul.mubr.msk.bf16.vlgmr.msra.gmra.mrb[64].mxu0 %vm20674_vm2, %v14759_v6  ;;  %12862 = vmatmul.mubr.msk.bf16.vlgmr.msra.gmra.mrb[128].mxu1 %vm20674_vm2, %v14903_v28  ;;  %v15352_v40 = vadd.s32 248, %v15063_v21 }
 0x11a   : > { %v1683_v57 = vsel %vm20676_vm3, %v1664_v31, %v1665_v33  ;;  %v1339_v16 = vrot.slane %v12577_v2, 7  ;;  %v1360_v54 = vsel %vm20675_vm4, %v1337_v14, %v1338_v18  ;;  %12894 = vmatpush3.bf16.msra.mxu0 %v15034_v24  ;;  %12928 = vmatpush3.bf16.msra.mxu1 %v15037_v17  ;;  %vm15370_vm15 = vcmp.ne.s32.totalorder %v633_v34, 31 }
 0x11b   : > { %v1684_v3 = vsel %vm20676_vm3, %v1663_v27, %v1664_v31  ;;  %v1685_v38 = vsel %vm20676_vm3, %v1662_v35, %v1663_v27  ;;  %12831 = vmatprep.mubr.msk.bf16.mxu0 %vm20674_vm2, %v14761_v7  ;;  %12865 = vmatprep.mubr.msk.bf16.mxu1 %vm20674_vm2, %v15217_v1  ;;  %v20869_v31 = vmov 0  ;;  %v15376_v24 = vadd.f32 %v1790_v32, %v1362_v60 }
 0x11c   : > { %v15362_v6 = vadd.f32 %v1685_v38, %v1466_v61  ;;  %v15364_v28 = vadd.f32 %v1684_v3, %v1360_v54  ;;  %v12581_v2 = vpop.f32.mrb[24].mxu0  ;;  %v12615_v14 = vpop.f32.mrb[24].mxu1  ;;  %v20870_v31 = vsel %vm15370_vm15, 4294967295, %v20869_v31  ;;  %12995 = vmatprep.subr.bf16.mxu0 %v15332_v59  ;;  %12961 = vmatprep.subr.bf16.mxu1 %v15335_v63  ;;  %v1359_v17 = vsel %vm20675_vm4, %v1338_v18, %v1339_v16 }
 0x11d   : > { %20871 = vst [vmem:[#allocation16_spill] sm:$0xff] %v20870_v31  ;;  %v1358_v7 = vsel %vm20675_vm4, %v1339_v16, %v1340_v25  ;;  %v1668_v27 = vrot.slane %v12615_v14, 1  ;;  %v1120_v35 = vpop.f32.mrb[25].mxu0  ;;  %v1286_v4 = vpop.f32.mrb[25].mxu1  ;;  %vm15382_vm0 = vcmp.ne.s32.totalorder %v640_v22, 0  ;;  %v20872_v34 = vmov 0 }
 0x11e   : > { %20867 = vst [vmem:[#allocation14_spill] sm:$0xff] %v15362_v6  ;;  %20868 = vst [vmem:[#allocation15_spill] sm:$0xff] %v15364_v28  ;;  %v20873_v34 = vsel %vm15382_vm0, 4294967295, %v20872_v34  ;;  %v661_v41 = vand.u32 31, %v15326_v53  ;;  %v15387_v61 = vadd.f32 %v1683_v57, %v1359_v17  ;;  %v1341_v54 = vrot.slane %v1120_v35, 7  ;;  %v12582_v32 = vpop.f32.mrb[26].mxu0 }
 0x11f   : > { %20874 = vst [vmem:[#allocation17_spill] sm:$0xff] %v20873_v34  ;;  %v1666_v60 = vrot.slane %v1286_v4, 1  ;;  %v12616_v3 = vpop.f32.mrb[26].mxu1  ;;  %v689_v18 = vand.u32 31, %v15352_v40  ;;  %v668_v38 = vand.u32 31, %v15329_v12  ;;  %v1343_v16 = vrot.slane %v12581_v2, 7 }
 0x120   : > { %v1344_v14 = vrot.slane %v12582_v32, 7  ;;  %v1669_v48 = vrot.slane %v12616_v3, 1  ;;  %v1123_v28 = vpop.f32.mrb[27].mxu0  ;;  %v1289_v22 = vpop.f32.mrb[27].mxu1  ;;  %v15391_v6 = vld [vmem:[#allocation2 + $0xa0] sm:$0xff]  ;;  %v1357_v17 = vsel %vm20675_vm4, %v1340_v25, %v1341_v54  ;;  %vm15430_vm1 = vcmp.ne.s32.totalorder %v661_v41, 31 }
 0x121   : > { %v1682_v53 = vsel %vm20676_vm3, %v1665_v33, %v1666_v60  ;;  %v1342_v57 = vrot.slane %v1123_v28, 7  ;;  %v1667_v35 = vrot.slane %v1289_v22, 1  ;;  %v1470_v2 = vsel %vm15382_vm0, %v1357_v17, 0.0  ;;  %12832 = vmatmul.mubr.msk.bf16.gmra.mrb[68].mxu0 %vm20674_vm2, %v14771_v8  ;;  %12866 = vmatmul.mubr.msk.bf16.gmra.mrb[132].mxu1 %vm20674_vm2, %v15265_v20 }
 0x122   : > { %v1794_v40 = vsel %vm15370_vm15, %v1682_v53, 0.0  ;;  %v1679_v12 = vsel %vm20676_vm3, %v1668_v27, %v1669_v48  ;;  %v1354_v33 = vsel %vm20675_vm4, %v1343_v16, %v1344_v14  ;;  %12835 = vmatprep.mubr.msk.bf16.mxu0 %vm20674_vm2, %v14773_v9  ;;  %12869 = vmatprep.mubr.msk.bf16.mxu1 %vm20674_vm2, %v15391_v6  ;;  %v472_v8 = vand.u32 31, %v15063_v21 }
 0x123   : > { %v1356_v25 = vsel %vm20675_vm4, %v1341_v54, %v1342_v57  ;;  %v1680_v28 = vsel %vm20676_vm3, %v1667_v35, %v1668_v27  ;;  %v1681_v4 = vsel %vm20676_vm3, %v1666_v60, %v1667_v35  ;;  %v15424_v22 = vadd.f32 %v1794_v40, %v1358_v7  ;;  %v15438_v7 = vld [vmem:[#allocation2 + $0xa8] sm:$0xff] }
 0x124   : > { %v15420_v32 = vadd.f32 %v1681_v4, %v1470_v2  ;;  %v15422_v3 = vadd.f32 %v1680_v28, %v1356_v25  ;;  %v1355_v27 = vsel %vm20675_vm4, %v1342_v57, %v1343_v16  ;;  %v12585_v54 = vpop.f32.mrb[28].mxu0  ;;  %v12619_v53 = vpop.f32.mrb[28].mxu1  ;;  %v20878_v35 = vmov 0 }
 0x125   : > { %v15428_v60 = vadd.f32 %v1679_v12, %v1355_v27  ;;  %v1672_v17 = vrot.slane %v12619_v53, 1  ;;  %v1136_v9 = vpop.f32.mrb[29].mxu0  ;;  %v20879_v35 = vsel %vm15430_vm1, 4294967295, %v20878_v35  ;;  %v1302_v31 = vpop.f32.mrb[29].mxu1  ;;  %vm15434_vm2 = vcmp.ne.s32.totalorder %v668_v38, 0 }
 0x126   : > { %20875 = vst [vmem:[#allocation18_spill] sm:$0xff] %v15420_v32  ;;  %20876 = vst [vmem:[#allocation19_spill] sm:$0xff] %v15422_v3  ;;  %v20881_v2 = vmov 0  ;;  %v1345_v40 = vrot.slane %v1136_v9, 7  ;;  %v1670_v25 = vrot.slane %v1302_v31, 1  ;;  %v12586_v16 = vpop.f32.mrb[30].mxu0 }
 0x127   : > { %20877 = vst [vmem:[#allocation20_spill] sm:$0xff] %v15428_v60  ;;  %20880 = vst [vmem:[#allocation21_spill] sm:$0xff] %v20879_v35  ;;  %v20882_v2 = vsel %vm15434_vm2, 4294967295, %v20881_v2  ;;  %vm15440_vm4 = vcmp.ne.s32.totalorder %v689_v18, 31  ;;  %v20884_v57 = vmov 0  ;;  %v12620_v12 = vpop.f32.mrb[30].mxu1 }
 0x128   : > { %20883 = vst [vmem:[#allocation22_spill] sm:$0xff] %v20882_v2  ;;  %v20885_v57 = vsel %vm15440_vm4, 4294967295, %v20884_v57  ;;  %vm15444_vm3 = vcmp.ne.s32.totalorder %v472_v8, 0  ;;  %v20887_v41 = vmov 0  ;;  %v1347_v28 = vrot.slane %v12585_v54, 7  ;;  %v1139_v27 = vpop.f32.mrb[31].mxu0 }
 0x129   : > { %20886 = vst [vmem:[#allocation23_spill] sm:$0xff] %v20885_v57  ;;  %v20888_v41 = vsel %vm15444_vm3, 4294967295, %v20887_v41  ;;  %v1348_v4 = vrot.slane %v12586_v16, 7  ;;  %v1673_v38 = vrot.slane %v12620_v12, 1  ;;  %v1305_v53 = vpop.f32.mrb[31].mxu1  ;;  %v15448_v3 = vld [vmem:[#allocation2 + $0xb0] sm:$0xff] }
 0x12a   : > { %20889 = vst [vmem:[#allocation24_spill] sm:$0xff] %v20888_v41  ;;  %vm20890_vm15 = vcmp.lt.s32.totalorder %v15063_v21, 7  ;;  %v1346_v9 = vrot.slane %v1139_v27, 7  ;;  %vm20891_vm13 = vcmp.lt.s32.totalorder %v15063_v21, 1  ;;  %v1671_v60 = vrot.slane %v1305_v53, 1 }
 0x12b   : > { %v1678_v31 = vsel %vm20890_vm15, %v1669_v48, %v1670_v25  ;;  %v1353_v18 = vsel %vm20891_vm13, %v1344_v14, %v1345_v40  ;;  %vm20892_vm11 = vmmov %vm20890_vm15  ;;  %v20893_v16 = vrot.slane %v15071_v30, 1  ;;  %vm20895_vm15 = vcmask 23552  }
 0x12c   : > { %v1798_v8 = vsel %vm15430_vm1, %v1678_v31, 0.0  ;;  %v1675_v54 = vsel %vm20892_vm11, %v1672_v17, %v1673_v38  ;;  %vm20894_vm9 = vmmov %vm20892_vm11  ;;  %v1474_v32 = vsel %vm15434_vm2, %v1353_v18, 0.0  ;;  %12836 = vmatmul.mubr.msk.bf16.gmra.mrb[72].mxu0 %vm20895_vm15, %v14783_v10  ;;  %vm20897_vm1 = vcmp.lt.s32.totalorder %v15063_v21, 1 }
 0x12d   : > { %v1706_v12 = vsel %vm20894_vm9, %v1673_v38, %v20893_v16  ;;  %vm20896_vm13 = vmmov %vm20895_vm15  ;;  %v1352_v14 = vsel %vm20897_vm1, %v1345_v40, %v1346_v9  ;;  %v1677_v38 = vsel %vm20894_vm9, %v1670_v25, %v1671_v60  ;;  %v20901_v53 = vrot.slane %v15069_v29, 7 }
 0x12e   : > { %12870 = vmatmul.mubr.msk.bf16.gmra.mrb[136].mxu1 %vm20896_vm13, %v15438_v7  ;;  %v1802_v48 = vsel %vm15440_vm4, %v1706_v12, 0.0  ;;  %vm20898_vm11 = vmmov %vm20894_vm9  ;;  %v15480_v10 = vadd.f32 %v1677_v38, %v1474_v32  ;;  %v15488_v31 = vadd.f32 %v1798_v8, %v1354_v33  ;;  %v15508_v38 = vld [vmem:[#allocation2 + $0xc0] sm:$0xff] }
 0x12f   : > { %v1676_v30 = vsel %vm20898_vm11, %v1671_v60, %v1672_v17  ;;  %vm20899_vm7 = vmmov %vm20896_vm13  ;;  %v1381_v40 = vsel %vm20897_vm1, %v1348_v4, %v20901_v53  ;;  %v12693_v17 = vpop.f32.mrb[32].mxu1  ;;  %v14555_v53 = vld [vmem:[#allocation2 + $0x58] sm:$0xff] }
 0x130   : > { %12839 = vmatprep.mubr.msk.bf16.mxu0 %vm20899_vm7, %v14785_v11  ;;  %vm20900_vm15 = vmmov %vm20899_vm7  ;;  %v15482_v27 = vadd.f32 %v1676_v30, %v1352_v14  ;;  %v1446_v60 = vsel %vm15444_vm3, %v1381_v40, 0.0  ;;  %v2431_v25 = vrot.slane %v12693_v17, 7  ;;  %v15496_v18 = vpop.f32.mrb[33].mxu1  ;;  %v15506_v14 = vld [vmem:[#allocation2 + $0xb8] sm:$0xff] }
 0x131   : > { %12873 = vmatprep.mubr.msk.bf16.mxu1 %vm20900_vm15, %v15448_v3  ;;  %vm20902_vm7 = vmmov %vm20897_vm1  ;;  %v15499_v29 = vadd.f32 %v15093_v49, %v1446_v60  ;;  %v20691_v8 = vrot.slane %v15496_v18, 7  ;;  %v12694_v12 = vpop.f32.mrb[34].mxu1 }
 0x132   : > { %v1351_v11 = vsel %vm20902_vm7, %v1346_v9, %v1347_v28  ;;  %vm20903_vm13 = vmmov %vm20897_vm1  ;;  %v2432_v30 = vrot.slane %v12694_v12, 7  ;;  %v2107_v9 = vpop.f32.mrb[35].mxu1 }
 0x133   : > { %v1350_v32 = vsel %vm20903_vm13, %v1347_v28, %v1348_v4  ;;  %v15501_v16 = vadd.f32 %v1675_v54, %v1351_v11  ;;  %v2430_v28 = vrot.slane %v2107_v9, 7  ;;  %vm20904_vm11 = vmmov %vm20897_vm1 }
 0x134   : > { %v15503_v33 = vadd.f32 %v1802_v48, %v1350_v32  ;;  %v2489_v4 = vsel %vm20904_vm11, %v2431_v25, %v2432_v30  ;;  %vm20905_vm9 = vmmov %vm20900_vm15  ;;  %v14556_v48 = vld [vmem:[#allocation2 + $0x60] sm:$0xff]  ;;  %v12697_v11 = vpop.f32.mrb[36].mxu1 }
 0x135   : > { %12840 = vmatmul.mubr.msk.bf16.gmra.mrb[76].mxu0 %vm20905_vm9, %v14555_v53  ;;  %vm20906_vm15 = vmmov %vm20905_vm9  ;;  %v2490_v49 = vsel %vm20897_vm1, %v2430_v28, %v2431_v25  ;;  %v15525_v40 = vadd.f32 %v15153_v44, %v2489_v4  ;;  %v2435_v32 = vrot.slane %v12697_v11, 7  ;;  %v2120_v25 = vpop.f32.mrb[37].mxu1 }
 0x136   : > { %12874 = vmatmul.mubr.msk.bf16.gmra.mrb[140].mxu1 %vm20906_vm15, %v15506_v14  ;;  %vm20907_vm7 = vmmov %vm20897_vm1  ;;  %v15528_v17 = vadd.f32 %v15109_v55, %v2490_v49  ;;  %v2433_v12 = vrot.slane %v2120_v25, 7  ;;  %v12698_v9 = vpop.f32.mrb[38].mxu1 }
 0x137   : > { %v2491_v54 = vsel %vm20907_vm7, %v20691_v8, %v2430_v28  ;;  %vm20908_vm13 = vmmov %vm20905_vm9  ;;  %v15533_v28 = vld [vmem:[#allocation2 + $0xc8] sm:$0xff]  ;;  %v2436_v53 = vrot.slane %v12698_v9, 7  ;;  %v15535_v8 = vld [vmem:[#allocation2 + $0xd0] sm:$0xff] }
 0x138   : > { %12843 = vmatprep.mubr.msk.bf16.mxu0 %vm20908_vm13, %v14556_v48  ;;  %vm20909_vm4 = vmmov %vm20905_vm9  ;;  %v15531_v60 = vadd.f32 %v15099_v51, %v2491_v54  ;;  %v2123_v48 = vpop.f32.mrb[39].mxu1  ;;  %v14557_v51 = vld [vmem:[#allocation2 + $0x68] sm:$0xff] }
 0x139   : > { %12877 = vmatprep.mubr.msk.bf16.mxu1 %vm20909_vm4, %v15508_v38  ;;  %vm20910_vm4 = vmmov %vm20897_vm1  ;;  %v2434_v4 = vrot.slane %v2123_v48, 7 }
 0x13a   : > { %v2488_v44 = vsel %vm20910_vm4, %v2432_v30, %v2433_v12  ;;  %vm20911_vm11 = vmmov %vm20897_vm1  ;;  %v14558_v30 = vld [vmem:[#allocation2 + $0x70] sm:$0xff] }
 0x13b   : > { %v2485_v55 = vsel %vm20911_vm11, %v2435_v32, %v2436_v53  ;;  %vm20912_vm15 = vmmov %vm20905_vm9  ;;  %v2497_v49 = vsel %vm15115_vm6, %v2488_v44, 0.0  ;;  %v2486_v54 = vsel %vm20897_vm1, %v2434_v4, %v2435_v32 }
 0x13c   : > { %vm20913_vm7 = vmmov %vm20897_vm1  ;;  %v15554_v25 = vadd.f32 %v15149_v42, %v2497_v49  ;;  %v15557_v9 = vadd.f32 %v15157_v50, %v2486_v54  ;;  %v15560_v48 = vadd.f32 %v15202_v39, %v2485_v55  ;;  %v12701_v44 = vpop.f32.mrb[40].mxu1  ;;  %v15567_v42 = vld [vmem:[#allocation2 + $0xe0] sm:$0xff] }
 0x13d   : > { %12844 = vmatmul.mubr.msk.bf16.gmra.mrb[80].mxu0 %vm20905_vm9, %v14557_v51  ;;  %v2487_v11 = vsel %vm20913_vm7, %v2433_v12, %v2434_v4  ;;  %vm20914_vm13 = vmmov %vm20905_vm9  ;;  %v2439_v12 = vrot.slane %v12701_v44, 7  ;;  %v2136_v4 = vpop.f32.mrb[41].mxu1 }
 0x13e   : > { %12878 = vmatmul.mubr.msk.bf16.gmra.mrb[144].mxu1 %vm20912_vm15, %v15533_v28  ;;  %12847 = vmatprep.mubr.msk.bf16.mxu0 %vm20914_vm13, %v14558_v30  ;;  %vm20915_vm4 = vmmov %vm20905_vm9  ;;  %v15563_v32 = vadd.f32 %v15151_v43, %v2487_v11  ;;  %v2437_v51 = vrot.slane %v2136_v4, 7  ;;  %v12702_v30 = vpop.f32.mrb[42].mxu1  ;;  %v14559_v43 = vld [vmem:[#allocation2 + $0x78] sm:$0xff] }
 0x13f   : > { %12881 = vmatprep.mubr.msk.bf16.mxu1 %vm20915_vm4, %v15535_v8  ;;  %v2440_v57 = vrot.slane %v12702_v30, 7  ;;  %v2139_v35 = vpop.f32.mrb[43].mxu1  ;;  %vm20916_vm11 = vmmov %vm20897_vm1 }
 0x140   : > { %v2484_v50 = vsel %vm20916_vm11, %v2436_v53, %v2437_v51  ;;  %v2438_v49 = vrot.slane %v2139_v35, 7  ;;  %vm20917_vm9 = vmmov %vm20897_vm1  ;;  %v14560_v53 = vld [vmem:[#allocation2 + $0x80] sm:$0xff] }
 0x141   : > { %v2481_v39 = vsel %vm20917_vm9, %v2439_v12, %v2440_v57  ;;  %vm20918_vm15 = vmmov %vm20915_vm4  ;;  %v2501_v55 = vsel %vm15163_vm8, %v2484_v50, 0.0 }
 0x142   : > { %vm20919_vm1 = vmmov %vm20915_vm4  ;;  %v2482_v54 = vsel %vm20913_vm7, %v2438_v49, %v2439_v12  ;;  %v15586_v35 = vadd.f32 %v15198_v36, %v2501_v55  ;;  %v15592_v4 = vadd.f32 %v15251_v15, %v2481_v39 }
 0x143   : > { %vm20920_vm13 = vmmov %vm20913_vm7  ;;  %v15589_v44 = vadd.f32 %v15206_v47, %v2482_v54  ;;  %v238_v47 = vld [vmem:[%s14671_s29 + $0x1e0] sm:$0xff]  ;;  %v239_v54 = vld [vmem:[%s14671_s29 + $0x1e8] sm:$0xff] }
 0x144   : > { %v2483_v11 = vsel %vm20920_vm13, %v2437_v51, %v2438_v49  ;;  %vm20921_vm4 = vmmov %vm20919_vm1  ;;  %20923 = vst [vmem:[#allocation25_spill] sm:$0xff] %v15586_v35  ;;  %v12705_v51 = vpop.f32.mrb[44].mxu1  ;;  %v15599_v35 = vld [vmem:[#allocation2 + $0xf0] sm:$0xff] }
 0x145   : > { %12848 = vmatmul.mubr.msk.bf16.gmra.mrb[84].mxu0 %vm20918_vm15, %v14559_v43  ;;  %vm20922_vm11 = vmmov %vm20919_vm1  ;;  %20924 = vst [vmem:[#allocation26_spill] sm:$0xff] %v15592_v4  ;;  %v15595_v12 = vadd.f32 %v15200_v37, %v2483_v11  ;;  %v2443_v30 = vrot.slane %v12705_v51, 7  ;;  %v2152_v50 = vpop.f32.mrb[45].mxu1  ;;  %v336_v37 = vpack.c.bf16 %v239_v54, %v238_v47  ;;  %v240_v11 = vld [vmem:[%s14671_s29 + $0x1f0] sm:$0xff]  ;;  %v241_v4 = vld [vmem:[%s14671_s29 + $0x1f8] sm:$0xff] }
 0x146   : > { %12882 = vmatmul.mubr.msk.bf16.gmra.mrb[148].mxu1 %vm20919_vm1, %v15565_v13  ;;  %12851 = vmatprep.mubr.msk.bf16.mxu0 %vm20921_vm4, %v14560_v53  ;;  %v2441_v49 = vrot.slane %v2152_v50, 7  ;;  %v12706_v43 = vpop.f32.mrb[46].mxu1  ;;  %20927 = vst [vmem:[#allocation29_spill] sm:$0xff] %v15599_v35  ;;  %vm20928_vm9 = vmmov %vm20913_vm7  ;;  %v14561_v50 = vld [vmem:[#allocation2 + $0x88] sm:$0xff] }
 0x147   : > { %12885 = vmatprep.mubr.msk.bf16.mxu1 %vm20922_vm11, %v15567_v42  ;;  %20925 = vst [vmem:[#allocation27_spill] sm:$0xff] %v15595_v12  ;;  %v2444_v36 = vrot.slane %v12706_v43, 7  ;;  %v2155_v55 = vpop.f32.mrb[47].mxu1  ;;  %vm20929_vm15 = vmmov %vm20913_vm7  ;;  %v337_v12 = vpack.c.bf16 %v241_v4, %v240_v11 }
 0x148   : > { %v2480_v15 = vsel %vm20928_vm9, %v2440_v57, %v2441_v49  ;;  %v2442_v39 = vrot.slane %v2155_v55, 7  ;;  %vm20930_vm7 = vmmov %vm20919_vm1 }
 0x149   : > { %v2477_v51 = vsel %vm20929_vm15, %v2443_v30, %v2444_v36  ;;  %v2505_v43 = vsel %vm15212_vm10, %v2480_v15, 0.0  ;;  %vm20931_vm13 = vmmov %vm20928_vm9  ;;  %402 = vst.msk [vmem:[#allocation2 + $0x108] sm:$0xff] %vm20919_vm1, %v337_v12 }
 0x14a   : > { %v2478_v57 = vsel %vm20931_vm13, %v2442_v39, %v2443_v30  ;;  %vm20932_vm4 = vmmov %vm20928_vm9  ;;  %v15623_v47 = vadd.f32 %v15247_v45, %v2505_v43  ;;  %v15630_v4 = vadd.f32 %v15307_v19, %v2477_v51  ;;  %v15636_v45 = vld [vmem:[#allocation2 + $0xf8] sm:$0xff] }
 0x14b   : > { %v2479_v55 = vsel %vm20932_vm4, %v2441_v49, %v2442_v39  ;;  %vm20933_vm11 = vmmov %vm20919_vm1  ;;  %v15627_v54 = vadd.f32 %v15259_v62, %v2478_v57 }
 0x14c   : > { %vm20934_vm9 = vmmov %vm20919_vm1  ;;  %v15633_v30 = vadd.f32 %v15249_v52, %v2479_v55  ;;  %v12709_v49 = vpop.f32.mrb[48].mxu1 }
 0x14d   : > { %12852 = vmatmul.mubr.msk.bf16.gmra.mrb[88].mxu0 %vm20919_vm1, %v14561_v50  ;;  %vm20935_vm15 = vmmov %vm20919_vm1  ;;  %v2447_v15 = vrot.slane %v12709_v49, 7  ;;  %v2168_v39 = vpop.f32.mrb[49].mxu1  ;;  %v20943_v49 = vld [vmem:[#allocation12_spill] sm:$0xff] }
 0x14e   : > { %12886 = vmatmul.mubr.msk.bf16.gmra.mrb[152].mxu1 %vm20930_vm7, %v15597_v56  ;;  %12855 = vmatprep.mubr.msk.bf16.mxu0 %vm20933_vm11, %v15217_v1  ;;  %401 = vst.msk [vmem:[#allocation2 + $0x100] sm:$0xff] %vm20935_vm15, %v336_v37  ;;  %v2445_v11 = vrot.slane %v2168_v39, 7  ;;  %v12710_v46 = vpop.f32.mrb[50].mxu1  ;;  %vm20936_vm7 = vmmov %vm20932_vm4 }
 0x14f   : > { %12889 = vmatprep.mubr.msk.bf16.mxu1 %vm20934_vm9, %v15599_v35  ;;  %v2448_v43 = vrot.slane %v12710_v46, 7  ;;  %v2171_v37 = vpop.f32.mrb[51].mxu1  ;;  %vm20937_vm13 = vmmov %vm20932_vm4 }
 0x150   : > { %v2476_v62 = vsel %vm20936_vm7, %v2444_v36, %v2445_v11  ;;  %v2446_v57 = vrot.slane %v2171_v37, 7  ;;  %vm20938_vm4 = vmmov %vm20919_vm1 }
 0x151   : > { %v2473_v19 = vsel %vm20937_vm13, %v2447_v15, %v2448_v43  ;;  %vm20939_vm11 = vmmov %vm20919_vm1  ;;  %v2509_v52 = vsel %vm15261_vm12, %v2476_v62, 0.0 }
 0x152   : > { %vm20940_vm9 = vmmov %vm20936_vm7  ;;  %v15655_v36 = vadd.f32 %v15303_v58, %v2509_v52  ;;  %v15661_v55 = vadd.f32 %v15376_v24, %v2473_v19  ;;  %v11579_v58 = vld [vmem:[%s20657_s1 + $0xe] sm:$0x3] }
 0x153   : > { %v2474_v46 = vsel %vm20940_vm9, %v2446_v57, %v2447_v15  ;;  %vm20941_vm15 = vmmov %vm20936_vm7 }
 0x154   : > { %v2475_v12 = vsel %vm20941_vm15, %v2445_v11, %v2446_v57  ;;  %vm20942_vm7 = vmmov %vm20919_vm1  ;;  %v15658_v51 = vadd.f32 %v15317_v26, %v2474_v46  ;;  %v12713_v15 = vpop.f32.mrb[52].mxu1  ;;  %v11562_v11 = vld [vmem:[%s20657_s1 + $0xa] sm:$0x3] }
 0x155   : > { %12856 = vmatmul.mubr.msk.bf16.gmra.mrb[92].mxu0 %vm20938_vm4, %v15265_v20  ;;  %v15664_v39 = vadd.f32 %v20943_v49, %v2475_v12  ;;  %v2451_v37 = vrot.slane %v12713_v15, 7  ;;  %v2184_v62 = vpop.f32.mrb[53].mxu1  ;;  %vm20944_vm13 = vmmov %vm20940_vm9  ;;  %v15675_v46 = vand.u32 %v11562_v11, %v14644_v5  ;;  %v15678_v12 = vand.u32 %v11579_v58, %v14644_v5  ;;  %v20950_v11 = vld [vmem:[#allocation14_spill] sm:$0xff] }
 0x156   : > { %12890 = vmatmul.mubr.msk.bf16.gmra.mrb[156].mxu1 %vm20939_vm11, %v15636_v45  ;;  %12895 = vmatprep.mubr.msk.bf16.mxu0 %vm20919_vm1, %v14560_v53  ;;  %v12714_v26 = vpop.f32.mrb[54].mxu1  ;;  %vm20945_vm4 = vmmov %vm20940_vm9 }
 0x157   : > { %12929 = vmatprep.mubr.msk.bf16.mxu1 %vm20942_vm7, %v14560_v53  ;;  %v2449_v53 = vrot.slane %v2184_v62, 7  ;;  %v2452_v57 = vrot.slane %v12714_v26, 7  ;;  %v2187_v52 = vpop.f32.mrb[55].mxu1  ;;  %vm20946_vm11 = vmmov %vm20919_vm1 }
 0x158   : > { %v2450_v19 = vrot.slane %v2187_v52, 7  ;;  %vm20947_vm9 = vmmov %vm20919_vm1 }
 0x159   : > { %v2472_v24 = vsel %vm20944_vm13, %v2448_v43, %v2449_v53  ;;  %v2469_v49 = vsel %vm20945_vm4, %v2451_v37, %v2452_v57  ;;  %vm20948_vm15 = vmmov %vm20945_vm4 }
 0x15a   : > { %v2513_v15 = vsel %vm15319_vm14, %v2472_v24, 0.0  ;;  %v2470_v43 = vsel %vm20948_vm15, %v2450_v19, %v2451_v37  ;;  %vm20949_vm1 = vmmov %vm20945_vm4  ;;  %v15703_v37 = vadd.f32 %v15424_v22, %v2469_v49 }
 0x15b   : > { %v2471_v62 = vsel %vm20949_vm1, %v2449_v53, %v2450_v19  ;;  %v15693_v58 = vadd.f32 %v20950_v11, %v2513_v15  ;;  %vm20951_vm13 = vmmov %vm20942_vm7  ;;  %v20953_v53 = vld [vmem:[#allocation15_spill] sm:$0xff] }
 0x15c   : > { %20952 = vst [vmem:[#allocation12_spill] sm:$0xff] %v15703_v37  ;;  %v15706_v26 = vadd.f32 %v20953_v53, %v2471_v62  ;;  %vm20955_vm4 = vmmov %vm20949_vm1 }
 0x15d   : > { %12896 = vmatmul.mubr.msk.bf16.vlgmr.msra.gmra.mrb[96].mxu0 %vm20946_vm11, %v14561_v50  ;;  %vm20956_vm11 = vmmov %vm20949_vm1 }
 0x15e   : > { %12930 = vmatmul.mubr.msk.bf16.vlgmr.msra.gmra.mrb[160].mxu1 %vm20947_vm9, %v14561_v50  ;;  %12996 = vmatpush3.bf16.msra.mxu0 %v15332_v59  ;;  %v15700_v50 = vadd.f32 %v15387_v61, %v2470_v43  ;;  %20954 = vst [vmem:[#allocation14_spill] sm:$0xff] %v15706_v26  ;;  %v12717_v59 = vpop.f32.mrb[56].mxu1  ;;  %vm20957_vm9 = vmmov %vm20942_vm7 }
 0x15f   : > { %12962 = vmatpush3.bf16.msra.mxu1 %v15335_v63  ;;  %12899 = vmatprep.mubr.msk.bf16.mxu0 %vm20942_vm7, %v15217_v1  ;;  %v2455_v63 = vrot.slane %v12717_v59, 7  ;;  %v2200_v52 = vpop.f32.mrb[57].mxu1  ;;  %vm20958_vm15 = vmmov %vm20942_vm7 }
 0x160   : > { %12933 = vmatprep.mubr.msk.bf16.mxu1 %vm20951_vm13, %v15217_v1  ;;  %13029 = vmatprep.subr.bf16.mxu0 %v15675_v46  ;;  %v2453_v24 = vrot.slane %v2200_v52, 7  ;;  %v12718_v19 = vpop.f32.mrb[58].mxu1  ;;  %vm20959_vm7 = vmmov %vm20949_vm1  ;;  %v20963_v52 = vld [vmem:[#allocation20_spill] sm:$0xff] }
 0x161   : > { %13063 = vmatprep.subr.bf16.mxu1 %v15678_v12  ;;  %v2456_v15 = vrot.slane %v12718_v19, 7  ;;  %v2203_v11 = vpop.f32.mrb[59].mxu1  ;;  %vm20960_vm13 = vmmov %vm20957_vm9 }
 0x162   : > { %v2468_v61 = vsel %vm20955_vm4, %v2452_v57, %v2453_v24  ;;  %v2454_v43 = vrot.slane %v2203_v11, 7  ;;  %vm20961_vm4 = vmmov %vm20957_vm9  ;;  %v20962_v57 = vld [vmem:[#allocation18_spill] sm:$0xff] }
 0x163   : > { %v2465_v22 = vsel %vm20956_vm11, %v2455_v63, %v2456_v15  ;;  %v2517_v49 = vsel %vm15382_vm0, %v2468_v61, 0.0  ;;  %v20964_v61 = vld [vmem:[#allocation19_spill] sm:$0xff]  ;;  %vm20965_vm11 = vmmov %vm20949_vm1 }
 0x164   : > { %v2466_v62 = vsel %vm20949_vm1, %v2454_v43, %v2455_v63  ;;  %v2467_v53 = vsel %vm20959_vm7, %v2453_v24, %v2454_v43  ;;  %v15729_v59 = vadd.f32 %v20962_v57, %v2517_v49  ;;  %v15735_v11 = vadd.f32 %v15488_v31, %v2465_v22  ;;  %v12721_v34 = vpop.f32.mrb[60].mxu1 }
 0x165   : > { %12900 = vmatmul.mubr.msk.bf16.gmra.mrb[100].mxu0 %vm20957_vm9, %v15265_v20  ;;  %v15732_v19 = vadd.f32 %v20963_v52, %v2466_v62  ;;  %v15738_v63 = vadd.f32 %v20964_v61, %v2467_v53  ;;  %v2459_v24 = vrot.slane %v12721_v34, 7  ;;  %v2216_v43 = vpop.f32.mrb[61].mxu1  ;;  %vm20966_vm9 = vmmov %vm20949_vm1  ;;  %v20967_v31 = vrot.slane %v15496_v18, 7 }
 0x166   : > { %12934 = vmatmul.mubr.msk.bf16.gmra.mrb[164].mxu1 %vm20958_vm15, %v15265_v20  ;;  %12903 = vmatprep.mubr.msk.bf16.mxu0 %vm20960_vm13, %v15391_v6  ;;  %v2457_v0 = vrot.slane %v2216_v43, 7  ;;  %v12722_v23 = vpop.f32.mrb[62].mxu1  ;;  %vm20968_vm15 = vmmov %vm20949_vm1 }
 0x167   : > { %12937 = vmatprep.mubr.msk.bf16.mxu1 %vm20961_vm4, %v15391_v6  ;;  %v2460_v37 = vrot.slane %v12722_v23, 7  ;;  %v2219_v26 = vpop.f32.mrb[63].mxu1  ;;  %vm20969_vm1 = vmmov %vm20961_vm4 }
 0x168   : > { %v2464_v49 = vsel %vm20965_vm11, %v2456_v15, %v2457_v0  ;;  %v2458_v57 = vrot.slane %v2219_v26, 7  ;;  %vm20970_vm7 = vmmov %vm20969_vm1 }
 0x169   : > { %v2461_v62 = vsel %vm20966_vm9, %v2459_v24, %v2460_v37  ;;  %v2492_v22 = vsel %vm20968_vm15, %v2460_v37, %v20967_v31  ;;  %v2521_v23 = vsel %vm15434_vm2, %v2464_v49, 0.0  ;;  %vm20971_vm13 = vmmov %vm20966_vm9 }
 0x16a   : > { %v2462_v34 = vsel %vm20971_vm13, %v2458_v57, %v2459_v24  ;;  %vm20972_vm4 = vmmov %vm20966_vm9  ;;  %v2493_v18 = vsel %vm15444_vm3, %v2492_v22, 0.0  ;;  %v15765_v37 = vadd.f32 %v15480_v10, %v2521_v23  ;;  %v15772_v52 = vadd.f32 %v15503_v33, %v2461_v62 }
 0x16b   : > { %v2463_v26 = vsel %vm20972_vm4, %v2457_v0, %v2458_v57  ;;  %vm20973_vm11 = vmmov %vm20969_vm1  ;;  %v13782_v15 = vadd.f32 %v15499_v29, %v2493_v18  ;;  %v15769_v53 = vadd.f32 %v15501_v16, %v2462_v34 }
 0x16c   : > { %vm20974_vm9 = vmmov %vm20969_vm1  ;;  %v15775_v0 = vadd.f32 %v15482_v27, %v2463_v26  ;;  %v12727_v61 = vpop.f32.mrb[64].mxu1 }
 0x16d   : > { %12904 = vmatmul.mubr.msk.bf16.gmra.mrb[104].mxu0 %vm20969_vm1, %v15438_v7  ;;  %v2559_v24 = vrot.slane %v12727_v61, 1  ;;  %v15777_v43 = vpop.f32.mrb[65].mxu1  ;;  %vm20975_vm15 = vmmov %vm20969_vm1 }
 0x16e   : > { %12938 = vmatmul.mubr.msk.bf16.gmra.mrb[168].mxu1 %vm20970_vm7, %v15438_v7  ;;  %12907 = vmatprep.mubr.msk.bf16.mxu0 %vm20973_vm11, %v15448_v3  ;;  %v20710_v49 = vrot.slane %v15777_v43, 1  ;;  %v12728_v57 = vpop.f32.mrb[66].mxu1  ;;  %vm20976_vm7 = vcmp.lt.s32.totalorder %v15063_v21, 7  ;;  %vm20977_vm13 = vmmov %vm20969_vm1 }
 0x16f   : > { %12941 = vmatprep.mubr.msk.bf16.mxu1 %vm20974_vm9, %v15448_v3  ;;  %v2560_v10 = vrot.slane %v12728_v57, 1  ;;  %v2273_v31 = vpop.f32.mrb[67].mxu1  ;;  %vm20978_vm4 = vmmov %vm20969_vm1 }
 0x170   : > { %v2558_v22 = vrot.slane %v2273_v31, 1  ;;  %vm20979_vm11 = vmmov %vm20976_vm7 }
 0x171   : > { %v2617_v27 = vsel %vm20976_vm7, %v2559_v24, %v2560_v10  ;;  %vm20980_vm9 = vmmov %vm20976_vm7 }
 0x172   : > { %v15791_v29 = vadd.f32 %v15528_v17, %v2617_v27  ;;  %v2619_v16 = vsel %vm20979_vm11, %v20710_v49, %v2558_v22  ;;  %v2618_v33 = vsel %vm20980_vm9, %v2558_v22, %v2559_v24  ;;  %vm20986_vm11 = vmmov %vm20969_vm1 }
 0x173   : > { %v15799_v62 = vadd.f32 %v13782_v15, %v2619_v16  ;;  %v15802_v23 = vadd.f32 %v15531_v60, %v2618_v33 }
 0x174   : > { %v12731_v34 = vpop.f32.mrb[68].mxu1 }
 0x175   : > { %12908 = vmatmul.mubr.msk.bf16.gmra.mrb[108].mxu0 %vm20975_vm15, %v15506_v14  ;;  %v2563_v26 = vrot.slane %v12731_v34, 1  ;;  %v2286_v18 = vpop.f32.mrb[69].mxu1  ;;  %vm20981_vm15 = vmmov %vm20976_vm7 }
 0x176   : > { %12942 = vmatmul.mubr.msk.bf16.gmra.mrb[172].mxu1 %vm20969_vm1, %v15506_v14  ;;  %12911 = vmatprep.mubr.msk.bf16.mxu0 %vm20977_vm13, %v15508_v38  ;;  %v2561_v61 = vrot.slane %v2286_v18, 1  ;;  %v12732_v57 = vpop.f32.mrb[70].mxu1  ;;  %vm20982_vm7 = vmmov %vm20969_vm1 }
 0x177   : > { %12945 = vmatprep.mubr.msk.bf16.mxu1 %vm20978_vm4, %v15508_v38  ;;  %v2564_v17 = vrot.slane %v12732_v57, 1  ;;  %v2289_v31 = vpop.f32.mrb[71].mxu1  ;;  %vm20984_vm13 = vmmov %vm20980_vm9 }
 0x178   : > { %v2562_v27 = vrot.slane %v2289_v31, 1  ;;  %v2616_v41 = vsel %vm20981_vm15, %v2560_v10, %v2561_v61  ;;  %vm20985_vm4 = vmmov %vm20969_vm1 }
 0x179   : > { %v2624_v60 = vsel %vm15111_vm5, %v2616_v41, 0.0  ;;  %v2613_v24 = vsel %vm20984_vm13, %v2563_v26, %v2564_v17  ;;  %vm20987_vm15 = vmmov %vm20980_vm9 }
 0x17a   : > { %v15819_v10 = vadd.f32 %v15525_v40, %v2624_v60  ;;  %v15822_v22 = vadd.f32 %v15557_v9, %v2613_v24  ;;  %v2615_v16 = vsel %vm20980_vm9, %v2561_v61, %v2562_v27  ;;  %v2614_v33 = vsel %vm20987_vm15, %v2562_v27, %v2563_v26  ;;  %vm20990_vm13 = vmmov %vm20985_vm4 }
 0x17b   : > { %v15827_v41 = vadd.f32 %v15554_v25, %v2615_v16  ;;  %v15832_v18 = vadd.f32 %v15563_v32, %v2614_v33  ;;  %v20991_v25 = vld [vmem:[#allocation5_spill] sm:$0xff] }
 0x17c   : > { %v12735_v34 = vpop.f32.mrb[72].mxu1  ;;  %v20996_v33 = vld [vmem:[#allocation25_spill] sm:$0xff] }
 0x17d   : > { %12912 = vmatmul.mubr.msk.bf16.gmra.mrb[112].mxu0 %vm20969_vm1, %v15533_v28  ;;  %v2567_v57 = vrot.slane %v12735_v34, 1  ;;  %v2302_v31 = vpop.f32.mrb[73].mxu1  ;;  %vm20988_vm1 = vmmov %vm20980_vm9 }
 0x17e   : > { %12946 = vmatmul.mubr.msk.bf16.gmra.mrb[176].mxu1 %vm20982_vm7, %v15533_v28  ;;  %12915 = vmatprep.mubr.msk.bf16.mxu0 %vm20985_vm4, %v15535_v8  ;;  %v2565_v40 = vrot.slane %v2302_v31, 1  ;;  %v12736_v60 = vpop.f32.mrb[74].mxu1  ;;  %vm20989_vm7 = vmmov %vm20985_vm4  ;;  %vm20992_vm4 = vnez %v20991_v25 }
 0x17f   : > { %12949 = vmatprep.mubr.msk.bf16.mxu1 %vm20986_vm11, %v15535_v8  ;;  %v2568_v49 = vrot.slane %v12736_v60, 1  ;;  %v2305_v9 = vpop.f32.mrb[75].mxu1  ;;  %vm20993_vm11 = vmmov %vm20988_vm1 }
 0x180   : > { %v2566_v24 = vrot.slane %v2305_v9, 1  ;;  %v2612_v61 = vsel %vm20988_vm1, %v2564_v17, %v2565_v40  ;;  %vm20994_vm9 = vmmov %vm20989_vm7  ;;  %v20998_v9 = vld [vmem:[#allocation27_spill] sm:$0xff] }
 0x181   : > { %v2628_v32 = vsel %vm20992_vm4, %v2612_v61, 0.0  ;;  %v2609_v26 = vsel %vm20993_vm11, %v2567_v57, %v2568_v49  ;;  %vm20995_vm15 = vmmov %vm20989_vm7 }
 0x182   : > { %v15849_v17 = vadd.f32 %v15560_v48, %v2628_v32  ;;  %v15852_v27 = vadd.f32 %v15589_v44, %v2609_v26  ;;  %v2611_v16 = vsel %vm20988_vm1, %v2565_v40, %v2566_v24  ;;  %vm21000_vm11 = vmmov %vm20994_vm9 }
 0x183   : > { %v15857_v34 = vadd.f32 %v20996_v33, %v2611_v16  ;;  %v242_v16 = vld [vmem:[%s14671_s29 + $0x200] sm:$0xff]  ;;  %v243_v33 = vld [vmem:[%s14671_s29 + $0x208] sm:$0xff] }
 0x184   : > { %v12739_v60 = vpop.f32.mrb[76].mxu1 }
 0x185   : > { %12916 = vmatmul.mubr.msk.bf16.gmra.mrb[116].mxu0 %vm20989_vm7, %v15565_v13  ;;  %vm20997_vm7 = vmmov %vm20988_vm1  ;;  %v2571_v48 = vrot.slane %v12739_v60, 1  ;;  %v2318_v32 = vpop.f32.mrb[77].mxu1  ;;  %v338_v60 = vpack.c.bf16 %v243_v33, %v242_v16 }
 0x186   : > { %12950 = vmatmul.mubr.msk.bf16.gmra.mrb[180].mxu1 %vm20990_vm13, %v15565_v13  ;;  %12919 = vmatprep.mubr.msk.bf16.mxu0 %vm20994_vm9, %v15567_v42  ;;  %v2610_v31 = vsel %vm20997_vm7, %v2566_v24, %v2567_v57  ;;  %v2569_v25 = vrot.slane %v2318_v32, 1  ;;  %v12740_v44 = vpop.f32.mrb[78].mxu1  ;;  %vm20999_vm13 = vmmov %vm20988_vm1  ;;  %v21001_v57 = vld [vmem:[#allocation7_spill] sm:$0xff] }
 0x187   : > { %12953 = vmatprep.mubr.msk.bf16.mxu1 %vm20995_vm15, %v15567_v42  ;;  %v15862_v61 = vadd.f32 %v20998_v9, %v2610_v31  ;;  %v2572_v26 = vrot.slane %v12740_v44, 1  ;;  %v2321_v15 = vpop.f32.mrb[79].mxu1  ;;  %vm21002_vm15 = vnez %v21001_v57  ;;  %v244_v9 = vld [vmem:[%s14671_s29 + $0x210] sm:$0xff]  ;;  %vm21003_vm7 = vmmov %vm20994_vm9 }
 0x188   : > { %v2570_v2 = vrot.slane %v2321_v15, 1  ;;  %v2608_v40 = vsel %vm20999_vm13, %v2568_v49, %v2569_v25  ;;  %v245_v15 = vld [vmem:[%s14671_s29 + $0x218] sm:$0xff]  ;;  %vm21004_vm13 = vmmov %vm21003_vm7 }
 0x189   : > { %v2632_v24 = vsel %vm21002_vm15, %v2608_v40, 0.0  ;;  %v2605_v31 = vsel %vm20988_vm1, %v2571_v48, %v2572_v26  ;;  %v21005_v49 = vld [vmem:[#allocation26_spill] sm:$0xff]  ;;  %v339_v33 = vpack.c.bf16 %v245_v15, %v244_v9 }
 0x18a   : > { %v15883_v32 = vadd.f32 %v21005_v49, %v2632_v24  ;;  %v15886_v44 = vadd.f32 %v15627_v54, %v2605_v31 }
 0x18c   : > { %21006 = vst [vmem:[#allocation15_spill] sm:$0xff] %v15886_v44 }
 0x18d   : > { %12920 = vmatmul.mubr.msk.bf16.gmra.mrb[120].mxu0 %vm21000_vm11, %v15597_v56  ;;  %vm21007_vm11 = vmmov %vm20988_vm1 }
 0x18e   : > { %12954 = vmatmul.mubr.msk.bf16.gmra.mrb[184].mxu1 %vm20994_vm9, %v15597_v56  ;;  %12923 = vmatprep.mubr.msk.bf16.mxu0 %vm21003_vm7, %v15599_v35  ;;  %v2607_v40 = vsel %vm21007_vm11, %v2569_v25, %v2570_v2  ;;  %vm21008_vm9 = vmmov %vm20988_vm1  ;;  %v12743_v56 = vpop.f32.mrb[80].mxu1 }
 0x18f   : > { %12957 = vmatprep.mubr.msk.bf16.mxu1 %vm21004_vm13, %v15599_v35  ;;  %v15891_v57 = vadd.f32 %v15623_v47, %v2607_v40  ;;  %v2606_v16 = vsel %vm21008_vm9, %v2570_v2, %v2571_v48  ;;  %vm21009_vm1 = vmmov %vm21003_vm7  ;;  %v2575_v24 = vrot.slane %v12743_v56, 1  ;;  %v2334_v49 = vpop.f32.mrb[81].mxu1  ;;  %v21014_v2 = vld [vmem:[#allocation9_spill] sm:$0xff] }
 0x190   : > { %403 = vst.msk [vmem:[#allocation2 + $0x110] sm:$0xff] %vm21009_vm1, %v338_v60  ;;  %v15897_v35 = vadd.f32 %v15633_v30, %v2606_v16  ;;  %vm21010_vm7 = vmmov %vm21009_vm1  ;;  %v2573_v54 = vrot.slane %v2334_v49, 1  ;;  %v12744_v31 = vpop.f32.mrb[82].mxu1 }
 0x191   : > { %404 = vst.msk [vmem:[#allocation2 + $0x118] sm:$0xff] %vm21010_vm7, %v339_v33  ;;  %v2576_v25 = vrot.slane %v12744_v31, 1  ;;  %v2337_v44 = vpop.f32.mrb[83].mxu1  ;;  %vm21011_vm13 = vmmov %vm21008_vm9 }
 0x192   : > { %v2574_v47 = vrot.slane %v2337_v44, 1  ;;  %v2604_v40 = vsel %vm21011_vm13, %v2572_v26, %v2573_v54  ;;  %vm21012_vm11 = vmmov %vm21009_vm1 }
 0x193   : > { %vm21013_vm9 = vmmov %vm21009_vm1  ;;  %vm21015_vm1 = vnez %v21014_v2 }
 0x194   : > { %v2636_v56 = vsel %vm21015_vm1, %v2604_v40, 0.0  ;;  %vm21016_vm15 = vmmov %vm21011_vm13  ;;  %v2603_v60 = vsel %vm21011_vm13, %v2573_v54, %v2574_v47  ;;  %v12747_v44 = vpop.f32.mrb[84].mxu1 }
 0x195   : > { %12924 = vmatmul.mubr.msk.bf16.gmra.mrb[124].mxu0 %vm21012_vm11, %v15636_v45  ;;  %v2601_v30 = vsel %vm21016_vm15, %v2575_v24, %v2576_v25  ;;  %vm21017_vm4 = vmmov %vm21010_vm7  ;;  %v15915_v48 = vadd.f32 %v15630_v4, %v2636_v56  ;;  %v15923_v9 = vadd.f32 %v15655_v36, %v2603_v60  ;;  %v2350_v33 = vpop.f32.mrb[85].mxu1  ;;  %v11596_v4 = vld [vmem:[%s20657_s1 + $0xc] sm:$0x3]  ;;  %v21022_v56 = vld [vmem:[#allocation11_spill] sm:$0xff] }
 0x196   : > { %12958 = vmatmul.mubr.msk.bf16.gmra.mrb[188].mxu1 %vm21013_vm9, %v15636_v45  ;;  %12997 = vmatprep.mubr.msk.bf16.mxu0 %vm21017_vm4, %v15217_v1  ;;  %v15918_v26 = vadd.f32 %v15658_v51, %v2601_v30  ;;  %vm21018_vm15 = vmmov %vm21011_vm13  ;;  %v11613_v51 = vld [vmem:[%s20657_s1 + $0x10] sm:$0x3]  ;;  %v2577_v49 = vrot.slane %v2350_v33, 1  ;;  %v12748_v36 = vpop.f32.mrb[86].mxu1 }
 0x197   : > { %12963 = vmatprep.mubr.msk.bf16.mxu1 %vm21010_vm7, %v15217_v1  ;;  %v2602_v15 = vsel %vm21018_vm15, %v2574_v47, %v2575_v24  ;;  %v2579_v1 = vrot.slane %v12747_v44, 1  ;;  %v2580_v54 = vrot.slane %v12748_v36, 1  ;;  %v2353_v31 = vpop.f32.mrb[87].mxu1  ;;  %vm21019_vm4 = vmmov %vm21011_vm13  ;;  %v15942_v47 = vand.u32 %v11613_v51, %v14644_v5 }
 0x198   : > { %v15928_v16 = vadd.f32 %v15664_v39, %v2602_v15  ;;  %v2578_v40 = vrot.slane %v2353_v31, 1  ;;  %v2600_v24 = vsel %vm21019_vm4, %v2576_v25, %v2577_v49  ;;  %v15939_v39 = vand.u32 %v11596_v4, %v14644_v5  ;;  %vm21020_vm11 = vmmov %vm21010_vm7 }
 0x199   : > { %vm21021_vm9 = vmmov %vm21010_vm7  ;;  %vm21023_vm7 = vnez %v21022_v56 }
 0x19a   : > { %v2640_v30 = vsel %vm21023_vm7, %v2600_v24, 0.0  ;;  %vm21024_vm13 = vmmov %vm21019_vm4 }
 0x19b   : > { %v2597_v60 = vsel %vm21024_vm13, %v2579_v1, %v2580_v54  ;;  %v15955_v25 = vadd.f32 %v15661_v55, %v2640_v30  ;;  %vm21025_vm15 = vmmov %vm21019_vm4  ;;  %v21036_v30 = vld [vmem:[#allocation12_spill] sm:$0xff] }
 0x19c   : > { %v15958_v15 = vadd.f32 %v15700_v50, %v2597_v60  ;;  %v2599_v44 = vsel %vm21025_vm15, %v2577_v49, %v2578_v40  ;;  %vm21026_vm4 = vmmov %vm21021_vm9  ;;  %v12751_v55 = vpop.f32.mrb[88].mxu1 }
 0x19d   : > { %12998 = vmatmul.mubr.msk.bf16.vlgmr.msra.gmra.mrb[128].mxu0 %vm21021_vm9, %v15265_v20  ;;  %vm21028_vm9 = vmmov %vm21024_vm13  ;;  %v2583_v50 = vrot.slane %v12751_v55, 1  ;;  %v2366_v4 = vpop.f32.mrb[89].mxu1 }
 0x19e   : > { %12964 = vmatmul.mubr.msk.bf16.vlgmr.msra.gmra.mrb[160].mxu1 %vm21020_vm11, %v15265_v20  ;;  %13030 = vmatpush3.bf16.msra.mxu0 %v15675_v46  ;;  %vm21027_vm11 = vmmov %vm21026_vm4  ;;  %v15967_v20 = vadd.f32 %v15693_v58, %v2599_v44  ;;  %v2598_v46 = vsel %vm21028_vm9, %v2578_v40, %v2579_v1  ;;  %v2581_v51 = vrot.slane %v2366_v4, 1  ;;  %v12752_v49 = vpop.f32.mrb[90].mxu1  ;;  %v21032_v1 = vld [vmem:[#allocation16_spill] sm:$0xff] }
 0x19f   : > { %13064 = vmatpush3.bf16.msra.mxu1 %v15678_v12  ;;  %12967 = vmatprep.mubr.msk.bf16.mxu1 %vm21026_vm4, %v15391_v6  ;;  %v21029_v12 = vld [vmem:[#allocation14_spill] sm:$0xff]  ;;  %v2584_v36 = vrot.slane %v12752_v49, 1  ;;  %vm21030_vm13 = vmmov %vm21028_vm9 }
 0x1a0   : > { %13001 = vmatprep.mubr.msk.bf16.mxu0 %vm21027_vm11, %v15391_v6  ;;  %v15972_v33 = vadd.f32 %v21029_v12, %v2598_v46  ;;  %13097 = vmatprep.subr.bf16.mxu0 %v15939_v39  ;;  %v2369_v6 = vpop.f32.mrb[91].mxu1  ;;  %v2596_v58 = vsel %vm21030_vm13, %v2580_v54, %v2581_v51  ;;  %vm21031_vm15 = vmmov %vm21026_vm4  ;;  %vm21033_vm11 = vnez %v21032_v1 }
 0x1a1   : > { %13131 = vmatprep.subr.bf16.mxu1 %v15942_v47  ;;  %v2582_v31 = vrot.slane %v2369_v6, 1  ;;  %v2644_v40 = vsel %vm21033_vm11, %v2596_v58, 0.0  ;;  %v2593_v24 = vsel %vm21028_vm9, %v2583_v50, %v2584_v36  ;;  %vm21034_vm7 = vmmov %vm21026_vm4 }
 0x1a2   : > { %vm21035_vm1 = vmmov %vm21026_vm4  ;;  %v15991_v54 = vadd.f32 %v21036_v30, %v2644_v40  ;;  %v15994_v60 = vadd.f32 %v15732_v19, %v2593_v24 }
 0x1a3   : > { %vm21037_vm13 = vmmov %vm21028_vm9 }
 0x1a4   : > { %v12755_v55 = vpop.f32.mrb[92].mxu1  ;;  %vm21046_vm11 = vmmov %vm21026_vm4 }
 0x1a5   : > { %13002 = vmatmul.mubr.msk.bf16.gmra.mrb[132].mxu0 %vm21026_vm4, %v15438_v7  ;;  %v2382_v4 = vpop.f32.mrb[93].mxu1 }
 0x1a6   : > { %12968 = vmatmul.mubr.msk.bf16.gmra.mrb[164].mxu1 %vm21031_vm15, %v15438_v7  ;;  %13005 = vmatprep.mubr.msk.bf16.mxu0 %vm21035_vm1, %v15448_v3  ;;  %v2595_v7 = vsel %vm21037_vm13, %v2581_v51, %v2582_v31  ;;  %vm21038_vm15 = vmmov %vm21028_vm9  ;;  %v2585_v49 = vrot.slane %v2382_v4, 1  ;;  %v12756_v6 = vpop.f32.mrb[94].mxu1 }
 0x1a7   : > { %12971 = vmatprep.mubr.msk.bf16.mxu1 %vm21034_vm7, %v15448_v3  ;;  %v15999_v44 = vadd.f32 %v15729_v59, %v2595_v7  ;;  %v2594_v46 = vsel %vm21038_vm15, %v2582_v31, %v2583_v50  ;;  %v2587_v3 = vrot.slane %v12755_v55, 1  ;;  %v2588_v58 = vrot.slane %v12756_v6, 1  ;;  %v2385_v19 = vpop.f32.mrb[95].mxu1  ;;  %vm21039_vm1 = vmmov %vm21028_vm9  ;;  %v21041_v59 = vld [vmem:[#allocation21_spill] sm:$0xff]  ;;  %v21049_v7 = vld [vmem:[#allocation23_spill] sm:$0xff] }
 0x1a8   : > { %v16004_v12 = vadd.f32 %v15738_v63, %v2594_v46  ;;  %v2586_v40 = vrot.slane %v2385_v19, 1  ;;  %v2592_v51 = vsel %vm21039_vm1, %v2584_v36, %v2585_v49  ;;  %vm21040_vm7 = vmmov %vm21026_vm4  ;;  %vm21042_vm9 = vnez %v21041_v59  ;;  %v16288_v59 = vld [vmem:[#allocation2 + $0xc8] sm:$0xff] }
 0x1a9   : > { %v2648_v63 = vsel %vm21042_vm9, %v2592_v51, 0.0  ;;  %vm21043_vm13 = vmmov %vm21039_vm1  ;;  %v21044_v31 = vrot.slane %v15777_v43, 1 }
 0x1aa   : > { %v2589_v50 = vsel %vm21043_vm13, %v2587_v3, %v2588_v58  ;;  %vm21045_vm15 = vmmov %vm21039_vm1  ;;  %v16025_v36 = vadd.f32 %v15735_v11, %v2648_v63 }
 0x1ab   : > { %v2620_v24 = vsel %vm21045_vm15, %v2588_v58, %v21044_v31  ;;  %vm21047_vm1 = vmmov %vm21026_vm4 }
 0x1ac   : > { %v12761_v11 = vpop.f32.mrb[32].mxu0  ;;  %v12795_v4 = vpop.f32.mrb[96].mxu1  ;;  %vm21053_vm15 = vmmov %vm21047_vm1 }
 0x1ad   : > { %13006 = vmatmul.mubr.msk.bf16.gmra.mrb[136].mxu0 %vm21026_vm4, %v15506_v14  ;;  %vm21050_vm4 = vnez %v21049_v7  ;;  %v13780_v6 = vadd.f32 %v15791_v29, %v12761_v11  ;;  %v2789_v58 = vpop.f32.mrb[33].mxu0  ;;  %v16046_v19 = vpop.f32.mrb[97].mxu1  ;;  %v14563_v7 = vld [vmem:[#allocation2 + $0x98] sm:$0xff] }
 0x1ae   : > { %12972 = vmatmul.mubr.msk.bf16.gmra.mrb[168].mxu1 %vm21040_vm7, %v15506_v14  ;;  %13009 = vmatprep.mubr.msk.bf16.mxu0 %vm21047_vm1, %v15508_v38  ;;  %v16028_v14 = vadd.f32 %v15769_v53, %v2589_v50  ;;  %vm21048_vm7 = vmmov %vm21043_vm13  ;;  %v2652_v43 = vsel %vm21050_vm4, %v2620_v24, 0.0  ;;  %v12762_v51 = vpop.f32.mrb[34].mxu0  ;;  %v12796_v63 = vpop.f32.mrb[98].mxu1  ;;  %vm21052_vm13 = vcmp.lt.s32.totalorder %v15063_v21, 1 }
 0x1af   : > { %12975 = vmatprep.mubr.msk.bf16.mxu1 %vm21046_vm11, %v15508_v38  ;;  %v2591_v30 = vsel %vm21048_vm7, %v2585_v49, %v2586_v40  ;;  %v16038_v55 = vadd.f32 %v15772_v52, %v2652_v43  ;;  %vm21051_vm11 = vmmov %vm21048_vm7  ;;  %v3282_v49 = vrot.slane %v12795_v4, 7  ;;  %v20717_v52 = vrot.slane %v16046_v19, 7  ;;  %v2792_v50 = vpop.f32.mrb[35].mxu0  ;;  %v2958_v31 = vpop.f32.mrb[99].mxu1 }
 0x1b0   : > { %v16035_v46 = vadd.f32 %v15765_v37, %v2591_v30  ;;  %v2590_v38 = vsel %vm21051_vm11, %v2586_v40, %v2587_v3  ;;  %v16049_v37 = vadd.f32 %v15799_v62, %v2789_v58  ;;  %v13788_v3 = vadd.f32 %v15819_v10, %v12762_v51  ;;  %vm21054_vm7 = vmmov %vm21052_vm13 }
 0x1b1   : > { %v16043_v53 = vadd.f32 %v15775_v0, %v2590_v38  ;;  %v3283_v40 = vrot.slane %v12796_v63, 7  ;;  %v13792_v0 = vadd.f32 %v15802_v23, %v2792_v50  ;;  %v3281_v24 = vrot.slane %v2958_v31, 7  ;;  %vm21055_vm11 = vmmov %vm21054_vm7 }
 0x1b2   : > { %vm21056_vm4 = vmmov %vm21047_vm1 }
 0x1b3   : > { %v3340_v29 = vsel %vm21052_vm13, %v3282_v49, %v3283_v40  ;;  %v3341_v10 = vsel %vm21054_vm7, %v3281_v24, %v3282_v49  ;;  %v3342_v23 = vsel %vm21055_vm11, %v20717_v52, %v3281_v24  ;;  %vm21057_vm13 = vmmov %vm21047_vm1 }
 0x1b4   : > { %v16060_v62 = vadd.f32 %v13788_v3, %v3340_v29  ;;  %v16072_v30 = vadd.f32 %v13792_v0, %v3342_v23  ;;  %v16074_v43 = vadd.f32 %v13780_v6, %v3341_v10  ;;  %v12799_v38 = vpop.f32.mrb[100].mxu1 }
 0x1b5   : > { %13010 = vmatmul.mubr.msk.bf16.gmra.mrb[140].mxu0 %vm21047_vm1, %v15533_v28  ;;  %v3286_v4 = vrot.slane %v12799_v38, 7  ;;  %v2971_v58 = vpop.f32.mrb[101].mxu1 }
 0x1b6   : > { %12976 = vmatmul.mubr.msk.bf16.gmra.mrb[172].mxu1 %vm21053_vm15, %v15533_v28  ;;  %13013 = vmatprep.mubr.msk.bf16.mxu0 %vm21057_vm13, %v15535_v8  ;;  %v12765_v28 = vpop.f32.mrb[36].mxu0  ;;  %v3284_v63 = vrot.slane %v2971_v58, 7  ;;  %v12800_v50 = vpop.f32.mrb[102].mxu1 }
 0x1b7   : > { %12979 = vmatprep.mubr.msk.bf16.mxu1 %vm21056_vm4, %v15535_v8  ;;  %v13796_v11 = vadd.f32 %v15822_v22, %v12765_v28  ;;  %v2805_v49 = vpop.f32.mrb[37].mxu0  ;;  %v3287_v24 = vrot.slane %v12800_v50, 7  ;;  %v2974_v0 = vpop.f32.mrb[103].mxu1  ;;  %vm21058_vm4 = vmmov %vm21054_vm7 }
 0x1b8   : > { %v13800_v51 = vadd.f32 %v15827_v41, %v2805_v49  ;;  %v12766_v3 = vpop.f32.mrb[38].mxu0  ;;  %v3339_v6 = vsel %vm21058_vm4, %v3283_v40, %v3284_v63  ;;  %v3285_v10 = vrot.slane %v2974_v0, 7  ;;  %vm21060_vm15 = vmmov %vm21058_vm4 }
 0x1b9   : > { %v13804_v31 = vadd.f32 %v15849_v17, %v12766_v3  ;;  %v2808_v8 = vpop.f32.mrb[39].mxu0  ;;  %v3348_v23 = vsel %vm15115_vm6, %v3339_v6, 0.0  ;;  %v3336_v41 = vsel %vm21060_vm15, %v3286_v4, %v3287_v24  ;;  %vm21061_vm7 = vmmov %vm21047_vm1 }
 0x1ba   : > { %v13808_v29 = vadd.f32 %v15832_v18, %v2808_v8  ;;  %v16090_v17 = vadd.f32 %v13800_v51, %v3348_v23  ;;  %vm21062_vm11 = vmmov %vm21058_vm4 }
 0x1bb   : > { %v16092_v28 = vadd.f32 %v13804_v31, %v3336_v41  ;;  %v3337_v18 = vsel %vm21062_vm11, %v3285_v10, %v3286_v4  ;;  %vm21063_vm13 = vmmov %vm21058_vm4 }
 0x1bc   : > { %v3338_v40 = vsel %vm21063_vm13, %v3284_v63, %v3285_v10  ;;  %vm21064_vm4 = vmmov %vm21047_vm1  ;;  %v16102_v49 = vadd.f32 %v13796_v11, %v3337_v18  ;;  %v12803_v58 = vpop.f32.mrb[104].mxu1 }
 0x1bd   : > { %13014 = vmatmul.mubr.msk.bf16.gmra.mrb[144].mxu0 %vm21061_vm7, %v15565_v13  ;;  %v16100_v38 = vadd.f32 %v13808_v29, %v3338_v40  ;;  %vm21065_vm15 = vmmov %vm21047_vm1  ;;  %v3290_v3 = vrot.slane %v12803_v58, 7  ;;  %v2987_v4 = vpop.f32.mrb[105].mxu1  ;;  %v21069_v40 = vld [vmem:[#allocation28_spill] sm:$0xff]  ;;  %v21074_v58 = vld [vmem:[#allocation29_spill] sm:$0xff] }
 0x1be   : > { %12980 = vmatmul.mubr.msk.bf16.gmra.mrb[176].mxu1 %vm21047_vm1, %v15565_v13  ;;  %13017 = vmatprep.mubr.msk.bf16.mxu0 %vm21065_vm15, %v15567_v42  ;;  %v12769_v13 = vpop.f32.mrb[40].mxu0  ;;  %v3288_v63 = vrot.slane %v2987_v4, 7  ;;  %v12804_v0 = vpop.f32.mrb[106].mxu1  ;;  %vm21066_vm1 = vmmov %vm21062_vm11 }
 0x1bf   : > { %12983 = vmatprep.mubr.msk.bf16.mxu1 %vm21064_vm4, %v15567_v42  ;;  %v13812_v51 = vadd.f32 %v15852_v27, %v12769_v13  ;;  %v2821_v50 = vpop.f32.mrb[41].mxu0  ;;  %v3291_v29 = vrot.slane %v12804_v0, 7  ;;  %v2990_v10 = vpop.f32.mrb[107].mxu1  ;;  %vm21068_vm7 = vmmov %vm21066_vm1  ;;  %v21077_v0 = vld [vmem:[#allocation15_spill] sm:$0xff] }
 0x1c0   : > { %v13816_v31 = vadd.f32 %v15857_v34, %v2821_v50  ;;  %v12770_v8 = vpop.f32.mrb[42].mxu0  ;;  %v3335_v42 = vsel %vm21066_vm1, %v3287_v24, %v3288_v63  ;;  %v3289_v41 = vrot.slane %v2990_v10, 7  ;;  %vm21070_vm11 = vmmov %vm21064_vm4 }
 0x1c1   : > { %v13820_v6 = vadd.f32 %v15883_v32, %v12770_v8  ;;  %v2824_v11 = vpop.f32.mrb[43].mxu0  ;;  %v3352_v18 = vsel %vm15163_vm8, %v3335_v42, 0.0  ;;  %v3332_v34 = vsel %vm21068_vm7, %v3290_v3, %v3291_v29  ;;  %vm21071_vm13 = vmmov %vm21064_vm4 }
 0x1c2   : > { %v13824_v23 = vadd.f32 %v15862_v61, %v2824_v11  ;;  %v16120_v32 = vadd.f32 %v13816_v31, %v3352_v18  ;;  %vm21072_vm4 = vmmov %vm21066_vm1 }
 0x1c3   : > { %v16122_v13 = vadd.f32 %v13820_v6, %v3332_v34  ;;  %v3333_v61 = vsel %vm21072_vm4, %v3289_v41, %v3290_v3  ;;  %vm21073_vm15 = vmmov %vm21066_vm1 }
 0x1c4   : > { %v3334_v24 = vsel %vm21073_vm15, %v3288_v63, %v3289_v41  ;;  %vm21075_vm1 = vmmov %vm21070_vm11  ;;  %v16132_v4 = vadd.f32 %v13812_v51, %v3333_v61  ;;  %v12773_v31 = vpop.f32.mrb[44].mxu0  ;;  %v12807_v8 = vpop.f32.mrb[108].mxu1  ;;  %v16139_v61 = vld [vmem:[#allocation2 + $0x100] sm:$0xff] }
 0x1c5   : > { %13018 = vmatmul.mubr.msk.bf16.gmra.mrb[148].mxu0 %vm21071_vm13, %v21069_v40  ;;  %v16130_v50 = vadd.f32 %v13824_v23, %v3334_v24  ;;  %vm21076_vm7 = vmmov %vm21075_vm1  ;;  %v13828_v6 = vadd.f32 %v21077_v0, %v12773_v31  ;;  %v3294_v11 = vrot.slane %v12807_v8, 7  ;;  %v2837_v10 = vpop.f32.mrb[45].mxu0  ;;  %v3003_v3 = vpop.f32.mrb[109].mxu1 }
 0x1c6   : > { %12984 = vmatmul.mubr.msk.bf16.gmra.mrb[180].mxu1 %vm21070_vm11, %v21069_v40  ;;  %13021 = vmatprep.mubr.msk.bf16.mxu0 %vm21076_vm7, %v21074_v58  ;;  %v13832_v42 = vadd.f32 %v15891_v57, %v2837_v10  ;;  %v3292_v63 = vrot.slane %v3003_v3, 7  ;;  %v12774_v41 = vpop.f32.mrb[46].mxu0  ;;  %v12808_v18 = vpop.f32.mrb[110].mxu1  ;;  %vm21078_vm11 = vmmov %vm21072_vm4 }
 0x1c7   : > { %12987 = vmatprep.mubr.msk.bf16.mxu1 %vm21075_vm1, %v21074_v58  ;;  %v13836_v23 = vadd.f32 %v15915_v48, %v12774_v41  ;;  %v3295_v34 = vrot.slane %v12808_v18, 7  ;;  %v2840_v51 = vpop.f32.mrb[47].mxu0  ;;  %v3006_v40 = vpop.f32.mrb[111].mxu1  ;;  %vm21080_vm13 = vmmov %vm21072_vm4 }
 0x1c8   : > { %v3331_v24 = vsel %vm21078_vm11, %v3291_v29, %v3292_v63  ;;  %v13840_v58 = vadd.f32 %v15897_v35, %v2840_v51  ;;  %v3293_v31 = vrot.slane %v3006_v40, 7  ;;  %vm21081_vm4 = vmmov %vm21075_vm1 }
 0x1c9   : > { %v3356_v0 = vsel %vm15212_vm10, %v3331_v24, 0.0  ;;  %v3328_v57 = vsel %vm21080_vm13, %v3294_v11, %v3295_v34  ;;  %vm21082_vm15 = vmmov %vm21075_vm1 }
 0x1ca   : > { %v16152_v48 = vadd.f32 %v13832_v42, %v3356_v0  ;;  %v16154_v10 = vadd.f32 %v13836_v23, %v3328_v57  ;;  %vm21083_vm1 = vmmov %vm21078_vm11  ;;  %v16170_v0 = vld [vmem:[#allocation2 + $0x108] sm:$0xff] }
 0x1cb   : > { %v3329_v35 = vsel %vm21083_vm1, %v3293_v31, %v3294_v11  ;;  %vm21084_vm7 = vmmov %vm21083_vm1 }
 0x1cc   : > { %v3330_v29 = vsel %vm21084_vm7, %v3292_v63, %v3293_v31  ;;  %vm21085_vm11 = vmmov %vm21081_vm4  ;;  %v16164_v41 = vadd.f32 %v13828_v6, %v3329_v35  ;;  %v12811_v42 = vpop.f32.mrb[112].mxu1 }
 0x1cd   : > { %13022 = vmatmul.mubr.msk.bf16.gmra.mrb[152].mxu0 %vm21082_vm15, %v15636_v45  ;;  %v16162_v3 = vadd.f32 %v13840_v58, %v3330_v29  ;;  %vm21086_vm13 = vmmov %vm21081_vm4  ;;  %v3298_v23 = vrot.slane %v12811_v42, 7  ;;  %v3019_v11 = vpop.f32.mrb[113].mxu1  ;;  %v16176_v42 = vld [vmem:[#allocation2 + $0xa0] sm:$0xff] }
 0x1ce   : > { %12988 = vmatmul.mubr.msk.bf16.gmra.mrb[184].mxu1 %vm21081_vm4, %v15636_v45  ;;  %13025 = vmatprep.mubr.msk.bf16.mxu0 %vm21086_vm13, %v16139_v61  ;;  %v12777_v45 = vpop.f32.mrb[48].mxu0  ;;  %v3296_v63 = vrot.slane %v3019_v11, 7  ;;  %v12812_v31 = vpop.f32.mrb[114].mxu1  ;;  %vm21087_vm4 = vmmov %vm21083_vm1 }
 0x1cf   : > { %12991 = vmatprep.mubr.msk.bf16.mxu1 %vm21085_vm11, %v16139_v61  ;;  %v13844_v18 = vadd.f32 %v15918_v26, %v12777_v45  ;;  %v2853_v51 = vpop.f32.mrb[49].mxu0  ;;  %v3299_v58 = vrot.slane %v12812_v31, 7  ;;  %v3022_v35 = vpop.f32.mrb[115].mxu1  ;;  %vm21089_vm15 = vmmov %vm21083_vm1 }
 0x1d0   : > { %v13848_v40 = vadd.f32 %v15923_v9, %v2853_v51  ;;  %v12778_v24 = vpop.f32.mrb[50].mxu0  ;;  %v3327_v29 = vsel %vm21087_vm4, %v3295_v34, %v3296_v63  ;;  %v3297_v45 = vrot.slane %v3022_v35, 7  ;;  %vm21090_vm1 = vmmov %vm21085_vm11 }
 0x1d1   : > { %v13852_v6 = vadd.f32 %v15955_v25, %v12778_v24  ;;  %v2856_v57 = vpop.f32.mrb[51].mxu0  ;;  %v3360_v9 = vsel %vm15261_vm12, %v3327_v29, 0.0  ;;  %v3324_v51 = vsel %vm21089_vm15, %v3298_v23, %v3299_v58  ;;  %vm21091_vm7 = vmmov %vm21090_vm1  ;;  %v14562_v24 = vld [vmem:[#allocation2 + $0x90] sm:$0xff] }
 0x1d2   : > { %v13856_v26 = vadd.f32 %v15928_v16, %v2856_v57  ;;  %v16186_v25 = vadd.f32 %v13848_v40, %v3360_v9  ;;  %vm21092_vm11 = vmmov %vm21087_vm4 }
 0x1d3   : > { %v16188_v34 = vadd.f32 %v13852_v6, %v3324_v51  ;;  %v3325_v16 = vsel %vm21092_vm11, %v3297_v45, %v3298_v23  ;;  %vm21093_vm13 = vmmov %vm21087_vm4 }
 0x1d4   : > { %v3326_v11 = vsel %vm21093_vm13, %v3296_v63, %v3297_v45  ;;  %vm21094_vm4 = vmmov %vm21090_vm1  ;;  %v16197_v57 = vadd.f32 %v13844_v18, %v3325_v16  ;;  %v12781_v40 = vpop.f32.mrb[52].mxu0  ;;  %v12815_v35 = vpop.f32.mrb[116].mxu1  ;;  %v6177_v63 = vld [vmem:[%s20657_s1] sm:$0x3]  ;;  %v16206_v16 = vld [vmem:[#allocation2 + $0xa8] sm:$0xff] }
 0x1d5   : > { %13026 = vmatmul.mubr.msk.bf16.gmra.mrb[156].mxu0 %vm21091_vm7, %v16170_v0  ;;  %v16195_v31 = vadd.f32 %v13856_v26, %v3326_v11  ;;  %vm21095_vm15 = vmmov %vm21090_vm1  ;;  %v13860_v6 = vadd.f32 %v15958_v15, %v12781_v40  ;;  %v3302_v29 = vrot.slane %v12815_v35, 7  ;;  %v2869_v9 = vpop.f32.mrb[53].mxu0  ;;  %v3035_v23 = vpop.f32.mrb[117].mxu1  ;;  %v11648_v11 = vld [vmem:[%s20657_s1 + $0x4] sm:$0x3] }
 0x1d6   : > { %12992 = vmatmul.mubr.msk.bf16.gmra.mrb[188].mxu1 %vm21090_vm1, %v16170_v0  ;;  %13031 = vmatprep.mubr.msk.bf16.mxu0 %vm21094_vm4, %v14562_v24  ;;  %v13864_v45 = vadd.f32 %v15967_v20, %v2869_v9  ;;  %v3300_v26 = vrot.slane %v3035_v23, 7  ;;  %v12782_v51 = vpop.f32.mrb[54].mxu0  ;;  %v12816_v18 = vpop.f32.mrb[118].mxu1  ;;  %vm21096_vm1 = vmmov %vm21092_vm11  ;;  %v16216_v9 = vand.u32 %v6177_v63, %v14644_v5 }
 0x1d7   : > { %13065 = vmatprep.mubr.msk.bf16.mxu1 %vm21095_vm15, %v16176_v42  ;;  %v13868_v15 = vadd.f32 %v15991_v54, %v12782_v51  ;;  %v3303_v24 = vrot.slane %v12816_v18, 7  ;;  %v2872_v40 = vpop.f32.mrb[55].mxu0  ;;  %v3038_v35 = vpop.f32.mrb[119].mxu1  ;;  %vm21098_vm7 = vmmov %vm21096_vm1  ;;  %v16225_v54 = vld [vmem:[#allocation2 + $0xb0] sm:$0xff] }
 0x1d8   : > { %v3323_v52 = vsel %vm21096_vm1, %v3299_v58, %v3300_v26  ;;  %v13872_v8 = vadd.f32 %v15972_v33, %v2872_v40  ;;  %v3301_v20 = vrot.slane %v3038_v35, 7  ;;  %vm21099_vm11 = vmmov %vm21094_vm4  ;;  %v16228_v33 = vand.u32 %v11648_v11, %v14644_v5  ;;  %v14564_v11 = vld [vmem:[#allocation2 + $0xa0] sm:$0xff]  ;;  %v16251_v40 = vld [vmem:[#allocation2 + $0xb8] sm:$0xff] }
 0x1d9   : > { %v3364_v27 = vsel %vm15319_vm14, %v3323_v52, 0.0  ;;  %v3320_v22 = vsel %vm21098_vm7, %v3302_v29, %v3303_v24  ;;  %vm21100_vm13 = vmmov %vm21094_vm4 }
 0x1da   : > { %v16230_v58 = vadd.f32 %v13864_v45, %v3364_v27  ;;  %v16232_v63 = vadd.f32 %v13868_v15, %v3320_v22  ;;  %vm21101_vm4 = vmmov %vm21096_vm1 }
 0x1db   : > { %v3321_v52 = vsel %vm21101_vm4, %v3301_v20, %v3302_v29  ;;  %vm21102_vm15 = vmmov %vm21096_vm1 }
 0x1dc   : > { %v3322_v51 = vsel %vm21102_vm15, %v3300_v26, %v3301_v20  ;;  %v16241_v18 = vadd.f32 %v13860_v6, %v3321_v52  ;;  %vm21103_vm1 = vmmov %vm21099_vm11  ;;  %v12785_v27 = vpop.f32.mrb[56].mxu0  ;;  %v12819_v22 = vpop.f32.mrb[120].mxu1 }
 0x1dd   : > { %13032 = vmatmul.mubr.msk.bf16.vlgmr.msra.gmra.mrb[160].mxu0 %vm21099_vm11, %v14563_v7  ;;  %v16239_v7 = vadd.f32 %v13872_v8, %v3322_v51  ;;  %vm21104_vm7 = vmmov %vm21103_vm1  ;;  %v13876_v29 = vadd.f32 %v15994_v60, %v12785_v27  ;;  %v3306_v45 = vrot.slane %v12819_v22, 7  ;;  %v3051_v8 = vpop.f32.mrb[121].mxu1  ;;  %v16257_v22 = vld [vmem:[#allocation2 + $0xc0] sm:$0xff] }
 0x1de   : > { %13066 = vmatmul.mubr.msk.bf16.vlgmr.msra.gmra.mrb[160].mxu1 %vm21100_vm13, %v16206_v16  ;;  %13098 = vmatpush3.bf16.msra.mxu0 %v15939_v39  ;;  %v2885_v39 = vpop.f32.mrb[57].mxu0  ;;  %v12820_v15 = vpop.f32.mrb[122].mxu1  ;;  %vm21105_vm11 = vmmov %vm21101_vm4 }
 0x1df   : > { %13132 = vmatpush3.bf16.msra.mxu1 %v15942_v47  ;;  %13035 = vmatprep.mubr.msk.bf16.mxu0 %vm21103_vm1, %v14564_v11  ;;  %v13880_v6 = vadd.f32 %v15999_v44, %v2885_v39  ;;  %v3304_v47 = vrot.slane %v3051_v8, 7  ;;  %v12786_v26 = vpop.f32.mrb[58].mxu0  ;;  %v3307_v20 = vrot.slane %v12820_v15, 7  ;;  %v3054_v51 = vpop.f32.mrb[123].mxu1  ;;  %vm21107_vm13 = vmmov %vm21101_vm4 }
 0x1e0   : > { %13069 = vmatprep.mubr.msk.bf16.mxu1 %vm21104_vm7, %v16225_v54  ;;  %13165 = vmatprep.subr.bf16.mxu0 %v16216_v9  ;;  %v13884_v35 = vadd.f32 %v16025_v36, %v12786_v26  ;;  %v2888_v52 = vpop.f32.mrb[59].mxu0  ;;  %v3305_v27 = vrot.slane %v3054_v51, 7  ;;  %v14565_v36 = vld [vmem:[#allocation2 + $0xa8] sm:$0xff]  ;;  %vm21108_vm4 = vmmov %vm21103_vm1  ;;  %v246_v51 = vld [vmem:[%s14671_s29 + $0x220] sm:$0xff] }
 0x1e1   : > { %13199 = vmatprep.subr.bf16.mxu1 %v16228_v33  ;;  %v3319_v60 = vsel %vm21105_vm11, %v3303_v24, %v3304_v47  ;;  %v13888_v11 = vadd.f32 %v16004_v12, %v2888_v52  ;;  %v3316_v8 = vsel %vm21107_vm13, %v3306_v45, %v3307_v20  ;;  %vm21109_vm15 = vmmov %vm21103_vm1  ;;  %v14566_v52 = vld [vmem:[#allocation2 + $0xb0] sm:$0xff] }
 0x1e2   : > { %v3368_v39 = vsel %vm15382_vm0, %v3319_v60, 0.0  ;;  %v16268_v12 = vadd.f32 %v13884_v35, %v3316_v8  ;;  %vm21111_vm1 = vmmov %vm21105_vm11  ;;  %v247_v60 = vld [vmem:[%s14671_s29 + $0x228] sm:$0xff]  ;;  %v248_v35 = vld [vmem:[%s14671_s29 + $0x230] sm:$0xff] }
 0x1e3   : > { %v16266_v24 = vadd.f32 %v13880_v6, %v3368_v39  ;;  %v3317_v26 = vsel %vm21111_vm1, %v3305_v27, %v3306_v45  ;;  %vm21112_vm7 = vmmov %vm21111_vm1  ;;  %v340_v6 = vpack.c.bf16 %v247_v60, %v246_v51  ;;  %v249_v39 = vld [vmem:[%s14671_s29 + $0x238] sm:$0xff] }
 0x1e4   : > { %21110 = vst [vmem:[#allocation18_spill] sm:$0xff] %v16268_v12  ;;  %v3318_v15 = vsel %vm21112_vm7, %v3304_v47, %v3305_v27  ;;  %vm21113_vm11 = vmmov %vm21108_vm4  ;;  %v12789_v8 = vpop.f32.mrb[60].mxu0  ;;  %v12823_v45 = vpop.f32.mrb[124].mxu1  ;;  %v341_v23 = vpack.c.bf16 %v249_v39, %v248_v35 }
 0x1e5   : > { %13036 = vmatmul.mubr.msk.bf16.gmra.mrb[164].mxu0 %vm21108_vm4, %v14565_v36  ;;  %v16277_v44 = vadd.f32 %v13888_v11, %v3318_v15  ;;  %v16279_v36 = vadd.f32 %v13876_v29, %v3317_v26  ;;  %vm21114_vm13 = vmmov %vm21108_vm4  ;;  %v13892_v47 = vadd.f32 %v16028_v14, %v12789_v8  ;;  %v3310_v27 = vrot.slane %v12823_v45, 7  ;;  %v2901_v12 = vpop.f32.mrb[61].mxu0  ;;  %405 = vst.msk [vmem:[#allocation2 + $0x120] sm:$0xff] %vm21108_vm4, %v340_v6  ;;  %v16292_v14 = vld [vmem:[#allocation2 + $0xd0] sm:$0xff] }
 0x1e6   : > { %13070 = vmatmul.mubr.msk.bf16.gmra.mrb[164].mxu1 %vm21109_vm15, %v16251_v40  ;;  %13039 = vmatprep.mubr.msk.bf16.mxu0 %vm21113_vm11, %v14566_v52  ;;  %v3067_v52 = vpop.f32.mrb[125].mxu1  ;;  %v13896_v11 = vadd.f32 %v16035_v46, %v2901_v12  ;;  %v12790_v26 = vpop.f32.mrb[62].mxu0  ;;  %vm21115_vm15 = vmmov %vm21108_vm4  ;;  %21116 = vst [vmem:[#allocation20_spill] sm:$0xff] %v16292_v14 }
 0x1e7   : > { %13073 = vmatprep.mubr.msk.bf16.mxu1 %vm21114_vm13, %v16257_v22  ;;  %v3308_v29 = vrot.slane %v3067_v52, 7  ;;  %v12824_v15 = vpop.f32.mrb[126].mxu1  ;;  %406 = vst.msk [vmem:[#allocation2 + $0x128] sm:$0xff] %vm21115_vm15, %v341_v23  ;;  %v13900_v51 = vadd.f32 %v16038_v55, %v12790_v26  ;;  %v2904_v35 = vpop.f32.mrb[63].mxu0  ;;  %vm21118_vm7 = vmmov %vm21111_vm1  ;;  %v21119_v55 = vrot.slane %v16046_v19, 7  ;;  %v14567_v26 = vld [vmem:[#allocation2 + $0xb8] sm:$0xff] }
 0x1e8   : > { %v3311_v60 = vrot.slane %v12824_v15, 7  ;;  %v3070_v39 = vpop.f32.mrb[127].mxu1  ;;  %v13904_v46 = vadd.f32 %v16043_v53, %v2904_v35  ;;  %vm21120_vm11 = vmmov %vm21111_vm1 }
 0x1e9   : > { %v3315_v8 = vsel %vm21111_vm1, %v3307_v20, %v3308_v29  ;;  %v3309_v12 = vrot.slane %v3070_v39, 7  ;;  %vm21121_vm13 = vmmov %vm21108_vm4  ;;  %v14568_v39 = vld [vmem:[#allocation2 + $0xc0] sm:$0xff] }
 0x1ea   : > { %v3372_v45 = vsel %vm15434_vm2, %v3315_v8, 0.0  ;;  %v3312_v23 = vsel %vm21118_vm7, %v3310_v27, %v3311_v60  ;;  %v3343_v52 = vsel %vm21120_vm11, %v3311_v60, %v21119_v55  ;;  %vm21125_vm15 = vmmov %vm21111_vm1  ;;  %v250_v60 = vld [vmem:[%s14671_s29 + $0x240] sm:$0xff]  ;;  %v251_v8 = vld [vmem:[%s14671_s29 + $0x248] sm:$0xff] }
 0x1eb   : > { %v16308_v53 = vadd.f32 %v13896_v11, %v3372_v45  ;;  %v3344_v15 = vsel %vm15444_vm3, %v3343_v52, 0.0  ;;  %v16312_v35 = vadd.f32 %v13900_v51, %v3312_v23  ;;  %v3313_v19 = vsel %vm21125_vm15, %v3309_v12, %v3310_v27  ;;  %vm21126_vm1 = vmmov %vm21108_vm4  ;;  %v252_v23 = vld [vmem:[%s14671_s29 + $0x250] sm:$0xff]  ;;  %v253_v52 = vld [vmem:[%s14671_s29 + $0x258] sm:$0xff] }
 0x1ec   : > { %vm21127_vm7 = vmmov %vm21126_vm1  ;;  %v3376_v55 = vadd.f32 %v16049_v37, %v3344_v15  ;;  %v3314_v11 = vsel %vm21120_vm11, %v3308_v29, %v3309_v12  ;;  %v16324_v45 = vadd.f32 %v13892_v47, %v3313_v19  ;;  %v342_v51 = vpack.c.bf16 %v251_v8, %v250_v60  ;;  %v12829_v27 = vpop.f32.mrb[64].mxu0  ;;  %v12863_v6 = vpop.f32.mrb[128].mxu1  ;;  %v16339_v47 = vld [vmem:[#allocation2 + $0xd8] sm:$0xff]  ;;  %v16341_v12 = vld [vmem:[#allocation2 + $0xe0] sm:$0xff] }
 0x1ed   : > { %13040 = vmatmul.mubr.msk.bf16.gmra.mrb[168].mxu0 %vm21121_vm13, %v14567_v26  ;;  %21122 = vst [vmem:[#allocation19_spill] sm:$0xff] %v16308_v53  ;;  %21124 = vst [vmem:[#allocation25_spill] sm:$0xff] %v16312_v35  ;;  %v16328_v26 = vadd.f32 %v13904_v46, %v3314_v11  ;;  %v4006_v20 = vrot.slane %v12863_v6, 7  ;;  %v16330_v53 = vpop.f32.mrb[65].mxu0  ;;  %v16332_v35 = vpop.f32.mrb[129].mxu1  ;;  %v3410_v46 = vrot.slane %v12829_v27, 1 }
 0x1ee   : > { %13074 = vmatmul.mubr.msk.bf16.gmra.mrb[168].mxu1 %vm21108_vm4, %v16288_v59  ;;  %13043 = vmatprep.mubr.msk.bf16.mxu0 %vm21126_vm1, %v14568_v39  ;;  %21128 = vst [vmem:[#allocation27_spill] sm:$0xff] %v16324_v45  ;;  %v343_v39 = vpack.c.bf16 %v253_v52, %v252_v23  ;;  %21130 = vst [vmem:[#allocation14_spill] sm:$0xff] %v16332_v35  ;;  %v16335_v37 = vpop.f32.mrb[66].mxu0  ;;  %v16337_v29 = vpop.f32.mrb[130].mxu1  ;;  %v20718_v11 = vrot.slane %v16330_v53, 1  ;;  %vm21135_vm15 = vcmp.lt.s32.totalorder %v15063_v21, 7 }
 0x1ef   : > { %13077 = vmatprep.mubr.msk.bf16.mxu1 %vm21127_vm7, %v16292_v14  ;;  %21129 = vst [vmem:[#allocation26_spill] sm:$0xff] %v16328_v26  ;;  %vm21131_vm13 = vmmov %vm21126_vm1  ;;  %v3411_v6 = vrot.slane %v16335_v37, 1  ;;  %v4007_v19 = vrot.slane %v16337_v29, 7  ;;  %v3124_v60 = vpop.f32.mrb[67].mxu0  ;;  %v3715_v8 = vpop.f32.mrb[131].mxu1  ;;  %v254_v15 = vld [vmem:[%s14671_s29 + $0x260] sm:$0xff] }
 0x1f0   : > { %407 = vst.msk [vmem:[#allocation2 + $0x130] sm:$0xff] %vm21131_vm13, %v342_v51  ;;  %21132 = vst [vmem:[#allocation12_spill] sm:$0xff] %v16339_v47  ;;  %v3409_v51 = vrot.slane %v3124_v60, 1  ;;  %v4005_v23 = vrot.slane %v3715_v8, 7  ;;  %v16353_v27 = vld [vmem:[%s20658_s2] ss:$0 sm:$0xff] }
 0x1f1   : > { %21133 = vst [vmem:[#allocation28_spill] sm:$0xff] %v16341_v12  ;;  %vm21134_vm4 = vmmov %vm21126_vm1  ;;  %v3468_v52 = vsel %vm21135_vm15, %v3410_v46, %v3411_v6  ;;  %v16360_v37 = vsel %vm21120_vm11, %v4006_v20, %v4007_v19  ;;  %vm20728_vm13 = vcmask 523264  }
 0x1f2   : > { %408 = vst.msk [vmem:[#allocation2 + $0x138] sm:$0xff] %vm21134_vm4, %v343_v39  ;;  %v14569_v39 = vld [vmem:[#allocation2 + $0xc8] sm:$0xff]  ;;  %vm21136_vm7 = vmmov %vm21126_vm1  ;;  %v3506_v29 = vadd.f32 %v3468_v52, %v16074_v43  ;;  %v21142_v52 = vrot.slane %v16332_v35, 7 }
 0x1f3   : > { %21137 = vst [vmem:[#allocation29_spill] sm:$0xff] %v16360_v37  ;;  %vm21138_vm4 = vmmov %vm21135_vm15  ;;  %v255_v37 = vld [vmem:[%s14671_s29 + $0x268] sm:$0xff] }
 0x1f4   : > { %v3469_v60 = vsel %vm21138_vm4, %v3409_v51, %v3410_v46  ;;  %vm21139_vm15 = vmmov %vm21138_vm4  ;;  %v12833_v26 = vpop.f32.mrb[68].mxu0  ;;  %v12867_v14 = vpop.f32.mrb[132].mxu1  ;;  %v16403_v35 = vld [vmem:[#allocation2 + $0xe8] sm:$0xff] }
 0x1f5   : > { %13044 = vmatmul.mubr.msk.bf16.gmra.mrb[172].mxu0 %vm21126_vm1, %v14569_v39  ;;  %v3470_v8 = vsel %vm21139_vm15, %v20718_v11, %v3409_v51  ;;  %v14570_v39 = vld [vmem:[#allocation2 + $0xd0] sm:$0xff]  ;;  %v3505_v46 = vadd.f32 %v3469_v60, %v16072_v30  ;;  %v16384_v51 = vsel %vm21120_vm11, %v4005_v23, %v4006_v20  ;;  %vm21143_vm4 = vmmov %vm21120_vm11  ;;  %v3728_v45 = vpop.f32.mrb[133].mxu1  ;;  %21145 = vst [vmem:[#allocation31_spill] sm:$0xff] %v16403_v35 }
 0x1f6   : > { %13078 = vmatmul.mubr.msk.bf16.gmra.mrb[172].mxu1 %vm21136_vm7, %v16339_v47  ;;  %13047 = vmatprep.mubr.msk.bf16.mxu0 %vm21126_vm1, %v14570_v39  ;;  %vm21140_vm7 = vmmov %vm21126_vm1  ;;  %v3504_v43 = vadd.f32 %v3470_v8, %v3376_v55  ;;  %21141 = vst [vmem:[#allocation15_spill] sm:$0xff] %v16384_v51  ;;  %v16390_v39 = vsel %vm21143_vm4, %v21142_v52, %v4005_v23  ;;  %v256_v11 = vld [vmem:[%s14671_s29 + $0x270] sm:$0xff]  ;;  %v4010_v8 = vrot.slane %v12867_v14, 7  ;;  %v3137_v51 = vpop.f32.mrb[69].mxu0  ;;  %v4008_v52 = vrot.slane %v3728_v45, 7 }
 0x1f7   : > { %13081 = vmatprep.mubr.msk.bf16.mxu1 %vm21140_vm7, %v16341_v12  ;;  %21144 = vst [vmem:[#allocation30_spill] sm:$0xff] %v16390_v39  ;;  %v257_v12 = vld [vmem:[%s14671_s29 + $0x278] sm:$0xff]  ;;  %v3545_v47 = vadd.f32 %v16353_v27, %v3506_v29  ;;  %v344_v55 = vpack.c.bf16 %v255_v37, %v254_v15  ;;  %v3544_v20 = vadd.f32 %v16353_v27, %v3505_v46  ;;  %v3412_v23 = vrot.slane %v3137_v51, 1  ;;  %v16399_v39 = vpop.f32.mrb[70].mxu0  ;;  %v16401_v29 = vpop.f32.mrb[134].mxu1  ;;  %vm21146_vm15 = vmmov %vm21126_vm1  ;;  %v16415_v46 = vld [vmem:[#allocation2 + $0xf0] sm:$0xff] }
 0x1f8   : > { %v345_v30 = vpack.c.bf16 %v257_v12, %v256_v11  ;;  %v3543_v60 = vadd.f32 %v16353_v27, %v3504_v43  ;;  %v3414_v14 = vrot.slane %v12833_v26, 1  ;;  %v3415_v12 = vrot.slane %v16399_v39, 1  ;;  %v3140_v45 = vpop.f32.mrb[71].mxu0  ;;  %v3731_v15 = vpop.f32.mrb[135].mxu1  ;;  %vm21148_vm11 = vmmov %vm21143_vm4 }
 0x1f9   : > { %3578 = vst.msk [vmem:[%s16379_s14 + $0x10] sm:$0xff] %vm20728_vm13, %v3545_v47  ;;  %3577 = vst.msk [vmem:[%s16379_s14 + $0x8] sm:$0xff] %vm20728_vm13, %v3544_v20  ;;  %v4011_v47 = vrot.slane %v16401_v29, 7  ;;  %vm21147_vm7 = vcmp.lt.s32.totalorder %v15063_v21, 7  ;;  %v3413_v37 = vrot.slane %v3140_v45, 1  ;;  %v4009_v43 = vrot.slane %v3731_v15, 7 }
 0x1fa   : > { %409 = vst.msk [vmem:[#allocation2 + $0x140] sm:$0xff] %vm21146_vm15, %v344_v55  ;;  %v3467_v11 = vsel %vm21147_vm7, %v3411_v6, %v3412_v23  ;;  %v16419_v51 = vsel %vm21148_vm11, %v4007_v19, %v4008_v52  ;;  %vm21150_vm4 = vmmov %vm21147_vm7  ;;  %v14572_v45 = vld [vmem:[#allocation2 + $0xe0] sm:$0xff] }
 0x1fb   : > { %410 = vst.msk [vmem:[#allocation2 + $0x148] sm:$0xff] %vm21126_vm1, %v345_v30  ;;  %v3475_v39 = vsel %vm15111_vm5, %v3467_v11, 0.0  ;;  %v3464_v55 = vsel %vm21150_vm4, %v3414_v14, %v3415_v12  ;;  %v14571_v30 = vld [vmem:[#allocation2 + $0xd8] sm:$0xff]  ;;  %vm21151_vm15 = vmmov %vm21126_vm1  ;;  %v3466_v29 = vsel %vm21150_vm4, %v3412_v23, %v3413_v37  ;;  %v258_v15 = vld [vmem:[%s14671_s29 + $0x280] sm:$0xff] }
 0x1fc   : > { %3576 = vst.msk [vmem:[%s16379_s14] sm:$0xff] %vm20728_vm13, %v3543_v60  ;;  %vm21152_vm7 = vmmov %vm21148_vm11  ;;  %v3507_v19 = vadd.f32 %v3475_v39, %v16060_v62  ;;  %v3510_v60 = vadd.f32 %v3464_v55, %v16102_v49  ;;  %v259_v11 = vld [vmem:[%s14671_s29 + $0x288] sm:$0xff]  ;;  %v260_v23 = vld [vmem:[%s14671_s29 + $0x290] sm:$0xff] }
 0x1fd   : > { %13048 = vmatmul.mubr.msk.bf16.gmra.mrb[176].mxu0 %vm21151_vm15, %v14571_v30  ;;  %v16430_v6 = vsel %vm21152_vm7, %v4010_v8, %v4011_v47  ;;  %vm21154_vm11 = vmmov %vm21150_vm4  ;;  %v3508_v30 = vadd.f32 %v3466_v29, %v16090_v17  ;;  %v16447_v62 = vsel %vm21152_vm7, %v4009_v43, %v4010_v8  ;;  %v346_v55 = vpack.c.bf16 %v259_v11, %v258_v15  ;;  %v16467_v15 = vld [vmem:[#allocation2 + $0xf8] sm:$0xff] }
 0x1fe   : > { %13082 = vmatmul.mubr.msk.bf16.gmra.mrb[176].mxu1 %vm21126_vm1, %v16403_v35  ;;  %21153 = vst [vmem:[#allocation32_spill] sm:$0xff] %v16430_v6  ;;  %v3465_v20 = vsel %vm21154_vm11, %v3413_v37, %v3414_v14  ;;  %vm21155_vm15 = vmmov %vm21126_vm1  ;;  %v261_v14 = vld [vmem:[%s14671_s29 + $0x298] sm:$0xff]  ;;  %v3546_v37 = vadd.f32 %v16353_v27, %v3507_v19  ;;  %v3549_v17 = vadd.f32 %v16353_v27, %v3510_v60 }
 0x1ff   : > { %13051 = vmatprep.mubr.msk.bf16.mxu0 %vm21155_vm15, %v14572_v45  ;;  %v3509_v35 = vadd.f32 %v3465_v20, %v16100_v38  ;;  %13085 = vmatprep.mubr.msk.bf16.mxu1 %vm21126_vm1, %v16415_v46  ;;  %vm21156_vm11 = vmmov %vm21152_vm7  ;;  %v12837_v38 = vpop.f32.mrb[72].mxu0  ;;  %v347_v20 = vpack.c.bf16 %v261_v14, %v260_v23  ;;  %v3547_v8 = vadd.f32 %v16353_v27, %v3508_v30 }
 0x200   : > { %v16451_v49 = vsel %vm21156_vm11, %v4008_v52, %v4009_v43  ;;  %v3153_v6 = vpop.f32.mrb[73].mxu0  ;;  %3579 = vst.msk [vmem:[%s16379_s14 + $0x18] sm:$0xff] %vm20728_vm13, %v3546_v37  ;;  %3582 = vst.msk [vmem:[%s16379_s14 + $0x30] sm:$0xff] %vm20728_vm13, %v3549_v17 }
 0x201   : > { %21157 = vst [vmem:[#allocation33_spill] sm:$0xff] %v16451_v49  ;;  %v12871_v39 = vpop.f32.mrb[136].mxu1  ;;  %v3548_v29 = vadd.f32 %v16353_v27, %v3509_v35  ;;  %v3416_v43 = vrot.slane %v3153_v6, 1  ;;  %v16463_v60 = vpop.f32.mrb[74].mxu0  ;;  %vm21158_vm4 = vmmov %vm21126_vm1  ;;  %v3418_v35 = vrot.slane %v12837_v38, 1 }
 0x202   : > { %v4014_v45 = vrot.slane %v12871_v39, 7  ;;  %v3744_v52 = vpop.f32.mrb[137].mxu1  ;;  %411 = vst.msk [vmem:[#allocation2 + $0x150] sm:$0xff] %vm21158_vm4, %v346_v55  ;;  %vm21159_vm15 = vmmov %vm21126_vm1  ;;  %v3419_v11 = vrot.slane %v16463_v60, 1  ;;  %v3156_v30 = vpop.f32.mrb[75].mxu0  ;;  %vm21160_vm1 = vcmp.lt.s32.totalorder %v15063_v21, 7 }
 0x203   : > { %v4012_v19 = vrot.slane %v3744_v52, 7  ;;  %v16465_v49 = vpop.f32.mrb[138].mxu1  ;;  %412 = vst.msk [vmem:[#allocation2 + $0x158] sm:$0xff] %vm21159_vm15, %v347_v20  ;;  %v3463_v14 = vsel %vm21160_vm1, %v3415_v12, %v3416_v43  ;;  %v3417_v37 = vrot.slane %v3156_v30, 1  ;;  %v21161_v55 = vld [vmem:[#allocation5_spill] sm:$0xff]  ;;  %vm21163_vm4 = vmmov %vm21160_vm1  ;;  %v262_v30 = vld [vmem:[%s14671_s29 + $0x2a0] sm:$0xff] }
 0x204   : > { %3580 = vst.msk [vmem:[%s16379_s14 + $0x20] sm:$0xff] %vm20728_vm13, %v3547_v8  ;;  %3581 = vst.msk [vmem:[%s16379_s14 + $0x28] sm:$0xff] %vm20728_vm13, %v3548_v29  ;;  %v4015_v6 = vrot.slane %v16465_v49, 7  ;;  %v3747_v23 = vpop.f32.mrb[139].mxu1  ;;  %vm21162_vm11 = vnez %v21161_v55  ;;  %v3460_v20 = vsel %vm21163_vm4, %v3418_v35, %v3419_v11  ;;  %v14573_v49 = vld [vmem:[#allocation2 + $0xe8] sm:$0xff]  ;;  %v14574_v60 = vld [vmem:[#allocation2 + $0xf0] sm:$0xff] }
 0x205   : > { %v4013_v17 = vrot.slane %v3747_v23, 7  ;;  %v16481_v39 = vsel %vm21152_vm7, %v4011_v47, %v4012_v19  ;;  %v3479_v38 = vsel %vm21162_vm11, %v3463_v14, 0.0  ;;  %13052 = vmatmul.mubr.msk.bf16.gmra.mrb[180].mxu0 %vm21159_vm15, %v14573_v49  ;;  %vm21164_vm13 = vmmov %vm21159_vm15  ;;  %v3514_v8 = vadd.f32 %v3460_v20, %v16132_v4  ;;  %v263_v23 = vld [vmem:[%s14671_s29 + $0x2a8] sm:$0xff] }
 0x206   : > { %13086 = vmatmul.mubr.msk.bf16.gmra.mrb[180].mxu1 %vm21164_vm13, %v16467_v15  ;;  %vm21165_vm1 = vmmov %vm21152_vm7  ;;  %v3511_v47 = vadd.f32 %v3479_v38, %v16092_v28  ;;  %v3462_v52 = vsel %vm21163_vm4, %v3416_v43, %v3417_v37  ;;  %v264_v43 = vld [vmem:[%s14671_s29 + $0x2b0] sm:$0xff]  ;;  %v348_v20 = vpack.c.bf16 %v263_v23, %v262_v30 }
 0x207   : > { %v16492_v12 = vsel %vm21165_vm1, %v4014_v45, %v4015_v6  ;;  %vm21167_vm7 = vmmov %vm21163_vm4  ;;  %v3512_v14 = vadd.f32 %v3462_v52, %v16120_v32  ;;  %13089 = vmatprep.mubr.msk.bf16.mxu1 %vm21164_vm13, %v16139_v61  ;;  %v16509_v28 = vsel %vm21165_vm1, %v4013_v17, %v4014_v45  ;;  %v3553_v32 = vadd.f32 %v16353_v27, %v3514_v8 }
 0x208   : > { %21166 = vst [vmem:[#allocation34_spill] sm:$0xff] %v16492_v12  ;;  %v3461_v29 = vsel %vm21167_vm7, %v3417_v37, %v3418_v35  ;;  %vm21168_vm15 = vmmov %vm21164_vm13  ;;  %v265_v35 = vld [vmem:[%s14671_s29 + $0x2b8] sm:$0xff]  ;;  %v3550_v37 = vadd.f32 %v16353_v27, %v3511_v47  ;;  %vm21171_vm4 = vcmask 523264  }
 0x209   : > { %13055 = vmatprep.mubr.msk.bf16.mxu0 %vm21168_vm15, %v14574_v60  ;;  %v3513_v49 = vadd.f32 %v3461_v29, %v16130_v50  ;;  %vm21169_vm7 = vmmov %vm21165_vm1  ;;  %v12841_v50 = vpop.f32.mrb[76].mxu0  ;;  %v12875_v38 = vpop.f32.mrb[140].mxu1  ;;  %v349_v29 = vpack.c.bf16 %v265_v35, %v264_v43  ;;  %v3551_v45 = vadd.f32 %v16353_v27, %v3512_v14  ;;  %413 = vst.msk [vmem:[#allocation2 + $0x160] sm:$0xff] %vm21164_vm13, %v348_v20 }
 0x20a   : > { %v16513_v4 = vsel %vm21169_vm7, %v4012_v19, %v4013_v17  ;;  %v4018_v60 = vrot.slane %v12875_v38, 7  ;;  %v3169_v12 = vpop.f32.mrb[77].mxu0  ;;  %v3760_v19 = vpop.f32.mrb[141].mxu1  ;;  %3583 = vst.msk [vmem:[%s16379_s14 + $0x38] sm:$0xff] %vm21171_vm4, %v3550_v37  ;;  %vm21172_vm15 = vmmov %vm21171_vm4  ;;  %v3422_v30 = vrot.slane %v12841_v50, 1  ;;  %v21178_v50 = vld [vmem:[#allocation7_spill] sm:$0xff] }
 0x20b   : > { %21170 = vst [vmem:[#allocation35_spill] sm:$0xff] %v16513_v4  ;;  %v3552_v52 = vadd.f32 %v16353_v27, %v3513_v49  ;;  %3586 = vst.msk [vmem:[%s16379_s14 + $0x50] sm:$0xff] %vm21172_vm15, %v3553_v32  ;;  %v3420_v17 = vrot.slane %v3169_v12, 1  ;;  %v4016_v47 = vrot.slane %v3760_v19, 7  ;;  %v16525_v8 = vpop.f32.mrb[78].mxu0  ;;  %v16527_v4 = vpop.f32.mrb[142].mxu1 }
 0x20c   : > { %vm21173_vm1 = vmmov %vm21164_vm13  ;;  %v3423_v23 = vrot.slane %v16525_v8, 1  ;;  %v4019_v14 = vrot.slane %v16527_v4, 7  ;;  %v3172_v49 = vpop.f32.mrb[79].mxu0  ;;  %v3763_v12 = vpop.f32.mrb[143].mxu1  ;;  %v16539_v32 = vld [vmem:[#allocation2 + $0x110] sm:$0xff]  ;;  %vm21177_vm15 = vcmp.lt.s32.totalorder %v15063_v21, 1 }
 0x20d   : > { %414 = vst.msk [vmem:[#allocation2 + $0x168] sm:$0xff] %vm21173_vm1, %v349_v29  ;;  %vm21174_vm7 = vmmov %vm21171_vm4  ;;  %v3421_v35 = vrot.slane %v3172_v49, 1  ;;  %v4017_v37 = vrot.slane %v3763_v12, 7  ;;  %v16543_v38 = vsel %vm21177_vm15, %v4015_v6, %v4016_v47  ;;  %v14575_v29 = vld [vmem:[#allocation2 + $0xf8] sm:$0xff]  ;;  %v266_v8 = vld [vmem:[%s14671_s29 + $0x2c0] sm:$0xff] }
 0x20e   : > { %3584 = vst.msk [vmem:[%s16379_s14 + $0x40] sm:$0xff] %vm21174_vm7, %v3551_v45  ;;  %vm21175_vm2 = vmmov %vm21171_vm4  ;;  %vm21176_vm4 = vcmp.lt.s32.totalorder %v15063_v21, 7  ;;  %13056 = vmatmul.mubr.msk.bf16.gmra.mrb[184].mxu0 %vm21173_vm1, %v14575_v29  ;;  %v267_v49 = vld [vmem:[%s14671_s29 + $0x2c8] sm:$0xff] }
 0x20f   : > { %3585 = vst.msk [vmem:[%s16379_s14 + $0x48] sm:$0xff] %vm21175_vm2, %v3552_v52  ;;  %v3459_v43 = vsel %vm21176_vm4, %v3419_v11, %v3420_v17  ;;  %vm21179_vm2 = vnez %v21178_v50  ;;  %vm21180_vm13 = vmmov %vm21176_vm4  ;;  %13059 = vmatprep.mubr.msk.bf16.mxu0 %vm21173_vm1, %v16139_v61  ;;  %v268_v61 = vld [vmem:[%s14671_s29 + $0x2d0] sm:$0xff] }
 0x210   : > { %v3483_v20 = vsel %vm21179_vm2, %v3459_v43, 0.0  ;;  %v3456_v4 = vsel %vm21180_vm13, %v3422_v30, %v3423_v23  ;;  %vm21181_vm7 = vmmov %vm21173_vm1  ;;  %v3458_v19 = vsel %vm21180_vm13, %v3420_v17, %v3421_v35  ;;  %v269_v17 = vld [vmem:[%s14671_s29 + $0x2d8] sm:$0xff] }
 0x211   : > { %13090 = vmatmul.mubr.msk.bf16.gmra.mrb[184].mxu1 %vm21181_vm7, %v16170_v0  ;;  %vm21182_vm4 = vmmov %vm21177_vm15  ;;  %v3515_v6 = vadd.f32 %v3483_v20, %v16122_v13  ;;  %v3518_v45 = vadd.f32 %v3456_v4, %v16164_v41  ;;  %v3516_v12 = vadd.f32 %v3458_v19, %v16152_v48  ;;  %v350_v20 = vpack.c.bf16 %v267_v49, %v266_v8 }
 0x212   : > { %v16554_v11 = vsel %vm21182_vm4, %v4018_v60, %v4019_v14  ;;  %vm21184_vm15 = vmmov %vm21180_vm13  ;;  %v16572_v13 = vsel %vm21182_vm4, %v4017_v37, %v4018_v60  ;;  %v351_v4 = vpack.c.bf16 %v269_v17, %v268_v61  ;;  %vm21188_vm13 = vcmask 523264  }
 0x213   : > { %21183 = vst [vmem:[#allocation36_spill] sm:$0xff] %v16554_v11  ;;  %v3457_v52 = vsel %vm21184_vm15, %v3421_v35, %v3422_v30  ;;  %vm21185_vm7 = vmmov %vm21173_vm1  ;;  %v3554_v30 = vadd.f32 %v16353_v27, %v3515_v6  ;;  %v3557_v48 = vadd.f32 %v16353_v27, %v3518_v45  ;;  %v12879_v35 = vpop.f32.mrb[144].mxu1  ;;  %v3555_v60 = vadd.f32 %v16353_v27, %v3516_v12 }
 0x214   : > { %v3517_v43 = vadd.f32 %v3457_v52, %v16162_v3  ;;  %13093 = vmatprep.mubr.msk.bf16.mxu1 %vm21185_vm7, %v16539_v32  ;;  %vm21186_vm15 = vmmov %vm21182_vm4  ;;  %v12845_v3 = vpop.f32.mrb[80].mxu0  ;;  %v4022_v52 = vrot.slane %v12879_v35, 7  ;;  %415 = vst.msk [vmem:[#allocation2 + $0x170] sm:$0xff] %vm21185_vm7, %v350_v20 }
 0x215   : > { %v16576_v41 = vsel %vm21186_vm15, %v4016_v47, %v4017_v37  ;;  %v3185_v19 = vpop.f32.mrb[81].mxu0  ;;  %v3776_v47 = vpop.f32.mrb[145].mxu1  ;;  %3587 = vst.msk [vmem:[%s16379_s14 + $0x58] sm:$0xff] %vm21188_vm13, %v3554_v30  ;;  %vm21189_vm1 = vmmov %vm21188_vm13  ;;  %v3426_v8 = vrot.slane %v12845_v3, 1  ;;  %vm21193_vm13 = vcmp.lt.s32.totalorder %v15063_v21, 7 }
 0x216   : > { %21187 = vst [vmem:[#allocation37_spill] sm:$0xff] %v16576_v41  ;;  %v3556_v29 = vadd.f32 %v16353_v27, %v3517_v43  ;;  %3590 = vst.msk [vmem:[%s16379_s14 + $0x70] sm:$0xff] %vm21189_vm1, %v3557_v48  ;;  %v3424_v37 = vrot.slane %v3185_v19, 1  ;;  %v4020_v6 = vrot.slane %v3776_v47, 7  ;;  %v12846_v45 = vpop.f32.mrb[82].mxu0  ;;  %v12880_v11 = vpop.f32.mrb[146].mxu1 }
 0x217   : > { %v16588_v41 = vld [vmem:[#allocation2 + $0x118] sm:$0xff]  ;;  %vm21190_vm4 = vmmov %vm21185_vm7  ;;  %v3427_v49 = vrot.slane %v12846_v45, 1  ;;  %v4023_v12 = vrot.slane %v12880_v11, 7  ;;  %v3188_v43 = vpop.f32.mrb[83].mxu0  ;;  %v3779_v61 = vpop.f32.mrb[147].mxu1  ;;  %vm21195_vm7 = vnez %v21014_v2 }
 0x218   : > { %416 = vst.msk [vmem:[#allocation2 + $0x178] sm:$0xff] %vm21190_vm4, %v351_v4  ;;  %vm21191_vm15 = vmmov %vm21189_vm1  ;;  %v3455_v17 = vsel %vm21193_vm13, %v3423_v23, %v3424_v37  ;;  %v3425_v30 = vrot.slane %v3188_v43, 1  ;;  %v4021_v48 = vrot.slane %v3779_v61, 7 }
 0x219   : > { %3588 = vst.msk [vmem:[%s16379_s14 + $0x60] sm:$0xff] %vm21191_vm15, %v3555_v60  ;;  %vm21192_vm0 = vmmov %vm21189_vm1  ;;  %vm21194_vm1 = vcmp.lt.s32.totalorder %v15063_v21, 1  ;;  %v3487_v20 = vsel %vm21195_vm7, %v3455_v17, 0.0 }
 0x21a   : > { %3589 = vst.msk [vmem:[%s16379_s14 + $0x68] sm:$0xff] %vm21192_vm0, %v3556_v29  ;;  %v16600_v35 = vsel %vm21194_vm1, %v4019_v14, %v4020_v6  ;;  %vm21196_vm4 = vmmov %vm21193_vm13  ;;  %vm21197_vm0 = vcmask 23552   ;;  %v3519_v11 = vadd.f32 %v3487_v20, %v16154_v10 }
 0x21b   : > { %v3452_v4 = vsel %vm21196_vm4, %v3426_v8, %v3427_v49  ;;  %13060 = vmatmul.mubr.msk.bf16.gmra.mrb[188].mxu0 %vm21197_vm0, %v16170_v0  ;;  %vm21198_vm15 = vmmov %vm21197_vm0 }
 0x21c   : > { %13094 = vmatmul.mubr.msk.bf16.gmra.mrb[188].mxu1 %vm21198_vm15, %v16588_v41  ;;  %vm21199_vm13 = vmmov %vm21194_vm1  ;;  %v3522_v14 = vadd.f32 %v3452_v4, %v16197_v57  ;;  %v3558_v19 = vadd.f32 %v16353_v27, %v3519_v11 }
 0x21d   : > { %v16612_v23 = vsel %vm21199_vm13, %v4022_v52, %v4023_v12  ;;  %vm21200_vm1 = vmmov %vm21196_vm4  ;;  %13133 = vmatprep.mubr.msk.bf16.mxu1 %vm21197_vm0, %v16176_v42  ;;  %v16632_v57 = vsel %vm21199_vm13, %v4020_v6, %v4021_v48 }
 0x21e   : > { %v3453_v3 = vsel %vm21200_vm1, %v3425_v30, %v3426_v8  ;;  %vm21201_vm14 = vmmov %vm21200_vm1  ;;  %v3561_v47 = vadd.f32 %v16353_v27, %v3522_v14 }
 0x21f   : > { %v3454_v60 = vsel %vm21201_vm14, %v3424_v37, %v3425_v30  ;;  %vm21202_vm4 = vmmov %vm21197_vm0  ;;  %v3521_v29 = vadd.f32 %v3453_v3, %v16195_v31  ;;  %v12883_v37 = vpop.f32.mrb[148].mxu1  ;;  %vm21204_vm14 = vcmask 523264  }
 0x220   : > { %13099 = vmatprep.mubr.msk.bf16.mxu0 %vm21202_vm4, %v16176_v42  ;;  %v3520_v0 = vadd.f32 %v3454_v60, %v16186_v25  ;;  %vm21203_vm15 = vmmov %vm21199_vm13  ;;  %v12849_v25 = vpop.f32.mrb[84].mxu0  ;;  %v11631_v42 = vld [vmem:[%s20657_s1 + $0x2] sm:$0x3]  ;;  %v4026_v45 = vrot.slane %v12883_v37, 7  ;;  %v3792_v6 = vpop.f32.mrb[149].mxu1  ;;  %3591 = vst.msk [vmem:[%s16379_s14 + $0x78] sm:$0xff] %vm21204_vm14, %v3558_v19 }
 0x221   : > { %v16628_v10 = vsel %vm21203_vm15, %v4021_v48, %v4022_v52  ;;  %v3560_v52 = vadd.f32 %v16353_v27, %v3521_v29  ;;  %v3201_v8 = vpop.f32.mrb[85].mxu0  ;;  %vm21205_vm1 = vmmov %vm21204_vm14  ;;  %v4024_v61 = vrot.slane %v3792_v6, 7  ;;  %v12884_v30 = vpop.f32.mrb[150].mxu1  ;;  %v11698_v48 = vld [vmem:[%s20657_s1 + $0x6] sm:$0x3]  ;;  %v3430_v20 = vrot.slane %v12849_v25, 1 }
 0x222   : > { %v3559_v31 = vadd.f32 %v16353_v27, %v3520_v0  ;;  %3594 = vst.msk [vmem:[%s16379_s14 + $0x90] sm:$0xff] %vm21205_vm1, %v3561_v47  ;;  %v3428_v43 = vrot.slane %v3201_v8, 1  ;;  %v12850_v17 = vpop.f32.mrb[86].mxu0  ;;  %vm21206_vm4 = vmmov %vm21205_vm1  ;;  %v4027_v11 = vrot.slane %v12884_v30, 7  ;;  %v3795_v3 = vpop.f32.mrb[151].mxu1  ;;  %v16653_v60 = vand.u32 %v11631_v42, %v14644_v5 }
 0x223   : > { %vm21207_vm0 = vmmov %vm21205_vm1  ;;  %v3431_v4 = vrot.slane %v12850_v17, 1  ;;  %v3204_v14 = vpop.f32.mrb[87].mxu0  ;;  %vm21208_vm15 = vcmp.lt.s32.totalorder %v15063_v21, 7  ;;  %v4025_v19 = vrot.slane %v3795_v3, 7  ;;  %v16659_v47 = vsel %vm21199_vm13, %v4023_v12, %v4024_v61  ;;  %v12887_v17 = vpop.f32.mrb[152].mxu1 }
 0x224   : > { %3592 = vst.msk [vmem:[%s16379_s14 + $0x80] sm:$0xff] %vm21206_vm4, %v3559_v31  ;;  %v3451_v0 = vsel %vm21208_vm15, %v3427_v49, %v3428_v43  ;;  %v3429_v29 = vrot.slane %v3204_v14, 1  ;;  %vm21209_vm14 = vnez %v21022_v56  ;;  %vm21210_vm1 = vmmov %vm21208_vm15  ;;  %vm21211_vm4 = vcmask 23552  }
 0x225   : > { %3593 = vst.msk [vmem:[%s16379_s14 + $0x88] sm:$0xff] %vm21207_vm0, %v3560_v52  ;;  %v3491_v37 = vsel %vm21209_vm14, %v3451_v0, 0.0  ;;  %v3448_v25 = vsel %vm21210_vm1, %v3430_v20, %v3431_v4  ;;  %13100 = vmatmul.mubr.msk.bf16.vlgmr.msra.gmra.mrb[192].mxu0 %vm21211_vm4, %v16206_v16  ;;  %vm21212_vm0 = vmmov %vm21211_vm4  ;;  %v16670_v49 = vand.u32 %v11698_v48, %v14644_v5  ;;  %v3808_v48 = vpop.f32.mrb[153].mxu1 }
 0x226   : > { %13134 = vmatmul.mubr.msk.bf16.vlgmr.msra.gmra.mrb[192].mxu1 %vm21212_vm0, %v16206_v16  ;;  %vm21213_vm15 = vmmov %vm21199_vm13  ;;  %v3523_v12 = vadd.f32 %v3491_v37, %v16188_v34  ;;  %v3526_v31 = vadd.f32 %v3448_v25, %v16241_v18  ;;  %v3450_v8 = vsel %vm21210_vm1, %v3428_v43, %v3429_v29  ;;  %13166 = vmatpush3.bf16.msra.mxu0 %v16216_v9  ;;  %v12853_v9 = vpop.f32.mrb[88].mxu0 }
 0x227   : > { %v16674_v42 = vsel %vm21213_vm15, %v4026_v45, %v4027_v11  ;;  %vm21214_vm13 = vmmov %vm21210_vm1  ;;  %v3524_v16 = vadd.f32 %v3450_v8, %v16230_v58  ;;  %13200 = vmatpush3.bf16.msra.mxu1 %v16228_v33  ;;  %13233 = vmatprep.subr.bf16.mxu0 %v16653_v60  ;;  %v3217_v30 = vpop.f32.mrb[89].mxu0  ;;  %vm21219_vm1 = vcmask 523264   ;;  %v3434_v3 = vrot.slane %v12853_v9, 1 }
 0x228   : > { %v3449_v52 = vsel %vm21214_vm13, %v3429_v29, %v3430_v20  ;;  %vm21215_vm4 = vmmov %vm21212_vm0  ;;  %v3562_v18 = vadd.f32 %v16353_v27, %v3523_v12  ;;  %v3565_v43 = vadd.f32 %v16353_v27, %v3526_v31  ;;  %13301 = vmatprep.subr.bf16.mxu1 %v16670_v49  ;;  %v4028_v20 = vrot.slane %v3808_v48, 7  ;;  %v12854_v14 = vpop.f32.mrb[90].mxu0 }
 0x229   : > { %v3525_v6 = vadd.f32 %v3449_v52, %v16239_v7  ;;  %13103 = vmatprep.mubr.msk.bf16.mxu0 %vm21215_vm4, %v16225_v54  ;;  %vm21216_vm0 = vmmov %vm21213_vm15  ;;  %v3563_v58 = vadd.f32 %v16353_v27, %v3524_v16  ;;  %v3435_v0 = vrot.slane %v12854_v14, 1 }
 0x22a   : > { %v16690_v34 = vsel %vm21216_vm0, %v4025_v19, %v4026_v45  ;;  %vm21217_vm15 = vmmov %vm21215_vm4  ;;  %v4030_v45 = vrot.slane %v12887_v17, 7  ;;  %3595 = vst.msk [vmem:[%s16379_s14 + $0x98] sm:$0xff] %vm21219_vm1, %v3562_v18 }
 0x22b   : > { %13137 = vmatprep.mubr.msk.bf16.mxu1 %vm21217_vm15, %v16225_v54  ;;  %vm21218_vm13 = vmmov %vm21216_vm0  ;;  %v3564_v7 = vadd.f32 %v16353_v27, %v3525_v6  ;;  %v3432_v54 = vrot.slane %v3217_v30, 1 }
 0x22c   : > { %v16698_v33 = vsel %vm21218_vm13, %v4024_v61, %v4025_v19  ;;  %vm21220_vm4 = vmmov %vm21219_vm1  ;;  %v12888_v61 = vpop.f32.mrb[154].mxu1  ;;  %v3220_v19 = vpop.f32.mrb[91].mxu0  ;;  %vm21223_vm13 = vcmp.lt.s32.totalorder %v15063_v21, 7 }
 0x22d   : > { %3598 = vst.msk [vmem:[%s16379_s14 + $0xb0] sm:$0xff] %vm21220_vm4, %v3565_v43  ;;  %vm21221_vm0 = vmmov %vm21219_vm1  ;;  %v4031_v29 = vrot.slane %v12888_v61, 7  ;;  %v3811_v37 = vpop.f32.mrb[155].mxu1  ;;  %v3447_v25 = vsel %vm21223_vm13, %v3431_v4, %v3432_v54  ;;  %v3433_v12 = vrot.slane %v3220_v19, 1  ;;  %vm21224_vm1 = vcmp.lt.s32.totalorder %v15063_v21, 1 }
 0x22e   : > { %3596 = vst.msk [vmem:[%s16379_s14 + $0xa0] sm:$0xff] %vm21221_vm0, %v3563_v58  ;;  %vm21222_vm15 = vmmov %vm21221_vm0  ;;  %v4029_v31 = vrot.slane %v3811_v37, 7  ;;  %v16716_v52 = vsel %vm21224_vm1, %v4027_v11, %v4028_v20  ;;  %vm21225_vm4 = vnez %v21032_v1 }
 0x22f   : > { %3597 = vst.msk [vmem:[%s16379_s14 + $0xa8] sm:$0xff] %vm21222_vm15, %v3564_v7  ;;  %v3495_v8 = vsel %vm21225_vm4, %v3447_v25, 0.0  ;;  %vm21226_vm0 = vmmov %vm21223_vm13  ;;  %vm21227_vm15 = vcmask 23552   ;;  %v12891_v7 = vpop.f32.mrb[156].mxu1 }
 0x230   : > { %v3444_v16 = vsel %vm21226_vm0, %v3434_v3, %v3435_v0  ;;  %13104 = vmatmul.mubr.msk.bf16.gmra.mrb[196].mxu0 %vm21227_vm15, %v16251_v40  ;;  %vm21228_vm14 = vmmov %vm21227_vm15  ;;  %v3527_v6 = vadd.f32 %v3495_v8, %v16232_v63  ;;  %v3824_v48 = vpop.f32.mrb[157].mxu1 }
 0x231   : > { %13138 = vmatmul.mubr.msk.bf16.gmra.mrb[196].mxu1 %vm21228_vm14, %v16251_v40  ;;  %vm21229_vm13 = vmmov %vm21224_vm1  ;;  %v3530_v11 = vadd.f32 %v3444_v16, %v16279_v36  ;;  %v12892_v14 = vpop.f32.mrb[158].mxu1 }
 0x232   : > { %v16728_v4 = vsel %vm21229_vm13, %v4030_v45, %v4031_v29  ;;  %vm21230_vm1 = vmmov %vm21226_vm0  ;;  %v16748_v36 = vsel %vm21229_vm13, %v4028_v20, %v4029_v31  ;;  %v3566_v17 = vadd.f32 %v16353_v27, %v3527_v6  ;;  %v4035_v37 = vrot.slane %v12892_v14, 7 }
 0x233   : > { %v3445_v18 = vsel %vm21230_vm1, %v3433_v12, %v3434_v3  ;;  %vm21231_vm4 = vmmov %vm21226_vm0  ;;  %v3569_v58 = vadd.f32 %v16353_v27, %v3530_v11  ;;  %v4034_v3 = vrot.slane %v12891_v7, 7  ;;  %v21250_v7 = vld [vmem:[#allocation23_spill] sm:$0xff] }
 0x234   : > { %v3446_v43 = vsel %vm21231_vm4, %v3432_v54, %v3433_v12  ;;  %vm21232_vm0 = vmmov %vm21228_vm14  ;;  %v3529_v9 = vadd.f32 %v3445_v18, %v16277_v44  ;;  %vm21235_vm4 = vcmask 523264   ;;  %v4032_v54 = vrot.slane %v3824_v48, 7  ;;  %v3827_v12 = vpop.f32.mrb[159].mxu1  ;;  %v21254_v48 = vld [vmem:[#allocation20_spill] sm:$0xff] }
 0x235   : > { %13107 = vmatprep.mubr.msk.bf16.mxu0 %vm21232_vm0, %v16257_v22  ;;  %v3528_v40 = vadd.f32 %v3446_v43, %v16266_v24  ;;  %vm21233_vm14 = vmmov %vm21232_vm0  ;;  %v12857_v24 = vpop.f32.mrb[92].mxu0  ;;  %3599 = vst.msk [vmem:[%s16379_s14 + $0xb8] sm:$0xff] %vm21235_vm4, %v3566_v17  ;;  %v4033_v16 = vrot.slane %v3827_v12, 7 }
 0x236   : > { %13141 = vmatprep.mubr.msk.bf16.mxu1 %vm21233_vm14, %v16257_v22  ;;  %vm21234_vm15 = vmmov %vm21229_vm13  ;;  %v3568_v22 = vadd.f32 %v16353_v27, %v3529_v9  ;;  %v3233_v30 = vpop.f32.mrb[93].mxu0  ;;  %v3438_v61 = vrot.slane %v12857_v24, 1  ;;  %v16766_v6 = vsel %vm21229_vm13, %v4031_v29, %v4032_v54 }
 0x237   : > { %v16744_v63 = vsel %vm21234_vm15, %v4029_v31, %v4030_v45  ;;  %v3567_v44 = vadd.f32 %v16353_v27, %v3528_v40  ;;  %vm21236_vm1 = vmmov %vm21235_vm4  ;;  %v3436_v45 = vrot.slane %v3233_v30, 1  ;;  %v12858_v20 = vpop.f32.mrb[94].mxu0  ;;  %vm21239_vm15 = vcmp.lt.s32.totalorder %v15063_v21, 7 }
 0x238   : > { %3602 = vst.msk [vmem:[%s16379_s14 + $0xd0] sm:$0xff] %vm21236_vm1, %v3569_v58  ;;  %vm21237_vm0 = vmmov %vm21236_vm1  ;;  %v3439_v19 = vrot.slane %v12858_v20, 1  ;;  %v3236_v25 = vpop.f32.mrb[95].mxu0  ;;  %v21242_v40 = vrot.slane %v16330_v53, 1  ;;  %v21249_v58 = vld [vmem:[#allocation18_spill] sm:$0xff]  ;;  %v21252_v53 = vld [vmem:[#allocation27_spill] sm:$0xff] }
 0x239   : > { %3600 = vst.msk [vmem:[%s16379_s14 + $0xc0] sm:$0xff] %vm21237_vm0, %v3567_v44  ;;  %vm21238_vm14 = vmmov %vm21237_vm0  ;;  %v3443_v31 = vsel %vm21239_vm15, %v3435_v0, %v3436_v45  ;;  %v3437_v8 = vrot.slane %v3236_v25, 1  ;;  %vm21244_vm0 = vcmask 23552   ;;  %v21246_v0 = vld [vmem:[#allocation14_spill] sm:$0xff] }
 0x23a   : > { %3601 = vst.msk [vmem:[%s16379_s14 + $0xc8] sm:$0xff] %vm21238_vm14, %v3568_v22  ;;  %v3499_v18 = vsel %vm21042_vm9, %v3443_v31, 0.0  ;;  %vm21241_vm4 = vmmov %vm21239_vm15  ;;  %13108 = vmatmul.mubr.msk.bf16.gmra.mrb[200].mxu0 %vm21244_vm0, %v16288_v59  ;;  %v21247_v29 = vrot.slane %v21246_v0, 7  ;;  %v21259_v31 = vld [vmem:[#allocation19_spill] sm:$0xff] }
 0x23b   : > { %v3440_v43 = vsel %vm21241_vm4, %v3438_v61, %v3439_v19  ;;  %vm21243_vm1 = vmmov %vm21241_vm4  ;;  %v3531_v24 = vadd.f32 %v3499_v18, %v21249_v58 }
 0x23c   : > { %v3471_v9 = vsel %vm21243_vm1, %v3439_v19, %v21242_v40  ;;  %vm21245_vm14 = vmmov %vm21244_vm0  ;;  %v3534_v22 = vadd.f32 %v3440_v43, %v21252_v53  ;;  %v21258_v19 = vld [vmem:[#allocation26_spill] sm:$0xff]  ;;  %v12897_v43 = vpop.f32.mrb[96].mxu0 }
 0x23d   : > { %13142 = vmatmul.mubr.msk.bf16.gmra.mrb[200].mxu1 %vm21245_vm14, %v16288_v59  ;;  %vm21248_vm15 = vmmov %vm21229_vm13  ;;  %vm21251_vm13 = vnez %v21250_v7  ;;  %v21256_v59 = vld [vmem:[#allocation25_spill] sm:$0xff]  ;;  %v3570_v12 = vadd.f32 %v16353_v27, %v3531_v24 }
 0x23e   : > { %v4067_v17 = vsel %vm21248_vm15, %v4035_v37, %v21247_v29  ;;  %v3503_v44 = vsel %vm21251_vm13, %v3471_v9, 0.0  ;;  %vm21253_vm4 = vmmov %vm21243_vm1  ;;  %13145 = vmatprep.mubr.msk.bf16.mxu1 %vm21244_vm0, %v21254_v48  ;;  %v16803_v40 = vsel %vm21248_vm15, %v4033_v16, %v4034_v3 }
 0x23f   : > { %v3441_v30 = vsel %vm21253_vm4, %v3437_v8, %v3438_v61  ;;  %vm21255_vm1 = vmmov %vm21244_vm0  ;;  %v3535_v20 = vadd.f32 %v3503_v44, %v21256_v59  ;;  %v3573_v61 = vadd.f32 %v16353_v27, %v3534_v22  ;;  %v4266_v44 = vrot.slane %v12897_v43, 1 }
 0x240   : > { %13111 = vmatprep.mubr.msk.bf16.mxu0 %vm21255_vm1, %v21254_v48  ;;  %vm21257_vm14 = vmmov %vm21253_vm4  ;;  %v3533_v25 = vadd.f32 %v3441_v30, %v21258_v19  ;;  %vm21261_vm1 = vcmask 523264   ;;  %v21268_v30 = vld [vmem:[#allocation12_spill] sm:$0xff]  ;;  %v4068_v59 = vsel %vm15444_vm3, %v4067_v17, 0.0 }
 0x241   : > { %v3442_v14 = vsel %vm21257_vm14, %v3436_v45, %v3437_v8  ;;  %v3574_v9 = vadd.f32 %v16353_v27, %v3535_v20  ;;  %v16807_v8 = vpop.f32.mrb[97].mxu0  ;;  %vm21260_vm4 = vmmov %vm21248_vm15  ;;  %3603 = vst.msk [vmem:[%s16379_s14 + $0xd8] sm:$0xff] %vm21261_vm1, %v3570_v12  ;;  %v21275_v19 = vld [vmem:[#allocation28_spill] sm:$0xff]  ;;  %v21279_v12 = vld [vmem:[#allocation30_spill] sm:$0xff] }
 0x242   : > { %v3532_v18 = vadd.f32 %v3442_v14, %v21259_v31  ;;  %v3572_v45 = vadd.f32 %v16353_v27, %v3533_v25  ;;  %v16811_v0 = vsel %vm21260_vm4, %v4032_v54, %v4033_v16  ;;  %vm21262_vm0 = vmmov %vm21261_vm1  ;;  %v12898_v58 = vpop.f32.mrb[98].mxu0  ;;  %v20735_v54 = vrot.slane %v16807_v8, 1 }
 0x243   : > { %3606 = vst.msk [vmem:[%s16379_s14 + $0xf0] sm:$0xff] %vm21262_vm0, %v3573_v61  ;;  %vm21263_vm14 = vmmov %vm21260_vm4  ;;  %v4267_v53 = vrot.slane %v12898_v58, 1  ;;  %v3880_v22 = vpop.f32.mrb[99].mxu0  ;;  %vm21267_vm1 = vcmp.lt.s32.totalorder %v15063_v21, 7 }
 0x244   : > { %v3571_v29 = vadd.f32 %v16353_v27, %v3532_v18  ;;  %v16820_v24 = vsel %vm21263_vm14, %v4034_v3, %v4035_v37  ;;  %vm21264_vm15 = vmmov %vm21262_vm0  ;;  %v4265_v16 = vrot.slane %v3880_v22, 1  ;;  %v21271_v3 = vld [vmem:[#allocation15_spill] sm:$0xff]  ;;  %v12901_v17 = vpop.f32.mrb[100].mxu0 }
 0x245   : > { %3607 = vst.msk [vmem:[%s16379_s14 + $0xf8] sm:$0xff] %vm21264_vm15, %v3574_v9  ;;  %vm21265_vm13 = vmmov %vm21262_vm0  ;;  %v4324_v27 = vsel %vm21267_vm1, %v4266_v44, %v4267_v53  ;;  %v3893_v31 = vpop.f32.mrb[101].mxu0  ;;  %v4270_v9 = vrot.slane %v12901_v17, 1 }
 0x246   : > { %3605 = vst.msk [vmem:[%s16379_s14 + $0xe8] sm:$0xff] %vm21265_vm13, %v3572_v45  ;;  %vm21266_vm4 = vmmov %vm21262_vm0  ;;  %vm21269_vm0 = vcmask 23552   ;;  %v16836_v37 = vadd.f32 %v4324_v27, %v21271_v3  ;;  %v4268_v18 = vrot.slane %v3893_v31, 1  ;;  %v12902_v43 = vpop.f32.mrb[102].mxu0  ;;  %v21283_v3 = vld [vmem:[#allocation31_spill] sm:$0xff] }
 0x247   : > { %3604 = vst.msk [vmem:[%s16379_s14 + $0xe0] sm:$0xff] %vm21266_vm4, %v3571_v29  ;;  %13112 = vmatmul.mubr.msk.bf16.gmra.mrb[204].mxu0 %vm21269_vm0, %v21268_v30  ;;  %vm21270_vm14 = vmmov %vm21269_vm0  ;;  %v4271_v45 = vrot.slane %v12902_v43, 1  ;;  %v3896_v29 = vpop.f32.mrb[103].mxu0 }
 0x248   : > { %13146 = vmatmul.mubr.msk.bf16.gmra.mrb[204].mxu1 %vm21270_vm14, %v21268_v30  ;;  %vm21273_vm13 = vmmov %vm21267_vm1  ;;  %v4072_v30 = vsel %vm15115_vm6, %v16419_v51, 0.0  ;;  %v12905_v31 = vpop.f32.mrb[104].mxu0 }
 0x249   : > { %v4325_v20 = vsel %vm21273_vm13, %v4265_v16, %v4266_v44  ;;  %vm21274_vm15 = vmmov %vm21267_vm1  ;;  %v4269_v44 = vrot.slane %v3896_v29, 1 }
 0x24a   : > { %v4326_v14 = vsel %vm21274_vm15, %v20735_v54, %v4265_v16  ;;  %vm21276_vm4 = vmmov %vm21269_vm0  ;;  %v16853_v61 = vadd.f32 %v4325_v20, %v21279_v12  ;;  %v21290_v12 = vld [vmem:[#allocation33_spill] sm:$0xff] }
 0x24b   : > { %13115 = vmatprep.mubr.msk.bf16.mxu0 %vm21276_vm4, %v21275_v19  ;;  %vm21277_vm1 = vmmov %vm21269_vm0  ;;  %v16850_v25 = vadd.f32 %v4326_v14, %v4068_v59  ;;  %v21286_v59 = vld [vmem:[#allocation29_spill] sm:$0xff] }
 0x24c   : > { %13149 = vmatprep.mubr.msk.bf16.mxu1 %vm21277_vm1, %v21275_v19  ;;  %vm21280_vm0 = vmmov %vm21273_vm13 }
 0x24d   : > { %21278 = vst [vmem:[#allocation14_spill] sm:$0xff] %v16850_v25  ;;  %v4323_v58 = vsel %vm21280_vm0, %v4267_v53, %v4268_v18  ;;  %vm21281_vm14 = vmmov %vm21280_vm0  ;;  %v21326_v25 = vld [vmem:[#allocation13_spill] sm:$0xff] }
 0x24e   : > { %v4331_v22 = vsel %vm15111_vm5, %v4323_v58, 0.0  ;;  %v4320_v16 = vsel %vm21281_vm14, %v4270_v9, %v4271_v45  ;;  %vm21284_vm13 = vmmov %vm21277_vm1  ;;  %v4274_v58 = vrot.slane %v12905_v31, 1  ;;  %v14576_v31 = vld [vmem:[#allocation2 + $0x100] sm:$0xff] }
 0x24f   : > { %13116 = vmatmul.mubr.msk.bf16.gmra.mrb[208].mxu0 %vm21284_vm13, %v21283_v3  ;;  %vm21285_vm15 = vmmov %vm21277_vm1  ;;  %v16869_v20 = vadd.f32 %v4331_v22, %v21286_v59  ;;  %v16872_v53 = vadd.f32 %v4320_v16, %v16447_v62  ;;  %v3909_v62 = vpop.f32.mrb[105].mxu0  ;;  %v21297_v59 = vld [vmem:[#allocation32_spill] sm:$0xff] }
 0x250   : > { %13150 = vmatmul.mubr.msk.bf16.gmra.mrb[208].mxu1 %vm21285_vm15, %v21283_v3  ;;  %vm21287_vm4 = vmmov %vm21280_vm0  ;;  %v4272_v43 = vrot.slane %v3909_v62, 1  ;;  %v12906_v29 = vpop.f32.mrb[106].mxu0  ;;  %v21301_v62 = vld [vmem:[#allocation35_spill] sm:$0xff]  ;;  %v17218_v3 = vld [vmem:[#allocation2 + $0x170] sm:$0xff] }
 0x251   : > { %v4321_v14 = vsel %vm21287_vm4, %v4269_v44, %v4270_v9  ;;  %vm21288_vm1 = vmmov %vm21280_vm0  ;;  %v4275_v9 = vrot.slane %v12906_v29, 1  ;;  %v3912_v22 = vpop.f32.mrb[107].mxu0  ;;  %21378 = vst [vmem:[#allocation19_spill] sm:$0xff] %v17218_v3 }
 0x252   : > { %v4322_v19 = vsel %vm21288_vm1, %v4268_v18, %v4269_v44  ;;  %vm21289_vm0 = vmmov %vm21284_vm13  ;;  %v16883_v17 = vadd.f32 %v4321_v14, %v21290_v12  ;;  %v4273_v44 = vrot.slane %v3912_v22, 1 }
 0x253   : > { %13119 = vmatprep.mubr.msk.bf16.mxu0 %vm21289_vm0, %v16415_v46  ;;  %v16880_v51 = vadd.f32 %v4322_v19, %v4072_v30  ;;  %vm21291_vm14 = vmmov %vm21289_vm0 }
 0x254   : > { %13153 = vmatprep.mubr.msk.bf16.mxu1 %vm21291_vm14, %v16415_v46  ;;  %vm21292_vm13 = vmmov %vm21288_vm1  ;;  %v4076_v46 = vsel %vm15163_vm8, %v16481_v39, 0.0 }
 0x255   : > { %v4319_v18 = vsel %vm21292_vm13, %v4271_v45, %v4272_v43  ;;  %vm21293_vm15 = vmmov %vm21288_vm1 }
 0x256   : > { %v4335_v16 = vsel %vm21162_vm11, %v4319_v18, 0.0  ;;  %v4316_v30 = vsel %vm21293_vm15, %v4274_v58, %v4275_v9  ;;  %vm21295_vm4 = vmmov %vm21289_vm0 }
 0x257   : > { %13120 = vmatmul.mubr.msk.bf16.gmra.mrb[212].mxu0 %vm21295_vm4, %v16467_v15  ;;  %vm21296_vm1 = vmmov %vm21289_vm0  ;;  %v16901_v14 = vadd.f32 %v4335_v16, %v21297_v59  ;;  %v16904_v45 = vadd.f32 %v4316_v30, %v16509_v28 }
 0x258   : > { %13154 = vmatmul.mubr.msk.bf16.gmra.mrb[212].mxu1 %vm21296_vm1, %v16467_v15  ;;  %vm21298_vm0 = vmmov %vm21292_vm13  ;;  %v12909_v15 = vpop.f32.mrb[108].mxu0 }
 0x259   : > { %v4317_v19 = vsel %vm21298_vm0, %v4273_v44, %v4274_v58  ;;  %vm21299_vm14 = vmmov %vm21298_vm0  ;;  %v3925_v22 = vpop.f32.mrb[109].mxu0  ;;  %v4278_v16 = vrot.slane %v12909_v15, 1 }
 0x25a   : > { %v4318_v12 = vsel %vm21299_vm14, %v4272_v43, %v4273_v44  ;;  %vm21300_vm13 = vmmov %vm21296_vm1  ;;  %v16914_v29 = vadd.f32 %v4317_v19, %v21301_v62  ;;  %v4276_v28 = vrot.slane %v3925_v22, 1  ;;  %v12910_v18 = vpop.f32.mrb[110].mxu0  ;;  %v21308_v62 = vld [vmem:[#allocation34_spill] sm:$0xff] }
 0x25b   : > { %13123 = vmatprep.mubr.msk.bf16.mxu0 %vm21300_vm13, %v14576_v31  ;;  %v16911_v39 = vadd.f32 %v4318_v12, %v4076_v46  ;;  %vm21302_vm15 = vmmov %vm21296_vm1  ;;  %v4279_v58 = vrot.slane %v12910_v18, 1  ;;  %v3928_v30 = vpop.f32.mrb[111].mxu0  ;;  %v4080_v12 = vsel %vm15212_vm10, %v16543_v38, 0.0  ;;  %v270_v38 = vld [vmem:[%s14671_s29 + $0x2e0] sm:$0xff] }
 0x25c   : > { %13157 = vmatprep.mubr.msk.bf16.mxu1 %vm21302_vm15, %v14576_v31  ;;  %vm21303_vm4 = vmmov %vm21298_vm0  ;;  %v4277_v44 = vrot.slane %v3928_v30, 1  ;;  %v14577_v31 = vld [vmem:[#allocation2 + $0x108] sm:$0xff] }
 0x25d   : > { %v4315_v43 = vsel %vm21303_vm4, %v4275_v9, %v4276_v28  ;;  %vm21304_vm1 = vmmov %vm21298_vm0  ;;  %v271_v30 = vld [vmem:[%s14671_s29 + $0x2e8] sm:$0xff] }
 0x25e   : > { %v4339_v46 = vsel %vm21179_vm2, %v4315_v43, 0.0  ;;  %v4312_v59 = vsel %vm21304_vm1, %v4278_v16, %v4279_v58  ;;  %vm21306_vm0 = vmmov %vm21300_vm13 }
 0x25f   : > { %13124 = vmatmul.mubr.msk.bf16.gmra.mrb[216].mxu0 %vm21306_vm0, %v14577_v31  ;;  %vm21307_vm14 = vmmov %vm21306_vm0  ;;  %v16929_v9 = vadd.f32 %v4339_v46, %v21308_v62  ;;  %v16932_v15 = vadd.f32 %v4312_v59, %v16572_v13  ;;  %v352_v13 = vpack.c.bf16 %v271_v30, %v270_v38  ;;  %v272_v46 = vld [vmem:[%s14671_s29 + $0x2f0] sm:$0xff]  ;;  %v273_v59 = vld [vmem:[%s14671_s29 + $0x2f8] sm:$0xff] }
 0x260   : > { %13158 = vmatmul.mubr.msk.bf16.gmra.mrb[216].mxu1 %vm21307_vm14, %v14577_v31  ;;  %vm21309_vm13 = vmmov %vm21304_vm1  ;;  %v21312_v31 = vld [vmem:[#allocation37_spill] sm:$0xff]  ;;  %v353_v62 = vpack.c.bf16 %v273_v59, %v272_v46  ;;  %v21319_v59 = vld [vmem:[#allocation36_spill] sm:$0xff] }
 0x261   : > { %v4313_v22 = vsel %vm21309_vm13, %v4277_v44, %v4278_v16  ;;  %vm21310_vm15 = vmmov %vm21304_vm1  ;;  %v12913_v16 = vpop.f32.mrb[112].mxu0  ;;  %417 = vst.msk [vmem:[#allocation2 + $0x180] sm:$0xff] %vm21306_vm0, %v352_v13  ;;  %v4084_v13 = vsel %vm15261_vm12, %v16600_v35, 0.0 }
 0x262   : > { %v4314_v18 = vsel %vm21310_vm15, %v4276_v28, %v4277_v44  ;;  %vm21311_vm4 = vmmov %vm21306_vm0  ;;  %v16945_v54 = vadd.f32 %v4313_v22, %v21312_v31  ;;  %v3941_v50 = vpop.f32.mrb[113].mxu0  ;;  %v16953_v22 = vld [vmem:[#allocation2 + $0x100] sm:$0xff] }
 0x263   : > { %13127 = vmatprep.mubr.msk.bf16.mxu0 %vm21311_vm4, %v16539_v32  ;;  %v16942_v43 = vadd.f32 %v4314_v18, %v4080_v12  ;;  %vm21313_vm1 = vmmov %vm21306_vm0  ;;  %v4280_v28 = vrot.slane %v3941_v50, 1  ;;  %v12914_v44 = vpop.f32.mrb[114].mxu0  ;;  %v4282_v12 = vrot.slane %v12913_v16, 1 }
 0x264   : > { %13161 = vmatprep.mubr.msk.bf16.mxu1 %vm21313_vm1, %v16539_v32  ;;  %vm21314_vm14 = vmmov %vm21306_vm0  ;;  %v4283_v18 = vrot.slane %v12914_v44, 1  ;;  %v3944_v55 = vpop.f32.mrb[115].mxu0 }
 0x265   : > { %418 = vst.msk [vmem:[#allocation2 + $0x188] sm:$0xff] %vm21314_vm14, %v353_v62  ;;  %v4311_v31 = vsel %vm21309_vm13, %v4279_v58, %v4280_v28  ;;  %v4281_v38 = vrot.slane %v3944_v55, 1  ;;  %vm21315_vm15 = vmmov %vm21309_vm13 }
 0x266   : > { %v4343_v30 = vsel %vm21195_vm7, %v4311_v31, 0.0  ;;  %v4308_v46 = vsel %vm21315_vm15, %v4282_v12, %v4283_v18  ;;  %vm21317_vm4 = vmmov %vm21306_vm0  ;;  %v12917_v31 = vpop.f32.mrb[116].mxu0 }
 0x267   : > { %13128 = vmatmul.mubr.msk.bf16.gmra.mrb[220].mxu0 %vm21317_vm4, %v16588_v41  ;;  %vm21318_vm1 = vmmov %vm21306_vm0  ;;  %v16969_v16 = vadd.f32 %v4343_v30, %v21319_v59  ;;  %v16972_v55 = vadd.f32 %v4308_v46, %v16628_v10  ;;  %v3957_v10 = vpop.f32.mrb[117].mxu0 }
 0x268   : > { %13162 = vmatmul.mubr.msk.bf16.gmra.mrb[220].mxu1 %vm21318_vm1, %v16588_v41  ;;  %vm21320_vm0 = vmmov %vm21309_vm13  ;;  %v4284_v30 = vrot.slane %v3957_v10, 1  ;;  %v12918_v46 = vpop.f32.mrb[118].mxu0 }
 0x269   : > { %v4309_v58 = vsel %vm21320_vm0, %v4281_v38, %v4282_v12  ;;  %vm21321_vm14 = vmmov %vm21320_vm0  ;;  %v11681_v12 = vld [vmem:[%s20657_s1 + $0x8] sm:$0x3]  ;;  %v3960_v59 = vpop.f32.mrb[119].mxu0 }
 0x26a   : > { %v4310_v62 = vsel %vm21321_vm14, %v4280_v28, %v4281_v38  ;;  %vm21322_vm13 = vmmov %vm21318_vm1  ;;  %v16983_v44 = vadd.f32 %v4309_v58, %v16632_v57  ;;  %v16990_v28 = vld [vmem:[#allocation2 + $0x108] sm:$0xff]  ;;  %v4287_v57 = vrot.slane %v12918_v46, 1  ;;  %v16998_v2 = vand.u32 %v11681_v12, %v14644_v5 }
 0x26b   : > { %13167 = vmatprep.mubr.msk.bf16.mxu0 %vm21322_vm13, %v16953_v22  ;;  %v16980_v35 = vadd.f32 %v4310_v62, %v4084_v13  ;;  %vm21323_vm15 = vmmov %vm21318_vm1  ;;  %v11715_v38 = vld [vmem:[%s20657_s1 + $0xa] sm:$0x3]  ;;  %v4286_v13 = vrot.slane %v12917_v31, 1  ;;  %v4285_v62 = vrot.slane %v3960_v59, 1  ;;  %vm21325_vm1 = vnez %v21022_v56  ;;  %v17150_v56 = vld [vmem:[#allocation2 + $0x150] sm:$0xff] }
 0x26c   : > { %13201 = vmatprep.mubr.msk.bf16.mxu1 %vm21323_vm15, %v16953_v22  ;;  %vm21324_vm4 = vmmov %vm21320_vm0  ;;  %vm21327_vm14 = vnez %v21326_v25 }
 0x26d   : > { %v4307_v58 = vsel %vm21324_vm4, %v4283_v18, %v4284_v30  ;;  %v4304_v26 = vsel %vm21320_vm0, %v4286_v13, %v4287_v57  ;;  %v4088_v48 = vsel %vm21327_vm14, %v16659_v47, 0.0  ;;  %vm21328_vm15 = vmmov %vm21322_vm13  ;;  %v17012_v18 = vand.u32 %v11715_v38, %v14644_v5  ;;  %v17037_v38 = vld [vmem:[#allocation2 + $0x120] sm:$0xff] }
 0x26e   : > { %v4347_v10 = vsel %vm21325_vm1, %v4307_v58, 0.0  ;;  %v17018_v12 = vadd.f32 %v4304_v26, %v16690_v34  ;;  %vm21329_vm4 = vmmov %vm21320_vm0  ;;  %v4306_v47 = vsel %vm21320_vm0, %v4284_v30, %v4285_v62  ;;  %v12921_v26 = vpop.f32.mrb[120].mxu0  ;;  %vm21336_vm1 = vcmask 23552  }
 0x26f   : > { %13168 = vmatmul.mubr.msk.bf16.vlgmr.msra.gmra.mrb[224].mxu0 %vm21322_vm13, %v16990_v28  ;;  %v17015_v31 = vadd.f32 %v4347_v10, %v16612_v23  ;;  %v4305_v46 = vsel %vm21329_vm4, %v4285_v62, %v4286_v13  ;;  %v17025_v59 = vadd.f32 %v4306_v47, %v4088_v48  ;;  %v3973_v23 = vpop.f32.mrb[121].mxu0  ;;  %v4290_v48 = vrot.slane %v12921_v26, 1  ;;  %vm21331_vm4 = vmmov %vm21320_vm0  ;;  %v21334_v10 = vld [vmem:[#allocation17_spill] sm:$0xff] }
 0x270   : > { %13202 = vmatmul.mubr.msk.bf16.vlgmr.msra.gmra.mrb[224].mxu1 %vm21328_vm15, %v16990_v28  ;;  %13234 = vmatpush3.bf16.msra.mxu0 %v16653_v60  ;;  %v17028_v58 = vadd.f32 %v4305_v46, %v16698_v33  ;;  %vm21330_vm15 = vmmov %vm21322_vm13  ;;  %v4288_v60 = vrot.slane %v3973_v23, 1  ;;  %v12922_v34 = vpop.f32.mrb[122].mxu0  ;;  %vm21332_vm0 = vnez %v21032_v1  ;;  %v17120_v1 = vld [vmem:[#allocation2 + $0x140] sm:$0xff] }
 0x271   : > { %13302 = vmatpush3.bf16.msra.mxu1 %v16670_v49  ;;  %13171 = vmatprep.mubr.msk.bf16.mxu0 %vm21322_vm13, %v16539_v32  ;;  %v4291_v30 = vrot.slane %v12922_v34, 1  ;;  %v3976_v33 = vpop.f32.mrb[123].mxu0  ;;  %vm21333_vm13 = vmmov %vm21331_vm4  ;;  %21354 = vst [vmem:[#allocation20_spill] sm:$0xff] %v17120_v1 }
 0x272   : > { %13205 = vmatprep.mubr.msk.bf16.mxu1 %vm21330_vm15, %v16539_v32  ;;  %13267 = vmatprep.subr.bf16.mxu0 %v16998_v2  ;;  %v4303_v49 = vsel %vm21331_vm4, %v4287_v57, %v4288_v60  ;;  %v4289_v13 = vrot.slane %v3976_v33, 1  ;;  %vm21335_vm15 = vnez %v21334_v10  ;;  %vm21337_vm7 = vmmov %vm21336_vm1 }
 0x273   : > { %13335 = vmatprep.subr.bf16.mxu1 %v17012_v18  ;;  %v4351_v62 = vsel %vm21332_vm0, %v4303_v49, 0.0  ;;  %v4300_v32 = vsel %vm21333_vm13, %v4290_v48, %v4291_v30  ;;  %v4092_v46 = vsel %vm21335_vm15, %v16716_v52, 0.0  ;;  %vm21338_vm13 = vmmov %vm21331_vm4  ;;  %v17071_v49 = vld [vmem:[#allocation2 + $0x128] sm:$0xff] }
 0x274   : > { %v17053_v47 = vadd.f32 %v4351_v62, %v16674_v42  ;;  %v17056_v57 = vadd.f32 %v4300_v32, %v16744_v63  ;;  %v4301_v26 = vsel %vm21331_vm4, %v4289_v13, %v4290_v48  ;;  %v4302_v23 = vsel %vm21338_vm13, %v4288_v60, %v4289_v13  ;;  %vm21339_vm0 = vmmov %vm21336_vm1  ;;  %v17073_v13 = vld [vmem:[#allocation2 + $0x130] sm:$0xff] }
 0x275   : > { %v17064_v52 = vadd.f32 %v4302_v23, %v4092_v46  ;;  %v17067_v34 = vadd.f32 %v4301_v26, %v16748_v36  ;;  %v21343_v23 = vrot.slane %v16807_v8, 1 }
 0x277   : > { %13172 = vmatmul.mubr.msk.bf16.gmra.mrb[228].mxu0 %vm21336_vm1, %v16588_v41  ;;  %vm21341_vm1 = vmmov %vm21331_vm4 }
 0x278   : > { %13206 = vmatmul.mubr.msk.bf16.gmra.mrb[228].mxu1 %vm21337_vm7, %v16588_v41  ;;  %13175 = vmatprep.mubr.msk.bf16.mxu0 %vm21339_vm0, %v17037_v38  ;;  %vm21340_vm7 = vmmov %vm21339_vm0  ;;  %v12925_v41 = vpop.f32.mrb[124].mxu0 }
 0x279   : > { %13209 = vmatprep.mubr.msk.bf16.mxu1 %vm21340_vm7, %v17037_v38  ;;  %v3989_v42 = vpop.f32.mrb[125].mxu0  ;;  %v4294_v48 = vrot.slane %v12925_v41, 1  ;;  %vm21342_vm0 = vmmov %vm21341_vm1 }
 0x27a   : > { %v4292_v63 = vrot.slane %v3989_v42, 1  ;;  %v12926_v33 = vpop.f32.mrb[126].mxu0  ;;  %vm21344_vm4 = vmmov %vm21342_vm0 }
 0x27b   : > { %v4295_v62 = vrot.slane %v12926_v33, 1  ;;  %v3992_v60 = vpop.f32.mrb[127].mxu0  ;;  %vm21345_vm13 = vmmov %vm21340_vm7 }
 0x27c   : > { %v4299_v32 = vsel %vm21341_vm1, %v4291_v30, %v4292_v63  ;;  %v4293_v46 = vrot.slane %v3992_v60, 1  ;;  %vm21346_vm1 = vnez %v21250_v7 }
 0x27d   : > { %v4355_v36 = vsel %vm21042_vm9, %v4299_v32, 0.0  ;;  %v4296_v26 = vsel %vm21342_vm0, %v4294_v48, %v4295_v62  ;;  %v4327_v42 = vsel %vm21344_vm4, %v4295_v62, %v21343_v23  ;;  %vm21347_vm4 = vmmov %vm21340_vm7  ;;  %v21349_v62 = vld [vmem:[#allocation22_spill] sm:$0xff] }
 0x27e   : > { %v17090_v30 = vadd.f32 %v4355_v36, %v16728_v4  ;;  %v4359_v41 = vsel %vm21346_vm1, %v4327_v42, 0.0  ;;  %v17095_v33 = vadd.f32 %v4296_v26, %v16803_v40  ;;  %v4297_v8 = vsel %vm21342_vm0, %v4293_v46, %v4294_v48  ;;  %vm21351_vm9 = vmmov %vm21342_vm0  ;;  %v12999_v36 = vpop.f32.mrb[128].mxu0  ;;  %v17118_v42 = vld [vmem:[#allocation2 + $0x138] sm:$0xff] }
 0x27f   : > { %13176 = vmatmul.mubr.msk.bf16.gmra.mrb[232].mxu0 %vm21345_vm13, %v17071_v49  ;;  %vm21348_vm13 = vmmov %vm21347_vm4  ;;  %v4298_v60 = vsel %vm21351_vm9, %v4292_v63, %v4293_v46  ;;  %v17109_v32 = vadd.f32 %v4297_v8, %v16811_v0  ;;  %v17112_v40 = vadd.f32 %v4359_v41, %v16820_v24  ;;  %v17116_v26 = vpop.f32.mrb[129].mxu0  ;;  %21353 = vst [vmem:[#allocation27_spill] sm:$0xff] %v17118_v42  ;;  %v4986_v7 = vrot.slane %v12999_v36, 7 }
 0x280   : > { %13210 = vmatmul.mubr.msk.bf16.gmra.mrb[232].mxu1 %vm21340_vm7, %v17071_v49  ;;  %13179 = vmatprep.mubr.msk.bf16.mxu0 %vm21347_vm4, %v17073_v13  ;;  %vm21350_vm7 = vnez %v21349_v62  ;;  %v13000_v23 = vpop.f32.mrb[130].mxu0  ;;  %v20746_v63 = vrot.slane %v17116_v26, 7  ;;  %vm21355_vm9 = vcmp.lt.s32.totalorder %v15063_v21, 1  ;;  %vm21356_vm0 = vmmov %vm21347_vm4 }
 0x281   : > { %13213 = vmatprep.mubr.msk.bf16.mxu1 %vm21348_vm13, %v17073_v13  ;;  %v4096_v4 = vsel %vm21350_vm7, %v16766_v6, 0.0  ;;  %21352 = vst [vmem:[#allocation18_spill] sm:$0xff] %v17109_v32  ;;  %v4987_v11 = vrot.slane %v13000_v23, 7  ;;  %v4663_v6 = vpop.f32.mrb[131].mxu0  ;;  %vm21357_vm4 = vmmov %vm21356_vm0 }
 0x282   : > { %v17114_v48 = vadd.f32 %v4298_v60, %v4096_v4  ;;  %v4985_v0 = vrot.slane %v4663_v6, 7  ;;  %vm21359_vm13 = vmmov %vm21355_vm9  ;;  %v13003_v60 = vpop.f32.mrb[132].mxu0  ;;  %v17148_v6 = vld [vmem:[#allocation2 + $0x148] sm:$0xff] }
 0x283   : > { %v5044_v24 = vsel %vm21355_vm9, %v4986_v7, %v4987_v11  ;;  %vm21360_vm1 = vmmov %vm21355_vm9  ;;  %v4676_v36 = vpop.f32.mrb[133].mxu0 }
 0x284   : > { %v17130_v46 = vadd.f32 %v16869_v20, %v5044_v24  ;;  %v5045_v41 = vsel %vm21359_vm13, %v4985_v0, %v4986_v7  ;;  %v5046_v8 = vsel %vm21360_vm1, %v20746_v63, %v4985_v0  ;;  %vm21361_vm2 = vmmov %vm21356_vm0  ;;  %v4988_v7 = vrot.slane %v4676_v36, 7  ;;  %v13004_v23 = vpop.f32.mrb[134].mxu0 }
 0x285   : > { %vm21362_vm9 = vmmov %vm21356_vm0  ;;  %v17143_v4 = vadd.f32 %v16836_v37, %v5045_v41  ;;  %v17146_v20 = vadd.f32 %v16853_v61, %v5046_v8  ;;  %v4990_v24 = vrot.slane %v13003_v60, 7  ;;  %v4991_v0 = vrot.slane %v13004_v23, 7  ;;  %v4679_v63 = vpop.f32.mrb[135].mxu0 }
 0x286   : > { %21358 = vst [vmem:[#allocation25_spill] sm:$0xff] %v17130_v46  ;;  %v4989_v32 = vrot.slane %v4679_v63, 7  ;;  %vm21365_vm13 = vmmov %vm21360_vm1 }
 0x287   : > { %13180 = vmatmul.mubr.msk.bf16.gmra.mrb[236].mxu0 %vm21356_vm0, %v17118_v42  ;;  %v5040_v61 = vsel %vm21360_vm1, %v4990_v24, %v4991_v0 }
 0x288   : > { %13214 = vmatmul.mubr.msk.bf16.gmra.mrb[236].mxu1 %vm21357_vm4, %v17118_v42  ;;  %13183 = vmatprep.mubr.msk.bf16.mxu0 %vm21361_vm2, %v17120_v1  ;;  %vm21363_vm2 = vmmov %vm21360_vm1  ;;  %v17166_v8 = vadd.f32 %v16901_v14, %v5040_v61  ;;  %v13007_v14 = vpop.f32.mrb[136].mxu0  ;;  %v17184_v61 = vld [vmem:[#allocation2 + $0x160] sm:$0xff] }
 0x289   : > { %13217 = vmatprep.mubr.msk.bf16.mxu1 %vm21362_vm9, %v17120_v1  ;;  %v5043_v46 = vsel %vm21363_vm2, %v4987_v11, %v4988_v7  ;;  %vm21364_vm4 = vmmov %vm21356_vm0  ;;  %v5041_v11 = vsel %vm21365_vm13, %v4989_v32, %v4990_v24  ;;  %v4692_v60 = vpop.f32.mrb[137].mxu0  ;;  %v17182_v24 = vld [vmem:[#allocation2 + $0x158] sm:$0xff] }
 0x28a   : > { %v5052_v37 = vsel %vm15115_vm6, %v5043_v46, 0.0  ;;  %vm21366_vm9 = vmmov %vm21360_vm1  ;;  %v17175_v46 = vadd.f32 %v16872_v53, %v5041_v11  ;;  %v4992_v36 = vrot.slane %v4692_v60, 7  ;;  %v13008_v23 = vpop.f32.mrb[138].mxu0 }
 0x28b   : > { %v17163_v41 = vadd.f32 %v16880_v51, %v5052_v37  ;;  %v5042_v63 = vsel %vm21366_vm9, %v4988_v7, %v4989_v32  ;;  %vm21367_vm2 = vmmov %vm21356_vm0  ;;  %v4994_v37 = vrot.slane %v13007_v14, 7  ;;  %v4995_v32 = vrot.slane %v13008_v23, 7  ;;  %v4695_v7 = vpop.f32.mrb[139].mxu0 }
 0x28c   : > { %vm21368_vm1 = vmmov %vm21356_vm0  ;;  %v17180_v51 = vadd.f32 %v16883_v17, %v5042_v63  ;;  %v4993_v11 = vrot.slane %v4695_v7, 7 }
 0x28d   : > { %vm21371_vm13 = vmmov %vm21368_vm1 }
 0x28f   : > { %13184 = vmatmul.mubr.msk.bf16.gmra.mrb[240].mxu0 %vm21356_vm0, %v17148_v6  ;;  %vm21369_vm0 = vmmov %vm21366_vm9 }
 0x290   : > { %13218 = vmatmul.mubr.msk.bf16.gmra.mrb[240].mxu1 %vm21364_vm4, %v17148_v6  ;;  %13187 = vmatprep.mubr.msk.bf16.mxu0 %vm21367_vm2, %v17150_v56  ;;  %v5039_v53 = vsel %vm21369_vm0, %v4991_v0, %v4992_v36  ;;  %vm21370_vm4 = vmmov %vm21369_vm0 }
 0x291   : > { %13221 = vmatprep.mubr.msk.bf16.mxu1 %vm21368_vm1, %v17150_v56  ;;  %v5056_v27 = vsel %vm15163_vm8, %v5039_v53, 0.0  ;;  %v5036_v17 = vsel %vm21370_vm4, %v4994_v37, %v4995_v32  ;;  %vm21372_vm9 = vmmov %vm21368_vm1 }
 0x292   : > { %v17197_v63 = vadd.f32 %v16911_v39, %v5056_v27  ;;  %v17200_v14 = vadd.f32 %v16929_v9, %v5036_v17  ;;  %vm21374_vm2 = vmmov %vm21369_vm0  ;;  %v13011_v39 = vpop.f32.mrb[140].mxu0 }
 0x293   : > { %v5037_v0 = vsel %vm21374_vm2, %v4993_v11, %v4994_v37  ;;  %vm21375_vm1 = vmmov %vm21369_vm0  ;;  %v4708_v9 = vpop.f32.mrb[141].mxu0  ;;  %v17216_v37 = vld [vmem:[#allocation2 + $0x168] sm:$0xff]  ;;  %v4998_v17 = vrot.slane %v13011_v39, 7 }
 0x294   : > { %21373 = vst [vmem:[#allocation26_spill] sm:$0xff] %v17200_v14  ;;  %v5038_v60 = vsel %vm21375_vm1, %v4992_v36, %v4993_v11  ;;  %vm21376_vm0 = vmmov %vm21372_vm9  ;;  %v17209_v23 = vadd.f32 %v16904_v45, %v5037_v0  ;;  %v4996_v7 = vrot.slane %v4708_v9, 7  ;;  %v13012_v53 = vpop.f32.mrb[142].mxu0 }
 0x295   : > { %vm21377_vm4 = vmmov %vm21376_vm0  ;;  %v17214_v27 = vadd.f32 %v16914_v29, %v5038_v60  ;;  %v4999_v36 = vrot.slane %v13012_v53, 7  ;;  %v4711_v11 = vpop.f32.mrb[143].mxu0 }
 0x296   : > { %v4997_v0 = vrot.slane %v4711_v11, 7  ;;  %vm21381_vm2 = vmmov %vm21376_vm0 }
 0x297   : > { %13188 = vmatmul.mubr.msk.bf16.gmra.mrb[244].mxu0 %vm21371_vm13, %v17182_v24  ;;  %vm21379_vm13 = vmmov %vm21375_vm1 }
 0x298   : > { %13222 = vmatmul.mubr.msk.bf16.gmra.mrb[244].mxu1 %vm21372_vm9, %v17182_v24  ;;  %13191 = vmatprep.mubr.msk.bf16.mxu0 %vm21376_vm0, %v17184_v61  ;;  %v5035_v45 = vsel %vm21379_vm13, %v4995_v32, %v4996_v7  ;;  %vm21380_vm9 = vmmov %vm21375_vm1 }
 0x299   : > { %13225 = vmatprep.mubr.msk.bf16.mxu1 %vm21377_vm4, %v17184_v61  ;;  %v5060_v14 = vsel %vm15212_vm10, %v5035_v45, 0.0  ;;  %v5032_v29 = vsel %vm21380_vm9, %v4998_v17, %v4999_v36  ;;  %vm21382_vm1 = vmmov %vm21376_vm0 }
 0x29a   : > { %v17231_v60 = vadd.f32 %v16942_v43, %v5060_v14  ;;  %v17234_v39 = vadd.f32 %v16969_v16, %v5032_v29  ;;  %vm21384_vm0 = vmmov %vm21380_vm9  ;;  %v13015_v16 = vpop.f32.mrb[144].mxu0 }
 0x29b   : > { %v5033_v32 = vsel %vm21384_vm0, %v4997_v0, %v4998_v17  ;;  %vm21385_vm4 = vmmov %vm21384_vm0  ;;  %v4724_v14 = vpop.f32.mrb[145].mxu0  ;;  %v17250_v17 = vld [vmem:[#allocation2 + $0x178] sm:$0xff]  ;;  %v5002_v29 = vrot.slane %v13015_v16, 7 }
 0x29c   : > { %21383 = vst [vmem:[#allocation12_spill] sm:$0xff] %v17234_v39  ;;  %v5034_v9 = vsel %vm21385_vm4, %v4996_v7, %v4997_v0  ;;  %vm21386_vm13 = vmmov %vm21382_vm1  ;;  %v17243_v53 = vadd.f32 %v16932_v15, %v5033_v32  ;;  %v5000_v11 = vrot.slane %v4724_v14, 7  ;;  %v13016_v45 = vpop.f32.mrb[146].mxu0  ;;  %v17254_v32 = vld [vmem:[#allocation2 + $0x110] sm:$0xff] }
 0x29d   : > { %vm21387_vm9 = vmmov %vm21382_vm1  ;;  %v17248_v43 = vadd.f32 %v16945_v54, %v5034_v9  ;;  %v5003_v7 = vrot.slane %v13016_v45, 7  ;;  %v4727_v0 = vpop.f32.mrb[147].mxu0  ;;  %v11732_v45 = vld [vmem:[%s20657_s1 + $0xe] sm:$0x3] }
 0x29e   : > { %v5001_v15 = vrot.slane %v4727_v0, 7  ;;  %v17287_v0 = vld [vmem:[#allocation2 + $0x118] sm:$0xff] }
 0x29f   : > { %13192 = vmatmul.mubr.msk.bf16.gmra.mrb[248].mxu0 %vm21381_vm2, %v17216_v37  ;;  %vm21388_vm2 = vmmov %vm21384_vm0 }
 0x2a0   : > { %13226 = vmatmul.mubr.msk.bf16.gmra.mrb[248].mxu1 %vm21382_vm1, %v17216_v37  ;;  %13195 = vmatprep.mubr.msk.bf16.mxu0 %vm21386_vm13, %v17218_v3  ;;  %v5031_v19 = vsel %vm21388_vm2, %v4999_v36, %v5000_v11  ;;  %vm21389_vm1 = vmmov %vm21384_vm0 }
 0x2a1   : > { %13229 = vmatprep.mubr.msk.bf16.mxu1 %vm21387_vm9, %v17218_v3  ;;  %v5064_v39 = vsel %vm15261_vm12, %v5031_v19, 0.0  ;;  %v5028_v54 = vsel %vm21389_vm1, %v5002_v29, %v5003_v7  ;;  %vm21390_vm0 = vmmov %vm21387_vm9 }
 0x2a2   : > { %vm21391_vm4 = vmmov %vm21390_vm0  ;;  %v17265_v9 = vadd.f32 %v16980_v35, %v5064_v39  ;;  %v17268_v36 = vadd.f32 %v17015_v31, %v5028_v54  ;;  %v13019_v31 = vpop.f32.mrb[148].mxu0 }
 0x2a3   : > { %vm21392_vm13 = vmmov %vm21389_vm1  ;;  %v4740_v39 = vpop.f32.mrb[149].mxu0 }
 0x2a4   : > { %v5029_v16 = vsel %vm21392_vm13, %v5001_v15, %v5002_v29  ;;  %vm21393_vm9 = vmmov %vm21389_vm1  ;;  %v5004_v29 = vrot.slane %v4740_v39, 7 }
 0x2a5   : > { %v5030_v19 = vsel %vm21393_vm9, %v5000_v11, %v5001_v15  ;;  %vm21394_vm2 = vmmov %vm21390_vm0  ;;  %v17277_v14 = vadd.f32 %v16972_v55, %v5029_v16  ;;  %v13020_v11 = vpop.f32.mrb[150].mxu0  ;;  %v5006_v55 = vrot.slane %v13019_v31, 7 }
 0x2a6   : > { %vm21395_vm1 = vmmov %vm21390_vm0  ;;  %v17282_v35 = vadd.f32 %v16983_v44, %v5030_v19  ;;  %v5007_v15 = vrot.slane %v13020_v11, 7  ;;  %v4743_v54 = vpop.f32.mrb[151].mxu0  ;;  %v17295_v19 = vand.u32 %v11732_v45, %v14644_v5 }
 0x2a7   : > { %13196 = vmatmul.mubr.msk.bf16.gmra.mrb[252].mxu0 %vm21390_vm0, %v17250_v17  ;;  %vm21396_vm0 = vmmov %vm21393_vm9  ;;  %v5005_v16 = vrot.slane %v4743_v54, 7 }
 0x2a8   : > { %13230 = vmatmul.mubr.msk.bf16.gmra.mrb[252].mxu1 %vm21391_vm4, %v17250_v17  ;;  %13235 = vmatprep.mubr.msk.bf16.mxu0 %vm21394_vm2, %v16953_v22  ;;  %v11749_v22 = vld [vmem:[%s20657_s1 + $0xc] sm:$0x3]  ;;  %v5027_v44 = vsel %vm21396_vm0, %v5003_v7, %v5004_v29  ;;  %vm21397_vm4 = vmmov %vm21396_vm0 }
 0x2a9   : > { %13303 = vmatprep.mubr.msk.bf16.mxu1 %vm21395_vm1, %v17254_v32  ;;  %v5068_v39 = vsel %vm21327_vm14, %v5027_v44, 0.0  ;;  %v5024_v50 = vsel %vm21397_vm4, %v5006_v55, %v5007_v15  ;;  %vm21398_vm13 = vmmov %vm21395_vm1  ;;  %v17306_v31 = vand.u32 %v11749_v22, %v14644_v5  ;;  %v14578_v22 = vld [vmem:[#allocation2 + $0x110] sm:$0xff] }
 0x2aa   : > { %vm21399_vm9 = vmmov %vm21395_vm1  ;;  %v17309_v7 = vadd.f32 %v17025_v59, %v5068_v39  ;;  %v17312_v45 = vadd.f32 %v17053_v47, %v5024_v50  ;;  %v13023_v50 = vpop.f32.mrb[152].mxu0 }
 0x2ab   : > { %vm21400_vm2 = vmmov %vm21396_vm0  ;;  %v4756_v47 = vpop.f32.mrb[153].mxu0 }
 0x2ac   : > { %v5025_v11 = vsel %vm21400_vm2, %v5005_v16, %v5006_v55  ;;  %vm21401_vm1 = vmmov %vm21396_vm0 }
 0x2ad   : > { %v5026_v54 = vsel %vm21401_vm1, %v5004_v29, %v5005_v16  ;;  %vm21402_vm0 = vmmov %vm21399_vm9  ;;  %v5010_v29 = vrot.slane %v13023_v50, 7 }
 0x2ae   : > { %v17325_v59 = vadd.f32 %v17028_v58, %v5026_v54  ;;  %vm21403_vm4 = vmmov %vm21402_vm0 }
 0x2af   : > { %13236 = vmatmul.mubr.msk.bf16.vlgmr.msra.gmra.mrb[0].mxu0 %vm21398_vm13, %v16990_v28  ;;  %v17320_v28 = vadd.f32 %v17018_v12, %v5025_v11  ;;  %v13024_v12 = vpop.f32.mrb[154].mxu0  ;;  %vm21404_vm13 = vmmov %vm21401_vm1  ;;  %v14579_v11 = vld [vmem:[#allocation2 + $0x118] sm:$0xff] }
 0x2b0   : > { %13304 = vmatmul.mubr.msk.bf16.vlgmr.msra.gmra.mrb[0].mxu1 %vm21399_vm9, %v17287_v0  ;;  %13268 = vmatpush3.bf16.msra.mxu0 %v16998_v2  ;;  %v5008_v2 = vrot.slane %v4756_v47, 7  ;;  %v5011_v55 = vrot.slane %v13024_v12, 7  ;;  %vm21405_vm9 = vmmov %vm21401_vm1 }
 0x2b1   : > { %13336 = vmatpush3.bf16.msra.mxu1 %v17012_v18  ;;  %13239 = vmatprep.mubr.msk.bf16.mxu0 %vm21402_vm0, %v14578_v22  ;;  %v4759_v18 = vpop.f32.mrb[155].mxu0  ;;  %vm21406_vm2 = vmmov %vm21402_vm0 }
 0x2b2   : > { %13307 = vmatprep.mubr.msk.bf16.mxu1 %vm21403_vm4, %v17037_v38  ;;  %13369 = vmatprep.subr.bf16.mxu0 %v17295_v19  ;;  %v5023_v44 = vsel %vm21404_vm13, %v5007_v15, %v5008_v2  ;;  %v5009_v16 = vrot.slane %v4759_v18, 7  ;;  %v5020_v39 = vsel %vm21405_vm9, %v5010_v29, %v5011_v55  ;;  %vm21407_vm1 = vmmov %vm21402_vm0 }
 0x2b3   : > { %13403 = vmatprep.subr.bf16.mxu1 %v17306_v31  ;;  %v5072_v58 = vsel %vm21335_vm15, %v5023_v44, 0.0  ;;  %v17344_v22 = vadd.f32 %v17090_v30, %v5020_v39  ;;  %vm21409_vm0 = vmmov %vm21405_vm9  ;;  %v13027_v30 = vpop.f32.mrb[156].mxu0 }
 0x2b4   : > { %v17341_v54 = vadd.f32 %v17064_v52, %v5072_v58  ;;  %v5021_v15 = vsel %vm21409_vm0, %v5009_v16, %v5010_v29  ;;  %vm21410_vm4 = vmmov %vm21409_vm0  ;;  %v4772_v12 = vpop.f32.mrb[157].mxu0  ;;  %v5014_v29 = vrot.slane %v13027_v30, 7 }
 0x2b5   : > { %21408 = vst [vmem:[#allocation15_spill] sm:$0xff] %v17344_v22  ;;  %v5022_v50 = vsel %vm21410_vm4, %v5008_v2, %v5009_v16  ;;  %vm21411_vm13 = vmmov %vm21407_vm1  ;;  %v17353_v47 = vadd.f32 %v17056_v57, %v5021_v15  ;;  %v5012_v18 = vrot.slane %v4772_v12, 7  ;;  %v13028_v44 = vpop.f32.mrb[158].mxu0 }
 0x2b6   : > { %vm21412_vm9 = vmmov %vm21407_vm1  ;;  %v17358_v52 = vadd.f32 %v17067_v34, %v5022_v50  ;;  %v5015_v58 = vrot.slane %v13028_v44, 7  ;;  %v4775_v39 = vpop.f32.mrb[159].mxu0  ;;  %v21415_v34 = vrot.slane %v17116_v26, 7  ;;  %v21424_v44 = vld [vmem:[#allocation14_spill] sm:$0xff] }
 0x2b7   : > { %13240 = vmatmul.mubr.msk.bf16.gmra.mrb[4].mxu0 %vm21406_vm2, %v14579_v11  ;;  %vm21413_vm2 = vmmov %vm21409_vm0  ;;  %v5013_v16 = vrot.slane %v4775_v39, 7 }
 0x2b8   : > { %13308 = vmatmul.mubr.msk.bf16.gmra.mrb[4].mxu1 %vm21407_vm1, %v17071_v49  ;;  %13243 = vmatprep.mubr.msk.bf16.mxu0 %vm21411_vm13, %v17037_v38  ;;  %v5019_v2 = vsel %vm21413_vm2, %v5011_v55, %v5012_v18  ;;  %vm21414_vm1 = vmmov %vm21409_vm0  ;;  %v5047_v15 = vsel %vm21409_vm0, %v5015_v58, %v21415_v34  ;;  %v13067_v34 = vpop.f32.mrb[160].mxu1 }
 0x2b9   : > { %13311 = vmatprep.mubr.msk.bf16.mxu1 %vm21412_vm9, %v17073_v13  ;;  %v5076_v57 = vsel %vm21350_vm7, %v5019_v2, 0.0  ;;  %v5016_v11 = vsel %vm21414_vm1, %v5014_v29, %v5015_v58  ;;  %vm21416_vm4 = vmmov %vm21412_vm9  ;;  %v5048_v30 = vsel %vm15444_vm3, %v5047_v15, 0.0  ;;  %v21427_v2 = vld [vmem:[#allocation18_spill] sm:$0xff] }
 0x2ba   : > { %vm21417_vm13 = vmmov %vm21416_vm4  ;;  %v17375_v55 = vadd.f32 %v17114_v48, %v5076_v57  ;;  %v13910_v58 = vadd.f32 %v21424_v44, %v5048_v30  ;;  %v17392_v39 = vadd.f32 %v17112_v40, %v5016_v11 }
 0x2bb   : > { %vm21420_vm9 = vmmov %vm21409_vm0 }
 0x2bc   : > { %21418 = vst [vmem:[#allocation28_spill] sm:$0xff] %v17375_v55  ;;  %v5017_v12 = vsel %vm21420_vm9, %v5013_v16, %v5014_v29  ;;  %vm21421_vm2 = vmmov %vm21409_vm0  ;;  %v13033_v29 = vpop.f32.mrb[160].mxu0 }
 0x2bd   : > { %v5018_v26 = vsel %vm21421_vm2, %v5012_v18, %v5013_v16  ;;  %vm21422_vm1 = vmmov %vm21416_vm4  ;;  %v17389_v48 = vadd.f32 %v17095_v33, %v5017_v12  ;;  %21426 = vst [vmem:[#allocation31_spill] sm:$0xff] %v17392_v39  ;;  %v17397_v18 = vpop.f32.mrb[161].mxu0  ;;  %v5343_v16 = vpop.f32.mrb[161].mxu1  ;;  %v5114_v62 = vrot.slane %v13033_v29, 1 }
 0x2be   : > { %vm21423_vm0 = vmmov %vm21422_vm1  ;;  %v17395_v57 = vadd.f32 %v21427_v2, %v5018_v26  ;;  %v13034_v15 = vpop.f32.mrb[162].mxu0  ;;  %v13068_v50 = vpop.f32.mrb[162].mxu1  ;;  %v20755_v33 = vrot.slane %v17397_v18, 1 }
 0x2bf   : > { %13244 = vmatmul.mubr.msk.bf16.gmra.mrb[8].mxu0 %vm21416_vm4, %v17071_v49  ;;  %21425 = vst [vmem:[#allocation30_spill] sm:$0xff] %v17389_v48  ;;  %v5115_v10 = vrot.slane %v13034_v15, 1  ;;  %v4828_v25 = vpop.f32.mrb[163].mxu0  ;;  %v5346_v30 = vpop.f32.mrb[163].mxu1  ;;  %vm21429_vm4 = vcmp.lt.s32.totalorder %v15063_v21, 7  ;;  %vm21431_vm9 = vmmov %vm21423_vm0 }
 0x2c0   : > { %13312 = vmatmul.mubr.msk.bf16.gmra.mrb[8].mxu1 %vm21417_vm13, %v17118_v42  ;;  %13247 = vmatprep.mubr.msk.bf16.mxu0 %vm21422_vm1, %v17073_v13  ;;  %21428 = vst [vmem:[#allocation29_spill] sm:$0xff] %v17395_v57  ;;  %v5113_v12 = vrot.slane %v4828_v25, 1  ;;  %vm21430_vm13 = vmmov %vm21423_vm0  ;;  %v13037_v29 = vpop.f32.mrb[164].mxu0  ;;  %v13071_v15 = vpop.f32.mrb[164].mxu1 }
 0x2c1   : > { %13315 = vmatprep.mubr.msk.bf16.mxu1 %vm21423_vm0, %v17120_v1  ;;  %v5172_v40 = vsel %vm21429_vm4, %v5114_v62, %v5115_v10  ;;  %vm21432_vm2 = vmmov %vm21429_vm4  ;;  %v4841_v22 = vpop.f32.mrb[165].mxu0  ;;  %v5118_v39 = vrot.slane %v13037_v29, 1 }
 0x2c2   : > { %v13907_v11 = vadd.f32 %v17143_v4, %v5172_v40  ;;  %v5174_v26 = vsel %vm21432_vm2, %v20755_v33, %v5113_v12  ;;  %vm21433_vm1 = vmmov %vm21432_vm2  ;;  %v5359_v33 = vpop.f32.mrb[165].mxu1 }
 0x2c3   : > { %v5173_v44 = vsel %vm21433_vm1, %v5113_v12, %v5114_v62  ;;  %vm21434_vm4 = vmmov %vm21423_vm0  ;;  %v13911_v25 = vadd.f32 %v13910_v58, %v5174_v26  ;;  %v5116_v62 = vrot.slane %v4841_v22, 1  ;;  %v13038_v12 = vpop.f32.mrb[166].mxu0  ;;  %v13072_v55 = vpop.f32.mrb[166].mxu1 }
 0x2c4   : > { %v13919_v2 = vadd.f32 %v17146_v20, %v5173_v44  ;;  %v17418_v4 = vadd.f32 %v13907_v11, %v13067_v34  ;;  %v4844_v48 = vpop.f32.mrb[167].mxu0  ;;  %vm21439_vm2 = vmmov %vm21423_vm0  ;;  %v21445_v44 = vld [vmem:[#allocation25_spill] sm:$0xff] }
 0x2c5   : > { %v17422_v57 = vadd.f32 %v13911_v25, %v5343_v16  ;;  %v5117_v58 = vrot.slane %v4844_v48, 1 }
 0x2c6   : > { %v17420_v40 = vadd.f32 %v13919_v2, %v5346_v30  ;;  %v13041_v2 = vpop.f32.mrb[168].mxu0 }
 0x2c7   : > { %13248 = vmatmul.mubr.msk.bf16.gmra.mrb[12].mxu0 %vm21430_vm13, %v17118_v42  ;;  %21435 = vst [vmem:[#allocation33_spill] sm:$0xff] %v17422_v57  ;;  %v5362_v42 = vpop.f32.mrb[167].mxu1  ;;  %vm21436_vm13 = vmmov %vm21433_vm1 }
 0x2c8   : > { %13316 = vmatmul.mubr.msk.bf16.gmra.mrb[12].mxu1 %vm21431_vm9, %v17148_v6  ;;  %13251 = vmatprep.mubr.msk.bf16.mxu0 %vm21423_vm0, %v17120_v1  ;;  %v5119_v1 = vrot.slane %v13038_v12, 1  ;;  %v5171_v20 = vsel %vm21436_vm13, %v5115_v10, %v5116_v62  ;;  %vm21438_vm9 = vmmov %vm21433_vm1  ;;  %v4857_v12 = vpop.f32.mrb[169].mxu0 }
 0x2c9   : > { %13319 = vmatprep.mubr.msk.bf16.mxu1 %vm21434_vm4, %v17150_v56  ;;  %v5179_v34 = vsel %vm15111_vm5, %v5171_v20, 0.0  ;;  %vm21440_vm1 = vmmov %vm21423_vm0  ;;  %v13042_v57 = vpop.f32.mrb[170].mxu0 }
 0x2ca   : > { %v5168_v30 = vsel %vm21438_vm9, %v5118_v39, %v5119_v1  ;;  %vm21441_vm0 = vmmov %vm21438_vm9  ;;  %v13915_v25 = vadd.f32 %v21445_v44, %v5179_v34 }
 0x2cb   : > { %v13923_v22 = vadd.f32 %v17175_v46, %v5168_v30  ;;  %v5170_v16 = vsel %vm21441_vm0, %v5116_v62, %v5117_v58  ;;  %vm21442_vm4 = vmmov %vm21441_vm0  ;;  %v13075_v46 = vpop.f32.mrb[168].mxu1  ;;  %v5120_v30 = vrot.slane %v4857_v12, 1 }
 0x2cc   : > { %v5169_v10 = vsel %vm21442_vm4, %v5117_v58, %v5118_v39  ;;  %vm21443_vm13 = vmmov %vm21440_vm1  ;;  %v13927_v48 = vadd.f32 %v17163_v41, %v5170_v16  ;;  %v5375_v39 = vpop.f32.mrb[169].mxu1  ;;  %v17450_v20 = vadd.f32 %v13915_v25, %v13068_v50  ;;  %v5122_v41 = vrot.slane %v13041_v2, 1 }
 0x2cd   : > { %vm21444_vm3 = vmmov %vm21440_vm1  ;;  %v13935_v11 = vadd.f32 %v17180_v51, %v5169_v10  ;;  %v17446_v29 = vadd.f32 %v13923_v22, %v13071_v15  ;;  %v13076_v26 = vpop.f32.mrb[170].mxu1  ;;  %v5123_v16 = vrot.slane %v13042_v57, 1  ;;  %v4860_v51 = vpop.f32.mrb[171].mxu0 }
 0x2ce   : > { %v17452_v58 = vadd.f32 %v13927_v48, %v5359_v33  ;;  %v5378_v10 = vpop.f32.mrb[171].mxu1  ;;  %v5121_v15 = vrot.slane %v4860_v51, 1  ;;  %vm21448_vm9 = vmmov %vm21441_vm0  ;;  %v13045_v25 = vpop.f32.mrb[172].mxu0 }
 0x2cf   : > { %13252 = vmatmul.mubr.msk.bf16.gmra.mrb[16].mxu0 %vm21439_vm2, %v17148_v6  ;;  %v17448_v62 = vadd.f32 %v13935_v11, %v5362_v42  ;;  %v5164_v50 = vsel %vm21448_vm9, %v5122_v41, %v5123_v16  ;;  %vm21449_vm2 = vmmov %vm21440_vm1 }
 0x2d0   : > { %13320 = vmatmul.mubr.msk.bf16.gmra.mrb[16].mxu1 %vm21440_vm1, %v17182_v24  ;;  %13255 = vmatprep.mubr.msk.bf16.mxu0 %vm21443_vm13, %v17150_v56  ;;  %v13939_v57 = vadd.f32 %v17209_v23, %v5164_v50  ;;  %v5166_v33 = vsel %vm21441_vm0, %v5120_v30, %v5121_v15  ;;  %vm21450_vm4 = vmmov %vm21441_vm0  ;;  %v13079_v23 = vpop.f32.mrb[172].mxu1 }
 0x2d1   : > { %13323 = vmatprep.mubr.msk.bf16.mxu1 %vm21444_vm3, %v17184_v61  ;;  %vm21446_vm3 = vmmov %vm21441_vm0  ;;  %v13943_v48 = vadd.f32 %v17197_v63, %v5166_v33  ;;  %v5126_v63 = vrot.slane %v13045_v25, 1  ;;  %v21466_v25 = vld [vmem:[#allocation26_spill] sm:$0xff] }
 0x2d2   : > { %v5167_v34 = vsel %vm21446_vm3, %v5119_v1, %v5120_v30  ;;  %v5165_v1 = vsel %vm21450_vm4, %v5121_v15, %v5122_v41  ;;  %vm21451_vm13 = vmmov %vm21440_vm1  ;;  %v17476_v2 = vadd.f32 %v13939_v57, %v13075_v46  ;;  %v4873_v30 = vpop.f32.mrb[173].mxu0  ;;  %v5391_v41 = vpop.f32.mrb[173].mxu1  ;;  %v21457_v57 = vld [vmem:[#allocation7_spill] sm:$0xff] }
 0x2d3   : > { %v5183_v42 = vsel %vm21162_vm11, %v5167_v34, 0.0  ;;  %vm21452_vm3 = vmmov %vm21440_vm1  ;;  %v13951_v11 = vadd.f32 %v17214_v27, %v5165_v1  ;;  %v17482_v34 = vadd.f32 %v13943_v48, %v5375_v39  ;;  %v5124_v15 = vrot.slane %v4873_v30, 1  ;;  %v13046_v50 = vpop.f32.mrb[174].mxu0  ;;  %v17484_v22 = vpop.f32.mrb[174].mxu1 }
 0x2d4   : > { %v13931_v44 = vadd.f32 %v17166_v8, %v5183_v42  ;;  %21453 = vst [vmem:[#allocation32_spill] sm:$0xff] %v17476_v2  ;;  %v5127_v27 = vrot.slane %v13046_v50, 1  ;;  %v4876_v33 = vpop.f32.mrb[175].mxu0  ;;  %v5394_v8 = vpop.f32.mrb[175].mxu1  ;;  %v17486_v42 = vld [vmem:[#allocation2 + $0x180] sm:$0xff]  ;;  %vm21456_vm9 = vmmov %vm21441_vm0 }
 0x2d5   : > { %v17478_v12 = vadd.f32 %v13951_v11, %v5378_v10  ;;  %21455 = vst [vmem:[#allocation34_spill] sm:$0xff] %v17486_v42  ;;  %v5163_v46 = vsel %vm21456_vm9, %v5123_v16, %v5124_v15  ;;  %v5125_v10 = vrot.slane %v4876_v33, 1  ;;  %v274_v50 = vld [vmem:[%s14671_s29 + $0x300] sm:$0xff]  ;;  %v13083_v33 = vpop.f32.mrb[176].mxu1 }
 0x2d6   : > { %v17480_v51 = vadd.f32 %v13931_v44, %v13072_v55 }
 0x2d7   : > { %13256 = vmatmul.mubr.msk.bf16.gmra.mrb[20].mxu0 %vm21449_vm2, %v17182_v24  ;;  %21454 = vst [vmem:[#allocation35_spill] sm:$0xff] %v17478_v12  ;;  %vm21458_vm2 = vnez %v21457_v57  ;;  %v5407_v12 = vpop.f32.mrb[177].mxu1 }
 0x2d8   : > { %13324 = vmatmul.mubr.msk.bf16.gmra.mrb[20].mxu1 %vm21440_vm1, %v17216_v37  ;;  %13259 = vmatprep.mubr.msk.bf16.mxu0 %vm21451_vm13, %v17184_v61  ;;  %v5187_v55 = vsel %vm21458_vm2, %v5163_v46, 0.0  ;;  %vm21459_vm1 = vmmov %vm21441_vm0 }
 0x2d9   : > { %13327 = vmatprep.mubr.msk.bf16.mxu1 %vm21452_vm3, %v17218_v3  ;;  %v5160_v39 = vsel %vm21459_vm1, %v5126_v63, %v5127_v27  ;;  %vm21460_vm0 = vmmov %vm21452_vm3  ;;  %v13947_v30 = vadd.f32 %v21466_v25, %v5187_v55  ;;  %v17524_v55 = vld [vmem:[#allocation2 + $0x188] sm:$0xff] }
 0x2da   : > { %vm21461_vm4 = vmmov %vm21460_vm0  ;;  %v13955_v1 = vadd.f32 %v17243_v53, %v5160_v39  ;;  %v13049_v53 = vpop.f32.mrb[176].mxu0  ;;  %v276_v39 = vld [vmem:[%s14671_s29 + $0x310] sm:$0xff] }
 0x2db   : > { %vm21462_vm13 = vmmov %vm21459_vm1  ;;  %v4889_v57 = vpop.f32.mrb[177].mxu0  ;;  %v17518_v2 = vadd.f32 %v13947_v30, %v13076_v26  ;;  %v21471_v26 = vld [vmem:[#allocation9_spill] sm:$0xff] }
 0x2dc   : > { %v5162_v16 = vsel %vm21462_vm13, %v5124_v15, %v5125_v10  ;;  %vm21463_vm3 = vmmov %vm21459_vm1  ;;  %v17511_v46 = vadd.f32 %v13955_v1, %v13079_v23  ;;  %v275_v15 = vld [vmem:[%s14671_s29 + $0x308] sm:$0xff]  ;;  %v5130_v1 = vrot.slane %v13049_v53, 1 }
 0x2dd   : > { %v5161_v48 = vsel %vm21463_vm3, %v5125_v10, %v5126_v63  ;;  %vm21464_vm9 = vmmov %vm21460_vm0  ;;  %v13959_v11 = vadd.f32 %v17231_v60, %v5162_v16  ;;  %v277_v63 = vld [vmem:[%s14671_s29 + $0x318] sm:$0xff]  ;;  %v5128_v60 = vrot.slane %v4889_v57, 1  ;;  %v17522_v16 = vpop.f32.mrb[178].mxu1  ;;  %v21478_v53 = vld [vmem:[#allocation12_spill] sm:$0xff] }
 0x2de   : > { %vm21465_vm1 = vmmov %vm21460_vm0  ;;  %v13967_v44 = vadd.f32 %v17248_v43, %v5161_v48  ;;  %21467 = vst [vmem:[#allocation37_spill] sm:$0xff] %v17511_v46  ;;  %v13050_v43 = vpop.f32.mrb[178].mxu0  ;;  %v354_v48 = vpack.c.bf16 %v275_v15, %v274_v50  ;;  %v355_v23 = vpack.c.bf16 %v277_v63, %v276_v39 }
 0x2df   : > { %13260 = vmatmul.mubr.msk.bf16.gmra.mrb[24].mxu0 %vm21460_vm0, %v17216_v37  ;;  %v5131_v25 = vrot.slane %v13050_v43, 1  ;;  %v4892_v46 = vpop.f32.mrb[179].mxu0  ;;  %vm21468_vm0 = vmmov %vm21463_vm3  ;;  %vm21472_vm3 = vnez %v21471_v26 }
 0x2e0   : > { %13328 = vmatmul.mubr.msk.bf16.gmra.mrb[24].mxu1 %vm21461_vm4, %v17250_v17  ;;  %13263 = vmatprep.mubr.msk.bf16.mxu0 %vm21464_vm9, %v17218_v3  ;;  %v17516_v10 = vadd.f32 %v13967_v44, %v5394_v8  ;;  %v5410_v3 = vpop.f32.mrb[179].mxu1  ;;  %v5159_v8 = vsel %vm21468_vm0, %v5127_v27, %v5128_v60  ;;  %v5129_v44 = vrot.slane %v4892_v46, 1  ;;  %vm21469_vm4 = vmmov %vm21465_vm1  ;;  %v13053_v15 = vpop.f32.mrb[180].mxu0 }
 0x2e1   : > { %13331 = vmatprep.mubr.msk.bf16.mxu1 %vm21465_vm1, %v17486_v42  ;;  %v17520_v42 = vadd.f32 %v13959_v11, %v5391_v41  ;;  %419 = vst.msk [vmem:[#allocation2 + $0x190] sm:$0xff] %vm21469_vm4, %v354_v48  ;;  %vm21470_vm13 = vmmov %vm21465_vm1  ;;  %v5191_v41 = vsel %vm21472_vm3, %v5159_v8, 0.0 }
 0x2e2   : > { %420 = vst.msk [vmem:[#allocation2 + $0x198] sm:$0xff] %vm21470_vm13, %v355_v23  ;;  %vm21473_vm9 = vmmov %vm21468_vm0  ;;  %v5158_v27 = vsel %vm21468_vm0, %v5128_v60, %v5129_v44  ;;  %v13963_v46 = vadd.f32 %v21478_v53, %v5191_v41  ;;  %v4905_v60 = vpop.f32.mrb[181].mxu0 }
 0x2e3   : > { %v5156_v57 = vsel %vm21473_vm9, %v5130_v1, %v5131_v25  ;;  %vm21474_vm7 = vmmov %vm21465_vm1  ;;  %v13975_v50 = vadd.f32 %v17265_v9, %v5158_v27  ;;  %v8728_v9 = vld [vmem:[%s20657_s1] sm:$0x3] }
 0x2e4   : > { %v13971_v11 = vadd.f32 %v17277_v14, %v5156_v57  ;;  %vm21475_vm4 = vmmov %vm21468_vm0  ;;  %v13087_v14 = vpop.f32.mrb[180].mxu1  ;;  %v17555_v48 = vadd.f32 %v13963_v46, %v17484_v22  ;;  %v21480_v27 = vld [vmem:[#allocation11_spill] sm:$0xff] }
 0x2e5   : > { %v5157_v30 = vsel %vm21475_vm4, %v5129_v44, %v5130_v1  ;;  %vm21476_vm13 = vmmov %vm21465_vm1  ;;  %v5423_v43 = vpop.f32.mrb[181].mxu1  ;;  %v17557_v23 = vadd.f32 %v13975_v50, %v5407_v12 }
 0x2e6   : > { %vm21477_vm15 = vmmov %vm21465_vm1  ;;  %v17550_v39 = vadd.f32 %v13971_v11, %v13083_v33  ;;  %v13054_v33 = vpop.f32.mrb[182].mxu0  ;;  %v17565_v1 = vpop.f32.mrb[182].mxu1  ;;  %v17573_v11 = vand.u32 %v8728_v9, %v14644_v5 }
 0x2e7   : > { %13264 = vmatmul.mubr.msk.bf16.gmra.mrb[28].mxu0 %vm21465_vm1, %v17250_v17  ;;  %v13983_v17 = vadd.f32 %v17282_v35, %v5157_v30  ;;  %v5132_v35 = vrot.slane %v4905_v60, 1  ;;  %v5135_v8 = vrot.slane %v13054_v33, 1  ;;  %v4908_v44 = vpop.f32.mrb[183].mxu0  ;;  %v5426_v41 = vpop.f32.mrb[183].mxu1  ;;  %vm21482_vm9 = vmmov %vm21468_vm0 }
 0x2e8   : > { %13332 = vmatmul.mubr.msk.bf16.gmra.mrb[28].mxu1 %vm21474_vm7, %v17524_v55  ;;  %13269 = vmatprep.mubr.msk.bf16.mxu0 %vm21476_vm13, %v17254_v32  ;;  %v5133_v12 = vrot.slane %v4908_v44, 1  ;;  %vm21481_vm7 = vnez %v21480_v27  ;;  %vm21484_vm13 = vmmov %vm21475_vm4  ;;  %v13091_v60 = vpop.f32.mrb[184].mxu1 }
 0x2e9   : > { %13337 = vmatprep.mubr.msk.bf16.mxu1 %vm21477_vm15, %v17254_v32  ;;  %v17552_v63 = vadd.f32 %v13983_v17, %v5410_v3  ;;  %v11766_v32 = vld [vmem:[%s20657_s1 + $0x10] sm:$0x3]  ;;  %v5134_v3 = vrot.slane %v13053_v15, 1  ;;  %vm21479_vm15 = vmmov %vm21468_vm0 }
 0x2ea   : > { %v5155_v22 = vsel %vm21479_vm15, %v5131_v25, %v5132_v35  ;;  %v17570_v57 = vand.u32 %v11766_v32, %v14644_v5  ;;  %vm21483_vm0 = vmmov %vm21465_vm1  ;;  %v5154_v17 = vsel %vm21475_vm4, %v5132_v35, %v5133_v12 }
 0x2eb   : > { %v5195_v30 = vsel %vm21481_vm7, %v5155_v22, 0.0  ;;  %v5152_v50 = vsel %vm21482_vm9, %v5134_v3, %v5135_v8  ;;  %v5153_v53 = vsel %vm21484_vm13, %v5133_v12, %v5134_v3  ;;  %v13991_v46 = vadd.f32 %v17309_v7, %v5154_v17  ;;  %vm21485_vm15 = vmmov %vm21483_vm0  ;;  %v5439_v7 = vpop.f32.mrb[185].mxu1  ;;  %v21488_v12 = vld [vmem:[#allocation16_spill] sm:$0xff] }
 0x2ec   : > { %v13987_v25 = vadd.f32 %v17320_v28, %v5152_v50  ;;  %v13999_v15 = vadd.f32 %v17325_v59, %v5153_v53  ;;  %vm21486_vm9 = vmmov %vm21483_vm0  ;;  %v13057_v28 = vpop.f32.mrb[184].mxu0  ;;  %v278_v53 = vld [vmem:[%s14671_s29 + $0x320] sm:$0xff] }
 0x2ed   : > { %v17606_v9 = vadd.f32 %v13991_v46, %v5423_v43  ;;  %v5138_v33 = vrot.slane %v13057_v28, 1  ;;  %vm21491_vm13 = vmmov %vm21486_vm9 }
 0x2ee   : > { %v17597_v32 = vadd.f32 %v13987_v25, %v13087_v14 }
 0x2ef   : > { %13270 = vmatmul.mubr.msk.bf16.vlgmr.msra.gmra.mrb[0].mxu0 %vm21465_vm1, %v17287_v0  ;;  %vm21487_vm1 = vmmov %vm21475_vm4 }
 0x2f0   : > { %13338 = vmatmul.mubr.msk.bf16.vlgmr.msra.gmra.mrb[32].mxu1 %vm21483_vm0, %v17287_v0  ;;  %13370 = vmatpush3.bf16.msra.mxu0 %v17295_v19  ;;  %v13979_v0 = vadd.f32 %v17268_v36, %v5195_v30  ;;  %v17601_v19 = vadd.f32 %v13999_v15, %v5426_v41  ;;  %v17608_v36 = vpop.f32.mrb[186].mxu1  ;;  %vm21489_vm0 = vnez %v21488_v12  ;;  %vm21490_vm4 = vmmov %vm21487_vm1 }
 0x2f1   : > { %13404 = vmatpush3.bf16.msra.mxu1 %v17306_v31  ;;  %13273 = vmatprep.mubr.msk.bf16.mxu0 %vm21485_vm15, %v17037_v38  ;;  %v4921_v31 = vpop.f32.mrb[185].mxu0  ;;  %v5442_v44 = vpop.f32.mrb[187].mxu1  ;;  %vm21492_vm15 = vmmov %vm21486_vm9 }
 0x2f2   : > { %13341 = vmatprep.mubr.msk.bf16.mxu1 %vm21486_vm9, %v17037_v38  ;;  %13437 = vmatprep.subr.bf16.mxu0 %v17570_v57  ;;  %v17604_v59 = vadd.f32 %v13979_v0, %v17522_v16  ;;  %v5136_v38 = vrot.slane %v4921_v31, 1  ;;  %v13058_v35 = vpop.f32.mrb[186].mxu0  ;;  %vm21493_vm9 = vmmov %vm21487_vm1  ;;  %v13095_v15 = vpop.f32.mrb[188].mxu1  ;;  %v280_v31 = vld [vmem:[%s14671_s29 + $0x330] sm:$0xff] }
 0x2f3   : > { %13471 = vmatprep.subr.bf16.mxu1 %v17573_v11  ;;  %v5139_v14 = vrot.slane %v13058_v35, 1  ;;  %v4924_v3 = vpop.f32.mrb[187].mxu0 }
 0x2f4   : > { %v5151_v41 = vsel %vm21487_vm1, %v5135_v8, %v5136_v38  ;;  %v5137_v22 = vrot.slane %v4924_v3, 1  ;;  %v13061_v46 = vpop.f32.mrb[188].mxu0  ;;  %v5455_v3 = vpop.f32.mrb[189].mxu1 }
 0x2f5   : > { %v5199_v16 = vsel %vm21489_vm0, %v5151_v41, 0.0  ;;  %v5148_v43 = vsel %vm21490_vm4, %v5138_v33, %v5139_v14  ;;  %vm21494_vm0 = vmmov %vm21491_vm13  ;;  %v13096_v41 = vpop.f32.mrb[190].mxu1 }
 0x2f6   : > { %v14003_v30 = vadd.f32 %v17353_v47, %v5148_v43  ;;  %v5150_v8 = vsel %vm21493_vm9, %v5136_v38, %v5137_v22  ;;  %v5149_v50 = vsel %vm21487_vm1, %v5137_v22, %v5138_v33  ;;  %vm21495_vm4 = vmmov %vm21494_vm0  ;;  %v279_v47 = vld [vmem:[%s14671_s29 + $0x328] sm:$0xff]  ;;  %v281_v38 = vld [vmem:[%s14671_s29 + $0x338] sm:$0xff]  ;;  %v4937_v33 = vpop.f32.mrb[189].mxu0 }
 0x2f7   : > { %13274 = vmatmul.mubr.msk.bf16.gmra.mrb[4].mxu0 %vm21491_vm13, %v17071_v49  ;;  %v14007_v25 = vadd.f32 %v17341_v54, %v5150_v8  ;;  %v14015_v17 = vadd.f32 %v17358_v52, %v5149_v50  ;;  %v356_v28 = vpack.c.bf16 %v279_v47, %v278_v53  ;;  %v5140_v52 = vrot.slane %v4937_v33, 1  ;;  %vm21496_vm13 = vmmov %vm21487_vm1  ;;  %v21505_v47 = vld [vmem:[#allocation23_spill] sm:$0xff] }
 0x2f8   : > { %13342 = vmatmul.mubr.msk.bf16.gmra.mrb[36].mxu1 %vm21492_vm15, %v17071_v49  ;;  %13277 = vmatprep.mubr.msk.bf16.mxu0 %vm21494_vm0, %v17073_v13  ;;  %v13995_v49 = vadd.f32 %v17312_v45, %v5199_v16  ;;  %v17634_v0 = vadd.f32 %v14003_v30, %v13091_v60  ;;  %v13062_v45 = vpop.f32.mrb[190].mxu0  ;;  %v357_v22 = vpack.c.bf16 %v281_v38, %v280_v31  ;;  %v5142_v60 = vrot.slane %v13061_v46, 1  ;;  %v5458_v30 = vpop.f32.mrb[191].mxu1  ;;  %vm21497_vm15 = vmmov %vm21494_vm0  ;;  %v21508_v31 = vld [vmem:[#allocation20_spill] sm:$0xff]  ;;  %v21510_v38 = vld [vmem:[#allocation31_spill] sm:$0xff] }
 0x2f9   : > { %13345 = vmatprep.mubr.msk.bf16.mxu1 %vm21495_vm4, %v17073_v13  ;;  %v17638_v35 = vadd.f32 %v14015_v17, %v5442_v44  ;;  %v17643_v54 = vadd.f32 %v14007_v25, %v5439_v7  ;;  %421 = vst.msk [vmem:[#allocation2 + $0x1a0] sm:$0xff] %vm21494_vm0, %v356_v28  ;;  %v5143_v16 = vrot.slane %v13062_v45, 1  ;;  %v4940_v43 = vpop.f32.mrb[191].mxu0  ;;  %v5147_v44 = vsel %vm21496_vm13, %v5139_v14, %v5140_v52  ;;  %vm21501_vm4 = vmmov %vm21487_vm1  ;;  %v21504_v14 = vld [vmem:[#allocation30_spill] sm:$0xff]  ;;  %v21511_v45 = vld [vmem:[#allocation28_spill] sm:$0xff] }
 0x2fa   : > { %v17641_v13 = vadd.f32 %v13995_v49, %v17565_v1  ;;  %v5141_v8 = vrot.slane %v4940_v43, 1  ;;  %422 = vst.msk [vmem:[#allocation2 + $0x1a8] sm:$0xff] %vm21497_vm15, %v357_v22  ;;  %v21498_v1 = vld [vmem:[#allocation21_spill] sm:$0xff]  ;;  %v21500_v25 = vrot.slane %v17397_v18, 1  ;;  %v21502_v49 = vld [vmem:[#allocation27_spill] sm:$0xff]  ;;  %vm21503_vm13 = vmmov %vm21494_vm0  ;;  %vm21506_vm15 = vnez %v21505_v47 }
 0x2fb   : > { %vm21499_vm9 = vnez %v21498_v1  ;;  %v5144_v50 = vsel %vm21487_vm1, %v5142_v60, %v5143_v16  ;;  %v285_v47 = vld [vmem:[%s14671_s29 + $0x358] sm:$0xff] }
 0x2fc   : > { %v5203_v7 = vsel %vm21499_vm9, %v5147_v44, 0.0  ;;  %v5175_v17 = vsel %vm21501_vm4, %v5143_v16, %v21500_v25  ;;  %v14019_v53 = vadd.f32 %v21504_v14, %v5144_v50  ;;  %vm21507_vm9 = vmmov %vm21487_vm1  ;;  %v5145_v18 = vsel %vm21487_vm1, %v5141_v8, %v5142_v60  ;;  %v21512_v16 = vld [vmem:[#allocation29_spill] sm:$0xff]  ;;  %v21513_v44 = vld [vmem:[#allocation15_spill] sm:$0xff] }
 0x2fd   : > { %v5207_v46 = vsel %vm21506_vm15, %v5175_v17, 0.0  ;;  %v5146_v28 = vsel %vm21507_vm9, %v5140_v52, %v5141_v8  ;;  %vm21509_vm4 = vmmov %vm21494_vm0  ;;  %v14031_v43 = vadd.f32 %v21512_v16, %v5145_v18  ;;  %v14011_v50 = vadd.f32 %v21513_v44, %v5203_v7  ;;  %v282_v25 = vld [vmem:[%s14671_s29 + $0x340] sm:$0xff]  ;;  %v283_v17 = vld [vmem:[%s14671_s29 + $0x348] sm:$0xff]  ;;  %v13101_v52 = vpop.f32.mrb[192].mxu0 }
 0x2fe   : > { %v14027_v33 = vadd.f32 %v21510_v38, %v5207_v46  ;;  %v14023_v22 = vadd.f32 %v21511_v45, %v5146_v28  ;;  %v17678_v14 = vadd.f32 %v14019_v53, %v13095_v15  ;;  %v358_v60 = vpack.c.bf16 %v283_v17, %v282_v25  ;;  %v284_v8 = vld [vmem:[%s14671_s29 + $0x350] sm:$0xff]  ;;  %v17686_v38 = vpop.f32.mrb[193].mxu0  ;;  %vm21514_vm9 = vmmov %vm21494_vm0 }
 0x2ff   : > { %13278 = vmatmul.mubr.msk.bf16.gmra.mrb[8].mxu0 %vm21494_vm0, %v21502_v49  ;;  %v5834_v18 = vrot.slane %v13101_v52, 7  ;;  %v13102_v7 = vpop.f32.mrb[194].mxu0  ;;  %v17691_v16 = vadd.f32 %v14011_v50, %v17608_v36  ;;  %v359_v44 = vpack.c.bf16 %v285_v47, %v284_v8  ;;  %v20769_v25 = vrot.slane %v17686_v38, 7  ;;  %v286_v8 = vld [vmem:[%s14671_s29 + $0x360] sm:$0xff] }
 0x300   : > { %13346 = vmatmul.mubr.msk.bf16.gmra.mrb[40].mxu1 %vm21503_vm13, %v21502_v49  ;;  %13281 = vmatprep.mubr.msk.bf16.mxu0 %vm21509_vm4, %v21508_v31  ;;  %v13135_v49 = vpop.f32.mrb[192].mxu1  ;;  %v17682_v1 = vadd.f32 %v14027_v33, %v13096_v41  ;;  %v17693_v15 = vadd.f32 %v14023_v22, %v5455_v3  ;;  %423 = vst.msk [vmem:[#allocation2 + $0x1b0] sm:$0xff] %vm21514_vm9, %v358_v60  ;;  %v5835_v53 = vrot.slane %v13102_v7, 7  ;;  %v5511_v33 = vpop.f32.mrb[195].mxu0  ;;  %vm21515_vm13 = vcmp.lt.s32.totalorder %v15063_v21, 1  ;;  %vm21516_vm4 = vmmov %vm21494_vm0  ;;  %v18428_v27 = vld [vmem:[#allocation2 + $0x1a0] sm:$0xff] }
 0x301   : > { %13349 = vmatprep.mubr.msk.bf16.mxu1 %vm21494_vm0, %v21508_v31  ;;  %v17684_v31 = vadd.f32 %v14031_v43, %v5458_v30  ;;  %v5962_v46 = vrot.slane %v13135_v49, 1  ;;  %v17688_v28 = vpop.f32.mrb[193].mxu1  ;;  %v5833_v17 = vrot.slane %v5511_v33, 7  ;;  %vm21517_vm9 = vmmov %vm21494_vm0  ;;  %v289_v33 = vld [vmem:[%s14671_s29 + $0x378] sm:$0xff] }
 0x302   : > { %v13136_v45 = vpop.f32.mrb[194].mxu1  ;;  %v20768_v41 = vrot.slane %v17688_v28, 1  ;;  %v5892_v36 = vsel %vm21515_vm13, %v5834_v18, %v5835_v53  ;;  %424 = vst.msk [vmem:[#allocation2 + $0x1b8] sm:$0xff] %vm21517_vm9, %v359_v44  ;;  %vm21518_vm15 = vmmov %vm21515_vm13 }
 0x303   : > { %v5963_v30 = vrot.slane %v13136_v45, 1  ;;  %v5676_v43 = vpop.f32.mrb[195].mxu1  ;;  %v5931_v47 = vadd.f32 %v17450_v20, %v5892_v36  ;;  %v5893_v22 = vsel %vm21518_vm15, %v5833_v17, %v5834_v18  ;;  %v5894_v50 = vsel %vm21515_vm13, %v20769_v25, %v5833_v17  ;;  %v287_v18 = vld [vmem:[%s14671_s29 + $0x368] sm:$0xff]  ;;  %v13105_v7 = vpop.f32.mrb[196].mxu0 }
 0x304   : > { %v5961_v52 = vrot.slane %v5676_v43, 1  ;;  %v5930_v60 = vadd.f32 %v17418_v4, %v5893_v22  ;;  %v360_v45 = vpack.c.bf16 %v287_v18, %v286_v8  ;;  %v288_v4 = vld [vmem:[%s14671_s29 + $0x370] sm:$0xff]  ;;  %v5838_v22 = vrot.slane %v13105_v7, 7 }
 0x305   : > { %v6020_v3 = vsel %vm21487_vm1, %v5962_v46, %v5963_v30 }
 0x306   : > { %v6021_v49 = vsel %vm21487_vm1, %v5961_v52, %v5962_v46  ;;  %v17733_v46 = vld [vmem:[%s20658_s2] ss:$0 sm:$0xff]  ;;  %v6058_v43 = vadd.f32 %v6020_v3, %v5930_v60 }
 0x307   : > { %13282 = vmatmul.mubr.msk.bf16.gmra.mrb[12].mxu0 %vm21516_vm4, %v17148_v6  ;;  %vm21519_vm4 = vmmov %vm21494_vm0 }
 0x308   : > { %13350 = vmatmul.mubr.msk.bf16.gmra.mrb[44].mxu1 %vm21494_vm0, %v17148_v6  ;;  %13285 = vmatprep.mubr.msk.bf16.mxu0 %vm21519_vm4, %v17150_v56  ;;  %v5929_v6 = vadd.f32 %v17420_v40, %v5894_v50  ;;  %vm21520_vm0 = vmmov %vm21487_vm1  ;;  %v13139_v40 = vpop.f32.mrb[196].mxu1  ;;  %v6097_v8 = vadd.f32 %v17733_v46, %v6058_v43 }
 0x309   : > { %v17724_v20 = vsel %vm21520_vm0, %v20768_v41, %v5961_v52  ;;  %vm21522_vm15 = vmmov %vm21519_vm4  ;;  %v5966_v17 = vrot.slane %v13139_v40, 1  ;;  %v5524_v52 = vpop.f32.mrb[197].mxu0  ;;  %v5689_v36 = vpop.f32.mrb[197].mxu1 }
 0x30a   : > { %21521 = vst [vmem:[#allocation36_spill] sm:$0xff] %v17724_v20  ;;  %13353 = vmatprep.mubr.msk.bf16.mxu1 %vm21522_vm15, %v17150_v56  ;;  %v6057_v44 = vadd.f32 %v6021_v49, %v5929_v6  ;;  %v5836_v50 = vrot.slane %v5524_v52, 7  ;;  %v5964_v56 = vrot.slane %v5689_v36, 1  ;;  %v17737_v41 = vpop.f32.mrb[198].mxu0  ;;  %v17739_v25 = vpop.f32.mrb[198].mxu1  ;;  %vm21523_vm9 = vmmov %vm21519_vm4  ;;  %v361_v20 = vpack.c.bf16 %v289_v33, %v288_v4 }
 0x30b   : > { %425 = vst.msk [vmem:[#allocation2 + $0x1c0] sm:$0xff] %vm21523_vm9, %v360_v45  ;;  %v5839_v49 = vrot.slane %v17737_v41, 7  ;;  %v5967_v6 = vrot.slane %v17739_v25, 1  ;;  %v5527_v60 = vpop.f32.mrb[199].mxu0  ;;  %v5692_v18 = vpop.f32.mrb[199].mxu1  ;;  %vm21524_vm1 = vmmov %vm21520_vm0  ;;  %vm21525_vm0 = vcmask 523264  }
 0x30c   : > { %v6096_v3 = vadd.f32 %v17733_v46, %v6057_v44  ;;  %v5891_v7 = vsel %vm21515_vm13, %v5835_v53, %v5836_v50  ;;  %v6019_v40 = vsel %vm21524_vm1, %v5963_v30, %v5964_v56  ;;  %v5837_v52 = vrot.slane %v5527_v60, 7  ;;  %426 = vst.msk [vmem:[#allocation2 + $0x1c8] sm:$0xff] %vm21519_vm4, %v361_v20  ;;  %vm21526_vm15 = vmmov %vm21525_vm0  ;;  %v18296_v25 = vld [vmem:[#allocation2 + $0x190] sm:$0xff] }
 0x30d   : > { %v5965_v36 = vrot.slane %v5692_v18, 1  ;;  %6129 = vst.msk [vmem:[%s16379_s14 + $0x110] sm:$0xff] %vm21525_vm0, %v6097_v8  ;;  %v5900_v41 = vsel %vm15115_vm6, %v5891_v7, 0.0  ;;  %v6027_v4 = vsel %vm15111_vm5, %v6019_v40, 0.0  ;;  %vm21529_vm9 = vmmov %vm21515_vm13  ;;  %v292_v40 = vld [vmem:[%s14671_s29 + $0x390] sm:$0xff] }
 0x30e   : > { %6128 = vst.msk [vmem:[%s16379_s14 + $0x108] sm:$0xff] %vm21526_vm15, %v6096_v3  ;;  %v5888_v53 = vsel %vm21529_vm9, %v5838_v22, %v5839_v49  ;;  %vm21530_vm13 = vmmov %vm21524_vm1  ;;  %v5932_v20 = vadd.f32 %v17452_v58, %v5900_v41  ;;  %v6059_v33 = vadd.f32 %v6027_v4, %v5931_v47  ;;  %v291_v47 = vld [vmem:[%s14671_s29 + $0x388] sm:$0xff] }
 0x30f   : > { %v6016_v30 = vsel %vm21530_vm13, %v5966_v17, %v5967_v6  ;;  %vm21531_vm1 = vmmov %vm21519_vm4  ;;  %v5935_v43 = vadd.f32 %v17480_v51, %v5888_v53  ;;  %v290_v51 = vld [vmem:[%s14671_s29 + $0x380] sm:$0xff] }
 0x310   : > { %13286 = vmatmul.mubr.msk.bf16.gmra.mrb[16].mxu0 %vm21531_vm1, %v17182_v24  ;;  %vm21532_vm4 = vmmov %vm21531_vm1  ;;  %v13143_v7 = vpop.f32.mrb[200].mxu1 }
 0x311   : > { %13354 = vmatmul.mubr.msk.bf16.gmra.mrb[48].mxu1 %vm21532_vm4, %v17182_v24  ;;  %vm21533_vm0 = vmmov %vm21529_vm9  ;;  %v6017_v24 = vsel %vm21530_vm13, %v5965_v36, %v5966_v17  ;;  %v5970_v41 = vrot.slane %v13143_v7, 1 }
 0x312   : > { %v5889_v44 = vsel %vm21533_vm0, %v5837_v52, %v5838_v22  ;;  %vm21534_vm15 = vmmov %vm21531_vm1  ;;  %13357 = vmatprep.mubr.msk.bf16.mxu1 %vm21532_vm4, %v17184_v61  ;;  %v6098_v22 = vadd.f32 %v17733_v46, %v6059_v33 }
 0x313   : > { %13289 = vmatprep.mubr.msk.bf16.mxu0 %vm21534_vm15, %v17184_v61  ;;  %vm21535_vm9 = vmmov %vm21533_vm0  ;;  %v5934_v3 = vadd.f32 %v17446_v29, %v5889_v44  ;;  %v362_v29 = vpack.c.bf16 %v291_v47, %v290_v51  ;;  %vm21537_vm0 = vcmask 523264  }
 0x314   : > { %v5890_v8 = vsel %vm21535_vm9, %v5836_v50, %v5837_v52  ;;  %vm21536_vm1 = vmmov %vm21530_vm13  ;;  %v13109_v50 = vpop.f32.mrb[200].mxu0  ;;  %v293_v52 = vld [vmem:[%s14671_s29 + $0x398] sm:$0xff]  ;;  %6130 = vst.msk [vmem:[%s16379_s14 + $0x118] sm:$0xff] %vm21537_vm0, %v6098_v22 }
 0x315   : > { %v6018_v58 = vsel %vm21536_vm1, %v5964_v56, %v5965_v36  ;;  %v5933_v60 = vadd.f32 %v17448_v62, %v5890_v8  ;;  %v6062_v17 = vadd.f32 %v6016_v30, %v5934_v3  ;;  %v5540_v4 = vpop.f32.mrb[201].mxu0  ;;  %v5705_v56 = vpop.f32.mrb[201].mxu1  ;;  %v363_v36 = vpack.c.bf16 %v293_v52, %v292_v40  ;;  %vm21538_vm15 = vmmov %vm21532_vm4 }
 0x316   : > { %v6060_v18 = vadd.f32 %v6018_v58, %v5932_v20  ;;  %v5840_v33 = vrot.slane %v5540_v4, 7  ;;  %v5968_v44 = vrot.slane %v5705_v56, 1  ;;  %v17791_v62 = vpop.f32.mrb[202].mxu0  ;;  %v17793_v20 = vpop.f32.mrb[202].mxu1  ;;  %427 = vst.msk [vmem:[#allocation2 + $0x1d0] sm:$0xff] %vm21538_vm15, %v362_v29  ;;  %v5842_v8 = vrot.slane %v13109_v50, 7  ;;  %vm21539_vm9 = vmmov %vm21532_vm4 }
 0x317   : > { %v6061_v61 = vadd.f32 %v6017_v24, %v5933_v60  ;;  %v6101_v30 = vadd.f32 %v17733_v46, %v6062_v17  ;;  %v5843_v3 = vrot.slane %v17791_v62, 7  ;;  %v5971_v58 = vrot.slane %v17793_v20, 1  ;;  %v5543_v51 = vpop.f32.mrb[203].mxu0  ;;  %v5708_v24 = vpop.f32.mrb[203].mxu1  ;;  %428 = vst.msk [vmem:[#allocation2 + $0x1d8] sm:$0xff] %vm21539_vm9, %v363_v36  ;;  %vm21540_vm13 = vmmov %vm21537_vm0 }
 0x318   : > { %v6099_v53 = vadd.f32 %v17733_v46, %v6060_v18  ;;  %vm21541_vm1 = vcmp.lt.s32.totalorder %v15063_v21, 1  ;;  %vm21542_vm4 = vcmp.lt.s32.totalorder %v15063_v21, 7  ;;  %v5841_v18 = vrot.slane %v5543_v51, 7 }
 0x319   : > { %v6100_v47 = vadd.f32 %v17733_v46, %v6061_v61  ;;  %v5887_v22 = vsel %vm21541_vm1, %v5839_v49, %v5840_v33  ;;  %v6015_v60 = vsel %vm21542_vm4, %v5967_v6, %v5968_v44  ;;  %6133 = vst.msk [vmem:[%s16379_s14 + $0x130] sm:$0xff] %vm21537_vm0, %v6101_v30  ;;  %vm21545_vm15 = vmmov %vm21541_vm1  ;;  %v11801_v6 = vld [vmem:[%s20657_s1 + $0x4] sm:$0x3]  ;;  %v5969_v20 = vrot.slane %v5708_v24, 1 }
 0x31a   : > { %6131 = vst.msk [vmem:[%s16379_s14 + $0x120] sm:$0xff] %vm21540_vm13, %v6099_v53  ;;  %v5904_v7 = vsel %vm15163_vm8, %v5887_v22, 0.0  ;;  %v6031_v40 = vsel %vm21162_vm11, %v6015_v60, 0.0  ;;  %v5884_v52 = vsel %vm21545_vm15, %v5842_v8, %v5843_v3  ;;  %vm21546_vm9 = vmmov %vm21542_vm4  ;;  %vm21547_vm13 = vcmask 23552   ;;  %v21551_v61 = vld [vmem:[#allocation19_spill] sm:$0xff]  ;;  %v21554_v53 = vld [vmem:[#allocation32_spill] sm:$0xff] }
 0x31b   : > { %v6012_v49 = vsel %vm21546_vm9, %v5970_v41, %v5971_v58  ;;  %13290 = vmatmul.mubr.msk.bf16.gmra.mrb[20].mxu0 %vm21547_vm13, %v17216_v37  ;;  %vm21548_vm1 = vmmov %vm21547_vm13  ;;  %v5936_v17 = vadd.f32 %v17482_v34, %v5904_v7  ;;  %v6063_v4 = vadd.f32 %v6031_v40, %v5935_v43  ;;  %v5939_v56 = vadd.f32 %v17518_v2, %v5884_v52  ;;  %v294_v34 = vld [vmem:[%s14671_s29 + $0x3a0] sm:$0xff]  ;;  %v295_v43 = vld [vmem:[%s14671_s29 + $0x3a8] sm:$0xff] }
 0x31c   : > { %13358 = vmatmul.mubr.msk.bf16.gmra.mrb[52].mxu1 %vm21548_vm1, %v17216_v37  ;;  %vm21549_vm4 = vmmov %vm21537_vm0  ;;  %v21556_v30 = vld [vmem:[#allocation35_spill] sm:$0xff]  ;;  %v17842_v22 = vand.u32 %v11801_v6, %v14644_v5  ;;  %v364_v60 = vpack.c.bf16 %v295_v43, %v294_v34 }
 0x31d   : > { %6132 = vst.msk [vmem:[%s16379_s14 + $0x128] sm:$0xff] %vm21549_vm4, %v6100_v47  ;;  %vm21550_vm0 = vmmov %vm21545_vm15  ;;  %v6102_v2 = vadd.f32 %v17733_v46, %v6063_v4  ;;  %v13147_v47 = vpop.f32.mrb[204].mxu1 }
 0x31e   : > { %v5885_v36 = vsel %vm21550_vm0, %v5841_v18, %v5842_v8  ;;  %vm21552_vm15 = vmmov %vm21548_vm1  ;;  %v13113_v8 = vpop.f32.mrb[204].mxu0  ;;  %v5721_v52 = vpop.f32.mrb[205].mxu1 }
 0x31f   : > { %13293 = vmatprep.mubr.msk.bf16.mxu0 %vm21552_vm15, %v21551_v61  ;;  %vm21553_vm9 = vmmov %vm21550_vm0  ;;  %v5938_v62 = vadd.f32 %v21554_v53, %v5885_v36  ;;  %v5846_v7 = vrot.slane %v13113_v8, 7  ;;  %v5556_v40 = vpop.f32.mrb[205].mxu0  ;;  %vm21559_vm0 = vcmask 523264   ;;  %v17852_v53 = vpop.f32.mrb[206].mxu1 }
 0x320   : > { %v5886_v37 = vsel %vm21553_vm9, %v5840_v33, %v5841_v18  ;;  %vm21555_vm13 = vmmov %vm21548_vm1  ;;  %vm21557_vm1 = vcmp.lt.s32.totalorder %v15063_v21, 7  ;;  %6134 = vst.msk [vmem:[%s16379_s14 + $0x138] sm:$0xff] %vm21559_vm0, %v6102_v2  ;;  %v17850_v6 = vpop.f32.mrb[206].mxu0 }
 0x321   : > { %13361 = vmatprep.mubr.msk.bf16.mxu1 %vm21555_vm13, %v21551_v61  ;;  %v5937_v51 = vadd.f32 %v21556_v30, %v5886_v37  ;;  %v6066_v33 = vadd.f32 %v6012_v49, %v5938_v62  ;;  %v6013_v24 = vsel %vm21557_vm1, %v5969_v20, %v5970_v41  ;;  %vm21558_vm4 = vmmov %vm21557_vm1  ;;  %v5974_v61 = vrot.slane %v13147_v47, 1 }
 0x322   : > { %v6014_v18 = vsel %vm21558_vm4, %v5968_v44, %v5969_v20  ;;  %v5844_v37 = vrot.slane %v5556_v40, 7  ;;  %vm21560_vm15 = vmmov %vm21555_vm13  ;;  %v5972_v49 = vrot.slane %v5721_v52, 1  ;;  %v20771_v44 = vrot.slane %v17850_v6, 7  ;;  %v5559_v20 = vpop.f32.mrb[207].mxu0 }
 0x323   : > { %v6064_v4 = vadd.f32 %v6014_v18, %v5936_v17  ;;  %v6065_v36 = vadd.f32 %v6013_v24, %v5937_v51  ;;  %429 = vst.msk [vmem:[#allocation2 + $0x1e0] sm:$0xff] %vm21560_vm15, %v364_v60  ;;  %v6105_v41 = vadd.f32 %v17733_v46, %v6066_v33  ;;  %v20770_v62 = vrot.slane %v17852_v53, 1  ;;  %v5724_v17 = vpop.f32.mrb[207].mxu1  ;;  %vm21561_vm13 = vmmov %vm21559_vm0  ;;  %v296_v24 = vld [vmem:[%s14671_s29 + $0x3b0] sm:$0xff]  ;;  %v297_v18 = vld [vmem:[%s14671_s29 + $0x3b8] sm:$0xff] }
 0x324   : > { %v5883_v2 = vsel %vm21553_vm9, %v5843_v3, %v5844_v37  ;;  %v5845_v30 = vrot.slane %v5559_v20, 7  ;;  %v6011_v47 = vsel %vm21557_vm1, %v5971_v58, %v5972_v49  ;;  %vm21563_vm4 = vmmov %vm21553_vm9  ;;  %v14580_v3 = vld [vmem:[#allocation2 + $0x178] sm:$0xff]  ;;  %v11784_v58 = vld [vmem:[%s20657_s1 + $0x2] sm:$0x3] }
 0x325   : > { %v6103_v34 = vadd.f32 %v17733_v46, %v6064_v4  ;;  %v6104_v43 = vadd.f32 %v17733_v46, %v6065_v36  ;;  %6137 = vst.msk [vmem:[%s16379_s14 + $0x150] sm:$0xff] %vm21561_vm13, %v6105_v41  ;;  %v5908_v8 = vsel %vm15212_vm10, %v5883_v2, 0.0  ;;  %v5880_v60 = vsel %vm21563_vm4, %v5846_v7, %v20771_v44  ;;  %vm21564_vm0 = vmmov %vm21557_vm1  ;;  %13294 = vmatmul.mubr.msk.bf16.gmra.mrb[24].mxu0 %vm21560_vm15, %v14580_v3  ;;  %v21568_v20 = vld [vmem:[#allocation34_spill] sm:$0xff] }
 0x326   : > { %v6008_v33 = vsel %vm21564_vm0, %v5974_v61, %v20770_v62  ;;  %vm21565_vm9 = vmmov %vm21560_vm15  ;;  %v5940_v40 = vadd.f32 %v17520_v42, %v5908_v8  ;;  %v6035_v4 = vsel %vm21458_vm2, %v6011_v47, 0.0  ;;  %v5943_v36 = vadd.f32 %v17555_v48, %v5880_v60  ;;  %v299_v47 = vld [vmem:[%s14671_s29 + $0x3c8] sm:$0xff]  ;;  %v13117_v60 = vpop.f32.mrb[208].mxu0  ;;  %v13151_v62 = vpop.f32.mrb[208].mxu1 }
 0x327   : > { %13362 = vmatmul.mubr.msk.bf16.gmra.mrb[56].mxu1 %vm21565_vm9, %v14580_v3  ;;  %6135 = vst.msk [vmem:[%s16379_s14 + $0x140] sm:$0xff] %vm21561_vm13, %v6103_v34  ;;  %vm21566_vm1 = vmmov %vm21561_vm13  ;;  %v5881_v41 = vsel %vm21563_vm4, %v5845_v30, %v5846_v7  ;;  %v6067_v2 = vadd.f32 %v6035_v4, %v5939_v56  ;;  %v5973_v8 = vrot.slane %v5724_v17, 1  ;;  %v298_v3 = vld [vmem:[%s14671_s29 + $0x3c0] sm:$0xff]  ;;  %v17904_v7 = vand.u32 %v11784_v58, %v14644_v5 }
 0x328   : > { %6136 = vst.msk [vmem:[%s16379_s14 + $0x148] sm:$0xff] %vm21566_vm1, %v6104_v43  ;;  %vm21569_vm0 = vmmov %vm21565_vm9  ;;  %v21572_v43 = vld [vmem:[#allocation37_spill] sm:$0xff]  ;;  %v365_v44 = vpack.c.bf16 %v297_v18, %v296_v24  ;;  %v366_v52 = vpack.c.bf16 %v299_v47, %v298_v3  ;;  %vm21573_vm13 = vcmp.lt.s32.totalorder %v15063_v21, 7  ;;  %v21578_v3 = vrot.slane %v17850_v6, 7 }
 0x329   : > { %13297 = vmatprep.mubr.msk.bf16.mxu0 %vm21569_vm0, %v21568_v20  ;;  %vm21570_vm15 = vmmov %vm21569_vm0  ;;  %v5942_v42 = vadd.f32 %v21572_v43, %v5881_v41  ;;  %v6106_v56 = vadd.f32 %v17733_v46, %v6067_v2  ;;  %v5737_v41 = vpop.f32.mrb[209].mxu1  ;;  %v5978_v43 = vrot.slane %v13151_v62, 1  ;;  %v17921_v2 = vld [vmem:[#allocation2 + $0x120] sm:$0xff] }
 0x32a   : > { %13365 = vmatprep.mubr.msk.bf16.mxu1 %vm21570_vm15, %v21568_v20  ;;  %vm21571_vm9 = vmmov %vm21563_vm4  ;;  %v17913_v24 = vpop.f32.mrb[210].mxu1  ;;  %431 = vst.msk [vmem:[#allocation2 + $0x1f0] sm:$0xff] %vm21569_vm0, %v366_v52  ;;  %vm21576_vm15 = vcmask 523264  }
 0x32b   : > { %v5882_v34 = vsel %vm21571_vm9, %v5844_v37, %v5845_v30  ;;  %v6070_v4 = vadd.f32 %v6008_v33, %v5942_v42  ;;  %v6009_v37 = vsel %vm21573_vm13, %v5973_v8, %v5974_v61  ;;  %vm21574_vm1 = vmmov %vm21573_vm13  ;;  %v5572_v30 = vpop.f32.mrb[209].mxu0  ;;  %6138 = vst.msk [vmem:[%s16379_s14 + $0x158] sm:$0xff] %vm21576_vm15, %v6106_v56  ;;  %v5976_v33 = vrot.slane %v5737_v41, 1 }
 0x32c   : > { %v5941_v48 = vadd.f32 %v17516_v10, %v5882_v34  ;;  %v6010_v17 = vsel %vm21574_vm1, %v5972_v49, %v5973_v8  ;;  %v5850_v34 = vrot.slane %v13117_v60, 7  ;;  %v17911_v58 = vpop.f32.mrb[210].mxu0  ;;  %vm21575_vm4 = vmmov %vm21569_vm0  ;;  %v5848_v49 = vrot.slane %v5572_v30, 7 }
 0x32d   : > { %v6068_v10 = vadd.f32 %v6010_v17, %v5940_v40  ;;  %430 = vst.msk [vmem:[#allocation2 + $0x1e8] sm:$0xff] %vm21575_vm4, %v365_v44  ;;  %v6109_v61 = vadd.f32 %v17733_v46, %v6070_v4  ;;  %v5851_v18 = vrot.slane %v17911_v58, 7  ;;  %v5575_v62 = vpop.f32.mrb[211].mxu0  ;;  %v5740_v40 = vpop.f32.mrb[211].mxu1  ;;  %v5979_v52 = vrot.slane %v17913_v24, 1  ;;  %vm21577_vm9 = vmmov %vm21576_vm15  ;;  %13298 = vmatmul.mubr.msk.bf16.gmra.mrb[28].mxu0 %vm21569_vm0, %v17524_v55 }
 0x32e   : > { %v6069_v20 = vadd.f32 %v6009_v37, %v5941_v48  ;;  %v5849_v8 = vrot.slane %v5575_v62, 7  ;;  %vm21579_vm13 = vcmp.lt.s32.totalorder %v15063_v21, 1  ;;  %v21580_v48 = vrot.slane %v17852_v53, 1  ;;  %vm21582_vm15 = vmmov %vm21569_vm0  ;;  %v13121_v62 = vpop.f32.mrb[212].mxu0 }
 0x32f   : > { %v6107_v42 = vadd.f32 %v17733_v46, %v6068_v10  ;;  %6141 = vst.msk [vmem:[%s16379_s14 + $0x170] sm:$0xff] %vm21577_vm9, %v6109_v61  ;;  %v5879_v47 = vsel %vm21579_vm13, %v21578_v3, %v5848_v49  ;;  %vm21581_vm4 = vmmov %vm21579_vm13  ;;  %v5977_v4 = vrot.slane %v5740_v40, 1  ;;  %13366 = vmatmul.mubr.msk.bf16.gmra.mrb[60].mxu1 %vm21582_vm15, %v17524_v55  ;;  %v13155_v40 = vpop.f32.mrb[212].mxu1 }
 0x330   : > { %v6108_v44 = vadd.f32 %v17733_v46, %v6069_v20  ;;  %v6007_v60 = vsel %vm21574_vm1, %v21580_v48, %v5976_v33  ;;  %v5876_v56 = vsel %vm21581_vm4, %v5850_v34, %v5851_v18  ;;  %vm21583_vm2 = vmmov %vm21577_vm9  ;;  %v5912_v53 = vsel %vm15261_vm12, %v5879_v47, 0.0 }
 0x331   : > { %6139 = vst.msk [vmem:[%s16379_s14 + $0x160] sm:$0xff] %vm21577_vm9, %v6107_v42  ;;  %v6039_v37 = vsel %vm21472_vm3, %v6007_v60, 0.0  ;;  %v5947_v17 = vadd.f32 %v17604_v59, %v5876_v56  ;;  %vm21585_vm13 = vmmov %vm21574_vm1  ;;  %v5944_v55 = vadd.f32 %v17557_v23, %v5912_v53  ;;  %v300_v23 = vld [vmem:[%s14671_s29 + $0x3d0] sm:$0xff]  ;;  %v17975_v60 = vld [vmem:[#allocation2 + $0x128] sm:$0xff] }
 0x332   : > { %6140 = vst.msk [vmem:[%s16379_s14 + $0x168] sm:$0xff] %vm21583_vm2, %v6108_v44  ;;  %v6004_v30 = vsel %vm21585_vm13, %v5978_v43, %v5979_v52  ;;  %vm21586_vm1 = vmmov %vm21569_vm0  ;;  %v6071_v41 = vadd.f32 %v6039_v37, %v5943_v36  ;;  %vm21588_vm2 = vcmp.lt.s32.totalorder %v15063_v21, 1  ;;  %v301_v36 = vld [vmem:[%s14671_s29 + $0x3d8] sm:$0xff]  ;;  %v5854_v44 = vrot.slane %v13121_v62, 7 }
 0x333   : > { %13371 = vmatprep.mubr.msk.bf16.mxu0 %vm21586_vm1, %v17921_v2  ;;  %vm21587_vm4 = vmmov %vm21569_vm0  ;;  %v5877_v10 = vsel %vm21588_vm2, %v5849_v8, %v5850_v34 }
 0x334   : > { %13405 = vmatprep.mubr.msk.bf16.mxu1 %vm21587_vm4, %v17921_v2  ;;  %vm21589_vm0 = vmmov %vm21588_vm2  ;;  %v5946_v58 = vadd.f32 %v17550_v39, %v5877_v10  ;;  %v6110_v34 = vadd.f32 %v17733_v46, %v6071_v41  ;;  %v18619_v45 = vld [vmem:[#allocation2 + $0x1e8] sm:$0xff] }
 0x335   : > { %v5878_v20 = vsel %vm21589_vm0, %v5848_v49, %v5849_v8  ;;  %vm21590_vm15 = vmmov %vm21585_vm13  ;;  %v5982_v49 = vrot.slane %v13155_v40, 1  ;;  %v5588_v8 = vpop.f32.mrb[213].mxu0  ;;  %21774 = vst [vmem:[#allocation15_spill] sm:$0xff] %v18619_v45 }
 0x336   : > { %v5945_v59 = vadd.f32 %v17552_v63, %v5878_v20  ;;  %v6005_v24 = vsel %vm21590_vm15, %v5977_v4, %v5978_v43  ;;  %vm21591_vm9 = vmmov %vm21585_vm13  ;;  %v5753_v63 = vpop.f32.mrb[213].mxu1  ;;  %v6074_v3 = vadd.f32 %v6004_v30, %v5946_v58  ;;  %v5852_v47 = vrot.slane %v5588_v8, 7  ;;  %v17971_v43 = vpop.f32.mrb[214].mxu0  ;;  %v17988_v58 = vld [vmem:[#allocation2 + $0x130] sm:$0xff] }
 0x337   : > { %v6006_v61 = vsel %vm21591_vm9, %v5976_v33, %v5977_v4  ;;  %v5980_v48 = vrot.slane %v5753_v63, 1  ;;  %v17973_v33 = vpop.f32.mrb[214].mxu1  ;;  %vm21592_vm13 = vcmask 523264   ;;  %v5855_v4 = vrot.slane %v17971_v43, 7  ;;  %v5591_v37 = vpop.f32.mrb[215].mxu0  ;;  %vm21593_vm1 = vmmov %vm21589_vm0 }
 0x338   : > { %v6072_v42 = vadd.f32 %v6006_v61, %v5944_v55  ;;  %v6073_v39 = vadd.f32 %v6005_v24, %v5945_v59  ;;  %6142 = vst.msk [vmem:[%s16379_s14 + $0x178] sm:$0xff] %vm21592_vm13, %v6110_v34  ;;  %v5983_v53 = vrot.slane %v17973_v33, 1  ;;  %v5756_v30 = vpop.f32.mrb[215].mxu1  ;;  %v367_v55 = vpack.c.bf16 %v301_v36, %v300_v23  ;;  %vm21594_vm4 = vmmov %vm21591_vm9 }
 0x339   : > { %v6113_v41 = vadd.f32 %v17733_v46, %v6074_v3  ;;  %v5875_v20 = vsel %vm21593_vm1, %v5851_v18, %v5852_v47  ;;  %v6003_v59 = vsel %vm21594_vm4, %v5979_v52, %v5980_v48  ;;  %vm21595_vm2 = vmmov %vm21592_vm13  ;;  %v5872_v40 = vsel %vm21589_vm0, %v5854_v44, %v5855_v4 }
 0x33a   : > { %v6111_v56 = vadd.f32 %v17733_v46, %v6072_v42  ;;  %v6112_v10 = vadd.f32 %v17733_v46, %v6073_v39  ;;  %v5916_v61 = vsel %vm21327_vm14, %v5875_v20, 0.0  ;;  %v6043_v62 = vsel %vm21481_vm7, %v6003_v59, 0.0  ;;  %vm21597_vm15 = vmmov %vm21594_vm4 }
 0x33b   : > { %v6000_v18 = vsel %vm21597_vm15, %v5982_v49, %v5983_v53  ;;  %vm21598_vm9 = vcmask 23552   ;;  %vm21601_vm4 = vmmov %vm21595_vm2  ;;  %v5948_v52 = vadd.f32 %v17606_v9, %v5916_v61  ;;  %v6075_v23 = vadd.f32 %v6043_v62, %v5947_v17  ;;  %v13125_v17 = vpop.f32.mrb[216].mxu0  ;;  %v18038_v61 = vld [vmem:[#allocation2 + $0x140] sm:$0xff] }
 0x33c   : > { %6143 = vst.msk [vmem:[%s16379_s14 + $0x180] sm:$0xff] %vm21595_vm2, %v6111_v56  ;;  %13372 = vmatmul.mubr.msk.bf16.vlgmr.msra.gmra.mrb[0].mxu0 %vm21598_vm9, %v17975_v60  ;;  %vm21599_vm13 = vmmov %vm21598_vm9  ;;  %v5951_v36 = vadd.f32 %v17641_v13, %v5872_v40  ;;  %v5853_v34 = vrot.slane %v5591_v37, 7  ;;  %v5981_v42 = vrot.slane %v5756_v30, 1  ;;  %v5858_v56 = vrot.slane %v13125_v17, 7 }
 0x33d   : > { %13406 = vmatmul.mubr.msk.bf16.vlgmr.msra.gmra.mrb[64].mxu1 %vm21599_vm13, %v17975_v60  ;;  %vm21600_vm1 = vmmov %vm21598_vm9  ;;  %6145 = vst.msk [vmem:[%s16379_s14 + $0x190] sm:$0xff] %vm21601_vm4, %v6113_v41  ;;  %13438 = vmatpush3.bf16.msra.mxu0 %v17570_v57  ;;  %v6114_v8 = vadd.f32 %v17733_v46, %v6075_v23  ;;  %vm21604_vm9 = vcmp.lt.s32.totalorder %v15063_v21, 1  ;;  %v13159_v57 = vpop.f32.mrb[216].mxu1 }
 0x33e   : > { %432 = vst.msk [vmem:[#allocation2 + $0x1f8] sm:$0xff] %vm21600_vm1, %v367_v55  ;;  %13472 = vmatpush3.bf16.msra.mxu1 %v17573_v11  ;;  %vm21602_vm0 = vmmov %vm21600_vm1  ;;  %v5873_v9 = vsel %vm21604_vm9, %v5853_v34, %v5854_v44  ;;  %13505 = vmatprep.subr.bf16.mxu0 %v17842_v22  ;;  %vm21606_vm1 = vcmp.lt.s32.totalorder %v15063_v21, 7  ;;  %v5604_v44 = vpop.f32.mrb[217].mxu0  ;;  %v5769_v43 = vpop.f32.mrb[217].mxu1  ;;  %v5986_v37 = vrot.slane %v13159_v57, 1 }
 0x33f   : > { %6144 = vst.msk [vmem:[%s16379_s14 + $0x188] sm:$0xff] %vm21595_vm2, %v6112_v10  ;;  %13375 = vmatprep.mubr.msk.bf16.mxu0 %vm21602_vm0, %v17988_v58  ;;  %vm21603_vm15 = vmmov %vm21602_vm0  ;;  %13539 = vmatprep.subr.bf16.mxu1 %v17904_v7  ;;  %v5950_v63 = vadd.f32 %v17597_v32, %v5873_v9  ;;  %v6001_v3 = vsel %vm21606_vm1, %v5981_v42, %v5982_v49  ;;  %v5856_v30 = vrot.slane %v5604_v44, 7  ;;  %v13126_v55 = vpop.f32.mrb[218].mxu0  ;;  %v18034_v41 = vpop.f32.mrb[218].mxu1  ;;  %v5984_v49 = vrot.slane %v5769_v43, 1 }
 0x340   : > { %13409 = vmatprep.mubr.msk.bf16.mxu1 %vm21603_vm15, %v17988_v58  ;;  %vm21605_vm13 = vmmov %vm21604_vm9  ;;  %6146 = vst.msk [vmem:[%s16379_s14 + $0x198] sm:$0xff] %vm21595_vm2, %v6114_v8  ;;  %v5859_v20 = vrot.slane %v13126_v55, 7  ;;  %v5607_v59 = vpop.f32.mrb[219].mxu0 }
 0x341   : > { %v5874_v13 = vsel %vm21605_vm13, %v5852_v47, %v5853_v34  ;;  %vm21607_vm4 = vmmov %vm21606_vm1  ;;  %v6078_v32 = vadd.f32 %v6000_v18, %v5950_v63  ;;  %v5857_v23 = vrot.slane %v5607_v59, 7  ;;  %vm21612_vm13 = vcmask 23552   ;;  %v13129_v44 = vpop.f32.mrb[220].mxu0  ;;  %v18090_v59 = vld [vmem:[#allocation2 + $0x148] sm:$0xff] }
 0x342   : > { %v5949_v11 = vadd.f32 %v17601_v19, %v5874_v13  ;;  %v6002_v39 = vsel %vm21607_vm4, %v5980_v48, %v5981_v42  ;;  %v18036_v19 = vld [vmem:[#allocation2 + $0x138] sm:$0xff]  ;;  %v5772_v48 = vpop.f32.mrb[219].mxu1  ;;  %vm21608_vm0 = vmmov %vm21604_vm9  ;;  %v21609_v42 = vld [vmem:[#allocation17_spill] sm:$0xff]  ;;  %v5620_v55 = vpop.f32.mrb[221].mxu0 }
 0x343   : > { %v6076_v47 = vadd.f32 %v6002_v39, %v5948_v52  ;;  %v5871_v40 = vsel %vm21608_vm0, %v5855_v4, %v5856_v30  ;;  %v5987_v52 = vrot.slane %v18034_v41, 1  ;;  %v6117_v18 = vadd.f32 %v17733_v46, %v6078_v32  ;;  %vm21611_vm9 = vmmov %vm21606_vm1  ;;  %v18080_v43 = vpop.f32.mrb[220].mxu1  ;;  %v13130_v32 = vpop.f32.mrb[222].mxu0 }
 0x344   : > { %v6077_v10 = vadd.f32 %v6001_v3, %v5949_v11  ;;  %vm21610_vm15 = vnez %v21609_v42  ;;  %v5999_v9 = vsel %vm21611_vm9, %v5983_v53, %v5984_v49  ;;  %13376 = vmatmul.mubr.msk.bf16.gmra.mrb[4].mxu0 %vm21612_vm13, %v18036_v19  ;;  %vm21613_vm1 = vmmov %vm21612_vm13  ;;  %v5868_v17 = vsel %vm21608_vm0, %v5858_v56, %v5859_v20  ;;  %v18084_v41 = vpop.f32.mrb[221].mxu1 }
 0x345   : > { %v6115_v62 = vadd.f32 %v17733_v46, %v6076_v47  ;;  %v5920_v8 = vsel %vm21610_vm15, %v5871_v40, 0.0  ;;  %13410 = vmatmul.mubr.msk.bf16.gmra.mrb[68].mxu1 %vm21613_vm1, %v18036_v19  ;;  %vm21614_vm4 = vmmov %vm21595_vm2  ;;  %vm21615_vm2 = vnez %v21488_v12  ;;  %v5955_v53 = vadd.f32 %v17691_v16, %v5868_v17 }
 0x346   : > { %v6116_v34 = vadd.f32 %v17733_v46, %v6077_v10  ;;  %v5952_v4 = vadd.f32 %v17643_v54, %v5920_v8  ;;  %v6047_v13 = vsel %vm21615_vm2, %v5999_v9, 0.0  ;;  %vm21616_vm15 = vmmov %vm21611_vm9  ;;  %v5870_v11 = vsel %vm21608_vm0, %v5856_v30, %v5857_v23  ;;  %v13164_v10 = vpop.f32.mrb[222].mxu1  ;;  %v18095_v8 = vld [vmem:[#allocation2 + $0x150] sm:$0xff] }
 0x347   : > { %6147 = vst.msk [vmem:[%s16379_s14 + $0x1a0] sm:$0xff] %vm21614_vm4, %v6115_v62  ;;  %v5996_v33 = vsel %vm21616_vm15, %v5986_v37, %v5987_v52  ;;  %vm21617_vm9 = vmmov %vm21613_vm1  ;;  %v6079_v54 = vadd.f32 %v6047_v13, %v5951_v36  ;;  %v5953_v63 = vadd.f32 %v17638_v35, %v5870_v11  ;;  %v5985_v39 = vrot.slane %v5772_v48, 1  ;;  %v21631_v11 = vld [vmem:[#allocation21_spill] sm:$0xff] }
 0x348   : > { %13379 = vmatprep.mubr.msk.bf16.mxu0 %vm21617_vm9, %v18038_v61  ;;  %vm21618_vm13 = vmmov %vm21613_vm1  ;;  %v5862_v36 = vrot.slane %v13129_v44, 7  ;;  %v5990_v16 = vrot.slane %v18080_v43, 1  ;;  %v5860_v35 = vrot.slane %v5620_v55, 7  ;;  %v5988_v40 = vrot.slane %v18084_v41, 1  ;;  %v21637_v44 = vld [vmem:[#allocation24_spill] sm:$0xff]  ;;  %v21640_v41 = vld [vmem:[#allocation33_spill] sm:$0xff] }
 0x349   : > { %13413 = vmatprep.mubr.msk.bf16.mxu1 %vm21618_vm13, %v18038_v61  ;;  %vm21619_vm1 = vmmov %vm21614_vm4  ;;  %v6118_v47 = vadd.f32 %v17733_v46, %v6079_v54  ;;  %v5997_v30 = vsel %vm21616_vm15, %v5985_v39, %v5986_v37  ;;  %v5991_v9 = vrot.slane %v13164_v10, 1 }
 0x34a   : > { %6149 = vst.msk [vmem:[%s16379_s14 + $0x1b0] sm:$0xff] %vm21619_vm1, %v6117_v18  ;;  %vm21620_vm4 = vmmov %vm21619_vm1  ;;  %v6081_v62 = vadd.f32 %v5997_v30, %v5953_v63  ;;  %v5623_v18 = vpop.f32.mrb[223].mxu0  ;;  %v21641_v30 = vrot.slane %v17688_v28, 1 }
 0x34b   : > { %6148 = vst.msk [vmem:[%s16379_s14 + $0x1a8] sm:$0xff] %vm21620_vm4, %v6116_v34  ;;  %vm21621_vm2 = vmmov %vm21608_vm0  ;;  %v5788_v34 = vpop.f32.mrb[223].mxu1  ;;  %v5861_v13 = vrot.slane %v5623_v18, 7 }
 0x34c   : > { %v5869_v57 = vsel %vm21621_vm2, %v5857_v23, %v5858_v56  ;;  %vm21622_vm2 = vmmov %vm21616_vm15  ;;  %v5863_v23 = vrot.slane %v13130_v32, 7  ;;  %v6120_v17 = vadd.f32 %v17733_v46, %v6081_v62  ;;  %v13203_v10 = vpop.f32.mrb[224].mxu1  ;;  %v21645_v62 = vld [vmem:[#allocation23_spill] sm:$0xff] }
 0x34d   : > { %v5954_v3 = vadd.f32 %v17634_v0, %v5869_v57  ;;  %v5998_v0 = vsel %vm21622_vm2, %v5984_v49, %v5985_v39  ;;  %vm21623_vm9 = vmmov %vm21619_vm1  ;;  %v21633_v39 = vrot.slane %v17686_v38, 7 }
 0x34e   : > { %6150 = vst.msk [vmem:[%s16379_s14 + $0x1b8] sm:$0xff] %vm21623_vm9, %v6118_v47  ;;  %v6080_v48 = vadd.f32 %v5998_v0, %v5952_v4  ;;  %vm21624_vm13 = vmmov %vm21608_vm0  ;;  %vm21628_vm0 = vcmask 23552  }
 0x34f   : > { %v6082_v56 = vadd.f32 %v5996_v33, %v5954_v3  ;;  %v5867_v49 = vsel %vm21624_vm13, %v5859_v20, %v5860_v35  ;;  %v21625_v33 = vld [vmem:[#allocation22_spill] sm:$0xff]  ;;  %vm21627_vm4 = vmmov %vm21622_vm2  ;;  %13380 = vmatmul.mubr.msk.bf16.gmra.mrb[8].mxu0 %vm21628_vm0, %v18090_v59  ;;  %v5864_v3 = vsel %vm21624_vm13, %v5862_v36, %v5863_v23 }
 0x350   : > { %v6119_v4 = vadd.f32 %v17733_v46, %v6080_v48  ;;  %vm21626_vm1 = vnez %v21625_v33  ;;  %v5995_v57 = vsel %vm21627_vm4, %v5987_v52, %v5988_v40  ;;  %vm21629_vm15 = vmmov %vm21628_vm0  ;;  %13383 = vmatprep.mubr.msk.bf16.mxu0 %vm21628_vm0, %v18095_v8  ;;  %v5959_v55 = vadd.f32 %v17682_v1, %v5864_v3  ;;  %v13169_v1 = vpop.f32.mrb[224].mxu0 }
 0x351   : > { %v6121_v37 = vadd.f32 %v17733_v46, %v6082_v56  ;;  %v5924_v54 = vsel %vm21626_vm1, %v5867_v49, 0.0  ;;  %13414 = vmatmul.mubr.msk.bf16.gmra.mrb[72].mxu1 %vm21629_vm15, %v18090_v59  ;;  %vm21630_vm2 = vmmov %vm21623_vm9  ;;  %vm21632_vm9 = vnez %v21631_v11  ;;  %v18152_v49 = vpop.f32.mrb[225].mxu1 }
 0x352   : > { %v5956_v20 = vadd.f32 %v17693_v15, %v5924_v54  ;;  %v6051_v63 = vsel %vm21632_vm9, %v5995_v57, 0.0  ;;  %vm21634_vm4 = vmmov %vm21624_vm13  ;;  %6151 = vst.msk [vmem:[%s16379_s14 + $0x1c0] sm:$0xff] %vm21630_vm2, %v6119_v4  ;;  %vm21638_vm9 = vnez %v21637_v44  ;;  %vm21639_vm13 = vcmp.lt.s32.totalorder %v15063_v21, 7  ;;  %v18155_v54 = vld [vmem:[#allocation2 + $0x158] sm:$0xff] }
 0x353   : > { %6153 = vst.msk [vmem:[%s16379_s14 + $0x1d0] sm:$0xff] %vm21630_vm2, %v6121_v37  ;;  %v5895_v52 = vsel %vm21634_vm4, %v5863_v23, %v21633_v39  ;;  %vm21635_vm15 = vmmov %vm21628_vm0  ;;  %v6083_v15 = vadd.f32 %v6051_v63, %v5955_v53  ;;  %v5992_v38 = vsel %vm21639_vm13, %v5990_v16, %v5991_v9  ;;  %v18150_v37 = vpop.f32.mrb[225].mxu0  ;;  %v6557_v63 = vrot.slane %v13169_v1, 7 }
 0x354   : > { %13417 = vmatprep.mubr.msk.bf16.mxu1 %vm21635_vm15, %v18095_v8  ;;  %vm21636_vm1 = vmmov %vm21630_vm2  ;;  %v5896_v47 = vsel %vm21638_vm9, %v5895_v52, 0.0  ;;  %vm21646_vm15 = vnez %v21645_v62  ;;  %v18160_v52 = vld [vmem:[#allocation2 + $0x160] sm:$0xff]  ;;  %v20774_v43 = vrot.slane %v18150_v37, 7 }
 0x355   : > { %6152 = vst.msk [vmem:[%s16379_s14 + $0x1c8] sm:$0xff] %vm21636_vm1, %v6120_v17  ;;  %v5928_v56 = vadd.f32 %v21640_v41, %v5896_v47  ;;  %vm21642_vm4 = vmmov %vm21639_vm13  ;;  %vm21643_vm1 = vcmp.lt.s32.totalorder %v15063_v21, 1  ;;  %v6122_v48 = vadd.f32 %v17733_v46, %v6083_v15  ;;  %v5989_v17 = vrot.slane %v5788_v34, 1 }
 0x356   : > { %v6023_v0 = vsel %vm21642_vm4, %v5991_v9, %v21641_v30  ;;  %v5865_v53 = vsel %vm21643_vm1, %v5861_v13, %v5862_v36  ;;  %vm21644_vm0 = vmmov %vm21643_vm1  ;;  %v21647_v36 = vld [vmem:[#allocation36_spill] sm:$0xff]  ;;  %vm21649_vm1 = vcmask 23552  }
 0x357   : > { %v5866_v32 = vsel %vm21644_vm0, %v5860_v35, %v5861_v13  ;;  %v6055_v23 = vsel %vm21646_vm15, %v6023_v0, 0.0  ;;  %v5958_v28 = vadd.f32 %v17678_v14, %v5865_v53  ;;  %v6056_v9 = vadd.f32 %v21647_v36, %v5928_v56  ;;  %v13170_v35 = vpop.f32.mrb[226].mxu0  ;;  %v13204_v13 = vpop.f32.mrb[226].mxu1  ;;  %6154 = vst.msk [vmem:[%s16379_s14 + $0x1d8] sm:$0xff] %vm21630_vm2, %v6122_v48  ;;  %vm21648_vm13 = vmmov %vm21642_vm4  ;;  %13384 = vmatmul.mubr.msk.bf16.gmra.mrb[12].mxu0 %vm21649_vm1, %v18155_v54 }
 0x358   : > { %v5957_v18 = vadd.f32 %v17684_v31, %v5866_v32  ;;  %v6087_v4 = vadd.f32 %v6055_v23, %v5959_v55  ;;  %v6817_v31 = vrot.slane %v13203_v10, 1  ;;  %v20773_v14 = vrot.slane %v18152_v49, 1  ;;  %v6266_v3 = vpop.f32.mrb[227].mxu0  ;;  %v6431_v39 = vpop.f32.mrb[227].mxu1  ;;  %vm21650_vm0 = vmmov %vm21649_vm1 }
 0x359   : > { %v6086_v57 = vadd.f32 %v5992_v38, %v5958_v28  ;;  %v6095_v15 = vadd.f32 %v17733_v46, %v6056_v9  ;;  %v5993_v47 = vsel %vm21648_vm13, %v5989_v17, %v5990_v16  ;;  %v5994_v55 = vsel %vm21642_vm4, %v5988_v40, %v5989_v17  ;;  %13418 = vmatmul.mubr.msk.bf16.gmra.mrb[76].mxu1 %vm21650_vm0, %v18155_v54  ;;  %vm21651_vm15 = vmmov %vm21630_vm2  ;;  %v13207_v28 = vpop.f32.mrb[228].mxu1 }
 0x35a   : > { %v6126_v34 = vadd.f32 %v17733_v46, %v6087_v4  ;;  %v6084_v41 = vadd.f32 %v5994_v55, %v5956_v20  ;;  %v6085_v56 = vadd.f32 %v5993_v47, %v5957_v18  ;;  %v6558_v30 = vrot.slane %v13170_v35, 7  ;;  %vm21652_vm13 = vmmov %vm21650_vm0  ;;  %v13173_v18 = vpop.f32.mrb[228].mxu0  ;;  %v6444_v17 = vpop.f32.mrb[229].mxu1 }
 0x35b   : > { %v6125_v38 = vadd.f32 %v17733_v46, %v6086_v57  ;;  %6127 = vst.msk [vmem:[%s16379_s14 + $0x100] sm:$0xff] %vm21630_vm2, %v6095_v15  ;;  %v6818_v16 = vrot.slane %v13204_v13, 1  ;;  %v6556_v40 = vrot.slane %v6266_v3, 7  ;;  %v6816_v0 = vrot.slane %v6431_v39, 1  ;;  %13387 = vmatprep.mubr.msk.bf16.mxu0 %vm21652_vm13, %v18160_v52  ;;  %vm21653_vm4 = vmmov %vm21650_vm0  ;;  %v6279_v4 = vpop.f32.mrb[229].mxu0  ;;  %v18214_v3 = vld [vmem:[#allocation2 + $0x168] sm:$0xff] }
 0x35c   : > { %6158 = vst.msk [vmem:[%s16379_s14 + $0x1f8] sm:$0xff] %vm21651_vm15, %v6126_v34  ;;  %13421 = vmatprep.mubr.msk.bf16.mxu1 %vm21653_vm4, %v18160_v52  ;;  %vm21654_vm1 = vmmov %vm21630_vm2  ;;  %v6123_v20 = vadd.f32 %v17733_v46, %v6084_v41  ;;  %v6124_v53 = vadd.f32 %v17733_v46, %v6085_v56  ;;  %vm21655_vm15 = vcmp.lt.s32.totalorder %v15063_v21, 1  ;;  %vm21656_vm0 = vcmp.lt.s32.totalorder %v15063_v21, 7 }
 0x35d   : > { %6157 = vst.msk [vmem:[%s16379_s14 + $0x1f0] sm:$0xff] %vm21654_vm1, %v6125_v38  ;;  %v6615_v32 = vsel %vm21655_vm15, %v6557_v63, %v6558_v30  ;;  %v6875_v1 = vsel %vm21656_vm0, %v6817_v31, %v6818_v16  ;;  %vm21657_vm2 = vmmov %vm21655_vm15  ;;  %v6821_v35 = vrot.slane %v13207_v28, 1  ;;  %v6559_v13 = vrot.slane %v6279_v4, 7  ;;  %v18216_v38 = vld [vmem:[#allocation2 + $0x170] sm:$0xff] }
 0x35e   : > { %v6616_v10 = vsel %vm21657_vm2, %v6556_v40, %v6557_v63  ;;  %vm21658_vm13 = vmmov %vm21657_vm2  ;;  %6155 = vst.msk [vmem:[%s16379_s14 + $0x1e0] sm:$0xff] %vm21654_vm1, %v6123_v20  ;;  %v6819_v57 = vrot.slane %v6444_v17, 1  ;;  %v13174_v63 = vpop.f32.mrb[230].mxu0  ;;  %v6561_v39 = vrot.slane %v13173_v18, 7 }
 0x35f   : > { %v6617_v48 = vsel %vm21658_vm13, %v20774_v43, %v6556_v40  ;;  %vm21659_vm4 = vmmov %vm21656_vm0  ;;  %v18204_v46 = vadd.f32 %v6875_v1, %v6616_v10  ;;  %v6562_v15 = vrot.slane %v13174_v63, 7  ;;  %v6282_v47 = vpop.f32.mrb[231].mxu0 }
 0x360   : > { %v6876_v23 = vsel %vm21659_vm4, %v6816_v0, %v6817_v31  ;;  %vm21660_vm9 = vmmov %vm21654_vm1  ;;  %v13208_v31 = vpop.f32.mrb[230].mxu1  ;;  %v6874_v56 = vsel %vm21656_vm0, %v6818_v16, %v6819_v57  ;;  %v6560_v40 = vrot.slane %v6282_v47, 7  ;;  %vm21664_vm4 = vcmask 23552  }
 0x361   : > { %6156 = vst.msk [vmem:[%s16379_s14 + $0x1e8] sm:$0xff] %vm21660_vm9, %v6124_v53  ;;  %vm21661_vm15 = vmmov %vm21656_vm0  ;;  %v18212_v9 = vadd.f32 %v6876_v23, %v6617_v48  ;;  %v6822_v34 = vrot.slane %v13208_v31, 1  ;;  %v6447_v55 = vpop.f32.mrb[231].mxu1  ;;  %v6882_v53 = vsel %vm15111_vm5, %v6874_v56, 0.0  ;;  %v6611_v1 = vsel %vm21657_vm2, %v6561_v39, %v6562_v15  ;;  %13388 = vmatmul.mubr.msk.bf16.gmra.mrb[16].mxu0 %vm21664_vm4, %v18214_v3  ;;  %v18254_v56 = vld [vmem:[#allocation2 + $0x178] sm:$0xff] }
 0x362   : > { %v18210_v36 = vsel %vm21661_vm15, %v20773_v14, %v6816_v0  ;;  %vm21662_vm9 = vmmov %vm21657_vm2  ;;  %v6820_v0 = vrot.slane %v6447_v55, 1  ;;  %v18252_v17 = vadd.f32 %v6882_v53, %v6615_v32  ;;  %v13211_v63 = vpop.f32.mrb[232].mxu1 }
 0x363   : > { %v6614_v41 = vsel %vm21662_vm9, %v6558_v30, %v6559_v13  ;;  %vm21663_vm13 = vmmov %vm21656_vm0 }
 0x364   : > { %v6623_v20 = vsel %vm15115_vm6, %v6614_v41, 0.0  ;;  %v6871_v10 = vsel %vm21663_vm13, %v6821_v35, %v6822_v34  ;;  %vm21665_vm1 = vmmov %vm21664_vm4  ;;  %v6872_v48 = vsel %vm21656_vm0, %v6820_v0, %v6821_v35  ;;  %v6825_v35 = vrot.slane %v13211_v63, 1 }
 0x365   : > { %13422 = vmatmul.mubr.msk.bf16.gmra.mrb[80].mxu1 %vm21665_vm1, %v18214_v3  ;;  %vm21666_vm15 = vmmov %vm21657_vm2 }
 0x366   : > { %v6612_v30 = vsel %vm21666_vm15, %v6560_v40, %v6561_v39  ;;  %vm21667_vm9 = vmmov %vm21657_vm2  ;;  %v6460_v39 = vpop.f32.mrb[233].mxu1 }
 0x367   : > { %v6613_v16 = vsel %vm21667_vm9, %v6559_v13, %v6560_v40  ;;  %vm21668_vm2 = vmmov %vm21656_vm0  ;;  %v18244_v18 = vadd.f32 %v6871_v10, %v6612_v30  ;;  %v13177_v13 = vpop.f32.mrb[232].mxu0  ;;  %v6823_v47 = vrot.slane %v6460_v39, 1  ;;  %v13212_v41 = vpop.f32.mrb[234].mxu1 }
 0x368   : > { %v6873_v23 = vsel %vm21668_vm2, %v6819_v57, %v6820_v0  ;;  %vm21669_vm13 = vmmov %vm21665_vm1  ;;  %v18248_v4 = vadd.f32 %v6872_v48, %v6613_v16  ;;  %v6295_v31 = vpop.f32.mrb[233].mxu0  ;;  %v6565_v40 = vrot.slane %v13177_v13, 7  ;;  %v6463_v30 = vpop.f32.mrb[235].mxu1  ;;  %v18256_v16 = vld [vmem:[#allocation2 + $0x180] sm:$0xff] }
 0x369   : > { %13391 = vmatprep.mubr.msk.bf16.mxu0 %vm21669_vm13, %v18216_v38  ;;  %v18246_v28 = vadd.f32 %v6873_v23, %v6623_v20  ;;  %vm21670_vm4 = vmmov %vm21665_vm1  ;;  %v6563_v57 = vrot.slane %v6295_v31, 7  ;;  %v13178_v55 = vpop.f32.mrb[234].mxu0  ;;  %v6826_v20 = vrot.slane %v13212_v41, 1  ;;  %v6824_v23 = vrot.slane %v6463_v30, 1 }
 0x36a   : > { %13425 = vmatprep.mubr.msk.bf16.mxu1 %vm21670_vm4, %v18216_v38  ;;  %v6566_v0 = vrot.slane %v13178_v55, 7  ;;  %v6298_v10 = vpop.f32.mrb[235].mxu0  ;;  %vm21671_vm1 = vmmov %vm21667_vm9 }
 0x36b   : > { %v6610_v32 = vsel %vm21671_vm1, %v6562_v15, %v6563_v57  ;;  %vm21672_vm15 = vmmov %vm21656_vm0  ;;  %v6564_v48 = vrot.slane %v6298_v10, 7  ;;  %v6867_v39 = vsel %vm21656_vm0, %v6825_v35, %v6826_v20 }
 0x36c   : > { %v6870_v53 = vsel %vm21672_vm15, %v6822_v34, %v6823_v47  ;;  %v6627_v63 = vsel %vm15163_vm8, %v6610_v32, 0.0  ;;  %vm21673_vm9 = vmmov %vm21671_vm1 }
 0x36d   : > { %v6886_v13 = vsel %vm21162_vm11, %v6870_v53, 0.0  ;;  %v6607_v31 = vsel %vm21673_vm9, %v6565_v40, %v6566_v0  ;;  %vm21674_vm2 = vmmov %vm21670_vm4  ;;  %v6609_v34 = vsel %vm21671_vm1, %v6563_v57, %v6564_v48  ;;  %v13181_v57 = vpop.f32.mrb[236].mxu0  ;;  %v13215_v53 = vpop.f32.mrb[236].mxu1 }
 0x36e   : > { %13392 = vmatmul.mubr.msk.bf16.gmra.mrb[20].mxu0 %vm21674_vm2, %v18254_v56  ;;  %vm21675_vm13 = vmmov %vm21674_vm2  ;;  %v6476_v14 = vpop.f32.mrb[237].mxu1 }
 0x36f   : > { %13426 = vmatmul.mubr.msk.bf16.gmra.mrb[84].mxu1 %vm21675_vm13, %v18254_v56  ;;  %vm21676_vm4 = vmmov %vm21671_vm1  ;;  %v13216_v29 = vpop.f32.mrb[238].mxu1 }
 0x370   : > { %v6608_v15 = vsel %vm21676_vm4, %v6564_v48, %v6565_v40  ;;  %vm21677_vm15 = vmmov %vm21656_vm0  ;;  %v18292_v40 = vadd.f32 %v6886_v13, %v6611_v1  ;;  %v6311_v48 = vpop.f32.mrb[237].mxu0 }
 0x371   : > { %v6868_v55 = vsel %vm21677_vm15, %v6824_v23, %v6825_v35  ;;  %vm21678_vm9 = vmmov %vm21656_vm0  ;;  %v18284_v10 = vadd.f32 %v6867_v39, %v6608_v15  ;;  %v6829_v35 = vrot.slane %v13215_v53, 1  ;;  %v13182_v43 = vpop.f32.mrb[238].mxu0  ;;  %v18294_v39 = vld [vmem:[#allocation2 + $0x188] sm:$0xff] }
 0x372   : > { %v6869_v41 = vsel %vm21678_vm9, %v6823_v47, %v6824_v23  ;;  %vm21679_vm0 = vmmov %vm21674_vm2  ;;  %v18288_v32 = vadd.f32 %v6868_v55, %v6609_v34  ;;  %v6567_v47 = vrot.slane %v6311_v48, 7  ;;  %v6827_v23 = vrot.slane %v6476_v14, 1  ;;  %v6314_v55 = vpop.f32.mrb[239].mxu0 }
 0x373   : > { %13395 = vmatprep.mubr.msk.bf16.mxu0 %vm21679_vm0, %v18256_v16  ;;  %21680 = vst [vmem:[#allocation14_spill] sm:$0xff] %v18284_v10  ;;  %v18286_v30 = vadd.f32 %v6869_v41, %v6627_v63  ;;  %vm21683_vm2 = vmmov %vm21679_vm0  ;;  %v6569_v63 = vrot.slane %v13181_v57, 7  ;;  %v6570_v15 = vrot.slane %v13182_v43, 7  ;;  %v6830_v34 = vrot.slane %v13216_v29, 1  ;;  %v6479_v41 = vpop.f32.mrb[239].mxu1 }
 0x374   : > { %21682 = vst [vmem:[#allocation25_spill] sm:$0xff] %v18288_v32  ;;  %13429 = vmatprep.mubr.msk.bf16.mxu1 %vm21683_vm2, %v18256_v16  ;;  %vm21684_vm13 = vmmov %vm21671_vm1  ;;  %v6568_v53 = vrot.slane %v6314_v55, 7  ;;  %v6828_v48 = vrot.slane %v6479_v41, 1  ;;  %v21686_v32 = vld [vmem:[#allocation7_spill] sm:$0xff] }
 0x375   : > { %21681 = vst [vmem:[#allocation18_spill] sm:$0xff] %v18286_v30  ;;  %v6606_v1 = vsel %vm21684_vm13, %v6566_v0, %v6567_v47  ;;  %vm21685_vm4 = vmmov %vm21678_vm9  ;;  %vm21687_vm1 = vnez %v21686_v32 }
 0x376   : > { %v6866_v13 = vsel %vm21685_vm4, %v6826_v20, %v6827_v23  ;;  %v6631_v14 = vsel %vm15212_vm10, %v6606_v1, 0.0  ;;  %vm21688_vm15 = vmmov %vm21684_vm13  ;;  %13396 = vmatmul.mubr.msk.bf16.gmra.mrb[24].mxu0 %vm21679_vm0, %v18294_v39  ;;  %v6604_v0 = vsel %vm21684_vm13, %v6568_v53, %v6569_v63 }
 0x377   : > { %v6890_v57 = vsel %vm21687_vm1, %v6866_v13, 0.0  ;;  %v6603_v29 = vsel %vm21688_vm15, %v6569_v63, %v6570_v15  ;;  %vm21689_vm9 = vmmov %vm21685_vm4 }
 0x378   : > { %v6863_v43 = vsel %vm21689_vm9, %v6829_v35, %v6830_v34  ;;  %vm21690_vm2 = vmmov %vm21679_vm0  ;;  %v18332_v63 = vadd.f32 %v6890_v57, %v6607_v31 }
 0x379   : > { %13430 = vmatmul.mubr.msk.bf16.gmra.mrb[88].mxu1 %vm21690_vm2, %v18294_v39  ;;  %vm21691_vm4 = vmmov %vm21684_vm13  ;;  %v18324_v1 = vadd.f32 %v6863_v43, %v6604_v0  ;;  %v18334_v43 = vld [vmem:[#allocation2 + $0x198] sm:$0xff] }
 0x37a   : > { %v6605_v20 = vsel %vm21691_vm4, %v6567_v47, %v6568_v53  ;;  %vm21692_vm1 = vmmov %vm21689_vm9  ;;  %13433 = vmatprep.mubr.msk.bf16.mxu1 %vm21679_vm0, %v18296_v25  ;;  %v13185_v47 = vpop.f32.mrb[240].mxu0  ;;  %v13219_v53 = vpop.f32.mrb[240].mxu1 }
 0x37b   : > { %v6864_v55 = vsel %vm21692_vm1, %v6828_v48, %v6829_v35  ;;  %vm21693_vm15 = vmmov %vm21692_vm1  ;;  %v6833_v35 = vrot.slane %v13219_v53, 1  ;;  %v6327_v51 = vpop.f32.mrb[241].mxu0  ;;  %v6492_v10 = vpop.f32.mrb[241].mxu1 }
 0x37c   : > { %v6865_v41 = vsel %vm21693_vm15, %v6827_v23, %v6828_v48  ;;  %vm21694_vm9 = vmmov %vm21679_vm0  ;;  %v18328_v32 = vadd.f32 %v6864_v55, %v6605_v20  ;;  %v6571_v23 = vrot.slane %v6327_v51, 7  ;;  %v6831_v48 = vrot.slane %v6492_v10, 1  ;;  %v13186_v30 = vpop.f32.mrb[242].mxu0  ;;  %v13220_v50 = vpop.f32.mrb[242].mxu1 }
 0x37d   : > { %13399 = vmatprep.mubr.msk.bf16.mxu0 %vm21694_vm9, %v18296_v25  ;;  %v18326_v13 = vadd.f32 %v6865_v41, %v6631_v14  ;;  %v6573_v14 = vrot.slane %v13185_v47, 7  ;;  %v6574_v0 = vrot.slane %v13186_v30, 7  ;;  %v6834_v20 = vrot.slane %v13220_v50, 1  ;;  %v6330_v55 = vpop.f32.mrb[243].mxu0  ;;  %v6495_v41 = vpop.f32.mrb[243].mxu1  ;;  %vm21696_vm1 = vmmov %vm21691_vm4 }
 0x37e   : > { %21695 = vst [vmem:[#allocation26_spill] sm:$0xff] %v18328_v32  ;;  %v6602_v31 = vsel %vm21696_vm1, %v6570_v15, %v6571_v23  ;;  %vm21697_vm2 = vmmov %vm21693_vm15  ;;  %v6572_v53 = vrot.slane %v6330_v55, 7  ;;  %v6832_v32 = vrot.slane %v6495_v41, 1 }
 0x37f   : > { %v6862_v57 = vsel %vm21697_vm2, %v6830_v34, %v6831_v48  ;;  %v6635_v51 = vsel %vm15261_vm12, %v6602_v31, 0.0  ;;  %vm21698_vm13 = vmmov %vm21696_vm1 }
 0x380   : > { %v6894_v10 = vsel %vm21472_vm3, %v6862_v57, 0.0  ;;  %v6599_v30 = vsel %vm21698_vm13, %v6573_v14, %v6574_v0  ;;  %vm21699_vm4 = vmmov %vm21697_vm2  ;;  %v6860_v47 = vsel %vm21697_vm2, %v6832_v32, %v6833_v35  ;;  %vm21741_vm3 = vcmp.lt.s32.totalorder %v15063_v21, 7 }
 0x381   : > { %v6859_v50 = vsel %vm21699_vm4, %v6833_v35, %v6834_v20  ;;  %vm21700_vm15 = vmmov %vm21679_vm0  ;;  %v18373_v35 = vadd.f32 %v6894_v10, %v6603_v29 }
 0x382   : > { %13400 = vmatmul.mubr.msk.bf16.gmra.mrb[28].mxu0 %vm21700_vm15, %v18334_v43  ;;  %vm21701_vm9 = vmmov %vm21679_vm0 }
 0x383   : > { %13434 = vmatmul.mubr.msk.bf16.gmra.mrb[92].mxu1 %vm21701_vm9, %v18334_v43  ;;  %vm21702_vm0 = vmmov %vm21696_vm1 }
 0x384   : > { %v6600_v15 = vsel %vm21702_vm0, %v6572_v53, %v6573_v14  ;;  %vm21703_vm1 = vmmov %vm21702_vm0  ;;  %v13189_v14 = vpop.f32.mrb[244].mxu0 }
 0x385   : > { %v6601_v34 = vsel %vm21703_vm1, %v6571_v23, %v6572_v53  ;;  %vm21704_vm13 = vmmov %vm21697_vm2  ;;  %v18362_v41 = vadd.f32 %v6859_v50, %v6600_v15  ;;  %v11851_v23 = vld [vmem:[%s20657_s1 + $0x6] sm:$0x3]  ;;  %v6343_v53 = vpop.f32.mrb[245].mxu0  ;;  %v6577_v26 = vrot.slane %v13189_v14, 7 }
 0x386   : > { %v6861_v55 = vsel %vm21704_vm13, %v6831_v48, %v6832_v32  ;;  %vm21705_vm4 = vmmov %vm21701_vm9  ;;  %v18366_v57 = vadd.f32 %v6860_v47, %v6601_v34  ;;  %v13223_v32 = vpop.f32.mrb[244].mxu1  ;;  %v6575_v50 = vrot.slane %v6343_v53, 7  ;;  %v13190_v34 = vpop.f32.mrb[246].mxu0 }
 0x387   : > { %13439 = vmatprep.mubr.msk.bf16.mxu0 %vm21705_vm4, %v17921_v2  ;;  %21706 = vst [vmem:[#allocation12_spill] sm:$0xff] %v18362_v41  ;;  %v18364_v31 = vadd.f32 %v6861_v55, %v6635_v51  ;;  %vm21709_vm15 = vmmov %vm21705_vm4  ;;  %v11834_v2 = vld [vmem:[%s20657_s1 + $0x8] sm:$0x3]  ;;  %v6837_v48 = vrot.slane %v13223_v32, 1  ;;  %v6508_v51 = vpop.f32.mrb[245].mxu1  ;;  %v18379_v55 = vand.u32 %v11851_v23, %v14644_v5  ;;  %v6346_v10 = vpop.f32.mrb[247].mxu0 }
 0x388   : > { %21708 = vst [vmem:[#allocation30_spill] sm:$0xff] %v18366_v57  ;;  %13473 = vmatprep.mubr.msk.bf16.mxu1 %vm21709_vm15, %v18256_v16  ;;  %v6835_v15 = vrot.slane %v6508_v51, 1  ;;  %v13224_v47 = vpop.f32.mrb[246].mxu1  ;;  %v6578_v57 = vrot.slane %v13190_v34, 7  ;;  %vm21710_vm9 = vmmov %vm21702_vm0  ;;  %v6576_v51 = vrot.slane %v6346_v10, 7 }
 0x389   : > { %21707 = vst [vmem:[#allocation27_spill] sm:$0xff] %v18364_v31  ;;  %v6838_v29 = vrot.slane %v13224_v47, 1  ;;  %v6511_v41 = vpop.f32.mrb[247].mxu1  ;;  %v18382_v31 = vand.u32 %v11834_v2, %v14644_v5  ;;  %v6598_v32 = vsel %vm21710_vm9, %v6574_v0, %v6575_v50  ;;  %vm21711_vm0 = vmmov %vm21697_vm2 }
 0x38a   : > { %v6858_v53 = vsel %vm21711_vm0, %v6834_v20, %v6835_v15  ;;  %v6836_v6 = vrot.slane %v6511_v41, 1  ;;  %v6639_v23 = vsel %vm21327_vm14, %v6598_v32, 0.0  ;;  %v6595_v34 = vsel %vm21703_vm1, %v6577_v26, %v6578_v57  ;;  %vm21712_vm2 = vmmov %vm21711_vm0 }
 0x38b   : > { %v6898_v14 = vsel %vm21481_vm7, %v6858_v53, 0.0  ;;  %v6855_v2 = vsel %vm21712_vm2, %v6837_v48, %v6838_v29  ;;  %vm21713_vm13 = vmmov %vm21705_vm4  ;;  %13474 = vmatmul.mubr.msk.bf16.vlgmr.msra.gmra.mrb[96].mxu1 %vm21705_vm4, %v18294_v39 }
 0x38c   : > { %13440 = vmatmul.mubr.msk.bf16.vlgmr.msra.gmra.mrb[32].mxu0 %vm21713_vm13, %v17975_v60  ;;  %vm21714_vm15 = vmmov %vm21703_vm1  ;;  %v6856_v41 = vsel %vm21711_vm0, %v6836_v6, %v6837_v48  ;;  %13540 = vmatpush3.bf16.msra.mxu1 %v17904_v7 }
 0x38d   : > { %v6596_v0 = vsel %vm21714_vm15, %v6576_v51, %v6577_v26  ;;  %vm21715_vm9 = vmmov %vm21703_vm1  ;;  %13506 = vmatpush3.bf16.msra.mxu0 %v17842_v22  ;;  %v13193_v26 = vpop.f32.mrb[248].mxu0  ;;  %13573 = vmatprep.subr.bf16.mxu1 %v18382_v31 }
 0x38e   : > { %v6597_v20 = vsel %vm21715_vm9, %v6575_v50, %v6576_v51  ;;  %vm21716_vm1 = vmmov %vm21711_vm0  ;;  %v18409_v10 = vadd.f32 %v6855_v2, %v6596_v0  ;;  %v13227_v50 = vpop.f32.mrb[248].mxu1  ;;  %13607 = vmatprep.subr.bf16.mxu0 %v18379_v55  ;;  %v6359_v48 = vpop.f32.mrb[249].mxu0  ;;  %v6581_v2 = vrot.slane %v13193_v26, 7 }
 0x38f   : > { %v6857_v47 = vsel %vm21716_vm1, %v6835_v15, %v6836_v6  ;;  %v18413_v32 = vadd.f32 %v6856_v41, %v6597_v20  ;;  %vm21717_vm2 = vmmov %vm21705_vm4  ;;  %v18421_v6 = vadd.f32 %v6898_v14, %v6599_v30  ;;  %v6841_v22 = vrot.slane %v13227_v50, 1  ;;  %v6524_v15 = vpop.f32.mrb[249].mxu1  ;;  %v13194_v7 = vpop.f32.mrb[250].mxu0 }
 0x390   : > { %v18411_v60 = vadd.f32 %v6857_v47, %v6639_v23  ;;  %13443 = vmatprep.mubr.msk.bf16.mxu0 %vm21717_vm2, %v17988_v58  ;;  %vm21718_vm13 = vmmov %vm21717_vm2  ;;  %v6579_v53 = vrot.slane %v6359_v48, 7  ;;  %v6839_v51 = vrot.slane %v6524_v15, 1  ;;  %v13228_v23 = vpop.f32.mrb[250].mxu1  ;;  %v6582_v58 = vrot.slane %v13194_v7, 7  ;;  %v6362_v20 = vpop.f32.mrb[251].mxu0 }
 0x391   : > { %13477 = vmatprep.mubr.msk.bf16.mxu1 %vm21718_vm13, %v18296_v25  ;;  %v6842_v0 = vrot.slane %v13228_v23, 1  ;;  %v6527_v41 = vpop.f32.mrb[251].mxu1  ;;  %vm21719_vm4 = vmmov %vm21715_vm9  ;;  %v6580_v14 = vrot.slane %v6362_v20, 7  ;;  %vm21721_vm9 = vnez %v21609_v42 }
 0x392   : > { %v6594_v47 = vsel %vm21719_vm4, %v6578_v57, %v6579_v53  ;;  %vm21720_vm15 = vmmov %vm21711_vm0  ;;  %v6840_v50 = vrot.slane %v6527_v41, 1  ;;  %vm21722_vm0 = vnez %v21488_v12 }
 0x393   : > { %v6854_v30 = vsel %vm21720_vm15, %v6838_v29, %v6839_v51  ;;  %v6643_v48 = vsel %vm21721_vm9, %v6594_v47, 0.0  ;;  %vm21723_vm1 = vmmov %vm21719_vm4 }
 0x394   : > { %v6902_v26 = vsel %vm21722_vm0, %v6854_v30, 0.0  ;;  %v6591_v15 = vsel %vm21723_vm1, %v6581_v2, %v6582_v58  ;;  %vm21724_vm2 = vmmov %vm21720_vm15  ;;  %13444 = vmatmul.mubr.msk.bf16.gmra.mrb[36].mxu0 %vm21718_vm13, %v18036_v19  ;;  %v13231_v30 = vpop.f32.mrb[252].mxu1 }
 0x395   : > { %v6851_v7 = vsel %vm21724_vm2, %v6841_v22, %v6842_v0  ;;  %vm21725_vm4 = vmmov %vm21718_vm13  ;;  %v6845_v12 = vrot.slane %v13231_v30, 1 }
 0x396   : > { %13478 = vmatmul.mubr.msk.bf16.gmra.mrb[100].mxu1 %vm21725_vm4, %v18334_v43  ;;  %vm21726_vm15 = vmmov %vm21723_vm1 }
 0x397   : > { %v6592_v57 = vsel %vm21726_vm15, %v6580_v14, %v6581_v2  ;;  %vm21727_vm7 = vmmov %vm21723_vm1  ;;  %v18460_v2 = vadd.f32 %v6902_v26, %v6595_v34  ;;  %vm21735_vm15 = vnez %v21631_v11 }
 0x398   : > { %v6593_v29 = vsel %vm21727_vm7, %v6579_v53, %v6580_v14  ;;  %vm21728_vm0 = vmmov %vm21724_vm2  ;;  %v18452_v41 = vadd.f32 %v6851_v7, %v6592_v57  ;;  %v13197_v53 = vpop.f32.mrb[252].mxu0  ;;  %v6540_v14 = vpop.f32.mrb[253].mxu1  ;;  %v18462_v7 = vld [vmem:[#allocation2 + $0x1a8] sm:$0xff] }
 0x399   : > { %v6852_v23 = vsel %vm21728_vm0, %v6840_v50, %v6841_v22  ;;  %vm21729_vm1 = vmmov %vm21728_vm0  ;;  %v6375_v22 = vpop.f32.mrb[253].mxu0 }
 0x39a   : > { %v6853_v20 = vsel %vm21729_vm1, %v6839_v51, %v6840_v50  ;;  %vm21730_vm2 = vmmov %vm21725_vm4  ;;  %21731 = vst [vmem:[#allocation20_spill] sm:$0xff] %v18452_v41  ;;  %v18456_v47 = vadd.f32 %v6852_v23, %v6593_v29  ;;  %v6583_v51 = vrot.slane %v6375_v22, 7  ;;  %v6843_v50 = vrot.slane %v6540_v14, 1  ;;  %v13198_v42 = vpop.f32.mrb[254].mxu0 }
 0x39b   : > { %13447 = vmatprep.mubr.msk.bf16.mxu0 %vm21730_vm2, %v18038_v61  ;;  %v18454_v19 = vadd.f32 %v6853_v20, %v6643_v48  ;;  %vm21733_vm13 = vmmov %vm21730_vm2  ;;  %v13232_v61 = vpop.f32.mrb[254].mxu1  ;;  %v6585_v48 = vrot.slane %v13197_v53, 7  ;;  %v6586_v57 = vrot.slane %v13198_v42, 7  ;;  %v6378_v23 = vpop.f32.mrb[255].mxu0  ;;  %vm21734_vm4 = vnez %v21625_v33  ;;  %v21853_v33 = vld [vmem:[#allocation15_spill] sm:$0xff] }
 0x39c   : > { %21732 = vst [vmem:[#allocation31_spill] sm:$0xff] %v18456_v47  ;;  %13481 = vmatprep.mubr.msk.bf16.mxu1 %vm21733_vm13, %v18428_v27  ;;  %v6846_v29 = vrot.slane %v13232_v61, 1  ;;  %v6543_v20 = vpop.f32.mrb[255].mxu1  ;;  %v18464_v47 = vld [vmem:[#allocation2 + $0x1b0] sm:$0xff]  ;;  %v6590_v34 = vsel %vm21727_vm7, %v6582_v58, %v6583_v51  ;;  %v6850_v26 = vsel %vm21728_vm0, %v6842_v0, %v6843_v50  ;;  %v6584_v30 = vrot.slane %v6378_v23, 7  ;;  %vm21736_vm1 = vmmov %vm21727_vm7  ;;  %13448 = vmatmul.mubr.msk.bf16.gmra.mrb[40].mxu0 %vm21733_vm13, %v18090_v59 }
 0x39d   : > { %v6844_v22 = vrot.slane %v6543_v20, 1  ;;  %v6647_v14 = vsel %vm21734_vm4, %v6590_v34, 0.0  ;;  %v6906_v53 = vsel %vm21735_vm15, %v6850_v26, 0.0  ;;  %v6587_v42 = vsel %vm21736_vm1, %v6585_v48, %v6586_v57  ;;  %vm21738_vm2 = vmmov %vm21736_vm1 }
 0x39e   : > { %v21737_v61 = vrot.slane %v18150_v37, 7  ;;  %vm21739_vm7 = vmmov %vm21733_vm13  ;;  %vm21740_vm0 = vnez %v21637_v44  ;;  %v6847_v0 = vsel %vm21741_vm3, %v6845_v12, %v6846_v29  ;;  %v21742_v23 = vrot.slane %v18152_v49, 1 }
 0x39f   : > { %13482 = vmatmul.mubr.msk.bf16.gmra.mrb[104].mxu1 %vm21739_vm7, %v18462_v7  ;;  %vm21743_vm1 = vmmov %vm21741_vm3  ;;  %v18513_v26 = vadd.f32 %v6906_v53, %v6591_v15 }
 0x3a0   : > { %v6618_v41 = vsel %vm21738_vm2, %v6586_v57, %v21737_v61  ;;  %v6878_v37 = vsel %vm21743_vm1, %v6846_v29, %v21742_v23  ;;  %vm21744_vm15 = vmmov %vm21738_vm2 }
 0x3a1   : > { %v6619_v58 = vsel %vm21740_vm0, %v6618_v41, 0.0  ;;  %v6588_v57 = vsel %vm21744_vm15, %v6584_v30, %v6585_v48  ;;  %vm21745_vm2 = vmmov %vm21739_vm7  ;;  %vm21747_vm7 = vnez %v21645_v62  ;;  %v6849_v48 = vsel %vm21743_vm1, %v6843_v50, %v6844_v22 }
 0x3a2   : > { %13451 = vmatprep.mubr.msk.bf16.mxu0 %vm21745_vm2, %v18095_v8  ;;  %vm21746_vm13 = vmmov %vm21745_vm2  ;;  %v6910_v59 = vsel %vm21747_vm7, %v6878_v37, 0.0  ;;  %v18502_v20 = vadd.f32 %v6847_v0, %v6588_v57  ;;  %v13305_v8 = vpop.f32.mrb[0].mxu1  ;;  %v18511_v34 = vadd.f32 %v18210_v36, %v6619_v58  ;;  %v18515_v61 = vadd.f32 %v6849_v48, %v6647_v14  ;;  %v18522_v37 = vld [vmem:[#allocation2 + $0x1b8] sm:$0xff]  ;;  %v18524_v57 = vld [vmem:[#allocation2 + $0x1c0] sm:$0xff] }
 0x3a3   : > { %13485 = vmatprep.mubr.msk.bf16.mxu1 %vm21746_vm13, %v18464_v47  ;;  %vm21748_vm11 = vmmov %vm21744_vm15  ;;  %v7537_v23 = vrot.slane %v13305_v8, 7 }
 0x3a4   : > { %v6589_v41 = vsel %vm21748_vm11, %v6583_v51, %v6584_v30  ;;  %vm21749_vm3 = vmmov %vm21743_vm1  ;;  %v18517_v51 = vpop.f32.mrb[1].mxu1  ;;  %v18519_v30 = vadd.f32 %v6910_v59, %v6587_v42 }
 0x3a5   : > { %v6848_v49 = vsel %vm21749_vm3, %v6844_v22, %v6845_v12  ;;  %v20787_v12 = vrot.slane %v18517_v51, 7  ;;  %v13306_v0 = vpop.f32.mrb[2].mxu1  ;;  %vm21750_vm15 = vmmov %vm21745_vm2 }
 0x3a6   : > { %v18508_v29 = vadd.f32 %v6848_v49, %v6589_v41  ;;  %v7538_v50 = vrot.slane %v13306_v0, 7  ;;  %v7214_v22 = vpop.f32.mrb[3].mxu1  ;;  %13452 = vmatmul.mubr.msk.bf16.gmra.mrb[44].mxu0 %vm21750_vm15, %v18155_v54  ;;  %vm21751_vm13 = vmmov %vm21748_vm11 }
 0x3a7   : > { %v7536_v36 = vrot.slane %v7214_v22, 7  ;;  %13486 = vmatmul.mubr.msk.bf16.gmra.mrb[108].mxu1 %vm21745_vm2, %v18522_v37  ;;  %vm21752_vm3 = vmmov %vm21748_vm11  ;;  %v13309_v59 = vpop.f32.mrb[4].mxu1  ;;  %v18553_v22 = vld [vmem:[#allocation2 + $0x1d0] sm:$0xff] }
 0x3a8   : > { %v7595_v15 = vsel %vm21748_vm11, %v7537_v23, %v7538_v50  ;;  %vm21753_vm1 = vmmov %vm21745_vm2  ;;  %v7541_v41 = vrot.slane %v13309_v59, 7  ;;  %v7227_v49 = vpop.f32.mrb[5].mxu1 }
 0x3a9   : > { %v7596_v14 = vsel %vm21751_vm13, %v7536_v36, %v7537_v23  ;;  %v7597_v53 = vsel %vm21752_vm3, %v20787_v12, %v7536_v36  ;;  %13455 = vmatprep.mubr.msk.bf16.mxu0 %vm21753_vm1, %v18160_v52  ;;  %vm21754_vm7 = vmmov %vm21753_vm1  ;;  %v18543_v42 = vadd.f32 %v18252_v17, %v7595_v15  ;;  %v7539_v48 = vrot.slane %v7227_v49, 7  ;;  %v13310_v8 = vpop.f32.mrb[6].mxu1  ;;  %v18551_v23 = vld [vmem:[#allocation2 + $0x1c8] sm:$0xff] }
 0x3aa   : > { %13489 = vmatprep.mubr.msk.bf16.mxu1 %vm21754_vm7, %v18524_v57  ;;  %v18546_v54 = vadd.f32 %v18204_v46, %v7596_v14  ;;  %v18549_v58 = vadd.f32 %v18212_v9, %v7597_v53  ;;  %v7542_v52 = vrot.slane %v13310_v8, 7  ;;  %v7230_v0 = vpop.f32.mrb[7].mxu1  ;;  %vm21755_vm7 = vmmov %vm21752_vm3 }
 0x3ab   : > { %v7594_v17 = vsel %vm21755_vm7, %v7538_v50, %v7539_v48  ;;  %v7540_v36 = vrot.slane %v7230_v0, 7  ;;  %vm21756_vm11 = vmmov %vm21752_vm3  ;;  %v18585_v0 = vld [vmem:[#allocation2 + $0x1d8] sm:$0xff] }
 0x3ac   : > { %v7591_v46 = vsel %vm21756_vm11, %v7541_v41, %v7542_v52  ;;  %vm21757_vm15 = vmmov %vm21753_vm1  ;;  %v7603_v9 = vsel %vm15115_vm6, %v7594_v17, 0.0 }
 0x3ad   : > { %vm21758_vm2 = vmmov %vm21753_vm1  ;;  %v7593_v14 = vsel %vm21752_vm3, %v7539_v48, %v7540_v36  ;;  %v18580_v53 = vadd.f32 %v18292_v40, %v7591_v46 }
 0x3ae   : > { %13456 = vmatmul.mubr.msk.bf16.gmra.mrb[48].mxu0 %vm21757_vm15, %v18214_v3  ;;  %vm21759_vm13 = vmmov %vm21752_vm3  ;;  %v18574_v3 = vadd.f32 %v18246_v28, %v7603_v9  ;;  %v18583_v59 = vadd.f32 %v18248_v4, %v7593_v14  ;;  %v18587_v28 = vld [vmem:[#allocation2 + $0x1e0] sm:$0xff] }
 0x3af   : > { %13490 = vmatmul.mubr.msk.bf16.gmra.mrb[112].mxu1 %vm21758_vm2, %v18551_v23  ;;  %v7592_v15 = vsel %vm21759_vm13, %v7540_v36, %v7541_v41  ;;  %13459 = vmatprep.mubr.msk.bf16.mxu0 %vm21753_vm1, %v18216_v38  ;;  %vm21760_vm7 = vmmov %vm21753_vm1  ;;  %v13313_v41 = vpop.f32.mrb[8].mxu1 }
 0x3b0   : > { %13493 = vmatprep.mubr.msk.bf16.mxu1 %vm21760_vm7, %v18553_v22  ;;  %v18577_v50 = vadd.f32 %v18244_v18, %v7592_v15  ;;  %v7545_v49 = vrot.slane %v13313_v41, 7  ;;  %v7243_v48 = vpop.f32.mrb[9].mxu1  ;;  %vm21761_vm11 = vmmov %vm21752_vm3  ;;  %v21770_v41 = vld [vmem:[#allocation14_spill] sm:$0xff] }
 0x3b1   : > { %v7543_v8 = vrot.slane %v7243_v48, 7  ;;  %v13314_v38 = vpop.f32.mrb[10].mxu1  ;;  %vm21762_vm15 = vmmov %vm21752_vm3 }
 0x3b2   : > { %v7546_v17 = vrot.slane %v13314_v38, 7  ;;  %v7246_v36 = vpop.f32.mrb[11].mxu1  ;;  %vm21763_vm2 = vmmov %vm21753_vm1 }
 0x3b3   : > { %v7590_v18 = vsel %vm21761_vm11, %v7542_v52, %v7543_v8  ;;  %v7544_v9 = vrot.slane %v7246_v36, 7  ;;  %vm21764_vm13 = vmmov %vm21753_vm1  ;;  %v21769_v52 = vld [vmem:[#allocation18_spill] sm:$0xff]  ;;  %v21772_v36 = vld [vmem:[#allocation25_spill] sm:$0xff] }
 0x3b4   : > { %v7587_v40 = vsel %vm21762_vm15, %v7545_v49, %v7546_v17  ;;  %v7607_v46 = vsel %vm15163_vm8, %v7590_v18, 0.0  ;;  %vm21766_vm1 = vmmov %vm21752_vm3  ;;  %v13317_v18 = vpop.f32.mrb[12].mxu1 }
 0x3b5   : > { %v7588_v15 = vsel %vm21752_vm3, %v7544_v9, %v7545_v49  ;;  %v7589_v14 = vsel %vm21766_vm1, %v7543_v8, %v7544_v9  ;;  %vm21767_vm7 = vmmov %vm21763_vm2  ;;  %v18614_v38 = vadd.f32 %v18332_v63, %v7587_v40  ;;  %v7549_v8 = vrot.slane %v13317_v18, 7  ;;  %v7259_v9 = vpop.f32.mrb[13].mxu1  ;;  %v21785_v18 = vld [vmem:[#allocation26_spill] sm:$0xff] }
 0x3b6   : > { %13460 = vmatmul.mubr.msk.bf16.gmra.mrb[52].mxu0 %vm21763_vm2, %v18254_v56  ;;  %vm21768_vm11 = vmmov %vm21763_vm2  ;;  %v18608_v56 = vadd.f32 %v21769_v52, %v7607_v46  ;;  %v18611_v48 = vadd.f32 %v21770_v41, %v7588_v15  ;;  %v18617_v49 = vadd.f32 %v21772_v36, %v7589_v14  ;;  %v7547_v12 = vrot.slane %v7259_v9, 7  ;;  %v13318_v4 = vpop.f32.mrb[14].mxu1  ;;  %v18621_v46 = vld [vmem:[#allocation2 + $0x1f0] sm:$0xff]  ;;  %v302_v9 = vld [vmem:[%s14671_s29 + $0x3e0] sm:$0xff] }
 0x3b7   : > { %13494 = vmatmul.mubr.msk.bf16.gmra.mrb[116].mxu1 %vm21764_vm13, %v18585_v0  ;;  %13463 = vmatprep.mubr.msk.bf16.mxu0 %vm21767_vm7, %v18256_v16  ;;  %21771 = vst [vmem:[#allocation28_spill] sm:$0xff] %v18614_v38  ;;  %v7550_v62 = vrot.slane %v13318_v4, 7  ;;  %v7262_v11 = vpop.f32.mrb[15].mxu1  ;;  %21775 = vst [vmem:[#allocation19_spill] sm:$0xff] %v18621_v46  ;;  %v304_v4 = vld [vmem:[%s14671_s29 + $0x3f0] sm:$0xff]  ;;  %v305_v38 = vld [vmem:[%s14671_s29 + $0x3f8] sm:$0xff] }
 0x3b8   : > { %13497 = vmatprep.mubr.msk.bf16.mxu1 %vm21768_vm11, %v18587_v28  ;;  %21773 = vst [vmem:[#allocation29_spill] sm:$0xff] %v18617_v49  ;;  %vm21776_vm15 = vmmov %vm21766_vm1  ;;  %v7548_v40 = vrot.slane %v7262_v11, 7  ;;  %v369_v49 = vpack.c.bf16 %v305_v38, %v304_v4 }
 0x3b9   : > { %v7586_v63 = vsel %vm21776_vm15, %v7546_v17, %v7547_v12  ;;  %vm21777_vm2 = vmmov %vm21766_vm1 }
 0x3ba   : > { %v7583_v15 = vsel %vm21777_vm2, %v7549_v8, %v7550_v62  ;;  %vm21778_vm13 = vmmov %vm21767_vm7  ;;  %v7611_v14 = vsel %vm15212_vm10, %v7586_v63, 0.0  ;;  %v7584_v52 = vsel %vm21766_vm1, %v7548_v40, %v7549_v8  ;;  %v13321_v63 = vpop.f32.mrb[16].mxu1 }
 0x3bb   : > { %vm21779_vm3 = vmmov %vm21767_vm7  ;;  %v18642_v17 = vadd.f32 %v18326_v13, %v7611_v14  ;;  %v18645_v41 = vadd.f32 %v18324_v1, %v7584_v52  ;;  %v18648_v36 = vadd.f32 %v18373_v35, %v7583_v15 }
 0x3bc   : > { %vm21781_vm7 = vmmov %vm21766_vm1 }
 0x3bd   : > { %v7585_v11 = vsel %vm21781_vm7, %v7547_v12, %v7548_v40  ;;  %vm21782_vm11 = vmmov %vm21779_vm3  ;;  %21784 = vst [vmem:[#allocation32_spill] sm:$0xff] %v18642_v17  ;;  %v303_v12 = vld [vmem:[%s14671_s29 + $0x3e8] sm:$0xff]  ;;  %v18657_v17 = vld [vmem:[#allocation2 + $0x1f8] sm:$0xff] }
 0x3be   : > { %13464 = vmatmul.mubr.msk.bf16.gmra.mrb[56].mxu0 %vm21778_vm13, %v18294_v39  ;;  %vm21783_vm15 = vmmov %vm21779_vm3  ;;  %v18651_v8 = vadd.f32 %v21785_v18, %v7585_v11  ;;  %v368_v40 = vpack.c.bf16 %v303_v12, %v302_v9  ;;  %v21797_v9 = vld [vmem:[#allocation12_spill] sm:$0xff] }
 0x3bf   : > { %13498 = vmatmul.mubr.msk.bf16.gmra.mrb[120].mxu1 %vm21779_vm3, %v18619_v45  ;;  %13467 = vmatprep.mubr.msk.bf16.mxu0 %vm21782_vm11, %v18296_v25  ;;  %v7553_v45 = vrot.slane %v13321_v63, 7  ;;  %vm21786_vm2 = vmmov %vm21779_vm3 }
 0x3c0   : > { %13501 = vmatprep.mubr.msk.bf16.mxu1 %vm21783_vm15, %v18621_v46  ;;  %v7275_v46 = vpop.f32.mrb[17].mxu1  ;;  %433 = vst.msk [vmem:[#allocation2 + $0x200] sm:$0xff] %vm21786_vm2, %v368_v40  ;;  %vm21787_vm13 = vmmov %vm21786_vm2  ;;  %v21798_v40 = vld [vmem:[#allocation30_spill] sm:$0xff] }
 0x3c1   : > { %v7551_v13 = vrot.slane %v7275_v46, 7  ;;  %v13322_v14 = vpop.f32.mrb[18].mxu1  ;;  %434 = vst.msk [vmem:[#allocation2 + $0x208] sm:$0xff] %vm21787_vm13, %v369_v49  ;;  %vm21788_vm3 = vmmov %vm21766_vm1 }
 0x3c2   : > { %v7554_v1 = vrot.slane %v13322_v14, 7  ;;  %v7278_v35 = vpop.f32.mrb[19].mxu1  ;;  %vm21789_vm7 = vmmov %vm21786_vm2 }
 0x3c3   : > { %v7582_v15 = vsel %vm21788_vm3, %v7550_v62, %v7551_v13  ;;  %v7552_v52 = vrot.slane %v7278_v35, 7  ;;  %vm21790_vm11 = vmmov %vm21786_vm2  ;;  %v21796_v62 = vld [vmem:[#allocation27_spill] sm:$0xff]  ;;  %v13325_v14 = vpop.f32.mrb[20].mxu1 }
 0x3c4   : > { %v7579_v11 = vsel %vm21766_vm1, %v7553_v45, %v7554_v1  ;;  %v7615_v46 = vsel %vm15261_vm12, %v7582_v15, 0.0  ;;  %vm21792_vm15 = vmmov %vm21766_vm1  ;;  %v7291_v35 = vpop.f32.mrb[21].mxu1  ;;  %v11868_v15 = vld [vmem:[%s20657_s1 + $0xa] sm:$0x3] }
 0x3c5   : > { %v7580_v4 = vsel %vm21792_vm15, %v7552_v52, %v7553_v45  ;;  %vm21793_vm2 = vmmov %vm21766_vm1  ;;  %v18680_v18 = vadd.f32 %v21796_v62, %v7615_v46  ;;  %v18686_v63 = vadd.f32 %v18421_v6, %v7579_v11  ;;  %v13326_v46 = vpop.f32.mrb[22].mxu1 }
 0x3c6   : > { %13468 = vmatmul.mubr.msk.bf16.gmra.mrb[60].mxu0 %vm21789_vm7, %v18334_v43  ;;  %v7581_v49 = vsel %vm21793_vm2, %v7551_v13, %v7552_v52  ;;  %vm21794_vm13 = vmmov %vm21789_vm7  ;;  %v18683_v12 = vadd.f32 %v21797_v9, %v7580_v4  ;;  %v7557_v13 = vrot.slane %v13325_v14, 7  ;;  %v7555_v52 = vrot.slane %v7291_v35, 7  ;;  %v7294_v62 = vpop.f32.mrb[23].mxu1 }
 0x3c7   : > { %13502 = vmatmul.mubr.msk.bf16.gmra.mrb[124].mxu1 %vm21790_vm11, %v18657_v17  ;;  %13507 = vmatprep.mubr.msk.bf16.mxu0 %vm21794_vm13, %v18256_v16  ;;  %vm21795_vm3 = vmmov %vm21789_vm7  ;;  %v18689_v45 = vadd.f32 %v21798_v40, %v7581_v49  ;;  %v7558_v4 = vrot.slane %v13326_v46, 7  ;;  %v7556_v11 = vrot.slane %v7294_v62, 7  ;;  %v18700_v49 = vand.u32 %v11868_v15, %v14644_v5 }
 0x3c8   : > { %13541 = vmatprep.mubr.msk.bf16.mxu1 %vm21795_vm3, %v18256_v16  ;;  %v11885_v16 = vld [vmem:[%s20657_s1 + $0xe] sm:$0x3]  ;;  %v7578_v6 = vsel %vm21766_vm1, %v7554_v1, %v7555_v52  ;;  %vm21799_vm7 = vmmov %vm21766_vm1 }
 0x3c9   : > { %v18703_v9 = vand.u32 %v11885_v16, %v14644_v5  ;;  %v7575_v40 = vsel %vm21799_vm7, %v7557_v13, %v7558_v4  ;;  %vm21800_vm11 = vmmov %vm21795_vm3  ;;  %v7619_v14 = vsel %vm21327_vm14, %v7578_v6, 0.0 }
 0x3ca   : > { %vm21801_vm15 = vmmov %vm21795_vm3  ;;  %v18720_v15 = vadd.f32 %v18411_v60, %v7619_v14 }
 0x3cb   : > { %vm21802_vm2 = vmmov %vm21766_vm1 }
 0x3cc   : > { %v7576_v1 = vsel %vm21802_vm2, %v7556_v11, %v7557_v13  ;;  %vm21803_vm13 = vmmov %vm21766_vm1  ;;  %v18730_v13 = vadd.f32 %v18460_v2, %v7575_v40 }
 0x3cd   : > { %v7577_v35 = vsel %vm21803_vm13, %v7555_v52, %v7556_v11  ;;  %vm21804_vm1 = vmmov %vm21795_vm3 }
 0x3ce   : > { %13508 = vmatmul.mubr.msk.bf16.vlgmr.msra.gmra.mrb[64].mxu0 %vm21800_vm11, %v18294_v39  ;;  %v18733_v16 = vadd.f32 %v18413_v32, %v7577_v35  ;;  %vm21805_vm7 = vmmov %vm21802_vm2  ;;  %v21813_v35 = vld [vmem:[#allocation20_spill] sm:$0xff] }
 0x3cf   : > { %13542 = vmatmul.mubr.msk.bf16.vlgmr.msra.gmra.mrb[128].mxu1 %vm21801_vm15, %v18294_v39  ;;  %13608 = vmatpush3.bf16.msra.mxu0 %v18379_v55  ;;  %v18727_v39 = vadd.f32 %v18409_v10, %v7576_v1  ;;  %v13329_v55 = vpop.f32.mrb[24].mxu1  ;;  %vm21806_vm11 = vmmov %vm21802_vm2 }
 0x3d0   : > { %13574 = vmatpush3.bf16.msra.mxu1 %v18382_v31  ;;  %13511 = vmatprep.mubr.msk.bf16.mxu0 %vm21795_vm3, %v18296_v25  ;;  %v7561_v31 = vrot.slane %v13329_v55, 7  ;;  %v7307_v60 = vpop.f32.mrb[25].mxu1  ;;  %vm21807_vm15 = vmmov %vm21804_vm1 }
 0x3d1   : > { %13545 = vmatprep.mubr.msk.bf16.mxu1 %vm21804_vm1, %v18296_v25  ;;  %13641 = vmatprep.subr.bf16.mxu0 %v18700_v49  ;;  %v7559_v52 = vrot.slane %v7307_v60, 7  ;;  %v13330_v46 = vpop.f32.mrb[26].mxu1  ;;  %vm21808_vm2 = vmmov %vm21804_vm1 }
 0x3d2   : > { %13675 = vmatprep.subr.bf16.mxu1 %v18703_v9  ;;  %v7562_v62 = vrot.slane %v13330_v46, 7  ;;  %v7310_v6 = vpop.f32.mrb[27].mxu1  ;;  %vm21810_vm13 = vmmov %vm21805_vm7  ;;  %v21814_v46 = vld [vmem:[#allocation31_spill] sm:$0xff] }
 0x3d3   : > { %v7574_v10 = vsel %vm21805_vm7, %v7558_v4, %v7559_v52  ;;  %v7560_v11 = vrot.slane %v7310_v6, 7  ;;  %vm21811_vm3 = vmmov %vm21805_vm7  ;;  %v13333_v6 = vpop.f32.mrb[28].mxu1 }
 0x3d4   : > { %v7571_v2 = vsel %vm21806_vm11, %v7561_v31, %v7562_v62  ;;  %v7623_v40 = vsel %vm21721_vm9, %v7574_v10, 0.0  ;;  %vm21812_vm7 = vmmov %vm21804_vm1  ;;  %v7323_v10 = vpop.f32.mrb[29].mxu1 }
 0x3d5   : > { %v7572_v14 = vsel %vm21810_vm13, %v7560_v11, %v7561_v31  ;;  %v7573_v1 = vsel %vm21811_vm3, %v7559_v52, %v7560_v11  ;;  %v18756_v4 = vadd.f32 %v18454_v19, %v7623_v40  ;;  %v18762_v60 = vadd.f32 %v18513_v26, %v7571_v2  ;;  %v13334_v32 = vpop.f32.mrb[30].mxu1  ;;  %vm21815_vm11 = vmmov %vm21811_vm3 }
 0x3d6   : > { %13512 = vmatmul.mubr.msk.bf16.gmra.mrb[68].mxu0 %vm21807_vm15, %v18334_v43  ;;  %v18759_v55 = vadd.f32 %v21813_v35, %v7572_v14  ;;  %v18765_v31 = vadd.f32 %v21814_v46, %v7573_v1  ;;  %v7565_v52 = vrot.slane %v13333_v6, 7  ;;  %v7563_v11 = vrot.slane %v7323_v10, 7  ;;  %v7326_v38 = vpop.f32.mrb[31].mxu1  ;;  %vm21816_vm15 = vmmov %vm21811_vm3 }
 0x3d7   : > { %13546 = vmatmul.mubr.msk.bf16.gmra.mrb[132].mxu1 %vm21808_vm2, %v18334_v43  ;;  %13515 = vmatprep.mubr.msk.bf16.mxu0 %vm21804_vm1, %v18428_v27  ;;  %v7566_v24 = vrot.slane %v13334_v32, 7  ;;  %v7564_v40 = vrot.slane %v7326_v38, 7  ;;  %v21817_v26 = vrot.slane %v18517_v51, 7  ;;  %vm21818_vm2 = vmmov %vm21811_vm3 }
 0x3d8   : > { %13549 = vmatprep.mubr.msk.bf16.mxu1 %vm21812_vm7, %v18428_v27  ;;  %v7570_v19 = vsel %vm21815_vm11, %v7562_v62, %v7563_v11  ;;  %vm21819_vm13 = vmmov %vm21804_vm1 }
 0x3d9   : > { %v7567_v14 = vsel %vm21816_vm15, %v7565_v52, %v7566_v24  ;;  %v7598_v2 = vsel %vm21818_vm2, %v7566_v24, %v21817_v26  ;;  %vm21820_vm3 = vmmov %vm21804_vm1  ;;  %v7627_v32 = vsel %vm21734_vm4, %v7570_v19, 0.0 }
 0x3da   : > { %vm21821_vm1 = vmmov %vm21818_vm2  ;;  %v7599_v24 = vsel %vm21740_vm0, %v7598_v2, 0.0  ;;  %v18792_v51 = vadd.f32 %v18515_v61, %v7627_v32  ;;  %v18799_v46 = vadd.f32 %v18519_v30, %v7567_v14 }
 0x3db   : > { %v7568_v38 = vsel %vm21821_vm1, %v7564_v40, %v7565_v52  ;;  %vm21822_vm7 = vmmov %vm21821_vm1  ;;  %v14038_v1 = vadd.f32 %v18511_v34, %v7599_v24  ;;  %v13339_v52 = vpop.f32.mrb[32].mxu1 }
 0x3dc   : > { %v7569_v62 = vsel %vm21822_vm7, %v7563_v11, %v7564_v40  ;;  %vm21823_vm11 = vmmov %vm21820_vm3  ;;  %v18796_v35 = vadd.f32 %v18502_v20, %v7568_v38  ;;  %v7665_v10 = vrot.slane %v13339_v52, 1  ;;  %v18804_v11 = vpop.f32.mrb[33].mxu1 }
 0x3dd   : > { %vm21824_vm15 = vmmov %vm21820_vm3  ;;  %v18802_v6 = vadd.f32 %v18508_v29, %v7569_v62  ;;  %v20797_v19 = vrot.slane %v18804_v11, 1  ;;  %v13340_v40 = vpop.f32.mrb[34].mxu1 }
 0x3de   : > { %13516 = vmatmul.mubr.msk.bf16.gmra.mrb[72].mxu0 %vm21819_vm13, %v18462_v7  ;;  %v7666_v61 = vrot.slane %v13340_v40, 1  ;;  %v7379_v26 = vpop.f32.mrb[35].mxu1  ;;  %vm21825_vm2 = vmmov %vm21820_vm3 }
 0x3df   : > { %13550 = vmatmul.mubr.msk.bf16.gmra.mrb[136].mxu1 %vm21820_vm3, %v18462_v7  ;;  %13519 = vmatprep.mubr.msk.bf16.mxu0 %vm21823_vm11, %v18464_v47  ;;  %v7664_v2 = vrot.slane %v7379_v26, 1  ;;  %vm21826_vm13 = vmmov %vm21825_vm2  ;;  %vm21827_vm3 = vcmp.lt.s32.totalorder %v15063_v21, 7  ;;  %v13343_v38 = vpop.f32.mrb[36].mxu1 }
 0x3e0   : > { %13553 = vmatprep.mubr.msk.bf16.mxu1 %vm21824_vm15, %v18464_v47  ;;  %v7723_v20 = vsel %vm21827_vm3, %v7665_v10, %v7666_v61  ;;  %vm21828_vm1 = vmmov %vm21825_vm2  ;;  %v7669_v62 = vrot.slane %v13343_v38, 1  ;;  %v7392_v24 = vpop.f32.mrb[37].mxu1 }
 0x3e1   : > { %vm21829_vm7 = vmmov %vm21828_vm1  ;;  %v18818_v29 = vadd.f32 %v18546_v54, %v7723_v20  ;;  %v7667_v52 = vrot.slane %v7392_v24, 1  ;;  %v13344_v40 = vpop.f32.mrb[38].mxu1 }
 0x3e2   : > { %vm21830_vm11 = vmmov %vm21827_vm3  ;;  %v7670_v54 = vrot.slane %v13344_v40, 1  ;;  %v7395_v26 = vpop.f32.mrb[39].mxu1 }
 0x3e3   : > { %v7725_v34 = vsel %vm21830_vm11, %v20797_v19, %v7664_v2  ;;  %vm21831_vm15 = vmmov %vm21827_vm3  ;;  %v7668_v20 = vrot.slane %v7395_v26, 1  ;;  %v13347_v38 = vpop.f32.mrb[40].mxu1 }
 0x3e4   : > { %v7724_v30 = vsel %vm21831_vm15, %v7664_v2, %v7665_v10  ;;  %v18826_v14 = vadd.f32 %v14038_v1, %v7725_v34  ;;  %v7673_v40 = vrot.slane %v13347_v38, 1  ;;  %v7408_v26 = vpop.f32.mrb[41].mxu1 }
 0x3e5   : > { %v18829_v32 = vadd.f32 %v18549_v58, %v7724_v30 }
 0x3e6   : > { %13520 = vmatmul.mubr.msk.bf16.gmra.mrb[76].mxu0 %vm21825_vm2, %v18522_v37  ;;  %vm21832_vm2 = vmmov %vm21827_vm3 }
 0x3e7   : > { %13554 = vmatmul.mubr.msk.bf16.gmra.mrb[140].mxu1 %vm21826_vm13, %v18522_v37  ;;  %13523 = vmatprep.mubr.msk.bf16.mxu0 %vm21828_vm1, %v18524_v57  ;;  %v7722_v44 = vsel %vm21832_vm2, %v7666_v61, %v7667_v52  ;;  %vm21833_vm13 = vmmov %vm21828_vm1 }
 0x3e8   : > { %13557 = vmatprep.mubr.msk.bf16.mxu1 %vm21829_vm7, %v18524_v57  ;;  %vm21834_vm3 = vmmov %vm21828_vm1  ;;  %v7730_v58 = vsel %vm15111_vm5, %v7722_v44, 0.0 }
 0x3e9   : > { %vm21836_vm1 = vmmov %vm21832_vm2  ;;  %v18846_v61 = vadd.f32 %v18543_v42, %v7730_v58  ;;  %v7671_v42 = vrot.slane %v7408_v26, 1  ;;  %v13348_v58 = vpop.f32.mrb[42].mxu1 }
 0x3ea   : > { %v7719_v10 = vsel %vm21836_vm1, %v7669_v62, %v7670_v54  ;;  %vm21837_vm7 = vmmov %vm21834_vm3  ;;  %v7674_v19 = vrot.slane %v13348_v58, 1  ;;  %v21850_v58 = vld [vmem:[#allocation29_spill] sm:$0xff] }
 0x3eb   : > { %vm21838_vm11 = vmmov %vm21834_vm3  ;;  %v18849_v2 = vadd.f32 %v18577_v50, %v7719_v10  ;;  %v7411_v50 = vpop.f32.mrb[43].mxu1 }
 0x3ec   : > { %vm21839_vm15 = vmmov %vm21836_vm1  ;;  %v7672_v10 = vrot.slane %v7411_v50, 1  ;;  %v13351_v26 = vpop.f32.mrb[44].mxu1 }
 0x3ed   : > { %v7721_v34 = vsel %vm21839_vm15, %v7667_v52, %v7668_v20  ;;  %vm21840_vm2 = vmmov %vm21836_vm1 }
 0x3ee   : > { %13524 = vmatmul.mubr.msk.bf16.gmra.mrb[80].mxu0 %vm21833_vm13, %v18551_v23  ;;  %v18854_v44 = vadd.f32 %v18574_v3, %v7721_v34  ;;  %v7720_v30 = vsel %vm21840_vm2, %v7668_v20, %v7669_v62  ;;  %vm21841_vm13 = vmmov %vm21836_vm1  ;;  %v21843_v3 = vld [vmem:[#allocation5_spill] sm:$0xff] }
 0x3ef   : > { %13558 = vmatmul.mubr.msk.bf16.gmra.mrb[144].mxu1 %vm21834_vm3, %v18551_v23  ;;  %13527 = vmatprep.mubr.msk.bf16.mxu0 %vm21837_vm7, %v18553_v22  ;;  %v18859_v24 = vadd.f32 %v18583_v59, %v7720_v30  ;;  %v7718_v52 = vsel %vm21841_vm13, %v7670_v54, %v7671_v42  ;;  %vm21842_vm1 = vmmov %vm21834_vm3  ;;  %vm21844_vm7 = vnez %v21843_v3  ;;  %v7424_v3 = vpop.f32.mrb[45].mxu1 }
 0x3f0   : > { %13561 = vmatprep.mubr.msk.bf16.mxu1 %vm21838_vm11, %v18553_v22  ;;  %v7734_v59 = vsel %vm21844_vm7, %v7718_v52, 0.0  ;;  %vm21845_vm11 = vmmov %vm21840_vm2  ;;  %v7677_v52 = vrot.slane %v13351_v26, 1 }
 0x3f1   : > { %v7715_v62 = vsel %vm21845_vm11, %v7673_v40, %v7674_v19  ;;  %vm21846_vm15 = vmmov %vm21842_vm1  ;;  %v18876_v54 = vadd.f32 %v18580_v53, %v7734_v59  ;;  %v7675_v53 = vrot.slane %v7424_v3, 1  ;;  %v13352_v59 = vpop.f32.mrb[46].mxu1  ;;  %v21859_v3 = vld [vmem:[#allocation19_spill] sm:$0xff] }
 0x3f2   : > { %vm21847_vm2 = vmmov %vm21842_vm1  ;;  %v18879_v20 = vadd.f32 %v18611_v48, %v7715_v62  ;;  %v7678_v1 = vrot.slane %v13352_v59, 1  ;;  %v7427_v48 = vpop.f32.mrb[47].mxu1 }
 0x3f3   : > { %vm21848_vm13 = vmmov %vm21845_vm11  ;;  %v7676_v62 = vrot.slane %v7427_v48, 1 }
 0x3f4   : > { %v7717_v34 = vsel %vm21848_vm13, %v7671_v42, %v7672_v10 }
 0x3f5   : > { %v18884_v30 = vadd.f32 %v18608_v56, %v7717_v34  ;;  %v21856_v56 = vld [vmem:[#allocation7_spill] sm:$0xff]  ;;  %v21862_v34 = vld [vmem:[#allocation28_spill] sm:$0xff] }
 0x3f6   : > { %13528 = vmatmul.mubr.msk.bf16.gmra.mrb[84].mxu0 %vm21834_vm3, %v18585_v0  ;;  %vm21849_vm3 = vmmov %vm21845_vm11 }
 0x3f7   : > { %13562 = vmatmul.mubr.msk.bf16.gmra.mrb[148].mxu1 %vm21842_vm1, %v18585_v0  ;;  %13531 = vmatprep.mubr.msk.bf16.mxu0 %vm21846_vm15, %v18587_v28  ;;  %v7716_v38 = vsel %vm21849_vm3, %v7672_v10, %v7673_v40  ;;  %vm21852_vm1 = vmmov %vm21849_vm3 }
 0x3f8   : > { %13565 = vmatprep.mubr.msk.bf16.mxu1 %vm21847_vm2, %v18587_v28  ;;  %v18889_v50 = vadd.f32 %v21850_v58, %v7716_v38  ;;  %v7714_v42 = vsel %vm21852_vm1, %v7674_v19, %v7675_v53  ;;  %vm21854_vm11 = vmmov %vm21847_vm2  ;;  %v7713_v26 = vsel %vm21852_vm1, %v7675_v53, %v7676_v62  ;;  %v21863_v58 = vld [vmem:[#allocation32_spill] sm:$0xff] }
 0x3f9   : > { %vm21855_vm15 = vmmov %vm21847_vm2  ;;  %vm21857_vm2 = vnez %v21856_v56  ;;  %v18914_v59 = vadd.f32 %v21863_v58, %v7713_v26 }
 0x3fa   : > { %21851 = vst [vmem:[#allocation35_spill] sm:$0xff] %v18889_v50  ;;  %v7738_v40 = vsel %vm21857_vm2, %v7714_v42, 0.0  ;;  %vm21858_vm13 = vmmov %vm21852_vm1  ;;  %v13355_v42 = vpop.f32.mrb[48].mxu1 }
 0x3fb   : > { %v7711_v10 = vsel %vm21858_vm13, %v7677_v52, %v7678_v1  ;;  %vm21860_vm3 = vmmov %vm21854_vm11  ;;  %v18906_v19 = vadd.f32 %v21862_v34, %v7738_v40 }
 0x3fc   : > { %vm21861_vm7 = vmmov %vm21860_vm3  ;;  %v18909_v38 = vadd.f32 %v18645_v41, %v7711_v10 }
 0x3fd   : > { %vm21867_vm13 = vmmov %vm21860_vm3 }
 0x3fe   : > { %13532 = vmatmul.mubr.msk.bf16.gmra.mrb[88].mxu0 %vm21854_vm11, %v21853_v33  ;;  %vm21864_vm11 = vmmov %vm21852_vm1 }
 0x3ff   : > { %13566 = vmatmul.mubr.msk.bf16.gmra.mrb[152].mxu1 %vm21855_vm15, %v21853_v33  ;;  %13535 = vmatprep.mubr.msk.bf16.mxu0 %vm21860_vm3, %v21859_v3  ;;  %v7712_v48 = vsel %vm21864_vm11, %v7676_v62, %v7677_v52  ;;  %v7440_v33 = vpop.f32.mrb[49].mxu1  ;;  %vm21866_vm15 = vmmov %vm21860_vm3  ;;  %v21868_v52 = vld [vmem:[#allocation9_spill] sm:$0xff] }
 0x400   : > { %13569 = vmatprep.mubr.msk.bf16.mxu1 %vm21861_vm7, %v21859_v3  ;;  %v18919_v56 = vadd.f32 %v18651_v8, %v7712_v48  ;;  %v7681_v3 = vrot.slane %v13355_v42, 1  ;;  %v7679_v40 = vrot.slane %v7440_v33, 1  ;;  %v13356_v34 = vpop.f32.mrb[50].mxu1  ;;  %vm21865_vm7 = vmmov %vm21852_vm1  ;;  %vm21869_vm3 = vnez %v21868_v52 }
 0x401   : > { %v7682_v50 = vrot.slane %v13356_v34, 1  ;;  %v7443_v41 = vpop.f32.mrb[51].mxu1  ;;  %vm21870_vm11 = vmmov %vm21867_vm13 }
 0x402   : > { %v7680_v10 = vrot.slane %v7443_v41, 1  ;;  %v7710_v53 = vsel %vm21865_vm7, %v7678_v1, %v7679_v40  ;;  %vm21871_vm2 = vmmov %vm21870_vm11  ;;  %v13359_v42 = vpop.f32.mrb[52].mxu1 }
 0x403   : > { %v7742_v8 = vsel %vm21869_vm3, %v7710_v53, 0.0  ;;  %v7707_v62 = vsel %vm21852_vm1, %v7681_v3, %v7682_v50  ;;  %vm21872_vm7 = vmmov %vm21852_vm1  ;;  %v7456_v41 = vpop.f32.mrb[53].mxu1 }
 0x404   : > { %v18936_v33 = vadd.f32 %v18648_v36, %v7742_v8  ;;  %v18939_v1 = vadd.f32 %v18683_v12, %v7707_v62  ;;  %v7709_v26 = vsel %vm21872_vm7, %v7679_v40, %v7680_v10  ;;  %v11902_v36 = vld [vmem:[%s20657_s1 + $0xc] sm:$0x3]  ;;  %v11919_v12 = vld [vmem:[%s20657_s1 + $0x10] sm:$0x3]  ;;  %v7683_v40 = vrot.slane %v7456_v41, 1 }
 0x405   : > { %v18944_v58 = vadd.f32 %v18680_v18, %v7709_v26  ;;  %v13360_v18 = vpop.f32.mrb[54].mxu1  ;;  %v21877_v26 = vld [vmem:[#allocation11_spill] sm:$0xff] }
 0x406   : > { %13536 = vmatmul.mubr.msk.bf16.gmra.mrb[92].mxu0 %vm21866_vm15, %v18657_v17  ;;  %vm21873_vm15 = vmmov %vm21852_vm1  ;;  %v7686_v53 = vrot.slane %v13360_v18, 1  ;;  %v7459_v8 = vpop.f32.mrb[55].mxu1 }
 0x407   : > { %13570 = vmatmul.mubr.msk.bf16.gmra.mrb[156].mxu1 %vm21867_vm13, %v18657_v17  ;;  %13609 = vmatprep.mubr.msk.bf16.mxu0 %vm21871_vm2, %v18296_v25  ;;  %v7708_v48 = vsel %vm21873_vm15, %v7680_v10, %v7681_v3  ;;  %v7684_v62 = vrot.slane %v7459_v8, 1  ;;  %vm21874_vm2 = vmmov %vm21852_vm1  ;;  %v18963_v10 = vand.u32 %v11919_v12, %v14644_v5 }
 0x408   : > { %13575 = vmatprep.mubr.msk.bf16.mxu1 %vm21870_vm11, %v18296_v25  ;;  %v18949_v34 = vadd.f32 %v18689_v45, %v7708_v48  ;;  %v7685_v25 = vrot.slane %v13359_v42, 1  ;;  %v7706_v3 = vsel %vm21874_vm2, %v7682_v50, %v7683_v40  ;;  %v18960_v45 = vand.u32 %v11902_v36, %v14644_v5  ;;  %vm21875_vm13 = vmmov %vm21870_vm11 }
 0x409   : > { %vm21876_vm1 = vmmov %vm21870_vm11  ;;  %vm21878_vm11 = vnez %v21877_v26 }
 0x40a   : > { %v7746_v48 = vsel %vm21878_vm11, %v7706_v3, 0.0  ;;  %vm21879_vm7 = vmmov %vm21874_vm2 }
 0x40b   : > { %v7703_v42 = vsel %vm21879_vm7, %v7685_v25, %v7686_v53  ;;  %v18976_v50 = vadd.f32 %v18686_v63, %v7746_v48  ;;  %vm21880_vm15 = vmmov %vm21874_vm2  ;;  %v13363_v63 = vpop.f32.mrb[56].mxu1 }
 0x40c   : > { %v18979_v5 = vadd.f32 %v18727_v39, %v7703_v42  ;;  %v7705_v41 = vsel %vm21880_vm15, %v7683_v40, %v7684_v62  ;;  %vm21881_vm2 = vmmov %vm21876_vm1  ;;  %v7689_v39 = vrot.slane %v13363_v63, 1  ;;  %v7472_v36 = vpop.f32.mrb[57].mxu1 }
 0x40d   : > { %v7687_v12 = vrot.slane %v7472_v36, 1  ;;  %v13364_v40 = vpop.f32.mrb[58].mxu1  ;;  %vm21885_vm15 = vmmov %vm21881_vm2 }
 0x40e   : > { %13610 = vmatmul.mubr.msk.bf16.vlgmr.msra.gmra.mrb[96].mxu0 %vm21876_vm1, %v18334_v43  ;;  %v7690_v18 = vrot.slane %v13364_v40, 1  ;;  %vm21888_vm11 = vmmov %vm21881_vm2 }
 0x40f   : > { %13576 = vmatmul.mubr.msk.bf16.vlgmr.msra.gmra.mrb[128].mxu1 %vm21875_vm13, %v18334_v43  ;;  %13642 = vmatpush3.bf16.msra.mxu0 %v18700_v49  ;;  %vm21882_vm13 = vmmov %vm21876_vm1  ;;  %v18988_v43 = vadd.f32 %v18720_v15, %v7705_v41 }
 0x410   : > { %13676 = vmatpush3.bf16.msra.mxu1 %v18703_v9  ;;  %13579 = vmatprep.mubr.msk.bf16.mxu1 %vm21881_vm2, %v18428_v27  ;;  %vm21883_vm1 = vmmov %vm21879_vm7 }
 0x411   : > { %13613 = vmatprep.mubr.msk.bf16.mxu0 %vm21882_vm13, %v18428_v27  ;;  %v7704_v49 = vsel %vm21883_vm1, %v7684_v62, %v7685_v25  ;;  %13709 = vmatprep.subr.bf16.mxu0 %v18960_v45  ;;  %v7475_v27 = vpop.f32.mrb[59].mxu1  ;;  %vm21884_vm7 = vmmov %vm21883_vm1  ;;  %v7699_v62 = vsel %vm21883_vm1, %v7689_v39, %v7690_v18 }
 0x412   : > { %v18993_v9 = vadd.f32 %v18733_v16, %v7704_v49  ;;  %13743 = vmatprep.subr.bf16.mxu1 %v18963_v10  ;;  %v7688_v8 = vrot.slane %v7475_v27, 1  ;;  %v7702_v15 = vsel %vm21884_vm7, %v7686_v53, %v7687_v12  ;;  %v21886_v16 = vld [vmem:[#allocation16_spill] sm:$0xff]  ;;  %vm21889_vm3 = vmmov %vm21881_vm2  ;;  %v19015_v3 = vadd.f32 %v18759_v55, %v7699_v62  ;;  %v13367_v41 = vpop.f32.mrb[60].mxu1  ;;  %v21902_v62 = vld [vmem:[#allocation23_spill] sm:$0xff] }
 0x413   : > { %vm21887_vm13 = vnez %v21886_v16  ;;  %vm21890_vm7 = vmmov %vm21883_vm1  ;;  %v7488_v63 = vpop.f32.mrb[61].mxu1 }
 0x414   : > { %v7750_v25 = vsel %vm21887_vm13, %v7702_v15, 0.0  ;;  %v13368_v36 = vpop.f32.mrb[62].mxu1  ;;  %vm21899_vm13 = vmmov %vm21881_vm2 }
 0x415   : > { %v19012_v53 = vadd.f32 %v18730_v13, %v7750_v25  ;;  %v7691_v13 = vrot.slane %v7488_v63, 1  ;;  %v7694_v40 = vrot.slane %v13368_v36, 1  ;;  %v7491_v55 = vpop.f32.mrb[63].mxu1 }
 0x416   : > { %13614 = vmatmul.mubr.msk.bf16.gmra.mrb[100].mxu0 %vm21881_vm2, %v18462_v7  ;;  %v7692_v27 = vrot.slane %v7491_v55, 1 }
 0x417   : > { %13580 = vmatmul.mubr.msk.bf16.gmra.mrb[132].mxu1 %vm21885_vm15, %v18462_v7  ;;  %13617 = vmatprep.mubr.msk.bf16.mxu0 %vm21889_vm3, %v18464_v47  ;;  %v7701_v7 = vsel %vm21890_vm7, %v7687_v12, %v7688_v8  ;;  %vm21891_vm15 = vmmov %vm21883_vm1 }
 0x418   : > { %13583 = vmatprep.mubr.msk.bf16.mxu1 %vm21888_vm11, %v18464_v47  ;;  %v19020_v48 = vadd.f32 %v18756_v4, %v7701_v7  ;;  %v7700_v42 = vsel %vm21891_vm15, %v7688_v8, %v7689_v39  ;;  %v7693_v47 = vrot.slane %v13367_v41, 1  ;;  %vm21892_vm3 = vmmov %vm21883_vm1  ;;  %v21894_v4 = vld [vmem:[#allocation21_spill] sm:$0xff]  ;;  %v21897_v8 = vrot.slane %v18804_v11, 1  ;;  %v13407_v41 = vpop.f32.mrb[64].mxu1 }
 0x419   : > { %v19025_v49 = vadd.f32 %v18765_v31, %v7700_v42  ;;  %v7698_v12 = vsel %vm21892_vm3, %v7690_v18, %v7691_v13  ;;  %vm21893_vm11 = vmmov %vm21881_vm2  ;;  %vm21895_vm1 = vnez %v21894_v4 }
 0x41a   : > { %v7754_v31 = vsel %vm21895_vm1, %v7698_v12, 0.0  ;;  %vm21896_vm7 = vmmov %vm21892_vm3 }
 0x41b   : > { %v7695_v39 = vsel %vm21896_vm7, %v7693_v47, %v7694_v40  ;;  %vm21898_vm15 = vmmov %vm21892_vm3  ;;  %v19046_v18 = vadd.f32 %v18762_v60, %v7754_v31  ;;  %v13373_v60 = vpop.f32.mrb[0].mxu0 }
 0x41c   : > { %v7726_v15 = vsel %vm21898_vm15, %v7694_v40, %v21897_v8  ;;  %vm21900_vm3 = vmmov %vm21881_vm2  ;;  %v14036_v63 = vadd.f32 %v18818_v29, %v13373_v60  ;;  %v7894_v36 = vpop.f32.mrb[1].mxu0  ;;  %v19067_v40 = vpop.f32.mrb[65].mxu1 }
 0x41d   : > { %v13374_v55 = vpop.f32.mrb[2].mxu0  ;;  %v13408_v12 = vpop.f32.mrb[66].mxu1  ;;  %vm21906_vm15 = vmmov %vm21900_vm3 }
 0x41e   : > { %13618 = vmatmul.mubr.msk.bf16.gmra.mrb[104].mxu0 %vm21881_vm2, %v18522_v37  ;;  %vm21903_vm2 = vnez %v21902_v62  ;;  %v7897_v31 = vpop.f32.mrb[3].mxu0 }
 0x41f   : > { %13584 = vmatmul.mubr.msk.bf16.gmra.mrb[136].mxu1 %vm21893_vm11, %v18522_v37  ;;  %13621 = vmatprep.mubr.msk.bf16.mxu0 %vm21900_vm3, %v18524_v57  ;;  %v19049_v37 = vadd.f32 %v18796_v35, %v7695_v39  ;;  %vm21901_vm11 = vmmov %vm21896_vm7  ;;  %v7758_v11 = vsel %vm21903_vm2, %v7726_v15, 0.0  ;;  %v8062_v39 = vpop.f32.mrb[67].mxu1 }
 0x420   : > { %13587 = vmatprep.mubr.msk.bf16.mxu1 %vm21899_vm13, %v18524_v57  ;;  %v7697_v25 = vsel %vm21901_vm11, %v7691_v13, %v7692_v27  ;;  %v19059_v42 = vadd.f32 %v18799_v46, %v7758_v11  ;;  %vm21904_vm13 = vmmov %vm21896_vm7  ;;  %v8385_v13 = vrot.slane %v13407_v41, 7  ;;  %v20801_v46 = vrot.slane %v19067_v40, 7  ;;  %v13411_v11 = vpop.f32.mrb[68].mxu1 }
 0x421   : > { %v19056_v7 = vadd.f32 %v18792_v51, %v7697_v25  ;;  %v7696_v57 = vsel %vm21904_vm13, %v7692_v27, %v7693_v47  ;;  %v19070_v51 = vadd.f32 %v18826_v14, %v7894_v36  ;;  %v14044_v47 = vadd.f32 %v18846_v61, %v13374_v55  ;;  %vm21909_vm2 = vmmov %vm21900_vm3 }
 0x422   : > { %v19064_v35 = vadd.f32 %v18802_v6, %v7696_v57  ;;  %v8386_v27 = vrot.slane %v13408_v12, 7  ;;  %v14048_v6 = vadd.f32 %v18829_v32, %v7897_v31  ;;  %v8384_v8 = vrot.slane %v8062_v39, 7 }
 0x423   : > { %vm21905_vm7 = vcmp.lt.s32.totalorder %v15063_v21, 1  ;;  %v8389_v60 = vrot.slane %v13411_v11, 7 }
 0x424   : > { %v8443_v29 = vsel %vm21905_vm7, %v8385_v13, %v8386_v27  ;;  %vm21907_vm11 = vmmov %vm21905_vm7 }
 0x425   : > { %v19081_v14 = vadd.f32 %v14044_v47, %v8443_v29  ;;  %v8444_v61 = vsel %vm21907_vm11, %v8384_v8, %v8385_v13  ;;  %vm21908_vm13 = vmmov %vm21905_vm7  ;;  %v8075_v13 = vpop.f32.mrb[69].mxu1 }
 0x426   : > { %13622 = vmatmul.mubr.msk.bf16.gmra.mrb[108].mxu0 %vm21900_vm3, %v18551_v23  ;;  %v8445_v32 = vsel %vm21908_vm13, %v20801_v46, %v8384_v8  ;;  %vm21910_vm7 = vmmov %vm21909_vm2  ;;  %v19095_v25 = vadd.f32 %v14036_v63, %v8444_v61  ;;  %v8387_v55 = vrot.slane %v8075_v13, 7  ;;  %v13412_v47 = vpop.f32.mrb[70].mxu1 }
 0x427   : > { %13588 = vmatmul.mubr.msk.bf16.gmra.mrb[140].mxu1 %vm21906_vm15, %v18551_v23  ;;  %13625 = vmatprep.mubr.msk.bf16.mxu0 %vm21910_vm7, %v18553_v22  ;;  %v19093_v15 = vadd.f32 %v14048_v6, %v8445_v32  ;;  %v13377_v23 = vpop.f32.mrb[4].mxu0  ;;  %v8390_v39 = vrot.slane %v13412_v47, 7  ;;  %v8078_v6 = vpop.f32.mrb[71].mxu1 }
 0x428   : > { %13591 = vmatprep.mubr.msk.bf16.mxu1 %vm21909_vm2, %v18553_v22  ;;  %v14052_v57 = vadd.f32 %v18849_v2, %v13377_v23  ;;  %v7910_v41 = vpop.f32.mrb[5].mxu0  ;;  %vm21911_vm2 = vmmov %vm21907_vm11  ;;  %v8388_v29 = vrot.slane %v8078_v6, 7  ;;  %v19331_v2 = vld [vmem:[#allocation2 + $0x1d8] sm:$0xff] }
 0x429   : > { %v14056_v36 = vadd.f32 %v18854_v44, %v7910_v41  ;;  %v13378_v12 = vpop.f32.mrb[6].mxu0  ;;  %v8442_v63 = vsel %vm21911_vm2, %v8386_v27, %v8387_v55  ;;  %vm21913_vm15 = vmmov %vm21911_vm2  ;;  %v13415_v41 = vpop.f32.mrb[72].mxu1  ;;  %21983 = vst [vmem:[#allocation14_spill] sm:$0xff] %v19331_v2 }
 0x42a   : > { %v14060_v31 = vadd.f32 %v18876_v54, %v13378_v12  ;;  %v7913_v22 = vpop.f32.mrb[7].mxu0  ;;  %v8451_v61 = vsel %vm15115_vm6, %v8442_v63, 0.0  ;;  %v8439_v44 = vsel %vm21913_vm15, %v8389_v60, %v8390_v39  ;;  %vm21914_vm11 = vmmov %vm21900_vm3 }
 0x42b   : > { %v14064_v8 = vadd.f32 %v18859_v24, %v7913_v22  ;;  %v19111_v54 = vadd.f32 %v14056_v36, %v8451_v61  ;;  %vm21915_vm13 = vmmov %vm21911_vm2  ;;  %v8393_v36 = vrot.slane %v13415_v41, 7 }
 0x42c   : > { %v19113_v32 = vadd.f32 %v14060_v31, %v8439_v44  ;;  %v8440_v24 = vsel %vm21915_vm13, %v8388_v29, %v8389_v60  ;;  %vm21916_vm7 = vmmov %vm21911_vm2  ;;  %v8091_v60 = vpop.f32.mrb[73].mxu1 }
 0x42d   : > { %v8441_v27 = vsel %vm21916_vm7, %v8387_v55, %v8388_v29  ;;  %vm21917_vm2 = vmmov %vm21900_vm3  ;;  %v19123_v11 = vadd.f32 %v14052_v57, %v8440_v24  ;;  %v8391_v55 = vrot.slane %v8091_v60, 7  ;;  %v13416_v22 = vpop.f32.mrb[74].mxu1  ;;  %v21920_v29 = vld [vmem:[#allocation35_spill] sm:$0xff] }
 0x42e   : > { %13626 = vmatmul.mubr.msk.bf16.gmra.mrb[112].mxu0 %vm21914_vm11, %v18585_v0  ;;  %v19121_v23 = vadd.f32 %v14064_v8, %v8441_v27  ;;  %vm21918_vm15 = vmmov %vm21917_vm2  ;;  %v8394_v63 = vrot.slane %v13416_v22, 7  ;;  %v8094_v8 = vpop.f32.mrb[75].mxu1  ;;  %v21923_v27 = vld [vmem:[#allocation15_spill] sm:$0xff] }
 0x42f   : > { %13592 = vmatmul.mubr.msk.bf16.gmra.mrb[144].mxu1 %vm21900_vm3, %v18585_v0  ;;  %13629 = vmatprep.mubr.msk.bf16.mxu0 %vm21918_vm15, %v18587_v28  ;;  %v13381_v0 = vpop.f32.mrb[8].mxu0  ;;  %vm21919_vm3 = vmmov %vm21916_vm7  ;;  %v8392_v44 = vrot.slane %v8094_v8, 7  ;;  %v13419_v22 = vpop.f32.mrb[76].mxu1 }
 0x430   : > { %13595 = vmatprep.mubr.msk.bf16.mxu1 %vm21917_vm2, %v18587_v28  ;;  %v14068_v13 = vadd.f32 %v18879_v20, %v13381_v0  ;;  %v7926_v12 = vpop.f32.mrb[9].mxu0  ;;  %v8438_v28 = vsel %vm21919_vm3, %v8390_v39, %v8391_v55  ;;  %vm21922_vm11 = vmmov %vm21919_vm3  ;;  %v19293_v20 = vld [vmem:[#allocation2 + $0x1d0] sm:$0xff] }
 0x431   : > { %v14072_v47 = vadd.f32 %v18884_v30, %v7926_v12  ;;  %v13382_v31 = vpop.f32.mrb[10].mxu0  ;;  %v8455_v24 = vsel %vm15163_vm8, %v8438_v28, 0.0  ;;  %v8435_v30 = vsel %vm21922_vm11, %v8393_v36, %v8394_v63  ;;  %vm21924_vm13 = vmmov %vm21917_vm2  ;;  %v21928_v12 = vld [vmem:[#allocation19_spill] sm:$0xff]  ;;  %21967 = vst [vmem:[#allocation34_spill] sm:$0xff] %v19293_v20 }
 0x432   : > { %v14076_v6 = vadd.f32 %v18906_v19, %v13382_v31  ;;  %v7929_v57 = vpop.f32.mrb[11].mxu0  ;;  %vm21925_vm7 = vmmov %vm21917_vm2 }
 0x433   : > { %v14080_v61 = vadd.f32 %v21920_v29, %v7929_v57  ;;  %v19141_v19 = vadd.f32 %v14072_v47, %v8455_v24  ;;  %vm21926_vm2 = vmmov %vm21919_vm3  ;;  %v13385_v47 = vpop.f32.mrb[12].mxu0  ;;  %v8397_v57 = vrot.slane %v13419_v22, 7 }
 0x434   : > { %v19143_v0 = vadd.f32 %v14076_v6, %v8435_v30  ;;  %v8436_v39 = vsel %vm21926_vm2, %v8392_v44, %v8393_v36  ;;  %vm21927_vm15 = vmmov %vm21926_vm2  ;;  %v14084_v6 = vadd.f32 %v18909_v38, %v13385_v47  ;;  %v7942_v8 = vpop.f32.mrb[13].mxu0  ;;  %v8107_v36 = vpop.f32.mrb[77].mxu1 }
 0x435   : > { %v8437_v41 = vsel %vm21927_vm15, %v8391_v55, %v8392_v44  ;;  %vm21929_vm3 = vmmov %vm21925_vm7  ;;  %v19153_v31 = vadd.f32 %v14068_v13, %v8436_v39  ;;  %v14088_v28 = vadd.f32 %v18914_v59, %v7942_v8  ;;  %v8395_v55 = vrot.slane %v8107_v36, 7  ;;  %v13386_v29 = vpop.f32.mrb[14].mxu0  ;;  %v13420_v44 = vpop.f32.mrb[78].mxu1 }
 0x436   : > { %13630 = vmatmul.mubr.msk.bf16.gmra.mrb[116].mxu0 %vm21925_vm7, %v21923_v27  ;;  %v19151_v60 = vadd.f32 %v14080_v61, %v8437_v41  ;;  %vm21930_vm11 = vmmov %vm21929_vm3  ;;  %v14092_v61 = vadd.f32 %v18936_v33, %v13386_v29  ;;  %v8398_v24 = vrot.slane %v13420_v44, 7  ;;  %v7945_v13 = vpop.f32.mrb[15].mxu0  ;;  %v8110_v30 = vpop.f32.mrb[79].mxu1 }
 0x437   : > { %13596 = vmatmul.mubr.msk.bf16.gmra.mrb[148].mxu1 %vm21924_vm13, %v21923_v27  ;;  %13633 = vmatprep.mubr.msk.bf16.mxu0 %vm21930_vm11, %v21928_v12  ;;  %v19160_v27 = vld [vmem:[#allocation2 + $0x200] sm:$0xff]  ;;  %vm21931_vm13 = vmmov %vm21926_vm2  ;;  %v14096_v38 = vadd.f32 %v18919_v56, %v7945_v13  ;;  %v8396_v41 = vrot.slane %v8110_v30, 7 }
 0x438   : > { %13599 = vmatprep.mubr.msk.bf16.mxu1 %vm21929_vm3, %v21928_v12  ;;  %v8434_v39 = vsel %vm21931_vm13, %v8394_v63, %v8395_v55  ;;  %vm21933_vm7 = vmmov %vm21926_vm2 }
 0x439   : > { %v8459_v47 = vsel %vm15212_vm10, %v8434_v39, 0.0  ;;  %v8431_v59 = vsel %vm21933_vm7, %v8397_v57, %v8398_v24  ;;  %vm21934_vm2 = vmmov %vm21929_vm3 }
 0x43a   : > { %vm21935_vm15 = vmmov %vm21934_vm2  ;;  %v19173_v33 = vadd.f32 %v14088_v28, %v8459_v47  ;;  %v19175_v22 = vadd.f32 %v14092_v61, %v8431_v59  ;;  %v13423_v28 = vpop.f32.mrb[80].mxu1 }
 0x43b   : > { %vm21936_vm3 = vmmov %vm21933_vm7  ;;  %v8401_v44 = vrot.slane %v13423_v28, 7 }
 0x43c   : > { %v8432_v56 = vsel %vm21936_vm3, %v8396_v41, %v8397_v57  ;;  %vm21937_vm11 = vmmov %vm21936_vm3  ;;  %v8123_v57 = vpop.f32.mrb[81].mxu1 }
 0x43d   : > { %v8433_v63 = vsel %vm21937_vm11, %v8395_v55, %v8396_v41  ;;  %vm21938_vm13 = vmmov %vm21934_vm2  ;;  %v19185_v36 = vadd.f32 %v14084_v6, %v8432_v56  ;;  %v8399_v55 = vrot.slane %v8123_v57, 7  ;;  %v13424_v39 = vpop.f32.mrb[82].mxu1  ;;  %v19191_v41 = vld [vmem:[#allocation2 + $0x208] sm:$0xff] }
 0x43e   : > { %13634 = vmatmul.mubr.msk.bf16.gmra.mrb[120].mxu0 %vm21935_vm15, %v18657_v17  ;;  %v19183_v8 = vadd.f32 %v14096_v38, %v8433_v63  ;;  %vm21939_vm7 = vmmov %vm21934_vm2  ;;  %v8402_v38 = vrot.slane %v13424_v39, 7  ;;  %v8126_v59 = vpop.f32.mrb[83].mxu1 }
 0x43f   : > { %13600 = vmatmul.mubr.msk.bf16.gmra.mrb[152].mxu1 %vm21934_vm2, %v18657_v17  ;;  %13637 = vmatprep.mubr.msk.bf16.mxu0 %vm21939_vm7, %v19160_v27  ;;  %v13389_v17 = vpop.f32.mrb[16].mxu0  ;;  %vm21940_vm2 = vmmov %vm21936_vm3  ;;  %v8400_v63 = vrot.slane %v8126_v59, 7 }
 0x440   : > { %13603 = vmatprep.mubr.msk.bf16.mxu1 %vm21938_vm13, %v19160_v27  ;;  %v14100_v29 = vadd.f32 %v18939_v1, %v13389_v17  ;;  %v7958_v61 = vpop.f32.mrb[17].mxu0  ;;  %v8430_v56 = vsel %vm21940_vm2, %v8398_v24, %v8399_v55  ;;  %v19197_v17 = vld [vmem:[#allocation2 + $0x1a0] sm:$0xff]  ;;  %vm21942_vm15 = vmmov %vm21940_vm2 }
 0x441   : > { %v14104_v13 = vadd.f32 %v18944_v58, %v7958_v61  ;;  %v13390_v30 = vpop.f32.mrb[18].mxu0  ;;  %v8463_v58 = vsel %vm15261_vm12, %v8430_v56, 0.0  ;;  %v8427_v61 = vsel %vm21942_vm15, %v8401_v44, %v8402_v38  ;;  %vm21943_vm3 = vmmov %vm21939_vm7 }
 0x442   : > { %v14108_v6 = vadd.f32 %v18976_v50, %v13390_v30  ;;  %v7961_v47 = vpop.f32.mrb[19].mxu0  ;;  %vm21944_vm11 = vmmov %vm21943_vm3  ;;  %v14581_v30 = vld [vmem:[#allocation2 + $0x190] sm:$0xff]  ;;  %v13427_v59 = vpop.f32.mrb[84].mxu1 }
 0x443   : > { %v14112_v1 = vadd.f32 %v18949_v34, %v7961_v47  ;;  %v19207_v50 = vadd.f32 %v14104_v13, %v8463_v58  ;;  %vm21945_vm13 = vmmov %vm21940_vm2  ;;  %v13393_v13 = vpop.f32.mrb[20].mxu0  ;;  %v8405_v56 = vrot.slane %v13427_v59, 7 }
 0x444   : > { %v19209_v24 = vadd.f32 %v14108_v6, %v8427_v61  ;;  %v8428_v34 = vsel %vm21945_vm13, %v8400_v63, %v8401_v44  ;;  %vm21946_vm7 = vmmov %vm21940_vm2  ;;  %v14116_v6 = vadd.f32 %v18979_v5, %v13393_v13  ;;  %v7974_v58 = vpop.f32.mrb[21].mxu0  ;;  %v8139_v44 = vpop.f32.mrb[85].mxu1 }
 0x445   : > { %v8429_v57 = vsel %vm21946_vm7, %v8399_v55, %v8400_v63  ;;  %vm21947_vm2 = vmmov %vm21943_vm3  ;;  %v19218_v47 = vadd.f32 %v14100_v29, %v8428_v34  ;;  %v14120_v61 = vadd.f32 %v18988_v43, %v7974_v58  ;;  %v8403_v55 = vrot.slane %v8139_v44, 7  ;;  %v13394_v63 = vpop.f32.mrb[22].mxu0  ;;  %v13428_v46 = vpop.f32.mrb[86].mxu1  ;;  %v14582_v58 = vld [vmem:[#allocation2 + $0x198] sm:$0xff] }
 0x446   : > { %13638 = vmatmul.mubr.msk.bf16.gmra.mrb[124].mxu0 %vm21944_vm11, %v19191_v41  ;;  %v19216_v39 = vadd.f32 %v14112_v1, %v8429_v57  ;;  %vm21948_vm15 = vmmov %vm21947_vm2  ;;  %v14124_v29 = vadd.f32 %v19012_v53, %v13394_v63  ;;  %v8406_v1 = vrot.slane %v13428_v46, 7  ;;  %v7977_v34 = vpop.f32.mrb[23].mxu0  ;;  %v8142_v57 = vpop.f32.mrb[87].mxu1  ;;  %v19237_v53 = vld [vmem:[#allocation2 + $0x1b0] sm:$0xff] }
 0x447   : > { %13604 = vmatmul.mubr.msk.bf16.gmra.mrb[156].mxu1 %vm21943_vm3, %v19191_v41  ;;  %13643 = vmatprep.mubr.msk.bf16.mxu0 %vm21947_vm2, %v14581_v30  ;;  %v19224_v30 = vld [vmem:[#allocation2 + $0x1a8] sm:$0xff]  ;;  %vm21949_vm3 = vmmov %vm21946_vm7  ;;  %v14128_v5 = vadd.f32 %v18993_v9, %v7977_v34  ;;  %v8404_v13 = vrot.slane %v8142_v57, 7  ;;  %v14583_v34 = vld [vmem:[#allocation2 + $0x1a0] sm:$0xff] }
 0x448   : > { %13677 = vmatprep.mubr.msk.bf16.mxu1 %vm21948_vm15, %v19197_v17  ;;  %v8426_v28 = vsel %vm21949_vm3, %v8402_v38, %v8403_v55  ;;  %vm21951_vm11 = vmmov %vm21949_vm3 }
 0x449   : > { %v8467_v12 = vsel %vm21327_vm14, %v8426_v28, 0.0  ;;  %v8423_v43 = vsel %vm21951_vm11, %v8405_v56, %v8406_v1  ;;  %vm21952_vm13 = vmmov %vm21947_vm2 }
 0x44a   : > { %vm21953_vm7 = vmmov %vm21947_vm2  ;;  %v19239_v46 = vadd.f32 %v14120_v61, %v8467_v12  ;;  %v19241_v38 = vadd.f32 %v14124_v29, %v8423_v43  ;;  %v13397_v12 = vpop.f32.mrb[24].mxu0  ;;  %v19258_v43 = vld [vmem:[#allocation2 + $0x1b8] sm:$0xff] }
 0x44b   : > { %vm21954_vm2 = vmmov %vm21949_vm3 }
 0x44c   : > { %v8424_v9 = vsel %vm21954_vm2, %v8404_v13, %v8405_v56  ;;  %vm21955_vm15 = vmmov %vm21954_vm2  ;;  %v13431_v61 = vpop.f32.mrb[88].mxu1  ;;  %v14132_v56 = vadd.f32 %v19015_v3, %v13397_v12 }
 0x44d   : > { %v8425_v28 = vsel %vm21955_vm15, %v8403_v55, %v8404_v13  ;;  %v19250_v63 = vadd.f32 %v14116_v6, %v8424_v9  ;;  %vm21956_vm3 = vmmov %vm21953_vm7  ;;  %v8409_v29 = vrot.slane %v13431_v61, 7  ;;  %v7990_v55 = vpop.f32.mrb[25].mxu0  ;;  %v8155_v57 = vpop.f32.mrb[89].mxu1  ;;  %v19264_v61 = vld [vmem:[#allocation2 + $0x1c0] sm:$0xff] }
 0x44e   : > { %13644 = vmatmul.mubr.msk.bf16.vlgmr.msra.gmra.mrb[128].mxu0 %vm21952_vm13, %v14582_v58  ;;  %v19248_v44 = vadd.f32 %v14128_v5, %v8425_v28  ;;  %vm21957_vm11 = vmmov %vm21956_vm3  ;;  %v8407_v5 = vrot.slane %v8155_v57, 7  ;;  %v13398_v6 = vpop.f32.mrb[26].mxu0  ;;  %v13432_v13 = vpop.f32.mrb[90].mxu1  ;;  %v14584_v57 = vld [vmem:[#allocation2 + $0x1a8] sm:$0xff] }
 0x44f   : > { %13678 = vmatmul.mubr.msk.bf16.vlgmr.msra.gmra.mrb[128].mxu1 %vm21953_vm7, %v19224_v30  ;;  %13710 = vmatpush3.bf16.msra.mxu0 %v18960_v45  ;;  %v14136_v45 = vadd.f32 %v19020_v48, %v7990_v55  ;;  %v8410_v58 = vrot.slane %v13432_v13, 7  ;;  %v7993_v9 = vpop.f32.mrb[27].mxu0  ;;  %v8158_v28 = vpop.f32.mrb[91].mxu1  ;;  %vm21958_vm13 = vmmov %vm21954_vm2  ;;  %v14585_v13 = vld [vmem:[#allocation2 + $0x1b0] sm:$0xff] }
 0x450   : > { %13744 = vmatpush3.bf16.msra.mxu1 %v18963_v10  ;;  %13647 = vmatprep.mubr.msk.bf16.mxu0 %vm21956_vm3, %v14583_v34  ;;  %v14140_v10 = vadd.f32 %v19046_v18, %v13398_v6  ;;  %v8422_v34 = vsel %vm21958_vm13, %v8406_v1, %v8407_v5  ;;  %v14144_v3 = vadd.f32 %v19025_v49, %v7993_v9  ;;  %v8408_v12 = vrot.slane %v8158_v28, 7  ;;  %vm21960_vm7 = vmmov %vm21954_vm2 }
 0x451   : > { %13681 = vmatprep.mubr.msk.bf16.mxu1 %vm21957_vm11, %v19237_v53  ;;  %v8471_v48 = vsel %vm21721_vm9, %v8422_v34, 0.0  ;;  %v8419_v55 = vsel %vm21960_vm7, %v8409_v29, %v8410_v58  ;;  %vm21961_vm2 = vmmov %vm21956_vm3 }
 0x452   : > { %vm21962_vm15 = vmmov %vm21961_vm2  ;;  %v19273_v18 = vadd.f32 %v14136_v45, %v8471_v48  ;;  %v19275_v1 = vadd.f32 %v14140_v10, %v8419_v55 }
 0x453   : > { %vm21963_vm3 = vmmov %vm21960_vm7 }
 0x454   : > { %v8420_v49 = vsel %vm21963_vm3, %v8408_v12, %v8409_v29  ;;  %vm21964_vm11 = vmmov %vm21963_vm3 }
 0x455   : > { %v8421_v6 = vsel %vm21964_vm11, %v8407_v5, %v8408_v12  ;;  %vm21965_vm13 = vmmov %vm21961_vm2  ;;  %v19284_v28 = vadd.f32 %v14132_v56, %v8420_v49  ;;  %v13401_v45 = vpop.f32.mrb[28].mxu0 }
 0x456   : > { %13648 = vmatmul.mubr.msk.bf16.gmra.mrb[132].mxu0 %vm21961_vm2, %v14584_v57  ;;  %v19282_v9 = vadd.f32 %v14144_v3, %v8421_v6  ;;  %vm21966_vm7 = vmmov %vm21961_vm2  ;;  %v13435_v34 = vpop.f32.mrb[92].mxu1  ;;  %v14148_v10 = vadd.f32 %v19049_v37, %v13401_v45  ;;  %v8006_v55 = vpop.f32.mrb[29].mxu0 }
 0x457   : > { %13682 = vmatmul.mubr.msk.bf16.gmra.mrb[132].mxu1 %vm21962_vm15, %v19258_v43  ;;  %13651 = vmatprep.mubr.msk.bf16.mxu0 %vm21965_vm13, %v14585_v13  ;;  %v8413_v48 = vrot.slane %v13435_v34, 7  ;;  %v8171_v29 = vpop.f32.mrb[93].mxu1  ;;  %v14152_v57 = vadd.f32 %v19056_v7, %v8006_v55  ;;  %v13402_v12 = vpop.f32.mrb[30].mxu0  ;;  %v19290_v13 = vld [vmem:[#allocation2 + $0x1c8] sm:$0xff]  ;;  %vm21968_vm2 = vmmov %vm21963_vm3 }
 0x458   : > { %13685 = vmatprep.mubr.msk.bf16.mxu1 %vm21966_vm7, %v19264_v61  ;;  %v8411_v5 = vrot.slane %v8171_v29, 7  ;;  %v13436_v59 = vpop.f32.mrb[94].mxu1  ;;  %v14156_v56 = vadd.f32 %v19059_v42, %v13402_v12  ;;  %v8009_v49 = vpop.f32.mrb[31].mxu0  ;;  %vm21970_vm15 = vmmov %vm21968_vm2  ;;  %v21971_v29 = vrot.slane %v19067_v40, 7  ;;  %v14587_v40 = vld [vmem:[#allocation2 + $0x1c0] sm:$0xff] }
 0x459   : > { %v8414_v3 = vrot.slane %v13436_v59, 7  ;;  %v8174_v6 = vpop.f32.mrb[95].mxu1  ;;  %v14160_v45 = vadd.f32 %v19064_v35, %v8009_v49  ;;  %vm21972_vm3 = vmmov %vm21968_vm2  ;;  %v14586_v59 = vld [vmem:[#allocation2 + $0x1b8] sm:$0xff] }
 0x45a   : > { %v8418_v37 = vsel %vm21968_vm2, %v8410_v58, %v8411_v5  ;;  %v8412_v34 = vrot.slane %v8174_v6, 7  ;;  %vm21973_vm11 = vmmov %vm21966_vm7 }
 0x45b   : > { %v8475_v7 = vsel %vm21734_vm4, %v8418_v37, 0.0  ;;  %v8415_v55 = vsel %vm21970_vm15, %v8413_v48, %v8414_v3  ;;  %v8446_v42 = vsel %vm21972_vm3, %v8414_v3, %v21971_v29  ;;  %vm21974_vm13 = vmmov %vm21966_vm7 }
 0x45c   : > { %v19309_v58 = vadd.f32 %v14152_v57, %v8475_v7  ;;  %v8447_v12 = vsel %vm21740_vm0, %v8446_v42, 0.0  ;;  %v19313_v49 = vadd.f32 %v14156_v56, %v8415_v55  ;;  %vm21978_vm7 = vmmov %vm21968_vm2  ;;  %v8417_v57 = vsel %vm21972_vm3, %v8411_v5, %v8412_v34 }
 0x45d   : > { %v8416_v6 = vsel %vm21978_vm7, %v8412_v34, %v8413_v48  ;;  %vm21979_vm2 = vmmov %vm21973_vm11  ;;  %v8479_v3 = vadd.f32 %v19070_v51, %v8447_v12  ;;  %v19325_v7 = vadd.f32 %v14160_v45, %v8417_v57 }
 0x45e   : > { %13652 = vmatmul.mubr.msk.bf16.gmra.mrb[136].mxu0 %vm21973_vm11, %v14586_v59  ;;  %21975 = vst [vmem:[#allocation37_spill] sm:$0xff] %v19309_v58  ;;  %21977 = vst [vmem:[#allocation33_spill] sm:$0xff] %v19313_v49  ;;  %v19323_v37 = vadd.f32 %v14148_v10, %v8416_v6  ;;  %v13475_v55 = vpop.f32.mrb[96].mxu1  ;;  %vm21985_vm11 = vcmp.lt.s32.totalorder %v15063_v21, 7  ;;  %v19342_v58 = vld [vmem:[%s20658_s2] ss:$0 sm:$0xff] }
 0x45f   : > { %13686 = vmatmul.mubr.msk.bf16.gmra.mrb[136].mxu1 %vm21974_vm13, %v19290_v13  ;;  %13655 = vmatprep.mubr.msk.bf16.mxu0 %vm21979_vm2, %v14587_v40  ;;  %vm21980_vm15 = vmmov %vm21979_vm2  ;;  %21981 = vst [vmem:[#allocation36_spill] sm:$0xff] %v19325_v7  ;;  %v13441_v56 = vpop.f32.mrb[32].mxu0  ;;  %v9108_v29 = vrot.slane %v13475_v55, 7  ;;  %v19329_v48 = vpop.f32.mrb[97].mxu1  ;;  %v19335_v55 = vld [vmem:[#allocation2 + $0x1e0] sm:$0xff]  ;;  %v19389_v49 = vld [vmem:[#allocation2 + $0x1f0] sm:$0xff] }
 0x460   : > { %13689 = vmatprep.mubr.msk.bf16.mxu1 %vm21980_vm15, %v19293_v20  ;;  %v19327_v42 = vpop.f32.mrb[33].mxu0  ;;  %21982 = vst [vmem:[#allocation18_spill] sm:$0xff] %v19329_v48  ;;  %v13476_v40 = vpop.f32.mrb[98].mxu1  ;;  %v8513_v35 = vrot.slane %v13441_v56, 1  ;;  %21984 = vst [vmem:[#allocation25_spill] sm:$0xff] %v19335_v55 }
 0x461   : > { %v13442_v59 = vpop.f32.mrb[34].mxu0  ;;  %v9109_v5 = vrot.slane %v13476_v40, 7  ;;  %v8817_v34 = vpop.f32.mrb[99].mxu1  ;;  %v20804_v45 = vrot.slane %v19327_v42, 1  ;;  %vm21986_vm13 = vmmov %vm21972_vm3  ;;  %22001 = vst [vmem:[#allocation30_spill] sm:$0xff] %v19389_v49 }
 0x462   : > { %v8514_v12 = vrot.slane %v13442_v59, 1  ;;  %v8227_v10 = vpop.f32.mrb[35].mxu0  ;;  %v9107_v57 = vrot.slane %v8817_v34, 7  ;;  %v14588_v59 = vld [vmem:[#allocation2 + $0x1c8] sm:$0xff]  ;;  %vm21988_vm7 = vmmov %vm21979_vm2 }
 0x463   : > { %v8512_v6 = vrot.slane %v8227_v10, 1  ;;  %v19346_v56 = vsel %vm21986_vm13, %v9108_v29, %v9109_v5  ;;  %vm21989_vm15 = vmmov %vm21985_vm11 }
 0x464   : > { %v8571_v7 = vsel %vm21985_vm11, %v8513_v35, %v8514_v12  ;;  %21987 = vst [vmem:[#allocation26_spill] sm:$0xff] %v19346_v56  ;;  %vm21990_vm3 = vmmov %vm21985_vm11  ;;  %v14589_v56 = vld [vmem:[#allocation2 + $0x1d0] sm:$0xff] }
 0x465   : > { %v8609_v40 = vadd.f32 %v8571_v7, %v19095_v25  ;;  %v8572_v10 = vsel %vm21989_vm15, %v8512_v6, %v8513_v35  ;;  %v8573_v34 = vsel %vm21990_vm3, %v20804_v45, %v8512_v6  ;;  %vm21991_vm11 = vmmov %vm21986_vm13  ;;  %v21994_v25 = vrot.slane %v19329_v48, 7 }
 0x466   : > { %13656 = vmatmul.mubr.msk.bf16.gmra.mrb[140].mxu0 %vm21988_vm7, %v14588_v59  ;;  %v19360_v51 = vsel %vm21991_vm11, %v9107_v57, %v9108_v29  ;;  %vm21993_vm13 = vmmov %vm21979_vm2  ;;  %v8607_v59 = vadd.f32 %v8573_v34, %v8479_v3  ;;  %vm21997_vm15 = vcmask 523264  }
 0x467   : > { %13690 = vmatmul.mubr.msk.bf16.gmra.mrb[140].mxu1 %vm21979_vm2, %v19331_v2  ;;  %21992 = vst [vmem:[#allocation27_spill] sm:$0xff] %v19360_v51  ;;  %13659 = vmatprep.mubr.msk.bf16.mxu0 %vm21993_vm13, %v14589_v56  ;;  %v8608_v2 = vadd.f32 %v8572_v10, %v19093_v15  ;;  %vm21995_vm7 = vmmov %vm21991_vm11  ;;  %v8648_v7 = vadd.f32 %v19342_v58, %v8609_v40  ;;  %v13445_v29 = vpop.f32.mrb[36].mxu0  ;;  %v19377_v51 = vld [vmem:[#allocation2 + $0x1e8] sm:$0xff]  ;;  %vm22000_vm13 = vcmp.lt.s32.totalorder %v15063_v21, 7 }
 0x468   : > { %v19368_v35 = vsel %vm21995_vm7, %v21994_v25, %v9107_v57  ;;  %13693 = vmatprep.mubr.msk.bf16.mxu1 %vm21979_vm2, %v19335_v55  ;;  %v8646_v56 = vadd.f32 %v19342_v58, %v8607_v59  ;;  %v8240_v10 = vpop.f32.mrb[37].mxu0  ;;  %vm21998_vm3 = vmmov %vm21997_vm15  ;;  %v8517_v40 = vrot.slane %v13445_v29, 1  ;;  %v14590_v29 = vld [vmem:[#allocation2 + $0x1d8] sm:$0xff] }
 0x469   : > { %21996 = vst [vmem:[#allocation12_spill] sm:$0xff] %v19368_v35  ;;  %v13479_v6 = vpop.f32.mrb[100].mxu1  ;;  %v8647_v3 = vadd.f32 %v19342_v58, %v8608_v2  ;;  %8680 = vst.msk [vmem:[%s16379_s14 + $0x210] sm:$0xff] %vm21997_vm15, %v8648_v7  ;;  %v8515_v57 = vrot.slane %v8240_v10, 1  ;;  %v13446_v45 = vpop.f32.mrb[38].mxu0 }
 0x46a   : > { %v9112_v15 = vrot.slane %v13479_v6, 7  ;;  %v8830_v34 = vpop.f32.mrb[101].mxu1  ;;  %8678 = vst.msk [vmem:[%s16379_s14 + $0x200] sm:$0xff] %vm21998_vm3, %v8646_v56  ;;  %vm21999_vm11 = vmmov %vm21998_vm3  ;;  %v8518_v55 = vrot.slane %v13446_v45, 1  ;;  %v8243_v48 = vpop.f32.mrb[39].mxu0  ;;  %vm22006_vm3 = vcmask 23552  }
 0x46b   : > { %v9110_v25 = vrot.slane %v8830_v34, 7  ;;  %v13480_v35 = vpop.f32.mrb[102].mxu1  ;;  %8679 = vst.msk [vmem:[%s16379_s14 + $0x208] sm:$0xff] %vm21999_vm11, %v8647_v3  ;;  %v8570_v6 = vsel %vm22000_vm13, %v8514_v12, %v8515_v57  ;;  %v8516_v10 = vrot.slane %v8243_v48, 1  ;;  %vm22003_vm2 = vmmov %vm22000_vm13 }
 0x46c   : > { %v9113_v59 = vrot.slane %v13480_v35, 7  ;;  %v8833_v2 = vpop.f32.mrb[103].mxu1  ;;  %v8578_v56 = vsel %vm15111_vm5, %v8570_v6, 0.0  ;;  %v8567_v45 = vsel %vm22003_vm2, %v8517_v40, %v8518_v55  ;;  %vm22004_vm15 = vmmov %vm21995_vm7 }
 0x46d   : > { %v19387_v7 = vsel %vm21995_vm7, %v9109_v5, %v9110_v25  ;;  %v9111_v34 = vrot.slane %v8833_v2, 7  ;;  %vm22007_vm11 = vmmov %vm22006_vm3  ;;  %v8610_v48 = vadd.f32 %v8578_v56, %v19081_v14  ;;  %v8613_v12 = vadd.f32 %v8567_v45, %v19123_v11  ;;  %v14591_v2 = vld [vmem:[#allocation2 + $0x1e0] sm:$0xff] }
 0x46e   : > { %v19397_v35 = vsel %vm22004_vm15, %v9112_v15, %v9113_v59  ;;  %13660 = vmatmul.mubr.msk.bf16.gmra.mrb[144].mxu0 %vm22006_vm3, %v14590_v29  ;;  %vm22008_vm13 = vmmov %vm22003_vm2 }
 0x46f   : > { %22005 = vst [vmem:[#allocation20_spill] sm:$0xff] %v19397_v35  ;;  %13694 = vmatmul.mubr.msk.bf16.gmra.mrb[144].mxu1 %vm22007_vm11, %v19377_v51  ;;  %v8568_v5 = vsel %vm22008_vm13, %v8516_v10, %v8517_v40  ;;  %vm22009_vm7 = vmmov %vm22003_vm2  ;;  %v19413_v14 = vsel %vm22004_vm15, %v9111_v34, %v9112_v15  ;;  %v8652_v40 = vadd.f32 %v19342_v58, %v8613_v12  ;;  %vm22014_vm13 = vcmask 523264  }
 0x470   : > { %v8569_v3 = vsel %vm22009_vm7, %v8515_v57, %v8516_v10  ;;  %vm22010_vm2 = vmmov %vm22006_vm3  ;;  %v8612_v29 = vadd.f32 %v8568_v5, %v19121_v23  ;;  %v8649_v57 = vadd.f32 %v19342_v58, %v8610_v48 }
 0x471   : > { %13663 = vmatprep.mubr.msk.bf16.mxu0 %vm22010_vm2, %v14591_v2  ;;  %v8611_v6 = vadd.f32 %v8569_v3, %v19111_v54  ;;  %vm22011_vm3 = vmmov %vm22004_vm15  ;;  %v13449_v54 = vpop.f32.mrb[40].mxu0  ;;  %v19429_v2 = vld [vmem:[#allocation2 + $0x1f8] sm:$0xff] }
 0x472   : > { %v19417_v11 = vsel %vm22011_vm3, %v9110_v25, %v9111_v34  ;;  %vm22013_vm11 = vmmov %vm22010_vm2  ;;  %v13483_v10 = vpop.f32.mrb[104].mxu1  ;;  %v8651_v15 = vadd.f32 %v19342_v58, %v8612_v29  ;;  %v8256_v45 = vpop.f32.mrb[41].mxu0  ;;  %8681 = vst.msk [vmem:[%s16379_s14 + $0x218] sm:$0xff] %vm22014_vm13, %v8649_v57  ;;  %v8521_v12 = vrot.slane %v13449_v54, 1  ;;  %vm22018_vm3 = vcmp.lt.s32.totalorder %v15063_v21, 7 }
 0x473   : > { %22012 = vst [vmem:[#allocation31_spill] sm:$0xff] %v19417_v11  ;;  %13697 = vmatprep.mubr.msk.bf16.mxu1 %vm22013_vm11, %v19389_v49  ;;  %v8650_v23 = vadd.f32 %v19342_v58, %v8611_v6  ;;  %v9116_v56 = vrot.slane %v13483_v10, 7  ;;  %v8846_v5 = vpop.f32.mrb[105].mxu1  ;;  %vm22015_vm7 = vmmov %vm22014_vm13  ;;  %v8519_v25 = vrot.slane %v8256_v45, 1  ;;  %v13450_v48 = vpop.f32.mrb[42].mxu0  ;;  %vm22019_vm11 = vcmp.lt.s32.totalorder %v15063_v21, 1 }
 0x474   : > { %8684 = vst.msk [vmem:[%s16379_s14 + $0x230] sm:$0xff] %vm22015_vm7, %v8652_v40  ;;  %v9114_v34 = vrot.slane %v8846_v5, 7  ;;  %v13484_v3 = vpop.f32.mrb[106].mxu1  ;;  %vm22016_vm2 = vmmov %vm22015_vm7  ;;  %v8522_v6 = vrot.slane %v13450_v48, 1  ;;  %v8259_v10 = vpop.f32.mrb[43].mxu0  ;;  %v22020_v11 = vld [vmem:[#allocation5_spill] sm:$0xff] }
 0x475   : > { %8682 = vst.msk [vmem:[%s16379_s14 + $0x220] sm:$0xff] %vm22016_vm2, %v8650_v23  ;;  %vm22017_vm15 = vmmov %vm22016_vm2  ;;  %v9117_v29 = vrot.slane %v13484_v3, 7  ;;  %v8849_v35 = vpop.f32.mrb[107].mxu1  ;;  %v8566_v57 = vsel %vm22018_vm3, %v8518_v55, %v8519_v25  ;;  %v8520_v45 = vrot.slane %v8259_v10, 1  ;;  %vm22021_vm13 = vnez %v22020_v11  ;;  %v14593_v3 = vld [vmem:[#allocation2 + $0x1f0] sm:$0xff] }
 0x476   : > { %8683 = vst.msk [vmem:[%s16379_s14 + $0x228] sm:$0xff] %vm22017_vm15, %v8651_v15  ;;  %v19439_v40 = vsel %vm22019_vm11, %v9113_v59, %v9114_v34  ;;  %v9115_v5 = vrot.slane %v8849_v35, 7  ;;  %v8582_v49 = vsel %vm22021_vm13, %v8566_v57, 0.0  ;;  %vm22022_vm7 = vmmov %vm22018_vm3  ;;  %v14592_v15 = vld [vmem:[#allocation2 + $0x1e8] sm:$0xff]  ;;  %vm22025_vm15 = vcmask 23552  }
 0x477   : > { %v8563_v23 = vsel %vm22022_vm7, %v8521_v12, %v8522_v6  ;;  %vm22023_vm2 = vmmov %vm22019_vm11  ;;  %13664 = vmatmul.mubr.msk.bf16.gmra.mrb[148].mxu0 %vm22025_vm15, %v14592_v15  ;;  %v8614_v55 = vadd.f32 %v8582_v49, %v19113_v32 }
 0x478   : > { %v19447_v54 = vsel %vm22023_vm2, %v9116_v56, %v9117_v29  ;;  %vm22026_vm3 = vmmov %vm22025_vm15  ;;  %v8617_v59 = vadd.f32 %v8563_v23, %v19153_v31  ;;  %v19463_v32 = vsel %vm22023_vm2, %v9115_v5, %v9116_v56 }
 0x479   : > { %22024 = vst [vmem:[#allocation29_spill] sm:$0xff] %v19447_v54  ;;  %13698 = vmatmul.mubr.msk.bf16.gmra.mrb[148].mxu1 %vm22026_vm3, %v19429_v2  ;;  %vm22027_vm11 = vmmov %vm22022_vm7  ;;  %v8653_v49 = vadd.f32 %v19342_v58, %v8614_v55  ;;  %v22037_v54 = vld [vmem:[#allocation7_spill] sm:$0xff] }
 0x47a   : > { %v8564_v35 = vsel %vm22027_vm11, %v8520_v45, %v8521_v12  ;;  %vm22028_vm4 = vmmov %vm22022_vm7  ;;  %13701 = vmatprep.mubr.msk.bf16.mxu1 %vm22026_vm3, %v19160_v27  ;;  %v13487_v12 = vpop.f32.mrb[108].mxu1 }
 0x47b   : > { %v8565_v48 = vsel %vm22028_vm4, %v8519_v25, %v8520_v45  ;;  %vm22029_vm7 = vmmov %vm22026_vm3  ;;  %v8616_v57 = vadd.f32 %v8564_v35, %v19151_v60  ;;  %v8656_v25 = vadd.f32 %v19342_v58, %v8617_v59  ;;  %v9120_v45 = vrot.slane %v13487_v12, 7  ;;  %v8862_v15 = vpop.f32.mrb[109].mxu1 }
 0x47c   : > { %13667 = vmatprep.mubr.msk.bf16.mxu0 %vm22029_vm7, %v14593_v3  ;;  %v8615_v10 = vadd.f32 %v8565_v48, %v19141_v19  ;;  %vm22030_vm15 = vmmov %vm22023_vm2  ;;  %v13453_v19 = vpop.f32.mrb[44].mxu0  ;;  %vm22031_vm4 = vcmask 523264   ;;  %v13488_v55 = vpop.f32.mrb[110].mxu1  ;;  %vm22036_vm3 = vcmp.lt.s32.totalorder %v15063_v21, 1 }
 0x47d   : > { %v19467_v31 = vsel %vm22030_vm15, %v9114_v34, %v9115_v5  ;;  %v8655_v56 = vadd.f32 %v19342_v58, %v8616_v57  ;;  %v8272_v23 = vpop.f32.mrb[45].mxu0  ;;  %8685 = vst.msk [vmem:[%s16379_s14 + $0x238] sm:$0xff] %vm22031_vm4, %v8653_v49  ;;  %vm22032_vm11 = vmmov %vm22031_vm4  ;;  %v9118_v5 = vrot.slane %v8862_v15, 7  ;;  %v8525_v59 = vrot.slane %v13453_v19, 1  ;;  %v8865_v57 = vpop.f32.mrb[111].mxu1  ;;  %v19489_v15 = vld [vmem:[#allocation2 + $0x210] sm:$0xff] }
 0x47e   : > { %v8654_v60 = vadd.f32 %v19342_v58, %v8615_v10  ;;  %8688 = vst.msk [vmem:[%s16379_s14 + $0x250] sm:$0xff] %vm22032_vm11, %v8656_v25  ;;  %v8523_v34 = vrot.slane %v8272_v23, 1  ;;  %v13454_v35 = vpop.f32.mrb[46].mxu0  ;;  %vm22033_vm7 = vmmov %vm22031_vm4  ;;  %v9121_v3 = vrot.slane %v13488_v55, 7  ;;  %vm22035_vm15 = vcmp.lt.s32.totalorder %v15063_v21, 7 }
 0x47f   : > { %vm22034_vm2 = vmmov %vm22031_vm4  ;;  %v8526_v48 = vrot.slane %v13454_v35, 1  ;;  %v8275_v10 = vpop.f32.mrb[47].mxu0  ;;  %v19487_v49 = vsel %vm22036_vm3, %v9117_v29, %v9118_v5  ;;  %v9119_v23 = vrot.slane %v8865_v57, 7  ;;  %vm22038_vm4 = vnez %v22037_v54  ;;  %v14594_v35 = vld [vmem:[#allocation2 + $0x1f8] sm:$0xff] }
 0x480   : > { %8686 = vst.msk [vmem:[%s16379_s14 + $0x240] sm:$0xff] %vm22033_vm7, %v8654_v60  ;;  %v8562_v12 = vsel %vm22035_vm15, %v8522_v6, %v8523_v34  ;;  %v8524_v25 = vrot.slane %v8275_v10, 1  ;;  %vm22039_vm11 = vmmov %vm22035_vm15 }
 0x481   : > { %8687 = vst.msk [vmem:[%s16379_s14 + $0x248] sm:$0xff] %vm22034_vm2, %v8655_v56  ;;  %v8586_v60 = vsel %vm22038_vm4, %v8562_v12, 0.0  ;;  %v8559_v19 = vsel %vm22039_vm11, %v8525_v59, %v8526_v48  ;;  %vm22040_vm7 = vmmov %vm22036_vm3  ;;  %vm22042_vm2 = vcmask 23552  }
 0x482   : > { %v19497_v56 = vsel %vm22040_vm7, %v9120_v45, %v9121_v3  ;;  %13668 = vmatmul.mubr.msk.bf16.gmra.mrb[152].mxu0 %vm22042_vm2, %v14594_v35  ;;  %vm22043_vm15 = vmmov %vm22042_vm2  ;;  %v8618_v6 = vadd.f32 %v8586_v60, %v19143_v0  ;;  %v8621_v29 = vadd.f32 %v8559_v19, %v19185_v36  ;;  %v19514_v0 = vsel %vm22040_vm7, %v9119_v23, %v9120_v45 }
 0x483   : > { %22041 = vst [vmem:[#allocation28_spill] sm:$0xff] %v19497_v56  ;;  %13702 = vmatmul.mubr.msk.bf16.gmra.mrb[152].mxu1 %vm22043_vm15, %v19191_v41  ;;  %vm22044_vm3 = vmmov %vm22039_vm11 }
 0x484   : > { %v8560_v55 = vsel %vm22044_vm3, %v8524_v25, %v8525_v59  ;;  %vm22045_vm9 = vmmov %vm22044_vm3  ;;  %v13491_v59 = vpop.f32.mrb[112].mxu1 }
 0x485   : > { %v8561_v10 = vsel %vm22045_vm9, %v8523_v34, %v8524_v25  ;;  %vm22046_vm11 = vmmov %vm22042_vm2  ;;  %v8620_v12 = vadd.f32 %v8560_v55, %v19183_v8  ;;  %v8657_v34 = vadd.f32 %v19342_v58, %v8618_v6  ;;  %v9124_v25 = vrot.slane %v13491_v59, 7  ;;  %v8878_v19 = vpop.f32.mrb[113].mxu1  ;;  %v19530_v55 = vld [vmem:[#allocation2 + $0x218] sm:$0xff] }
 0x486   : > { %13671 = vmatprep.mubr.msk.bf16.mxu0 %vm22046_vm11, %v19160_v27  ;;  %v8619_v57 = vadd.f32 %v8561_v10, %v19173_v33  ;;  %vm22047_vm2 = vmmov %vm22040_vm7  ;;  %v8660_v27 = vadd.f32 %v19342_v58, %v8621_v29  ;;  %v13457_v33 = vpop.f32.mrb[48].mxu0  ;;  %vm22049_vm9 = vcmask 523264   ;;  %v13492_v6 = vpop.f32.mrb[114].mxu1 }
 0x487   : > { %v19518_v36 = vsel %vm22047_vm2, %v9118_v5, %v9119_v23  ;;  %vm22048_vm15 = vmmov %vm22046_vm11  ;;  %v8659_v45 = vadd.f32 %v19342_v58, %v8620_v12  ;;  %v8288_v60 = vpop.f32.mrb[49].mxu0  ;;  %8689 = vst.msk [vmem:[%s16379_s14 + $0x258] sm:$0xff] %vm22049_vm9, %v8657_v34  ;;  %v9122_v23 = vrot.slane %v8878_v19, 7  ;;  %v8529_v29 = vrot.slane %v13457_v33, 1  ;;  %v8881_v59 = vpop.f32.mrb[115].mxu1 }
 0x488   : > { %13705 = vmatprep.mubr.msk.bf16.mxu1 %vm22048_vm15, %v19489_v15  ;;  %v8658_v8 = vadd.f32 %v19342_v58, %v8619_v57  ;;  %vm22050_vm3 = vmmov %vm22049_vm9  ;;  %v8527_v5 = vrot.slane %v8288_v60, 1  ;;  %v13458_v35 = vpop.f32.mrb[50].mxu0  ;;  %v9125_v57 = vrot.slane %v13492_v6, 7  ;;  %vm22053_vm2 = vcmp.lt.s32.totalorder %v15063_v21, 7 }
 0x489   : > { %8692 = vst.msk [vmem:[%s16379_s14 + $0x270] sm:$0xff] %vm22050_vm3, %v8660_v27  ;;  %vm22051_vm11 = vmmov %vm22050_vm3  ;;  %v8530_v10 = vrot.slane %v13458_v35, 1  ;;  %v8291_v12 = vpop.f32.mrb[51].mxu0  ;;  %vm22054_vm15 = vcmp.lt.s32.totalorder %v15063_v21, 1  ;;  %v9123_v19 = vrot.slane %v8881_v59, 7  ;;  %vm22055_vm9 = vnez %v21868_v52 }
 0x48a   : > { %8690 = vst.msk [vmem:[%s16379_s14 + $0x260] sm:$0xff] %vm22051_vm11, %v8658_v8  ;;  %vm22052_vm7 = vmmov %vm22050_vm3  ;;  %v8558_v34 = vsel %vm22053_vm2, %v8526_v48, %v8527_v5  ;;  %v19540_v27 = vsel %vm22054_vm15, %v9121_v3, %v9122_v23  ;;  %v8528_v60 = vrot.slane %v8291_v12, 1 }
 0x48b   : > { %8691 = vst.msk [vmem:[%s16379_s14 + $0x268] sm:$0xff] %vm22052_vm7, %v8659_v45  ;;  %v8590_v56 = vsel %vm22055_vm9, %v8558_v34, 0.0  ;;  %vm22056_vm3 = vmmov %vm22053_vm2  ;;  %vm22058_vm7 = vcmask 23552  }
 0x48c   : > { %v8555_v8 = vsel %vm22056_vm3, %v8529_v29, %v8530_v10  ;;  %vm22057_vm11 = vmmov %vm22054_vm15  ;;  %13672 = vmatmul.mubr.msk.bf16.gmra.mrb[156].mxu0 %vm22058_vm7, %v19191_v41  ;;  %v8622_v48 = vadd.f32 %v8590_v56, %v19175_v22 }
 0x48d   : > { %v19548_v33 = vsel %vm22057_vm11, %v9124_v25, %v9125_v57  ;;  %vm22059_vm2 = vmmov %vm22058_vm7  ;;  %v8625_v3 = vadd.f32 %v8555_v8, %v19218_v47  ;;  %v19566_v22 = vsel %vm22057_vm11, %v9123_v19, %v9124_v25 }
 0x48e   : > { %13706 = vmatmul.mubr.msk.bf16.gmra.mrb[156].mxu1 %vm22059_vm2, %v19530_v55  ;;  %vm22060_vm15 = vmmov %vm22056_vm3  ;;  %v8661_v56 = vadd.f32 %v19342_v58, %v8622_v48 }
 0x48f   : > { %v8556_v45 = vsel %vm22060_vm15, %v8528_v60, %v8529_v29  ;;  %vm22061_vm14 = vmmov %vm22056_vm3  ;;  %13745 = vmatprep.mubr.msk.bf16.mxu1 %vm22059_vm2, %v19197_v17  ;;  %v13495_v29 = vpop.f32.mrb[116].mxu1 }
 0x490   : > { %v8557_v35 = vsel %vm22061_vm14, %v8527_v5, %v8528_v60  ;;  %vm22062_vm3 = vmmov %vm22059_vm2  ;;  %v8624_v6 = vadd.f32 %v8556_v45, %v19216_v39  ;;  %v8664_v5 = vadd.f32 %v19342_v58, %v8625_v3  ;;  %v9128_v12 = vrot.slane %v13495_v29, 7  ;;  %v8894_v34 = vpop.f32.mrb[117].mxu1 }
 0x491   : > { %13711 = vmatprep.mubr.msk.bf16.mxu0 %vm22062_vm3, %v19197_v17  ;;  %v8623_v41 = vadd.f32 %v8557_v35, %v19207_v50  ;;  %vm22063_vm7 = vmmov %vm22057_vm11  ;;  %v13461_v50 = vpop.f32.mrb[52].mxu0  ;;  %vm22064_vm14 = vcmask 523264   ;;  %vm22069_vm2 = vcmp.lt.s32.totalorder %v15063_v21, 1 }
 0x492   : > { %v19570_v47 = vsel %vm22063_vm7, %v9122_v23, %v9123_v19  ;;  %v8663_v25 = vadd.f32 %v19342_v58, %v8624_v6  ;;  %v8304_v59 = vpop.f32.mrb[53].mxu0  ;;  %8693 = vst.msk [vmem:[%s16379_s14 + $0x278] sm:$0xff] %vm22064_vm14, %v8661_v56  ;;  %vm22065_vm15 = vmmov %vm22064_vm14  ;;  %v9126_v23 = vrot.slane %v8894_v34, 7  ;;  %v13496_v19 = vpop.f32.mrb[118].mxu1  ;;  %v8533_v8 = vrot.slane %v13461_v50, 1 }
 0x493   : > { %v8662_v39 = vadd.f32 %v19342_v58, %v8623_v41  ;;  %8696 = vst.msk [vmem:[%s16379_s14 + $0x290] sm:$0xff] %vm22065_vm15, %v8664_v5  ;;  %v8531_v17 = vrot.slane %v8304_v59, 1  ;;  %v13462_v60 = vpop.f32.mrb[54].mxu0  ;;  %vm22066_vm3 = vmmov %vm22064_vm14  ;;  %v9129_v3 = vrot.slane %v13496_v19, 7  ;;  %v8897_v35 = vpop.f32.mrb[119].mxu1  ;;  %vm22068_vm7 = vcmp.lt.s32.totalorder %v15063_v21, 7 }
 0x494   : > { %vm22067_vm11 = vmmov %vm22066_vm3  ;;  %v8534_v48 = vrot.slane %v13462_v60, 1  ;;  %v8307_v45 = vpop.f32.mrb[55].mxu0  ;;  %v19590_v6 = vsel %vm22069_vm2, %v9125_v57, %v9126_v23  ;;  %v9127_v5 = vrot.slane %v8897_v35, 7  ;;  %vm22070_vm14 = vnez %v21877_v26  ;;  %v13499_v19 = vpop.f32.mrb[120].mxu1 }
 0x495   : > { %8694 = vst.msk [vmem:[%s16379_s14 + $0x280] sm:$0xff] %vm22066_vm3, %v8662_v39  ;;  %v8554_v41 = vsel %vm22068_vm7, %v8530_v10, %v8531_v17  ;;  %v8532_v56 = vrot.slane %v8307_v45, 1  ;;  %vm22071_vm15 = vmmov %vm22068_vm7  ;;  %v8910_v35 = vpop.f32.mrb[121].mxu1 }
 0x496   : > { %8695 = vst.msk [vmem:[%s16379_s14 + $0x288] sm:$0xff] %vm22067_vm11, %v8663_v25  ;;  %v8594_v29 = vsel %vm22070_vm14, %v8554_v41, 0.0  ;;  %v8551_v39 = vsel %vm22071_vm15, %v8533_v8, %v8534_v48  ;;  %vm22072_vm3 = vmmov %vm22069_vm2  ;;  %vm22073_vm11 = vcmask 23552  }
 0x497   : > { %v19598_v50 = vsel %vm22072_vm3, %v9128_v12, %v9129_v3  ;;  %13712 = vmatmul.mubr.msk.bf16.vlgmr.msra.gmra.mrb[160].mxu0 %vm22073_vm11, %v19224_v30  ;;  %vm22074_vm7 = vmmov %vm22073_vm11  ;;  %v8626_v10 = vadd.f32 %v8594_v29, %v19209_v24  ;;  %v8629_v57 = vadd.f32 %v8551_v39, %v19250_v63  ;;  %v19616_v24 = vsel %vm22072_vm3, %v9127_v5, %v9128_v12 }
 0x498   : > { %13746 = vmatmul.mubr.msk.bf16.vlgmr.msra.gmra.mrb[160].mxu1 %vm22074_vm7, %v19224_v30  ;;  %vm22075_vm2 = vmmov %vm22071_vm15 }
 0x499   : > { %v8552_v25 = vsel %vm22075_vm2, %v8532_v56, %v8533_v8  ;;  %vm22076_vm14 = vmmov %vm22075_vm2  ;;  %13749 = vmatprep.mubr.msk.bf16.mxu1 %vm22074_vm7, %v19237_v53  ;;  %v8665_v63 = vadd.f32 %v19342_v58, %v8626_v10  ;;  %v9132_v8 = vrot.slane %v13499_v19, 7 }
 0x49a   : > { %v8553_v59 = vsel %vm22076_vm14, %v8531_v17, %v8532_v56  ;;  %vm22077_vm15 = vmmov %vm22074_vm7  ;;  %v8628_v60 = vadd.f32 %v8552_v25, %v19248_v44  ;;  %v8668_v17 = vadd.f32 %v19342_v58, %v8629_v57  ;;  %vm22079_vm14 = vcmask 523264   ;;  %v13500_v56 = vpop.f32.mrb[122].mxu1 }
 0x49b   : > { %13715 = vmatprep.mubr.msk.bf16.mxu0 %vm22077_vm15, %v19237_v53  ;;  %v8627_v34 = vadd.f32 %v8553_v59, %v19239_v46  ;;  %vm22078_vm11 = vmmov %vm22072_vm3  ;;  %v13465_v46 = vpop.f32.mrb[56].mxu0  ;;  %8697 = vst.msk [vmem:[%s16379_s14 + $0x298] sm:$0xff] %vm22079_vm14, %v8665_v63  ;;  %v9133_v39 = vrot.slane %v13500_v56, 7  ;;  %v8913_v57 = vpop.f32.mrb[123].mxu1  ;;  %vm22084_vm7 = vcmp.lt.s32.totalorder %v15063_v21, 1 }
 0x49c   : > { %v19620_v30 = vsel %vm22078_vm11, %v9126_v23, %v9127_v5  ;;  %v8667_v12 = vadd.f32 %v19342_v58, %v8628_v60  ;;  %v8320_v45 = vpop.f32.mrb[57].mxu0  ;;  %vm22080_vm2 = vmmov %vm22079_vm14  ;;  %v9130_v23 = vrot.slane %v8910_v35, 7  ;;  %v8537_v5 = vrot.slane %v13465_v46, 1 }
 0x49d   : > { %v8666_v44 = vadd.f32 %v19342_v58, %v8627_v34  ;;  %8700 = vst.msk [vmem:[%s16379_s14 + $0x2b0] sm:$0xff] %vm22080_vm2, %v8668_v17  ;;  %v8535_v53 = vrot.slane %v8320_v45, 1  ;;  %v13466_v41 = vpop.f32.mrb[58].mxu0  ;;  %vm22081_vm15 = vmmov %vm22080_vm2  ;;  %vm22083_vm11 = vcmp.lt.s32.totalorder %v15063_v21, 7  ;;  %v9131_v60 = vrot.slane %v8913_v57, 7 }
 0x49e   : > { %vm22082_vm3 = vmmov %vm22080_vm2  ;;  %v8538_v29 = vrot.slane %v13466_v41, 1  ;;  %v8323_v10 = vpop.f32.mrb[59].mxu0  ;;  %v19640_v59 = vsel %vm22084_vm7, %v9129_v3, %v9130_v23  ;;  %vm22085_vm14 = vnez %v21886_v16 }
 0x49f   : > { %8698 = vst.msk [vmem:[%s16379_s14 + $0x2a0] sm:$0xff] %vm22081_vm15, %v8666_v44  ;;  %v8550_v25 = vsel %vm22083_vm11, %v8534_v48, %v8535_v53  ;;  %v8536_v34 = vrot.slane %v8323_v10, 1  ;;  %vm22086_vm2 = vmmov %vm22083_vm11 }
 0x4a0   : > { %8699 = vst.msk [vmem:[%s16379_s14 + $0x2a8] sm:$0xff] %vm22082_vm3, %v8667_v12  ;;  %v8598_v63 = vsel %vm22085_vm14, %v8550_v25, 0.0  ;;  %v8547_v17 = vsel %vm22086_vm2, %v8537_v5, %v8538_v29  ;;  %vm22087_vm15 = vmmov %vm22084_vm7  ;;  %vm22088_vm3 = vcmask 23552  }
 0x4a1   : > { %v19648_v46 = vsel %vm22087_vm15, %v9132_v8, %v9133_v39  ;;  %13716 = vmatmul.mubr.msk.bf16.gmra.mrb[164].mxu0 %vm22088_vm3, %v19258_v43  ;;  %vm22089_vm11 = vmmov %vm22088_vm3  ;;  %v8630_v48 = vadd.f32 %v8598_v63, %v19241_v38  ;;  %v8633_v3 = vadd.f32 %v8547_v17, %v19284_v28  ;;  %v19666_v38 = vsel %vm22087_vm15, %v9131_v60, %v9132_v8 }
 0x4a2   : > { %13750 = vmatmul.mubr.msk.bf16.gmra.mrb[164].mxu1 %vm22089_vm11, %v19258_v43  ;;  %vm22090_vm7 = vmmov %vm22086_vm2 }
 0x4a3   : > { %v8548_v19 = vsel %vm22090_vm7, %v8536_v34, %v8537_v5  ;;  %vm22091_vm14 = vmmov %vm22086_vm2  ;;  %v8669_v28 = vadd.f32 %v19342_v58, %v8630_v48  ;;  %v8672_v35 = vadd.f32 %v19342_v58, %v8633_v3 }
 0x4a4   : > { %v8549_v44 = vsel %vm22091_vm14, %v8535_v53, %v8536_v34  ;;  %vm22092_vm2 = vmmov %vm22088_vm3  ;;  %v8632_v45 = vadd.f32 %v8548_v19, %v19282_v9  ;;  %v13503_v53 = vpop.f32.mrb[124].mxu1  ;;  %vm22095_vm14 = vcmask 523264  }
 0x4a5   : > { %13719 = vmatprep.mubr.msk.bf16.mxu0 %vm22092_vm2, %v19264_v61  ;;  %v8631_v12 = vadd.f32 %v8549_v44, %v19273_v18  ;;  %vm22093_vm3 = vmmov %vm22087_vm15  ;;  %v13469_v18 = vpop.f32.mrb[60].mxu0  ;;  %v8926_v56 = vpop.f32.mrb[125].mxu1  ;;  %8701 = vst.msk [vmem:[%s16379_s14 + $0x2b8] sm:$0xff] %vm22095_vm14, %v8669_v28 }
 0x4a6   : > { %v19670_v43 = vsel %vm22093_vm3, %v9130_v23, %v9131_v60  ;;  %vm22094_vm11 = vmmov %vm22092_vm2  ;;  %v8671_v8 = vadd.f32 %v19342_v58, %v8632_v45  ;;  %v8336_v41 = vpop.f32.mrb[61].mxu0  ;;  %v9136_v23 = vrot.slane %v13503_v53, 7  ;;  %v9134_v5 = vrot.slane %v8926_v56, 7  ;;  %v13504_v57 = vpop.f32.mrb[126].mxu1  ;;  %v22107_v53 = vld [vmem:[#allocation34_spill] sm:$0xff] }
 0x4a7   : > { %13753 = vmatprep.mubr.msk.bf16.mxu1 %vm22094_vm11, %v19264_v61  ;;  %v8670_v9 = vadd.f32 %v19342_v58, %v8631_v12  ;;  %vm22096_vm7 = vmmov %vm22095_vm14  ;;  %v8539_v61 = vrot.slane %v8336_v41, 1  ;;  %v13470_v10 = vpop.f32.mrb[62].mxu0  ;;  %v8541_v25 = vrot.slane %v13469_v18, 1  ;;  %v9137_v60 = vrot.slane %v13504_v57, 7  ;;  %v8929_v17 = vpop.f32.mrb[127].mxu1 }
 0x4a8   : > { %8704 = vst.msk [vmem:[%s16379_s14 + $0x2d0] sm:$0xff] %vm22096_vm7, %v8672_v35  ;;  %vm22097_vm2 = vmmov %vm22096_vm7  ;;  %v8542_v34 = vrot.slane %v13470_v10, 1  ;;  %v8339_v63 = vpop.f32.mrb[63].mxu0  ;;  %vm22099_vm3 = vcmp.lt.s32.totalorder %v15063_v21, 7  ;;  %vm22100_vm11 = vcmp.lt.s32.totalorder %v15063_v21, 1  ;;  %v22102_v45 = vrot.slane %v19327_v42, 1 }
 0x4a9   : > { %8702 = vst.msk [vmem:[%s16379_s14 + $0x2c0] sm:$0xff] %vm22097_vm2, %v8670_v9  ;;  %vm22098_vm15 = vmmov %vm22097_vm2  ;;  %v8546_v48 = vsel %vm22099_vm3, %v8538_v29, %v8539_v61  ;;  %v19690_v3 = vsel %vm22100_vm11, %v9133_v39, %v9134_v5  ;;  %v8540_v19 = vrot.slane %v8339_v63, 1  ;;  %v9135_v35 = vrot.slane %v8929_v17, 7  ;;  %v13509_v17 = vpop.f32.mrb[64].mxu0 }
 0x4aa   : > { %8703 = vst.msk [vmem:[%s16379_s14 + $0x2c8] sm:$0xff] %vm22098_vm15, %v8671_v8  ;;  %v8602_v44 = vsel %vm21895_vm1, %v8546_v48, 0.0  ;;  %vm22101_vm14 = vmmov %vm22099_vm3  ;;  %vm22104_vm2 = vcmask 23552   ;;  %v19710_v42 = vsel %vm22100_vm11, %v9136_v23, %v9137_v60 }
 0x4ab   : > { %v8543_v12 = vsel %vm22101_vm14, %v8541_v25, %v8542_v34  ;;  %vm22103_vm7 = vmmov %vm22099_vm3  ;;  %13720 = vmatmul.mubr.msk.bf16.gmra.mrb[168].mxu0 %vm22104_vm2, %v19290_v13  ;;  %v8634_v29 = vadd.f32 %v8602_v44, %v19275_v1  ;;  %vm22106_vm3 = vnez %v21902_v62  ;;  %v22111_v1 = vld [vmem:[#allocation18_spill] sm:$0xff]  ;;  %v22117_v44 = vld [vmem:[#allocation36_spill] sm:$0xff] }
 0x4ac   : > { %v8574_v28 = vsel %vm22103_vm7, %v8542_v34, %v22102_v45  ;;  %vm22105_vm15 = vmmov %vm22104_vm2  ;;  %v8637_v18 = vadd.f32 %v8543_v12, %v19323_v37  ;;  %v22112_v8 = vrot.slane %v22111_v1, 7  ;;  %v22116_v34 = vld [vmem:[#allocation37_spill] sm:$0xff] }
 0x4ad   : > { %13754 = vmatmul.mubr.msk.bf16.gmra.mrb[168].mxu1 %vm22105_vm15, %v19290_v13  ;;  %v8606_v39 = vsel %vm22106_vm3, %v8574_v28, 0.0  ;;  %vm22108_vm14 = vmmov %vm22104_vm2  ;;  %v22110_v13 = vld [vmem:[#allocation33_spill] sm:$0xff]  ;;  %vm22114_vm15 = vcmp.lt.s32.totalorder %v15063_v21, 7  ;;  %v8673_v10 = vadd.f32 %v19342_v58, %v8634_v29  ;;  %v9368_v29 = vrot.slane %v13509_v17, 1 }
 0x4ae   : > { %13723 = vmatprep.mubr.msk.bf16.mxu0 %vm22108_vm14, %v22107_v53  ;;  %vm22109_vm7 = vmmov %vm22104_vm2  ;;  %v8638_v9 = vadd.f32 %v8606_v39, %v22110_v13  ;;  %v8544_v37 = vsel %vm22114_vm15, %v8540_v19, %v8541_v25  ;;  %v8676_v57 = vadd.f32 %v19342_v58, %v8637_v18  ;;  %v19738_v25 = vpop.f32.mrb[65].mxu0 }
 0x4af   : > { %13757 = vmatprep.mubr.msk.bf16.mxu1 %vm22109_vm7, %v22107_v53  ;;  %vm22113_vm2 = vmmov %vm22100_vm11  ;;  %v8636_v12 = vadd.f32 %v8544_v37, %v22117_v44  ;;  %v13510_v45 = vpop.f32.mrb[66].mxu0  ;;  %v22126_v53 = vld [vmem:[#allocation14_spill] sm:$0xff] }
 0x4b0   : > { %v9169_v41 = vsel %vm22113_vm2, %v9137_v60, %v22112_v8  ;;  %vm22115_vm11 = vmmov %vm22114_vm15  ;;  %v8677_v48 = vadd.f32 %v19342_v58, %v8638_v9  ;;  %v8982_v39 = vpop.f32.mrb[67].mxu0  ;;  %v22130_v9 = vld [vmem:[#allocation27_spill] sm:$0xff] }
 0x4b1   : > { %v8545_v56 = vsel %vm22115_vm11, %v8539_v61, %v8540_v19  ;;  %vm22118_vm14 = vmmov %vm22113_vm2  ;;  %v8675_v28 = vadd.f32 %v19342_v58, %v8636_v12  ;;  %v9170_v13 = vsel %vm21740_vm0, %v9169_v41, 0.0  ;;  %v22136_v41 = vld [vmem:[#allocation12_spill] sm:$0xff] }
 0x4b2   : > { %v8635_v63 = vadd.f32 %v8545_v56, %v22116_v34  ;;  %v19732_v60 = vsel %vm22118_vm14, %v9135_v35, %v9136_v23  ;;  %vm22119_vm7 = vmmov %vm22113_vm2  ;;  %vm22120_vm2 = vcmask 523264   ;;  %v9369_v23 = vrot.slane %v13510_v45, 1  ;;  %v22133_v56 = vld [vmem:[#allocation25_spill] sm:$0xff]  ;;  %v13513_v34 = vpop.f32.mrb[68].mxu0 }
 0x4b3   : > { %v19736_v61 = vsel %vm22119_vm7, %v9134_v5, %v9135_v35  ;;  %8705 = vst.msk [vmem:[%s16379_s14 + $0x2d8] sm:$0xff] %vm22120_vm2, %v8673_v10  ;;  %vm22121_vm15 = vmmov %vm22120_vm2  ;;  %v20816_v5 = vrot.slane %v19738_v25, 1  ;;  %v9367_v35 = vrot.slane %v8982_v39, 1  ;;  %v9372_v44 = vrot.slane %v13513_v34, 1 }
 0x4b4   : > { %8708 = vst.msk [vmem:[%s16379_s14 + $0x2f0] sm:$0xff] %vm22121_vm15, %v8676_v57  ;;  %v8674_v19 = vadd.f32 %v19342_v58, %v8635_v63  ;;  %vm22122_vm11 = vmmov %vm22120_vm2  ;;  %vm22127_vm15 = vcmask 23552   ;;  %v8995_v63 = vpop.f32.mrb[69].mxu0  ;;  %v9174_v39 = vsel %vm15115_vm6, %v19387_v7, 0.0 }
 0x4b5   : > { %8709 = vst.msk [vmem:[%s16379_s14 + $0x2f8] sm:$0xff] %vm22122_vm11, %v8677_v48  ;;  %vm22123_vm14 = vmmov %vm22120_vm2  ;;  %13724 = vmatmul.mubr.msk.bf16.gmra.mrb[172].mxu0 %vm22127_vm15, %v22126_v53  ;;  %v9370_v17 = vrot.slane %v8995_v63, 1  ;;  %v13514_v48 = vpop.f32.mrb[70].mxu0 }
 0x4b6   : > { %8706 = vst.msk [vmem:[%s16379_s14 + $0x2e0] sm:$0xff] %vm22123_vm14, %v8674_v19  ;;  %vm22124_vm7 = vmmov %vm22120_vm2  ;;  %vm22125_vm2 = vcmp.lt.s32.totalorder %v15063_v21, 7  ;;  %v9373_v12 = vrot.slane %v13514_v48, 1  ;;  %v8998_v19 = vpop.f32.mrb[71].mxu0 }
 0x4b7   : > { %8707 = vst.msk [vmem:[%s16379_s14 + $0x2e8] sm:$0xff] %vm22124_vm7, %v8675_v28  ;;  %v9426_v18 = vsel %vm22125_vm2, %v9368_v29, %v9369_v23  ;;  %vm22128_vm11 = vmmov %vm22127_vm15  ;;  %v9371_v28 = vrot.slane %v8998_v19, 1 }
 0x4b8   : > { %13758 = vmatmul.mubr.msk.bf16.gmra.mrb[172].mxu1 %vm22128_vm11, %v22126_v53  ;;  %v19762_v1 = vadd.f32 %v9426_v18, %v22130_v9  ;;  %vm22131_vm14 = vmmov %vm22125_vm2  ;;  %v22141_v53 = vld [vmem:[#allocation26_spill] sm:$0xff] }
 0x4b9   : > { %v9427_v8 = vsel %vm22131_vm14, %v9367_v35, %v9368_v29  ;;  %vm22132_vm7 = vmmov %vm22125_vm2 }
 0x4ba   : > { %v9428_v37 = vsel %vm22132_vm7, %v20816_v5, %v9367_v35  ;;  %vm22134_vm2 = vmmov %vm22128_vm11  ;;  %v19777_v57 = vadd.f32 %v9427_v8, %v22136_v41  ;;  %v22143_v8 = vld [vmem:[#allocation30_spill] sm:$0xff] }
 0x4bb   : > { %13727 = vmatprep.mubr.msk.bf16.mxu0 %vm22134_vm2, %v22133_v56  ;;  %vm22135_vm15 = vmmov %vm22134_vm2  ;;  %v19774_v10 = vadd.f32 %v9428_v37, %v9170_v13 }
 0x4bc   : > { %13761 = vmatprep.mubr.msk.bf16.mxu1 %vm22135_vm15, %v22133_v56  ;;  %vm22137_vm11 = vmmov %vm22132_vm7  ;;  %v22145_v56 = vld [vmem:[#allocation31_spill] sm:$0xff] }
 0x4bd   : > { %v9425_v45 = vsel %vm22137_vm11, %v9369_v23, %v9370_v17  ;;  %vm22139_vm14 = vmmov %vm22132_vm7  ;;  %v9424_v9 = vsel %vm22137_vm11, %v9370_v17, %v9371_v28 }
 0x4be   : > { %v9433_v35 = vsel %vm15111_vm5, %v9425_v45, 0.0  ;;  %v9422_v18 = vsel %vm22139_vm14, %v9372_v44, %v9373_v12  ;;  %vm22140_vm7 = vmmov %vm22134_vm2  ;;  %v19804_v37 = vadd.f32 %v9424_v9, %v9174_v39  ;;  %v9178_v39 = vsel %vm15163_vm8, %v19439_v40, 0.0 }
 0x4bf   : > { %13728 = vmatmul.mubr.msk.bf16.gmra.mrb[176].mxu0 %vm22140_vm7, %v19377_v51  ;;  %v19793_v13 = vadd.f32 %v9433_v35, %v22141_v53  ;;  %v19796_v23 = vadd.f32 %v9422_v18, %v19413_v14  ;;  %vm22142_vm15 = vmmov %vm22137_vm11  ;;  %v22152_v53 = vld [vmem:[#allocation20_spill] sm:$0xff] }
 0x4c0   : > { %13762 = vmatmul.mubr.msk.bf16.gmra.mrb[176].mxu1 %vm22134_vm2, %v19377_v51  ;;  %v9423_v7 = vsel %vm22142_vm15, %v9371_v28, %v9372_v44  ;;  %vm22144_vm14 = vmmov %vm22134_vm2  ;;  %v13517_v51 = vpop.f32.mrb[72].mxu0 }
 0x4c1   : > { %13731 = vmatprep.mubr.msk.bf16.mxu0 %vm22144_vm14, %v22143_v8  ;;  %v19807_v41 = vadd.f32 %v9423_v7, %v22145_v56  ;;  %vm22146_vm7 = vmmov %vm22134_vm2  ;;  %v9011_v14 = vpop.f32.mrb[73].mxu0  ;;  %v9376_v48 = vrot.slane %v13517_v51, 1 }
 0x4c2   : > { %13765 = vmatprep.mubr.msk.bf16.mxu1 %vm22146_vm7, %v22143_v8  ;;  %v9374_v34 = vrot.slane %v9011_v14, 1  ;;  %v13518_v63 = vpop.f32.mrb[74].mxu0  ;;  %vm22147_vm2 = vmmov %vm22137_vm11  ;;  %v14595_v8 = vld [vmem:[#allocation2 + $0x200] sm:$0xff] }
 0x4c3   : > { %v9377_v44 = vrot.slane %v13518_v63, 1  ;;  %v9014_v19 = vpop.f32.mrb[75].mxu0  ;;  %vm22149_vm15 = vmmov %vm22147_vm2 }
 0x4c4   : > { %v9421_v17 = vsel %vm22147_vm2, %v9373_v12, %v9374_v34  ;;  %v9375_v45 = vrot.slane %v9014_v19, 1  ;;  %vm22150_vm11 = vmmov %vm22146_vm7 }
 0x4c5   : > { %v9437_v35 = vsel %vm22021_vm13, %v9421_v17, 0.0  ;;  %v9418_v18 = vsel %vm22149_vm15, %v9376_v48, %v9377_v44  ;;  %vm22151_vm14 = vmmov %vm22146_vm7 }
 0x4c6   : > { %v19825_v7 = vadd.f32 %v9437_v35, %v22152_v53  ;;  %v19828_v12 = vadd.f32 %v9418_v18, %v19463_v32  ;;  %vm22153_vm7 = vmmov %vm22147_vm2  ;;  %v9420_v9 = vsel %vm22147_vm2, %v9374_v34, %v9375_v45  ;;  %v14596_v53 = vld [vmem:[#allocation2 + $0x208] sm:$0xff] }
 0x4c7   : > { %13732 = vmatmul.mubr.msk.bf16.gmra.mrb[180].mxu0 %vm22150_vm11, %v19429_v2  ;;  %v9419_v40 = vsel %vm22153_vm7, %v9375_v45, %v9376_v48  ;;  %vm22154_vm15 = vmmov %vm22150_vm11  ;;  %v19835_v56 = vadd.f32 %v9420_v9, %v9178_v39  ;;  %v9182_v39 = vsel %vm15212_vm10, %v19487_v49, 0.0 }
 0x4c8   : > { %13766 = vmatmul.mubr.msk.bf16.gmra.mrb[180].mxu1 %vm22151_vm14, %v19429_v2  ;;  %13735 = vmatprep.mubr.msk.bf16.mxu0 %vm22154_vm15, %v14595_v8  ;;  %v19838_v51 = vadd.f32 %v9419_v40, %v19467_v31  ;;  %v13521_v2 = vpop.f32.mrb[76].mxu0  ;;  %vm22155_vm14 = vmmov %vm22147_vm2  ;;  %v22160_v40 = vld [vmem:[#allocation29_spill] sm:$0xff] }
 0x4c9   : > { %13769 = vmatprep.mubr.msk.bf16.mxu1 %vm22150_vm11, %v14595_v8  ;;  %v9027_v14 = vpop.f32.mrb[77].mxu0  ;;  %v9380_v19 = vrot.slane %v13521_v2, 1  ;;  %vm22157_vm7 = vmmov %vm22147_vm2 }
 0x4ca   : > { %v9378_v32 = vrot.slane %v9027_v14, 1  ;;  %v13522_v63 = vpop.f32.mrb[78].mxu0  ;;  %vm22158_vm2 = vmmov %vm22150_vm11 }
 0x4cb   : > { %v9381_v17 = vrot.slane %v13522_v63, 1  ;;  %v9030_v48 = vpop.f32.mrb[79].mxu0  ;;  %vm22159_vm15 = vmmov %vm22158_vm2 }
 0x4cc   : > { %v9417_v34 = vsel %vm22155_vm14, %v9377_v44, %v9378_v32  ;;  %v9379_v45 = vrot.slane %v9030_v48, 1  ;;  %vm22161_vm11 = vmmov %vm22157_vm7  ;;  %v13525_v63 = vpop.f32.mrb[80].mxu0 }
 0x4cd   : > { %v9441_v31 = vsel %vm22038_vm4, %v9417_v34, 0.0  ;;  %v9414_v18 = vsel %vm22157_vm7, %v9380_v19, %v9381_v17  ;;  %vm22162_vm14 = vmmov %vm22157_vm7 }
 0x4ce   : > { %v19853_v9 = vadd.f32 %v9441_v31, %v22160_v40  ;;  %v19856_v44 = vadd.f32 %v9414_v18, %v19514_v0  ;;  %v9415_v49 = vsel %vm22161_vm11, %v9379_v45, %v9380_v19  ;;  %v9416_v8 = vsel %vm22162_vm14, %v9378_v32, %v9379_v45  ;;  %vm22163_vm4 = vmmov %vm22158_vm2  ;;  %v9043_v0 = vpop.f32.mrb[81].mxu0  ;;  %v22170_v40 = vld [vmem:[#allocation28_spill] sm:$0xff] }
 0x4cf   : > { %13736 = vmatmul.mubr.msk.bf16.gmra.mrb[184].mxu0 %vm22158_vm2, %v14596_v53  ;;  %v19864_v2 = vadd.f32 %v9416_v8, %v9182_v39  ;;  %v19867_v14 = vadd.f32 %v9415_v49, %v19518_v36  ;;  %vm22164_vm7 = vmmov %vm22158_vm2  ;;  %v9382_v48 = vrot.slane %v9043_v0, 1  ;;  %v13526_v34 = vpop.f32.mrb[82].mxu0  ;;  %v9384_v31 = vrot.slane %v13525_v63, 1 }
 0x4d0   : > { %13770 = vmatmul.mubr.msk.bf16.gmra.mrb[184].mxu1 %vm22159_vm15, %v14596_v53  ;;  %13739 = vmatprep.mubr.msk.bf16.mxu0 %vm22163_vm4, %v19489_v15  ;;  %v9385_v19 = vrot.slane %v13526_v34, 1  ;;  %v9046_v18 = vpop.f32.mrb[83].mxu0  ;;  %vm22165_vm2 = vmmov %vm22161_vm11  ;;  %v9186_v53 = vsel %vm15261_vm12, %v19540_v27, 0.0 }
 0x4d1   : > { %13773 = vmatprep.mubr.msk.bf16.mxu1 %vm22164_vm7, %v19489_v15  ;;  %v9413_v32 = vsel %vm22165_vm2, %v9381_v17, %v9382_v48  ;;  %v9383_v45 = vrot.slane %v9046_v18, 1  ;;  %vm22167_vm4 = vmmov %vm22165_vm2  ;;  %v13529_v34 = vpop.f32.mrb[84].mxu0 }
 0x4d2   : > { %v9445_v36 = vsel %vm22055_vm9, %v9413_v32, 0.0  ;;  %v9410_v15 = vsel %vm22167_vm4, %v9384_v31, %v9385_v19  ;;  %vm22168_vm15 = vmmov %vm22164_vm7  ;;  %v9059_v18 = vpop.f32.mrb[85].mxu0 }
 0x4d3   : > { %vm22169_vm11 = vmmov %vm22164_vm7  ;;  %v19885_v49 = vadd.f32 %v9445_v36, %v22170_v40  ;;  %v19888_v17 = vadd.f32 %v9410_v15, %v19566_v22  ;;  %v13530_v32 = vpop.f32.mrb[86].mxu0  ;;  %v9388_v36 = vrot.slane %v13529_v34, 1 }
 0x4d4   : > { %vm22171_vm14 = vmmov %vm22165_vm2  ;;  %v9389_v40 = vrot.slane %v13530_v32, 1  ;;  %v9062_v5 = vpop.f32.mrb[87].mxu0 }
 0x4d5   : > { %v9411_v27 = vsel %vm22171_vm14, %v9383_v45, %v9384_v31  ;;  %vm22172_vm7 = vmmov %vm22165_vm2  ;;  %v9387_v15 = vrot.slane %v9062_v5, 1  ;;  %v22173_v31 = vld [vmem:[#allocation13_spill] sm:$0xff]  ;;  %v13533_v34 = vpop.f32.mrb[88].mxu0 }
 0x4d6   : > { %v9412_v8 = vsel %vm22172_vm7, %v9382_v48, %v9383_v45  ;;  %v19897_v0 = vadd.f32 %v9411_v27, %v19570_v47  ;;  %vm22174_vm4 = vnez %v22173_v31  ;;  %vm22177_vm14 = vmmov %vm22165_vm2 }
 0x4d7   : > { %13740 = vmatmul.mubr.msk.bf16.gmra.mrb[188].mxu0 %vm22168_vm15, %v19530_v55  ;;  %v19894_v63 = vadd.f32 %v9412_v8, %v9186_v53  ;;  %v9190_v48 = vsel %vm22174_vm4, %v19590_v6, 0.0  ;;  %vm22175_vm15 = vnez %v21877_v26  ;;  %vm22178_vm7 = vmmov %vm22165_vm2 }
 0x4d8   : > { %13774 = vmatmul.mubr.msk.bf16.gmra.mrb[188].mxu1 %vm22169_vm11, %v19530_v55  ;;  %v9386_v55 = vrot.slane %v9059_v18, 1  ;;  %vm22176_vm11 = vmmov %vm22165_vm2  ;;  %v9075_v18 = vpop.f32.mrb[89].mxu0 }
 0x4d9   : > { %v9406_v47 = vsel %vm22176_vm11, %v9388_v36, %v9389_v40  ;;  %v9390_v32 = vrot.slane %v9075_v18, 1 }
 0x4da   : > { %v9409_v22 = vsel %vm22165_vm2, %v9385_v19, %v9386_v55  ;;  %v19912_v27 = vadd.f32 %v9406_v47, %v19616_v24  ;;  %v9407_v19 = vsel %vm22177_vm14, %v9387_v15, %v9388_v36  ;;  %v9408_v5 = vsel %vm22178_vm7, %v9386_v55, %v9387_v15  ;;  %v22179_v36 = vld [vmem:[#allocation17_spill] sm:$0xff]  ;;  %vm22182_vm7 = vmmov %vm22165_vm2 }
 0x4db   : > { %v9449_v45 = vsel %vm22175_vm15, %v9409_v22, 0.0  ;;  %v19918_v8 = vadd.f32 %v9408_v5, %v9190_v48  ;;  %v19921_v6 = vadd.f32 %v9407_v19, %v19620_v30  ;;  %v13534_v22 = vpop.f32.mrb[90].mxu0  ;;  %v9405_v24 = vsel %vm22165_vm2, %v9389_v40, %v9390_v32  ;;  %vm22183_vm15 = vmmov %vm22165_vm2 }
 0x4dc   : > { %v19909_v53 = vadd.f32 %v9449_v45, %v19548_v33  ;;  %v9392_v33 = vrot.slane %v13533_v34, 1  ;;  %v9393_v45 = vrot.slane %v13534_v22, 1  ;;  %v9078_v26 = vpop.f32.mrb[91].mxu0  ;;  %vm22180_vm11 = vnez %v22179_v36 }
 0x4dd   : > { %v9391_v47 = vrot.slane %v9078_v26, 1  ;;  %v9194_v55 = vsel %vm22180_vm11, %v19640_v59, 0.0  ;;  %vm22181_vm14 = vnez %v21886_v16  ;;  %v13537_v34 = vpop.f32.mrb[92].mxu0 }
 0x4de   : > { %v9453_v15 = vsel %vm22181_vm14, %v9405_v24, 0.0  ;;  %v9402_v30 = vsel %vm22182_vm7, %v9392_v33, %v9393_v45  ;;  %v9091_v18 = vpop.f32.mrb[93].mxu0  ;;  %vm22184_vm7 = vmmov %vm22165_vm2 }
 0x4df   : > { %v19933_v48 = vadd.f32 %v9453_v15, %v19598_v50  ;;  %v19936_v19 = vadd.f32 %v9402_v30, %v19666_v38  ;;  %v9403_v40 = vsel %vm22183_vm15, %v9391_v47, %v9392_v33  ;;  %v9404_v26 = vsel %vm22165_vm2, %v9390_v32, %v9391_v47  ;;  %v13538_v24 = vpop.f32.mrb[94].mxu0  ;;  %vm22185_vm15 = vmmov %vm22165_vm2 }
 0x4e0   : > { %v19942_v5 = vadd.f32 %v9404_v26, %v9194_v55  ;;  %v19945_v59 = vadd.f32 %v9403_v40, %v19670_v43  ;;  %v9394_v22 = vrot.slane %v9091_v18, 1  ;;  %v9396_v50 = vrot.slane %v13537_v34, 1  ;;  %v9094_v16 = vpop.f32.mrb[95].mxu0  ;;  %v22188_v26 = vld [vmem:[#allocation22_spill] sm:$0xff] }
 0x4e1   : > { %v9397_v15 = vrot.slane %v13538_v24, 1  ;;  %v9395_v30 = vrot.slane %v9094_v16, 1  ;;  %v22186_v43 = vrot.slane %v19738_v25, 1 }
 0x4e2   : > { %v9401_v38 = vsel %vm22184_vm7, %v9393_v45, %v9394_v22  ;;  %vm22187_vm7 = vmmov %vm22165_vm2 }
 0x4e3   : > { %v9457_v33 = vsel %vm21895_vm1, %v9401_v38, 0.0  ;;  %v9398_v32 = vsel %vm22185_vm15, %v9396_v50, %v9397_v15  ;;  %v9429_v47 = vsel %vm22165_vm2, %v9397_v15, %v22186_v43  ;;  %v9399_v16 = vsel %vm22187_vm7, %v9395_v30, %v9396_v50  ;;  %vm22190_vm1 = vmmov %vm22165_vm2 }
 0x4e4   : > { %v19958_v55 = vadd.f32 %v9457_v33, %v19648_v46  ;;  %v9461_v40 = vsel %vm22106_vm3, %v9429_v47, 0.0  ;;  %v19963_v45 = vadd.f32 %v9398_v32, %v19732_v60  ;;  %vm22189_vm15 = vnez %v22188_v26  ;;  %v13611_v60 = vpop.f32.mrb[96].mxu0 }
 0x4e5   : > { %v9198_v34 = vsel %vm22189_vm15, %v19690_v3, 0.0  ;;  %v9400_v25 = vsel %vm22190_vm1, %v9394_v22, %v9395_v30  ;;  %v19973_v18 = vadd.f32 %v9399_v16, %v19736_v61  ;;  %v19976_v46 = vadd.f32 %v9461_v40, %v19710_v42  ;;  %v19980_v15 = vpop.f32.mrb[97].mxu0 }
 0x4e6   : > { %v19978_v24 = vadd.f32 %v9400_v25, %v9198_v34  ;;  %v13612_v38 = vpop.f32.mrb[98].mxu0  ;;  %v10088_v50 = vrot.slane %v13611_v60, 7  ;;  %v20821_v3 = vrot.slane %v19980_v15, 7  ;;  %vm22191_vm1 = vcmp.lt.s32.totalorder %v15063_v21, 1 }
 0x4e7   : > { %v10089_v33 = vrot.slane %v13612_v38, 7  ;;  %v9765_v32 = vpop.f32.mrb[99].mxu0  ;;  %vm22192_vm2 = vmmov %vm22191_vm1 }
 0x4e8   : > { %v10087_v43 = vrot.slane %v9765_v32, 7  ;;  %vm22193_vm7 = vmmov %vm22191_vm1 }
 0x4e9   : > { %v10146_v22 = vsel %vm22191_vm1, %v10088_v50, %v10089_v33  ;;  %v13615_v16 = vpop.f32.mrb[100].mxu0  ;;  %vm22196_vm3 = vmmov %vm22191_vm1 }
 0x4ea   : > { %v19986_v61 = vadd.f32 %v19793_v13, %v10146_v22  ;;  %v10147_v42 = vsel %vm22192_vm2, %v10087_v43, %v10088_v50  ;;  %v10148_v30 = vsel %vm22193_vm7, %v20821_v3, %v10087_v43  ;;  %v9778_v34 = vpop.f32.mrb[101].mxu0  ;;  %v10092_v13 = vrot.slane %v13615_v16, 7  ;;  %vm22194_vm2 = vmmov %vm22191_vm1 }
 0x4eb   : > { %v19995_v47 = vadd.f32 %v19762_v1, %v10147_v42  ;;  %v19998_v40 = vadd.f32 %v19777_v57, %v10148_v30  ;;  %v10090_v25 = vrot.slane %v9778_v34, 7  ;;  %v13616_v60 = vpop.f32.mrb[102].mxu0  ;;  %vm22195_vm7 = vmmov %vm22191_vm1 }
 0x4ec   : > { %v10093_v38 = vrot.slane %v13616_v60, 7  ;;  %v9781_v32 = vpop.f32.mrb[103].mxu0 }
 0x4ed   : > { %v10145_v50 = vsel %vm22191_vm1, %v10089_v33, %v10090_v25  ;;  %v10091_v22 = vrot.slane %v9781_v32, 7 }
 0x4ee   : > { %v10154_v43 = vsel %vm15115_vm6, %v10145_v50, 0.0  ;;  %v10142_v1 = vsel %vm22194_vm2, %v10092_v13, %v10093_v38  ;;  %vm22198_vm2 = vmmov %vm22191_vm1 }
 0x4ef   : > { %v20007_v57 = vadd.f32 %v19804_v37, %v10154_v43  ;;  %v20010_v42 = vadd.f32 %v19825_v7, %v10142_v1  ;;  %v10143_v30 = vsel %vm22195_vm7, %v10091_v22, %v10092_v13  ;;  %v10144_v16 = vsel %vm22196_vm3, %v10090_v25, %v10091_v22  ;;  %vm22197_vm3 = vmmov %vm22191_vm1 }
 0x4f0   : > { %v20017_v33 = vadd.f32 %v19796_v23, %v10143_v30  ;;  %v20020_v34 = vadd.f32 %v19807_v41, %v10144_v16  ;;  %vm22199_vm7 = vmmov %vm22191_vm1 }
 0x4f1   : > { %v13619_v60 = vpop.f32.mrb[104].mxu0 }
 0x4f2   : > { %v9794_v32 = vpop.f32.mrb[105].mxu0  ;;  %v10096_v43 = vrot.slane %v13619_v60, 7 }
 0x4f3   : > { %v10094_v50 = vrot.slane %v9794_v32, 7  ;;  %v13620_v37 = vpop.f32.mrb[106].mxu0 }
 0x4f4   : > { %v10097_v3 = vrot.slane %v13620_v37, 7  ;;  %v9797_v7 = vpop.f32.mrb[107].mxu0 }
 0x4f5   : > { %v10141_v1 = vsel %vm22191_vm1, %v10093_v38, %v10094_v50  ;;  %v10095_v13 = vrot.slane %v9797_v7, 7 }
 0x4f6   : > { %v10158_v25 = vsel %vm15163_vm8, %v10141_v1, 0.0  ;;  %v10138_v23 = vsel %vm22197_vm3, %v10096_v43, %v10097_v3  ;;  %vm22200_vm3 = vmmov %vm22191_vm1 }
 0x4f7   : > { %v20029_v41 = vadd.f32 %v19835_v56, %v10158_v25  ;;  %v20032_v22 = vadd.f32 %v19853_v9, %v10138_v23  ;;  %v10139_v30 = vsel %vm22198_vm2, %v10095_v13, %v10096_v43  ;;  %v10140_v16 = vsel %vm22199_vm7, %v10094_v50, %v10095_v13  ;;  %vm22201_vm2 = vmmov %vm22191_vm1 }
 0x4f8   : > { %v20039_v38 = vadd.f32 %v19828_v12, %v10139_v30  ;;  %v20042_v60 = vadd.f32 %v19838_v51, %v10140_v16  ;;  %vm22202_vm7 = vmmov %vm22191_vm1 }
 0x4f9   : > { %v13623_v32 = vpop.f32.mrb[108].mxu0 }
 0x4fa   : > { %v9810_v37 = vpop.f32.mrb[109].mxu0  ;;  %v10100_v1 = vrot.slane %v13623_v32, 7 }
 0x4fb   : > { %v10098_v7 = vrot.slane %v9810_v37, 7  ;;  %v13624_v56 = vpop.f32.mrb[110].mxu0 }
 0x4fc   : > { %v10101_v25 = vrot.slane %v13624_v56, 7  ;;  %v9813_v9 = vpop.f32.mrb[111].mxu0 }
 0x4fd   : > { %v10137_v23 = vsel %vm22191_vm1, %v10097_v3, %v10098_v7  ;;  %v10099_v43 = vrot.slane %v9813_v9, 7 }
 0x4fe   : > { %v10162_v50 = vsel %vm15212_vm10, %v10137_v23, 0.0  ;;  %v10134_v12 = vsel %vm22200_vm3, %v10100_v1, %v10101_v25  ;;  %vm22203_vm3 = vmmov %vm22191_vm1 }
 0x4ff   : > { %v20051_v51 = vadd.f32 %v19864_v2, %v10162_v50  ;;  %v20054_v13 = vadd.f32 %v19885_v49, %v10134_v12  ;;  %v10135_v30 = vsel %vm22201_vm2, %v10099_v43, %v10100_v1  ;;  %v10136_v16 = vsel %vm22202_vm7, %v10098_v7, %v10099_v43  ;;  %vm22204_vm2 = vmmov %vm22191_vm1 }
 0x500   : > { %v20061_v3 = vadd.f32 %v19856_v44, %v10135_v30  ;;  %v20064_v32 = vadd.f32 %v19867_v14, %v10136_v16  ;;  %vm22205_vm7 = vmmov %vm22191_vm1 }
 0x501   : > { %v13627_v37 = vpop.f32.mrb[112].mxu0 }
 0x502   : > { %v9826_v56 = vpop.f32.mrb[113].mxu0  ;;  %v10104_v23 = vrot.slane %v13627_v37, 7 }
 0x503   : > { %v10102_v9 = vrot.slane %v9826_v56, 7  ;;  %v13628_v2 = vpop.f32.mrb[114].mxu0 }
 0x504   : > { %v10105_v50 = vrot.slane %v13628_v2, 7  ;;  %v9829_v49 = vpop.f32.mrb[115].mxu0 }
 0x505   : > { %v10133_v12 = vsel %vm22191_vm1, %v10101_v25, %v10102_v9  ;;  %v10103_v1 = vrot.slane %v9829_v49, 7 }
 0x506   : > { %v10166_v7 = vsel %vm15261_vm12, %v10133_v12, 0.0  ;;  %v10130_v44 = vsel %vm22203_vm3, %v10104_v23, %v10105_v50  ;;  %vm22206_vm3 = vmmov %vm22191_vm1 }
 0x507   : > { %v20073_v14 = vadd.f32 %v19894_v63, %v10166_v7  ;;  %v20076_v43 = vadd.f32 %v19909_v53, %v10130_v44  ;;  %v10131_v30 = vsel %vm22204_vm2, %v10103_v1, %v10104_v23  ;;  %v10132_v16 = vsel %vm22205_vm7, %v10102_v9, %v10103_v1  ;;  %vm22207_vm2 = vmmov %vm22191_vm1 }
 0x508   : > { %v20083_v25 = vadd.f32 %v19888_v17, %v10131_v30  ;;  %v20086_v37 = vadd.f32 %v19897_v0, %v10132_v16  ;;  %vm22208_vm7 = vmmov %vm22191_vm1 }
 0x509   : > { %v13631_v56 = vpop.f32.mrb[116].mxu0 }
 0x50a   : > { %v9842_v2 = vpop.f32.mrb[117].mxu0  ;;  %v10108_v12 = vrot.slane %v13631_v56, 7 }
 0x50b   : > { %v10106_v49 = vrot.slane %v9842_v2, 7  ;;  %v13632_v63 = vpop.f32.mrb[118].mxu0 }
 0x50c   : > { %v10109_v7 = vrot.slane %v13632_v63, 7  ;;  %v9845_v53 = vpop.f32.mrb[119].mxu0 }
 0x50d   : > { %v10129_v44 = vsel %vm22191_vm1, %v10105_v50, %v10106_v49  ;;  %v10107_v23 = vrot.slane %v9845_v53, 7 }
 0x50e   : > { %v10170_v9 = vsel %vm22174_vm4, %v10129_v44, 0.0  ;;  %v10126_v17 = vsel %vm22206_vm3, %v10108_v12, %v10109_v7  ;;  %vm22209_vm3 = vmmov %vm22191_vm1 }
 0x50f   : > { %v20095_v0 = vadd.f32 %v19918_v8, %v10170_v9  ;;  %v20098_v1 = vadd.f32 %v19933_v48, %v10126_v17  ;;  %v10127_v30 = vsel %vm22207_vm2, %v10107_v23, %v10108_v12  ;;  %v10128_v16 = vsel %vm22208_vm7, %v10106_v49, %v10107_v23  ;;  %vm22210_vm2 = vmmov %vm22191_vm1 }
 0x510   : > { %v20105_v50 = vadd.f32 %v19912_v27, %v10127_v30  ;;  %v20108_v56 = vadd.f32 %v19921_v6, %v10128_v16  ;;  %vm22211_vm7 = vmmov %vm22191_vm1 }
 0x511   : > { %v13635_v2 = vpop.f32.mrb[120].mxu0 }
 0x512   : > { %v9858_v63 = vpop.f32.mrb[121].mxu0  ;;  %v10112_v44 = vrot.slane %v13635_v2, 7 }
 0x513   : > { %v10110_v53 = vrot.slane %v9858_v63, 7  ;;  %v13636_v8 = vpop.f32.mrb[122].mxu0 }
 0x514   : > { %v10113_v9 = vrot.slane %v13636_v8, 7  ;;  %v9861_v48 = vpop.f32.mrb[123].mxu0 }
 0x515   : > { %v10125_v17 = vsel %vm22191_vm1, %v10109_v7, %v10110_v53  ;;  %v10111_v12 = vrot.slane %v9861_v48, 7 }
 0x516   : > { %v10174_v49 = vsel %vm22180_vm11, %v10125_v17, 0.0  ;;  %v10122_v27 = vsel %vm22209_vm3, %v10112_v44, %v10113_v9  ;;  %vm22212_vm3 = vmmov %vm22191_vm1 }
 0x517   : > { %v20117_v6 = vadd.f32 %v19942_v5, %v10174_v49  ;;  %v20120_v23 = vadd.f32 %v19958_v55, %v10122_v27  ;;  %v10123_v30 = vsel %vm22210_vm2, %v10111_v12, %v10112_v44  ;;  %v10124_v16 = vsel %vm22211_vm7, %v10110_v53, %v10111_v12  ;;  %vm22214_vm2 = vmmov %vm22191_vm1 }
 0x518   : > { %v20127_v7 = vadd.f32 %v19936_v19, %v10123_v30  ;;  %v20130_v2 = vadd.f32 %v19945_v59, %v10124_v16  ;;  %v22213_v59 = vrot.slane %v19980_v15, 7  ;;  %vm22215_vm7 = vmmov %vm22191_vm1 }
 0x519   : > { %v13639_v63 = vpop.f32.mrb[124].mxu0 }
 0x51a   : > { %v9874_v8 = vpop.f32.mrb[125].mxu0  ;;  %v10116_v17 = vrot.slane %v13639_v63, 7 }
 0x51b   : > { %v10114_v48 = vrot.slane %v9874_v8, 7  ;;  %v13640_v5 = vpop.f32.mrb[126].mxu0 }
 0x51c   : > { %v10117_v49 = vrot.slane %v13640_v5, 7  ;;  %v9877_v55 = vpop.f32.mrb[127].mxu0 }
 0x51d   : > { %v10121_v27 = vsel %vm22191_vm1, %v10113_v9, %v10114_v48  ;;  %v10115_v44 = vrot.slane %v9877_v55, 7 }
 0x51e   : > { %v10178_v53 = vsel %vm22189_vm15, %v10121_v27, 0.0  ;;  %v10118_v19 = vsel %vm22212_vm3, %v10116_v17, %v10117_v49  ;;  %v10149_v12 = vsel %vm22214_vm2, %v10117_v49, %v22213_v59  ;;  %vm22216_vm3 = vcmp.lt.s32.totalorder %v15063_v21, 7 }
 0x51f   : > { %v20143_v30 = vadd.f32 %v19978_v24, %v10178_v53  ;;  %v10150_v16 = vsel %vm21740_vm0, %v10149_v12, 0.0  ;;  %v10119_v9 = vsel %vm22215_vm7, %v10115_v44, %v10116_v17  ;;  %v10120_v63 = vsel %vm22191_vm1, %v10114_v48, %v10115_v44  ;;  %vm22217_vm2 = vmmov %vm22216_vm3 }
 0x520   : > { %v14166_v8 = vadd.f32 %v19774_v10, %v10150_v16  ;;  %v20153_v5 = vadd.f32 %v19963_v45, %v10119_v9  ;;  %v20156_v15 = vadd.f32 %v19976_v46, %v10118_v19  ;;  %v20159_v24 = vadd.f32 %v19973_v18, %v10120_v63  ;;  %vm22218_vm7 = vmmov %vm22217_vm2 }
 0x521   : > { %v13645_v49 = vpop.f32.mrb[128].mxu0  ;;  %vm22220_vm1 = vmmov %vm22217_vm2 }
 0x522   : > { %v13679_v55 = vpop.f32.mrb[128].mxu1  ;;  %v20161_v27 = vpop.f32.mrb[129].mxu0  ;;  %v10216_v12 = vrot.slane %v13645_v49, 1  ;;  %vm22230_vm0 = vmmov %vm22220_vm1 }
 0x523   : > { %v10445_v53 = vpop.f32.mrb[129].mxu1  ;;  %v13646_v17 = vpop.f32.mrb[130].mxu0  ;;  %v20828_v45 = vrot.slane %v20161_v27, 1  ;;  %vm22238_vm15 = vmmov %vm22230_vm0 }
 0x524   : > { %v13680_v59 = vpop.f32.mrb[130].mxu1  ;;  %v10217_v48 = vrot.slane %v13646_v17, 1  ;;  %v9930_v44 = vpop.f32.mrb[131].mxu0 }
 0x525   : > { %v10448_v10 = vpop.f32.mrb[131].mxu1  ;;  %v10215_v16 = vrot.slane %v9930_v44, 1 }
 0x526   : > { %v10274_v46 = vsel %vm22216_vm3, %v10216_v12, %v10217_v48  ;;  %vm22221_vm3 = vmmov %vm22220_vm1 }
 0x527   : > { %v14163_v18 = vadd.f32 %v19995_v47, %v10274_v46  ;;  %v10276_v19 = vsel %vm22217_vm2, %v20828_v45, %v10215_v16  ;;  %v10275_v9 = vsel %vm22218_vm7, %v10215_v16, %v10216_v12  ;;  %vm22222_vm2 = vmmov %vm22220_vm1 }
 0x528   : > { %v14167_v63 = vadd.f32 %v14166_v8, %v10276_v19  ;;  %v14175_v49 = vadd.f32 %v19998_v40, %v10275_v9  ;;  %vm22223_vm7 = vmmov %vm22220_vm1 }
 0x529   : > { %v13649_v17 = vpop.f32.mrb[132].mxu0  ;;  %v20174_v26 = vadd.f32 %v14163_v18, %v13679_v55 }
 0x52a   : > { %v13683_v58 = vpop.f32.mrb[132].mxu1  ;;  %v20176_v44 = vadd.f32 %v14167_v63, %v10445_v53  ;;  %v20178_v36 = vadd.f32 %v14175_v49, %v10448_v10  ;;  %v9943_v47 = vpop.f32.mrb[133].mxu0  ;;  %v10220_v45 = vrot.slane %v13649_v17, 1 }
 0x52b   : > { %v10461_v46 = vpop.f32.mrb[133].mxu1  ;;  %v10218_v31 = vrot.slane %v9943_v47, 1  ;;  %v13650_v39 = vpop.f32.mrb[134].mxu0 }
 0x52c   : > { %22219 = vst [vmem:[#allocation32_spill] sm:$0xff] %v20176_v44  ;;  %v13684_v35 = vpop.f32.mrb[134].mxu1  ;;  %v10221_v28 = vrot.slane %v13650_v39, 1  ;;  %v9946_v29 = vpop.f32.mrb[135].mxu0 }
 0x52d   : > { %v10464_v12 = vpop.f32.mrb[135].mxu1  ;;  %v10273_v40 = vsel %vm22220_vm1, %v10217_v48, %v10218_v31  ;;  %v10219_v8 = vrot.slane %v9946_v29, 1 }
 0x52e   : > { %v10281_v55 = vsel %vm15111_vm5, %v10273_v40, 0.0  ;;  %v10270_v53 = vsel %vm22221_vm3, %v10220_v45, %v10221_v28  ;;  %vm22224_vm3 = vmmov %vm22220_vm1 }
 0x52f   : > { %v14171_v10 = vadd.f32 %v19986_v61, %v10281_v55  ;;  %v14179_v16 = vadd.f32 %v20017_v33, %v10270_v53  ;;  %v10272_v18 = vsel %vm22222_vm2, %v10218_v31, %v10219_v8  ;;  %v10271_v39 = vsel %vm22223_vm7, %v10219_v8, %v10220_v45  ;;  %vm22225_vm2 = vmmov %vm22220_vm1 }
 0x530   : > { %v14183_v19 = vadd.f32 %v20007_v57, %v10272_v18  ;;  %v14191_v29 = vadd.f32 %v20020_v34, %v10271_v39  ;;  %vm22226_vm7 = vmmov %vm22220_vm1 }
 0x531   : > { %v13653_v48 = vpop.f32.mrb[136].mxu0  ;;  %v20194_v63 = vadd.f32 %v14171_v10, %v13680_v59  ;;  %v20196_v49 = vadd.f32 %v14179_v16, %v13683_v58 }
 0x532   : > { %v13687_v9 = vpop.f32.mrb[136].mxu1  ;;  %v20198_v17 = vadd.f32 %v14183_v19, %v10461_v46  ;;  %v20200_v61 = vadd.f32 %v14191_v29, %v10464_v12  ;;  %v9959_v33 = vpop.f32.mrb[137].mxu0  ;;  %v10224_v45 = vrot.slane %v13653_v48, 1 }
 0x533   : > { %v10477_v47 = vpop.f32.mrb[137].mxu1  ;;  %v10222_v31 = vrot.slane %v9959_v33, 1  ;;  %v13654_v40 = vpop.f32.mrb[138].mxu0 }
 0x534   : > { %v13688_v55 = vpop.f32.mrb[138].mxu1  ;;  %v10225_v8 = vrot.slane %v13654_v40, 1  ;;  %v9962_v57 = vpop.f32.mrb[139].mxu0 }
 0x535   : > { %v10480_v53 = vpop.f32.mrb[139].mxu1  ;;  %v10269_v34 = vsel %vm22220_vm1, %v10221_v28, %v10222_v31  ;;  %v10223_v59 = vrot.slane %v9962_v57, 1 }
 0x536   : > { %v10285_v58 = vsel %vm22021_vm13, %v10269_v34, 0.0  ;;  %v10266_v46 = vsel %vm22224_vm3, %v10224_v45, %v10225_v8  ;;  %vm22227_vm3 = vnez %v22037_v54 }
 0x537   : > { %v14187_v12 = vadd.f32 %v20010_v42, %v10285_v58  ;;  %v14195_v10 = vadd.f32 %v20039_v38, %v10266_v46  ;;  %v10268_v16 = vsel %vm22225_vm2, %v10222_v31, %v10223_v59  ;;  %v10267_v18 = vsel %vm22226_vm7, %v10223_v59, %v10224_v45  ;;  %vm22228_vm2 = vmmov %vm22220_vm1 }
 0x538   : > { %v14199_v39 = vadd.f32 %v20029_v41, %v10268_v16  ;;  %v14207_v28 = vadd.f32 %v20042_v60, %v10267_v18  ;;  %vm22229_vm7 = vmmov %vm22220_vm1 }
 0x539   : > { %v13657_v19 = vpop.f32.mrb[140].mxu0  ;;  %v20216_v48 = vadd.f32 %v14187_v12, %v13684_v35  ;;  %v20218_v33 = vadd.f32 %v14195_v10, %v13687_v9 }
 0x53a   : > { %v13691_v29 = vpop.f32.mrb[140].mxu1  ;;  %v20220_v40 = vadd.f32 %v14199_v39, %v10477_v47  ;;  %v20222_v42 = vadd.f32 %v14207_v28, %v10480_v53  ;;  %v9975_v38 = vpop.f32.mrb[141].mxu0  ;;  %v10228_v45 = vrot.slane %v13657_v19, 1 }
 0x53b   : > { %v10493_v57 = vpop.f32.mrb[141].mxu1  ;;  %v10226_v31 = vrot.slane %v9975_v38, 1  ;;  %v13658_v34 = vpop.f32.mrb[142].mxu0 }
 0x53c   : > { %v13692_v58 = vpop.f32.mrb[142].mxu1  ;;  %v10229_v59 = vrot.slane %v13658_v34, 1  ;;  %v9978_v41 = vpop.f32.mrb[143].mxu0 }
 0x53d   : > { %v10496_v46 = vpop.f32.mrb[143].mxu1  ;;  %v10265_v60 = vsel %vm22220_vm1, %v10225_v8, %v10226_v31  ;;  %v10227_v35 = vrot.slane %v9978_v41, 1  ;;  %vm22231_vm1 = vmmov %vm22230_vm0 }
 0x53e   : > { %v10289_v9 = vsel %vm22227_vm3, %v10265_v60, 0.0  ;;  %v10262_v47 = vsel %vm22228_vm2, %v10228_v45, %v10229_v59  ;;  %vm22232_vm2 = vmmov %vm22230_vm0 }
 0x53f   : > { %v14203_v53 = vadd.f32 %v20032_v22, %v10289_v9  ;;  %v14211_v12 = vadd.f32 %v20061_v3, %v10262_v47  ;;  %v10264_v10 = vsel %vm22229_vm7, %v10226_v31, %v10227_v35  ;;  %v10263_v16 = vsel %vm22230_vm0, %v10227_v35, %v10228_v45  ;;  %vm22233_vm7 = vmmov %vm22230_vm0 }
 0x540   : > { %v14215_v18 = vadd.f32 %v20051_v51, %v10264_v10  ;;  %v14223_v8 = vadd.f32 %v20064_v32, %v10263_v16 }
 0x541   : > { %v13661_v39 = vpop.f32.mrb[144].mxu0  ;;  %v20238_v19 = vadd.f32 %v14203_v53, %v13688_v55  ;;  %v20240_v38 = vadd.f32 %v14211_v12, %v13691_v29 }
 0x542   : > { %v13695_v28 = vpop.f32.mrb[144].mxu1  ;;  %v20242_v34 = vadd.f32 %v14215_v18, %v10493_v57  ;;  %v20244_v22 = vadd.f32 %v14223_v8, %v10496_v46  ;;  %v9991_v3 = vpop.f32.mrb[145].mxu0  ;;  %v10232_v45 = vrot.slane %v13661_v39, 1 }
 0x543   : > { %v10509_v41 = vpop.f32.mrb[145].mxu1  ;;  %v10230_v31 = vrot.slane %v9991_v3, 1  ;;  %v13662_v60 = vpop.f32.mrb[146].mxu0 }
 0x544   : > { %v13696_v9 = vpop.f32.mrb[146].mxu1  ;;  %v10233_v35 = vrot.slane %v13662_v60, 1  ;;  %v9994_v51 = vpop.f32.mrb[147].mxu0 }
 0x545   : > { %v10512_v47 = vpop.f32.mrb[147].mxu1  ;;  %v10261_v32 = vsel %vm22230_vm0, %v10229_v59, %v10230_v31  ;;  %v10231_v55 = vrot.slane %v9994_v51, 1 }
 0x546   : > { %v10293_v29 = vsel %vm22055_vm9, %v10261_v32, 0.0  ;;  %v10258_v57 = vsel %vm22231_vm1, %v10232_v45, %v10233_v35 }
 0x547   : > { %v14219_v46 = vadd.f32 %v20054_v13, %v10293_v29  ;;  %v14227_v53 = vadd.f32 %v20083_v25, %v10258_v57  ;;  %v10260_v12 = vsel %vm22232_vm2, %v10230_v31, %v10231_v55  ;;  %v10259_v10 = vsel %vm22233_vm7, %v10231_v55, %v10232_v45  ;;  %vm22236_vm2 = vmmov %vm22230_vm0 }
 0x548   : > { %v14231_v16 = vadd.f32 %v20073_v14, %v10260_v12  ;;  %v14239_v59 = vadd.f32 %v20086_v37, %v10259_v10  ;;  %vm22237_vm7 = vmmov %vm22230_vm0 }
 0x549   : > { %v20260_v39 = vadd.f32 %v14219_v46, %v13692_v58  ;;  %v20262_v3 = vadd.f32 %v14227_v53, %v13695_v28  ;;  %v22234_v46 = vld [vmem:[#allocation11_spill] sm:$0xff] }
 0x54a   : > { %v13665_v18 = vpop.f32.mrb[148].mxu0  ;;  %v20264_v60 = vadd.f32 %v14231_v16, %v10509_v41  ;;  %v20266_v13 = vadd.f32 %v14239_v59, %v10512_v47  ;;  %vm22235_vm1 = vnez %v22234_v46 }
 0x54b   : > { %v10007_v25 = vpop.f32.mrb[149].mxu0  ;;  %v10236_v45 = vrot.slane %v13665_v18, 1 }
 0x54c   : > { %v13699_v8 = vpop.f32.mrb[148].mxu1  ;;  %v10234_v31 = vrot.slane %v10007_v25, 1  ;;  %v13666_v32 = vpop.f32.mrb[150].mxu0 }
 0x54d   : > { %v10525_v51 = vpop.f32.mrb[149].mxu1  ;;  %v10237_v55 = vrot.slane %v13666_v32, 1  ;;  %v10010_v14 = vpop.f32.mrb[151].mxu0 }
 0x54e   : > { %v13700_v29 = vpop.f32.mrb[150].mxu1  ;;  %v10257_v37 = vsel %vm22230_vm0, %v10233_v35, %v10234_v31  ;;  %v10235_v58 = vrot.slane %v10010_v14, 1 }
 0x54f   : > { %v10528_v57 = vpop.f32.mrb[151].mxu1  ;;  %v10297_v28 = vsel %vm22235_vm1, %v10257_v37, 0.0  ;;  %v10254_v41 = vsel %vm22236_vm2, %v10236_v45, %v10237_v55  ;;  %vm22241_vm2 = vmmov %vm22230_vm0 }
 0x550   : > { %v14235_v47 = vadd.f32 %v20076_v43, %v10297_v28  ;;  %v14243_v53 = vadd.f32 %v20105_v50, %v10254_v41  ;;  %v10256_v12 = vsel %vm22237_vm7, %v10234_v31, %v10235_v58  ;;  %v10255_v10 = vsel %vm22238_vm15, %v10235_v58, %v10236_v45  ;;  %vm22239_vm15 = vmmov %vm22230_vm0 }
 0x551   : > { %v14247_v16 = vadd.f32 %v20095_v0, %v10256_v12  ;;  %v14255_v35 = vadd.f32 %v20108_v56, %v10255_v10  ;;  %vm22242_vm7 = vmmov %vm22230_vm0 }
 0x552   : > { %v20282_v25 = vadd.f32 %v14235_v47, %v13696_v9  ;;  %v20284_v32 = vadd.f32 %v14243_v53, %v13699_v8  ;;  %v22240_v47 = vld [vmem:[#allocation16_spill] sm:$0xff] }
 0x553   : > { %v20286_v14 = vadd.f32 %v14247_v16, %v10525_v51  ;;  %v20288_v43 = vadd.f32 %v14255_v35, %v10528_v57 }
 0x555   : > { %v13669_v59 = vpop.f32.mrb[152].mxu0 }
 0x556   : > { %v13703_v18 = vpop.f32.mrb[152].mxu1  ;;  %v10023_v50 = vpop.f32.mrb[153].mxu0  ;;  %v10240_v45 = vrot.slane %v13669_v59, 1 }
 0x557   : > { %v10541_v37 = vpop.f32.mrb[153].mxu1  ;;  %v10238_v31 = vrot.slane %v10023_v50, 1  ;;  %v13670_v28 = vpop.f32.mrb[154].mxu0 }
 0x558   : > { %v13704_v41 = vpop.f32.mrb[154].mxu1  ;;  %v10241_v58 = vrot.slane %v13670_v28, 1  ;;  %v10026_v0 = vpop.f32.mrb[155].mxu0 }
 0x559   : > { %v10544_v12 = vpop.f32.mrb[155].mxu1  ;;  %v10253_v56 = vsel %vm22239_vm15, %v10237_v55, %v10238_v31  ;;  %v10239_v9 = vrot.slane %v10026_v0, 1  ;;  %vm22243_vm15 = vmmov %vm22230_vm0 }
 0x55a   : > { %v10301_v8 = vsel %vm22181_vm14, %v10253_v56, 0.0  ;;  %v10250_v51 = vsel %vm22230_vm0, %v10240_v45, %v10241_v58  ;;  %vm22244_vm0 = vnez %v21894_v4  ;;  %vm22247_vm14 = vnez %v21902_v62 }
 0x55b   : > { %v14251_v57 = vadd.f32 %v20098_v1, %v10301_v8  ;;  %v14259_v53 = vadd.f32 %v20127_v7, %v10250_v51  ;;  %v10252_v10 = vsel %vm22241_vm2, %v10238_v31, %v10239_v9  ;;  %v10251_v16 = vsel %vm22242_vm7, %v10239_v9, %v10240_v45  ;;  %vm22246_vm7 = vmmov %vm22241_vm2 }
 0x55c   : > { %v14263_v35 = vadd.f32 %v20117_v6, %v10252_v10  ;;  %v14271_v55 = vadd.f32 %v20130_v2, %v10251_v16 }
 0x55d   : > { %v20304_v28 = vadd.f32 %v14251_v57, %v13700_v29  ;;  %v20306_v0 = vadd.f32 %v14259_v53, %v13703_v18 }
 0x55e   : > { %v20308_v56 = vadd.f32 %v14263_v35, %v10541_v37  ;;  %v20310_v1 = vadd.f32 %v14271_v55, %v10544_v12  ;;  %v22245_v12 = vrot.slane %v20161_v27, 1 }
 0x55f   : > { %v13673_v59 = vpop.f32.mrb[156].mxu0 }
 0x560   : > { %v10039_v7 = vpop.f32.mrb[157].mxu0  ;;  %v10244_v45 = vrot.slane %v13673_v59, 1 }
 0x561   : > { %v13707_v50 = vpop.f32.mrb[156].mxu1  ;;  %v10242_v31 = vrot.slane %v10039_v7, 1  ;;  %v13674_v51 = vpop.f32.mrb[158].mxu0 }
 0x562   : > { %v10557_v8 = vpop.f32.mrb[157].mxu1  ;;  %v10245_v9 = vrot.slane %v13674_v51, 1  ;;  %v10042_v6 = vpop.f32.mrb[159].mxu0 }
 0x563   : > { %v13708_v44 = vpop.f32.mrb[158].mxu1  ;;  %v10249_v2 = vsel %vm22243_vm15, %v10241_v58, %v10242_v31  ;;  %v10243_v29 = vrot.slane %v10042_v6, 1  ;;  %vm22248_vm15 = vmmov %vm22241_vm2 }
 0x564   : > { %v10560_v10 = vpop.f32.mrb[159].mxu1  ;;  %v10305_v18 = vsel %vm22244_vm0, %v10249_v2, 0.0  ;;  %v10246_v37 = vsel %vm22241_vm2, %v10244_v45, %v10245_v9  ;;  %v10277_v57 = vsel %vm22246_vm7, %v10245_v9, %v22245_v12  ;;  %vm22250_vm7 = vcmp.lt.s32.totalorder %v15063_v21, 1 }
 0x565   : > { %v14267_v53 = vadd.f32 %v20120_v23, %v10305_v18  ;;  %v14275_v16 = vadd.f32 %v20153_v5, %v10246_v37  ;;  %v10309_v35 = vsel %vm22247_vm14, %v10277_v57, 0.0  ;;  %v10248_v58 = vsel %vm22248_vm15, %v10242_v31, %v10243_v29  ;;  %vm22251_vm15 = vmmov %vm22241_vm2 }
 0x566   : > { %v14283_v55 = vadd.f32 %v20156_v15, %v10309_v35  ;;  %v14279_v59 = vadd.f32 %v20143_v30, %v10248_v58  ;;  %v10247_v27 = vsel %vm22241_vm2, %v10243_v29, %v10244_v45  ;;  %vm22252_vm2 = vmmov %vm22250_vm7 }
 0x567   : > { %v14287_v7 = vadd.f32 %v20159_v24, %v10247_v27  ;;  %v20333_v23 = vadd.f32 %v14267_v53, %v13704_v41  ;;  %v20335_v5 = vadd.f32 %v14275_v16, %v13707_v50  ;;  %vm22253_vm14 = vmmov %vm22252_vm2 }
 0x568   : > { %v20337_v6 = vadd.f32 %v14283_v55, %v13708_v44  ;;  %v20339_v2 = vadd.f32 %v14279_v59, %v10557_v8  ;;  %vm22254_vm0 = vmmov %vm22251_vm15 }
 0x569   : > { %22249 = vst [vmem:[#allocation9_spill] sm:$0xff] %v20335_v5  ;;  %v20345_v30 = vadd.f32 %v14287_v7, %v10560_v10 }
 0x56a   : > { %v13713_v51 = vpop.f32.mrb[160].mxu0 }
 0x56b   : > { %v13747_v9 = vpop.f32.mrb[160].mxu1  ;;  %v20341_v18 = vpop.f32.mrb[161].mxu0  ;;  %v10936_v24 = vrot.slane %v13713_v51, 7  ;;  %v20373_v51 = vld [vmem:[%s20658_s2] ss:$0 sm:$0xff] }
 0x56c   : > { %v11064_v31 = vrot.slane %v13747_v9, 1  ;;  %v20343_v15 = vpop.f32.mrb[161].mxu1  ;;  %v13714_v45 = vpop.f32.mrb[162].mxu0  ;;  %v20835_v44 = vrot.slane %v20341_v18, 7 }
 0x56d   : > { %v13748_v29 = vpop.f32.mrb[162].mxu1  ;;  %v20834_v37 = vrot.slane %v20343_v15, 1  ;;  %v10937_v41 = vrot.slane %v13714_v45, 7  ;;  %v10613_v50 = vpop.f32.mrb[163].mxu0 }
 0x56e   : > { %v11065_v12 = vrot.slane %v13748_v29, 1  ;;  %v10778_v57 = vpop.f32.mrb[163].mxu1  ;;  %v10935_v8 = vrot.slane %v10613_v50, 7 }
 0x56f   : > { %v11063_v53 = vrot.slane %v10778_v57, 1  ;;  %v10994_v16 = vsel %vm22250_vm7, %v10936_v24, %v10937_v41  ;;  %vm22255_vm7 = vmmov %vm22254_vm0 }
 0x570   : > { %v11122_v10 = vsel %vm22251_vm15, %v11064_v31, %v11065_v12  ;;  %v11033_v35 = vadd.f32 %v20194_v63, %v10994_v16  ;;  %v10995_v58 = vsel %vm22252_vm2, %v10935_v8, %v10936_v24  ;;  %v10996_v55 = vsel %vm22253_vm14, %v20835_v44, %v10935_v8  ;;  %vm22257_vm14 = vmmov %vm22252_vm2 }
 0x571   : > { %v11123_v59 = vsel %vm22254_vm0, %v11063_v53, %v11064_v31  ;;  %v11031_v27 = vadd.f32 %v20178_v36, %v10996_v55  ;;  %v11032_v7 = vadd.f32 %v20174_v26, %v10995_v58  ;;  %v20368_v63 = vsel %vm22255_vm7, %v20834_v37, %v11063_v53  ;;  %vm22261_vm7 = vmmov %vm22257_vm14 }
 0x572   : > { %22256 = vst [vmem:[#allocation21_spill] sm:$0xff] %v20368_v63  ;;  %vm22258_vm15 = vcmask 523264  }
 0x573   : > { %v11160_v29 = vadd.f32 %v11122_v10, %v11032_v7  ;;  %v11159_v24 = vadd.f32 %v11123_v59, %v11031_v27  ;;  %vm22259_vm2 = vmmov %vm22258_vm15 }
 0x574   : > { %v13717_v9 = vpop.f32.mrb[164].mxu0 }
 0x575   : > { %v13751_v45 = vpop.f32.mrb[164].mxu1  ;;  %v10626_v50 = vpop.f32.mrb[165].mxu0  ;;  %v10940_v26 = vrot.slane %v13717_v9, 7  ;;  %v11199_v58 = vadd.f32 %v20373_v51, %v11160_v29  ;;  %v11198_v55 = vadd.f32 %v20373_v51, %v11159_v24 }
 0x576   : > { %v11068_v31 = vrot.slane %v13751_v45, 1  ;;  %v10791_v36 = vpop.f32.mrb[165].mxu1  ;;  %v10938_v57 = vrot.slane %v10626_v50, 7  ;;  %v13718_v16 = vpop.f32.mrb[166].mxu0 }
 0x577   : > { %v11066_v8 = vrot.slane %v10791_v36, 1  ;;  %v13752_v53 = vpop.f32.mrb[166].mxu1  ;;  %v10941_v37 = vrot.slane %v13718_v16, 7  ;;  %v10629_v63 = vpop.f32.mrb[167].mxu0  ;;  %11231 = vst.msk [vmem:[%s16379_s14 + $0x310] sm:$0xff] %vm22258_vm15, %v11199_v58 }
 0x578   : > { %v11069_v44 = vrot.slane %v13752_v53, 1  ;;  %v10794_v5 = vpop.f32.mrb[167].mxu1  ;;  %v10993_v10 = vsel %vm22257_vm14, %v10937_v41, %v10938_v57  ;;  %v10939_v27 = vrot.slane %v10629_v63, 7  ;;  %11230 = vst.msk [vmem:[%s16379_s14 + $0x308] sm:$0xff] %vm22259_vm2, %v11198_v55  ;;  %vm22262_vm14 = vmmov %vm22254_vm0 }
 0x579   : > { %v11121_v59 = vsel %vm22254_vm0, %v11065_v12, %v11066_v8  ;;  %v11067_v7 = vrot.slane %v10794_v5, 1  ;;  %v11002_v45 = vsel %vm15115_vm6, %v10993_v10, 0.0  ;;  %v10990_v24 = vsel %vm22261_vm7, %v10940_v26, %v10941_v37  ;;  %vm22263_vm0 = vmmov %vm22261_vm7 }
 0x57a   : > { %v11129_v29 = vsel %vm15111_vm5, %v11121_v59, 0.0  ;;  %v11118_v41 = vsel %vm22262_vm14, %v11068_v31, %v11069_v44  ;;  %v11034_v12 = vadd.f32 %v20198_v17, %v11002_v45  ;;  %v11037_v5 = vadd.f32 %v20216_v48, %v10990_v24  ;;  %vm22264_vm6 = vmmov %vm22263_vm0 }
 0x57b   : > { %v11161_v63 = vadd.f32 %v11129_v29, %v11033_v35  ;;  %v10991_v50 = vsel %vm22263_vm0, %v10939_v27, %v10940_v26  ;;  %v10992_v36 = vsel %vm22264_vm6, %v10938_v57, %v10939_v27  ;;  %vm22265_vm5 = vmmov %vm22262_vm14 }
 0x57c   : > { %v11036_v20 = vadd.f32 %v20196_v49, %v10991_v50  ;;  %v11119_v16 = vsel %vm22265_vm5, %v11067_v7, %v11068_v31  ;;  %vm22266_vm15 = vmmov %vm22265_vm5  ;;  %v11035_v35 = vadd.f32 %v20200_v61, %v10992_v36 }
 0x57d   : > { %v11120_v53 = vsel %vm22266_vm15, %v11066_v8, %v11067_v7  ;;  %v11200_v17 = vadd.f32 %v20373_v51, %v11161_v63  ;;  %vm22267_vm7 = vmmov %vm22259_vm2 }
 0x57e   : > { %v11162_v58 = vadd.f32 %v11120_v53, %v11034_v12  ;;  %v13721_v48 = vpop.f32.mrb[168].mxu0  ;;  %v11164_v10 = vadd.f32 %v11118_v41, %v11036_v20  ;;  %v11163_v49 = vadd.f32 %v11119_v16, %v11035_v35  ;;  %vm22268_vm14 = vmmov %vm22263_vm0 }
 0x57f   : > { %v10642_v59 = vpop.f32.mrb[169].mxu0  ;;  %11232 = vst.msk [vmem:[%s16379_s14 + $0x318] sm:$0xff] %vm22259_vm2, %v11200_v17  ;;  %v10944_v45 = vrot.slane %v13721_v48, 7  ;;  %vm22269_vm0 = vmmov %vm22265_vm5 }
 0x580   : > { %v13755_v55 = vpop.f32.mrb[168].mxu1  ;;  %v11201_v31 = vadd.f32 %v20373_v51, %v11162_v58  ;;  %v10942_v27 = vrot.slane %v10642_v59, 7  ;;  %v13722_v7 = vpop.f32.mrb[170].mxu0  ;;  %v11203_v61 = vadd.f32 %v20373_v51, %v11164_v10  ;;  %v11202_v63 = vadd.f32 %v20373_v51, %v11163_v49  ;;  %vm22270_vm6 = vmmov %vm22259_vm2 }
 0x581   : > { %v11072_v26 = vrot.slane %v13755_v55, 1  ;;  %v10807_v57 = vpop.f32.mrb[169].mxu1  ;;  %v10945_v29 = vrot.slane %v13722_v7, 7  ;;  %v10645_v41 = vpop.f32.mrb[171].mxu0  ;;  %vm22272_vm5 = vmmov %vm22268_vm14 }
 0x582   : > { %v11070_v8 = vrot.slane %v10807_v57, 1  ;;  %v13756_v9 = vpop.f32.mrb[170].mxu1  ;;  %11233 = vst.msk [vmem:[%s16379_s14 + $0x320] sm:$0xff] %vm22267_vm7, %v11201_v31  ;;  %v10989_v50 = vsel %vm22268_vm14, %v10941_v37, %v10942_v27  ;;  %v10943_v20 = vrot.slane %v10645_v41, 7  ;;  %vm22273_vm15 = vmmov %vm22269_vm0 }
 0x583   : > { %v11073_v24 = vrot.slane %v13756_v9, 1  ;;  %v10810_v12 = vpop.f32.mrb[171].mxu1  ;;  %11235 = vst.msk [vmem:[%s16379_s14 + $0x330] sm:$0xff] %vm22270_vm6, %v11203_v61  ;;  %v11006_v53 = vsel %vm15163_vm8, %v10989_v50, 0.0  ;;  %v10986_v35 = vsel %vm22272_vm5, %v10944_v45, %v10945_v29  ;;  %vm22274_vm7 = vmmov %vm22272_vm5 }
 0x584   : > { %v11117_v36 = vsel %vm22269_vm0, %v11069_v44, %v11070_v8  ;;  %11234 = vst.msk [vmem:[%s16379_s14 + $0x328] sm:$0xff] %vm22259_vm2, %v11202_v63  ;;  %v11038_v37 = vadd.f32 %v20220_v40, %v11006_v53  ;;  %v11041_v48 = vadd.f32 %v20238_v19, %v10986_v35  ;;  %v10987_v55 = vsel %vm22274_vm7, %v10943_v20, %v10944_v45  ;;  %vm22275_vm8 = vmmov %vm22272_vm5 }
 0x585   : > { %v11133_v17 = vsel %vm22021_vm13, %v11117_v36, 0.0  ;;  %v11114_v58 = vsel %vm22273_vm15, %v11072_v26, %v11073_v24  ;;  %v10988_v11 = vsel %vm22275_vm8, %v10942_v27, %v10943_v20  ;;  %v11040_v10 = vadd.f32 %v20218_v33, %v10987_v55  ;;  %vm22276_vm13 = vmmov %vm22269_vm0 }
 0x586   : > { %v11165_v44 = vadd.f32 %v11133_v17, %v11037_v5  ;;  %v11071_v59 = vrot.slane %v10810_v12, 1  ;;  %v11039_v49 = vadd.f32 %v20222_v42, %v10988_v11  ;;  %vm22277_vm14 = vmmov %vm22269_vm0 }
 0x587   : > { %v11168_v40 = vadd.f32 %v11114_v58, %v11040_v10  ;;  %vm22278_vm0 = vmmov %vm22259_vm2 }
 0x588   : > { %v11204_v57 = vadd.f32 %v20373_v51, %v11165_v44  ;;  %v13725_v31 = vpop.f32.mrb[172].mxu0  ;;  %v11115_v5 = vsel %vm22276_vm13, %v11071_v59, %v11072_v26  ;;  %v11116_v19 = vsel %vm22277_vm14, %v11070_v8, %v11071_v59  ;;  %vm22279_vm6 = vmmov %vm22272_vm5 }
 0x589   : > { %v10948_v9 = vrot.slane %v13725_v31, 7  ;;  %v10658_v61 = vpop.f32.mrb[173].mxu0  ;;  %v11166_v33 = vadd.f32 %v11116_v19, %v11038_v37  ;;  %v11167_v27 = vadd.f32 %v11115_v5, %v11039_v49  ;;  %v11207_v50 = vadd.f32 %v20373_v51, %v11168_v40  ;;  %vm22280_vm5 = vmmov %vm22278_vm0 }
 0x58a   : > { %11236 = vst.msk [vmem:[%s16379_s14 + $0x338] sm:$0xff] %vm22278_vm0, %v11204_v57  ;;  %v10946_v12 = vrot.slane %v10658_v61, 7  ;;  %v13726_v42 = vpop.f32.mrb[174].mxu0  ;;  %vm22282_vm15 = vmmov %vm22276_vm13 }
 0x58b   : > { %v13759_v7 = vpop.f32.mrb[172].mxu1  ;;  %v10949_v36 = vrot.slane %v13726_v42, 7  ;;  %v10661_v8 = vpop.f32.mrb[175].mxu0  ;;  %v11205_v53 = vadd.f32 %v20373_v51, %v11166_v33  ;;  %v11206_v17 = vadd.f32 %v20373_v51, %v11167_v27  ;;  %11239 = vst.msk [vmem:[%s16379_s14 + $0x350] sm:$0xff] %vm22280_vm5, %v11207_v50  ;;  %vm22283_vm2 = vmmov %vm22279_vm6 }
 0x58c   : > { %v10823_v45 = vpop.f32.mrb[173].mxu1  ;;  %v11076_v41 = vrot.slane %v13759_v7, 1  ;;  %v10985_v35 = vsel %vm22279_vm6, %v10945_v29, %v10946_v12  ;;  %v10947_v58 = vrot.slane %v10661_v8, 7  ;;  %vm22284_vm7 = vmmov %vm22276_vm13 }
 0x58d   : > { %v13760_v63 = vpop.f32.mrb[174].mxu1  ;;  %v11074_v26 = vrot.slane %v10823_v45, 1  ;;  %v11010_v44 = vsel %vm15212_vm10, %v10985_v35, 0.0  ;;  %v10982_v11 = vsel %vm22283_vm2, %v10948_v9, %v10949_v36  ;;  %vm22285_vm8 = vmmov %vm22278_vm0 }
 0x58e   : > { %v11077_v20 = vrot.slane %v13760_v63, 1  ;;  %v10826_v16 = vpop.f32.mrb[175].mxu1  ;;  %11237 = vst.msk [vmem:[%s16379_s14 + $0x340] sm:$0xff] %vm22285_vm8, %v11205_v53  ;;  %vm22286_vm13 = vmmov %vm22278_vm0  ;;  %v11042_v29 = vadd.f32 %v20242_v34, %v11010_v44  ;;  %v11045_v57 = vadd.f32 %v20260_v39, %v10982_v11 }
 0x58f   : > { %v11113_v55 = vsel %vm22282_vm15, %v11073_v24, %v11074_v26  ;;  %11238 = vst.msk [vmem:[%s16379_s14 + $0x348] sm:$0xff] %vm22286_vm13, %v11206_v17  ;;  %vm22287_vm10 = vmmov %vm22283_vm2  ;;  %v11075_v40 = vrot.slane %v10826_v16, 1 }
 0x590   : > { %v11110_v10 = vsel %vm22284_vm7, %v11076_v41, %v11077_v20  ;;  %v11137_v59 = vsel %vm22227_vm3, %v11113_v55, 0.0  ;;  %v10983_v24 = vsel %vm22287_vm10, %v10947_v58, %v10948_v9  ;;  %vm22288_vm14 = vmmov %vm22283_vm2 }
 0x591   : > { %v11169_v49 = vadd.f32 %v11137_v59, %v11041_v48  ;;  %v10984_v31 = vsel %vm22288_vm14, %v10946_v12, %v10947_v58  ;;  %v11044_v7 = vadd.f32 %v20240_v38, %v10983_v24  ;;  %vm22289_vm3 = vmmov %vm22284_vm7 }
 0x592   : > { %v11043_v5 = vadd.f32 %v20244_v22, %v10984_v31  ;;  %v13729_v19 = vpop.f32.mrb[176].mxu0  ;;  %v11111_v39 = vsel %vm22289_vm3, %v11075_v40, %v11076_v41  ;;  %vm22290_vm0 = vmmov %vm22289_vm3 }
 0x593   : > { %v13763_v34 = vpop.f32.mrb[176].mxu1  ;;  %v11208_v54 = vadd.f32 %v20373_v51, %v11169_v49  ;;  %v11172_v61 = vadd.f32 %v11110_v10, %v11044_v7  ;;  %v11112_v48 = vsel %vm22290_vm0, %v11074_v26, %v11075_v40  ;;  %v10674_v9 = vpop.f32.mrb[177].mxu0  ;;  %v10952_v38 = vrot.slane %v13729_v19, 7  ;;  %vm22291_vm6 = vmmov %vm22280_vm5 }
 0x594   : > { %v10839_v45 = vpop.f32.mrb[177].mxu1  ;;  %v11170_v33 = vadd.f32 %v11112_v48, %v11042_v29  ;;  %v11171_v27 = vadd.f32 %v11111_v39, %v11043_v5  ;;  %v11080_v12 = vrot.slane %v13763_v34, 1  ;;  %v13730_v42 = vpop.f32.mrb[178].mxu0  ;;  %v10950_v50 = vrot.slane %v10674_v9, 7  ;;  %vm22292_vm15 = vmmov %vm22283_vm2 }
 0x595   : > { %v13764_v22 = vpop.f32.mrb[178].mxu1  ;;  %11240 = vst.msk [vmem:[%s16379_s14 + $0x358] sm:$0xff] %vm22291_vm6, %v11208_v54  ;;  %v11211_v63 = vadd.f32 %v20373_v51, %v11172_v61  ;;  %v11078_v41 = vrot.slane %v10839_v45, 1  ;;  %v10953_v8 = vrot.slane %v13730_v42, 7  ;;  %v10677_v16 = vpop.f32.mrb[179].mxu0  ;;  %vm22293_vm2 = vmmov %vm22290_vm0 }
 0x596   : > { %v10842_v26 = vpop.f32.mrb[179].mxu1  ;;  %v11209_v53 = vadd.f32 %v20373_v51, %v11170_v33  ;;  %v11210_v17 = vadd.f32 %v20373_v51, %v11171_v27  ;;  %v11081_v35 = vrot.slane %v13764_v22, 1  ;;  %v10951_v58 = vrot.slane %v10677_v16, 7  ;;  %vm22294_vm7 = vmmov %vm22287_vm10 }
 0x597   : > { %11243 = vst.msk [vmem:[%s16379_s14 + $0x370] sm:$0xff] %vm22280_vm5, %v11211_v63  ;;  %v10981_v37 = vsel %vm22292_vm15, %v10949_v36, %v10950_v50  ;;  %v11109_v44 = vsel %vm22293_vm2, %v11077_v20, %v11078_v41  ;;  %v10978_v55 = vsel %vm22294_vm7, %v10952_v38, %v10953_v8  ;;  %v11079_v11 = vrot.slane %v10842_v26, 1  ;;  %vm22295_vm8 = vmmov %vm22280_vm5 }
 0x598   : > { %11241 = vst.msk [vmem:[%s16379_s14 + $0x360] sm:$0xff] %vm22295_vm8, %v11209_v53  ;;  %vm22296_vm13 = vmmov %vm22280_vm5  ;;  %v11014_v29 = vsel %vm15261_vm12, %v10981_v37, 0.0  ;;  %v11141_v59 = vsel %vm22055_vm9, %v11109_v44, 0.0  ;;  %v11049_v24 = vadd.f32 %v20282_v25, %v10978_v55 }
 0x599   : > { %11242 = vst.msk [vmem:[%s16379_s14 + $0x368] sm:$0xff] %vm22296_vm13, %v11210_v17  ;;  %vm22298_vm10 = vmmov %vm22290_vm0  ;;  %v11046_v20 = vadd.f32 %v20264_v60, %v11014_v29  ;;  %v11173_v49 = vadd.f32 %v11141_v59, %v11045_v57 }
 0x59a   : > { %v11106_v36 = vsel %vm22298_vm10, %v11080_v12, %v11081_v35  ;;  %vm22299_vm14 = vmmov %vm22294_vm7  ;;  %v13733_v19 = vpop.f32.mrb[180].mxu0 }
 0x59b   : > { %v10979_v31 = vsel %vm22299_vm14, %v10951_v58, %v10952_v38  ;;  %vm22300_vm3 = vmmov %vm22294_vm7  ;;  %v13767_v60 = vpop.f32.mrb[180].mxu1  ;;  %v11212_v57 = vadd.f32 %v20373_v51, %v11173_v49  ;;  %v10690_v61 = vpop.f32.mrb[181].mxu0  ;;  %v10956_v38 = vrot.slane %v13733_v19, 7 }
 0x59c   : > { %v10980_v7 = vsel %vm22300_vm3, %v10950_v50, %v10951_v58  ;;  %v11048_v5 = vadd.f32 %v20262_v3, %v10979_v31  ;;  %vm22301_vm12 = vmmov %vm22290_vm0  ;;  %v11084_v54 = vrot.slane %v13767_v60, 1  ;;  %v10855_v39 = vpop.f32.mrb[181].mxu1  ;;  %v13734_v45 = vpop.f32.mrb[182].mxu0 }
 0x59d   : > { %v11047_v40 = vadd.f32 %v20266_v13, %v10980_v7  ;;  %v11107_v52 = vsel %vm22301_vm12, %v11079_v11, %v11080_v12  ;;  %vm22302_vm9 = vmmov %vm22290_vm0  ;;  %v10954_v13 = vrot.slane %v10690_v61, 7  ;;  %v11082_v3 = vrot.slane %v10855_v39, 1  ;;  %v13768_v33 = vpop.f32.mrb[182].mxu1  ;;  %v10693_v22 = vpop.f32.mrb[183].mxu0 }
 0x59e   : > { %v11108_v25 = vsel %vm22302_vm9, %v11078_v41, %v11079_v11  ;;  %v11176_v48 = vadd.f32 %v11106_v36, %v11048_v5  ;;  %vm22303_vm0 = vmmov %vm22280_vm5  ;;  %v10957_v12 = vrot.slane %v13734_v45, 7  ;;  %v11085_v42 = vrot.slane %v13768_v33, 1  ;;  %v10858_v63 = vpop.f32.mrb[183].mxu1 }
 0x59f   : > { %v11174_v34 = vadd.f32 %v11108_v25, %v11046_v20  ;;  %v11175_v9 = vadd.f32 %v11107_v52, %v11047_v40  ;;  %11244 = vst.msk [vmem:[%s16379_s14 + $0x378] sm:$0xff] %vm22303_vm0, %v11212_v57  ;;  %vm22304_vm6 = vmmov %vm22300_vm3  ;;  %v10955_v11 = vrot.slane %v10693_v22, 7  ;;  %v11083_v10 = vrot.slane %v10858_v63, 1 }
 0x5a0   : > { %v11215_v50 = vadd.f32 %v20373_v51, %v11176_v48  ;;  %v10977_v16 = vsel %vm22304_vm6, %v10953_v8, %v10954_v13  ;;  %vm22305_vm5 = vmmov %vm22293_vm2  ;;  %vm22320_vm6 = vnez %v22240_v47 }
 0x5a1   : > { %v11213_v27 = vadd.f32 %v20373_v51, %v11174_v34  ;;  %v11214_v41 = vadd.f32 %v20373_v51, %v11175_v9  ;;  %v11105_v26 = vsel %vm22305_vm5, %v11081_v35, %v11082_v3  ;;  %vm22306_vm15 = vmmov %vm22303_vm0  ;;  %v11018_v17 = vsel %vm22174_vm4, %v10977_v16, 0.0 }
 0x5a2   : > { %v11145_v58 = vsel %vm22235_vm1, %v11105_v26, 0.0  ;;  %vm22308_vm2 = vmmov %vm22300_vm3  ;;  %v11050_v8 = vadd.f32 %v20286_v14, %v11018_v17  ;;  %v13737_v36 = vpop.f32.mrb[184].mxu0 }
 0x5a3   : > { %11245 = vst.msk [vmem:[%s16379_s14 + $0x380] sm:$0xff] %vm22306_vm15, %v11213_v27  ;;  %v10974_v37 = vsel %vm22308_vm2, %v10956_v38, %v10957_v12  ;;  %vm22309_vm7 = vmmov %vm22305_vm5  ;;  %v11177_v35 = vadd.f32 %v11145_v58, %v11049_v24  ;;  %v13771_v20 = vpop.f32.mrb[184].mxu1  ;;  %v10706_v31 = vpop.f32.mrb[185].mxu0  ;;  %v10960_v5 = vrot.slane %v13737_v36, 7 }
 0x5a4   : > { %v11102_v44 = vsel %vm22309_vm7, %v11084_v54, %v11085_v42  ;;  %vm22310_vm8 = vmmov %vm22303_vm0  ;;  %v11053_v55 = vadd.f32 %v20304_v28, %v10974_v37  ;;  %v10871_v7 = vpop.f32.mrb[185].mxu1  ;;  %v11088_v52 = vrot.slane %v13771_v20, 1  ;;  %v10958_v25 = vrot.slane %v10706_v31, 7  ;;  %v13738_v19 = vpop.f32.mrb[186].mxu0 }
 0x5a5   : > { %11247 = vst.msk [vmem:[%s16379_s14 + $0x390] sm:$0xff] %vm22310_vm8, %v11215_v50  ;;  %vm22311_vm13 = vmmov %vm22303_vm0  ;;  %v11216_v46 = vadd.f32 %v20373_v51, %v11177_v35  ;;  %v13772_v60 = vpop.f32.mrb[186].mxu1  ;;  %v10961_v34 = vrot.slane %v13738_v19, 7 }
 0x5a6   : > { %11246 = vst.msk [vmem:[%s16379_s14 + $0x388] sm:$0xff] %vm22311_vm13, %v11214_v41  ;;  %vm22312_vm4 = vmmov %vm22308_vm2  ;;  %v10874_v61 = vpop.f32.mrb[187].mxu1  ;;  %v11089_v9 = vrot.slane %v13772_v60, 1 }
 0x5a7   : > { %v10975_v29 = vsel %vm22312_vm4, %v10955_v11, %v10956_v38  ;;  %vm22313_vm1 = vmmov %vm22308_vm2  ;;  %v11087_v53 = vrot.slane %v10874_v61, 1  ;;  %v22341_v61 = vld [vmem:[#allocation24_spill] sm:$0xff] }
 0x5a8   : > { %v10976_v59 = vsel %vm22313_vm1, %v10954_v13, %v10955_v11  ;;  %v11052_v14 = vadd.f32 %v20284_v32, %v10975_v29  ;;  %vm22314_vm10 = vmmov %vm22305_vm5  ;;  %v11086_v32 = vrot.slane %v10871_v7, 1 }
 0x5a9   : > { %v11051_v49 = vadd.f32 %v20288_v43, %v10976_v59  ;;  %v11103_v24 = vsel %vm22314_vm10, %v11083_v10, %v11084_v54  ;;  %vm22315_vm14 = vmmov %vm22305_vm5  ;;  %v10709_v54 = vpop.f32.mrb[187].mxu0 }
 0x5aa   : > { %v11104_v28 = vsel %vm22315_vm14, %v11082_v3, %v11083_v10  ;;  %vm22316_vm3 = vmmov %vm22303_vm0  ;;  %v11180_v43 = vadd.f32 %v11102_v44, %v11052_v14  ;;  %v10959_v13 = vrot.slane %v10709_v54, 7  ;;  %v13741_v17 = vpop.f32.mrb[188].mxu0 }
 0x5ab   : > { %11248 = vst.msk [vmem:[%s16379_s14 + $0x398] sm:$0xff] %vm22316_vm3, %v11216_v46  ;;  %v11178_v40 = vadd.f32 %v11104_v28, %v11050_v8  ;;  %v11179_v57 = vadd.f32 %v11103_v24, %v11051_v49  ;;  %vm22317_vm12 = vmmov %vm22313_vm1  ;;  %v13775_v58 = vpop.f32.mrb[188].mxu1  ;;  %v10964_v44 = vrot.slane %v13741_v17, 7  ;;  %v10722_v35 = vpop.f32.mrb[189].mxu0 }
 0x5ac   : > { %v10973_v48 = vsel %vm22317_vm12, %v10957_v12, %v10958_v25  ;;  %v11219_v3 = vadd.f32 %v20373_v51, %v11180_v43  ;;  %vm22319_vm9 = vmmov %vm22305_vm5  ;;  %v11092_v8 = vrot.slane %v13775_v58, 1  ;;  %v13742_v46 = vpop.f32.mrb[190].mxu0 }
 0x5ad   : > { %v11217_v39 = vadd.f32 %v20373_v51, %v11178_v40  ;;  %v11218_v45 = vadd.f32 %v20373_v51, %v11179_v57  ;;  %v11022_v27 = vsel %vm22180_vm11, %v10973_v48, 0.0  ;;  %v11101_v38 = vsel %vm22319_vm9, %v11085_v42, %v11086_v32  ;;  %vm22321_vm5 = vmmov %vm22313_vm1  ;;  %v10725_v49 = vpop.f32.mrb[191].mxu0  ;;  %v22344_v48 = vld [vmem:[#allocation32_spill] sm:$0xff] }
 0x5ae   : > { %v11054_v22 = vadd.f32 %v20308_v56, %v11022_v27  ;;  %v11149_v63 = vsel %vm22320_vm6, %v11101_v38, 0.0  ;;  %v10970_v12 = vsel %vm22321_vm5, %v10960_v5, %v10961_v34  ;;  %vm22322_vm15 = vmmov %vm22309_vm7  ;;  %v10965_v20 = vrot.slane %v13742_v46, 7  ;;  %v22350_v38 = vld [vmem:[#allocation9_spill] sm:$0xff] }
 0x5af   : > { %11249 = vst.msk [vmem:[%s16379_s14 + $0x3a0] sm:$0xff] %vm22303_vm0, %v11217_v39  ;;  %v11098_v50 = vsel %vm22322_vm15, %v11088_v52, %v11089_v9  ;;  %vm22323_vm2 = vmmov %vm22303_vm0  ;;  %v11181_v41 = vadd.f32 %v11149_v63, %v11053_v55  ;;  %v11057_v42 = vadd.f32 %v20333_v23, %v10970_v12  ;;  %v10887_v23 = vpop.f32.mrb[189].mxu1  ;;  %v10963_v7 = vrot.slane %v10725_v49, 7 }
 0x5b0   : > { %11251 = vst.msk [vmem:[%s16379_s14 + $0x3b0] sm:$0xff] %vm22323_vm2, %v11219_v3  ;;  %vm22324_vm7 = vmmov %vm22303_vm0  ;;  %v13776_v29 = vpop.f32.mrb[190].mxu1  ;;  %v11090_v36 = vrot.slane %v10887_v23, 1  ;;  %vm22342_vm2 = vnez %v22341_v61 }
 0x5b1   : > { %11250 = vst.msk [vmem:[%s16379_s14 + $0x3a8] sm:$0xff] %vm22324_vm7, %v11218_v45  ;;  %vm22325_vm11 = vmmov %vm22313_vm1  ;;  %v11220_v37 = vadd.f32 %v20373_v51, %v11181_v41  ;;  %v10890_v14 = vpop.f32.mrb[191].mxu1  ;;  %v11093_v31 = vrot.slane %v13776_v29, 1 }
 0x5b2   : > { %v10971_v16 = vsel %vm22325_vm11, %v10959_v13, %v10960_v5  ;;  %vm22326_vm8 = vmmov %vm22313_vm1 }
 0x5b3   : > { %v10972_v47 = vsel %vm22326_vm8, %v10958_v25, %v10959_v13  ;;  %v11056_v26 = vadd.f32 %v20306_v0, %v10971_v16  ;;  %vm22327_vm13 = vmmov %vm22319_vm9 }
 0x5b4   : > { %v11055_v56 = vadd.f32 %v20310_v1, %v10972_v47  ;;  %v11099_v11 = vsel %vm22327_vm13, %v11087_v53, %v11088_v52  ;;  %vm22328_vm4 = vmmov %vm22319_vm9  ;;  %v10962_v1 = vrot.slane %v10722_v35, 7  ;;  %v22331_v52 = vld [vmem:[#allocation22_spill] sm:$0xff]  ;;  %vm22335_vm9 = vnez %v21894_v4 }
 0x5b5   : > { %v11184_v55 = vadd.f32 %v11098_v50, %v11056_v26  ;;  %v11100_v10 = vsel %vm22328_vm4, %v11086_v32, %v11087_v53  ;;  %vm22329_vm1 = vmmov %vm22303_vm0  ;;  %vm22332_vm14 = vnez %v22331_v52  ;;  %v22337_v32 = vrot.slane %v20341_v18, 7 }
 0x5b6   : > { %11252 = vst.msk [vmem:[%s16379_s14 + $0x3b8] sm:$0xff] %vm22329_vm1, %v11220_v37  ;;  %v11182_v0 = vadd.f32 %v11100_v10, %v11054_v22  ;;  %v11183_v59 = vadd.f32 %v11099_v11, %v11055_v56  ;;  %vm22330_vm10 = vmmov %vm22321_vm5  ;;  %v22345_v18 = vrot.slane %v20343_v15, 1  ;;  %v22351_v22 = vld [vmem:[#allocation21_spill] sm:$0xff]  ;;  %v11091_v50 = vrot.slane %v10890_v14, 1 }
 0x5b7   : > { %v11223_v24 = vadd.f32 %v20373_v51, %v11184_v55  ;;  %v10969_v28 = vsel %vm22330_vm10, %v10961_v34, %v10962_v1  ;;  %vm22333_vm3 = vmmov %vm22328_vm4  ;;  %vm22349_vm4 = vnez %v21902_v62 }
 0x5b8   : > { %v11221_v40 = vadd.f32 %v20373_v51, %v11182_v0  ;;  %v11222_v5 = vadd.f32 %v20373_v51, %v11183_v59  ;;  %v11026_v25 = vsel %vm22332_vm14, %v10969_v28, 0.0  ;;  %v11097_v19 = vsel %vm22333_vm3, %v11089_v9, %v11090_v36  ;;  %vm22334_vm12 = vmmov %vm22303_vm0 }
 0x5b9   : > { %11255 = vst.msk [vmem:[%s16379_s14 + $0x3d0] sm:$0xff] %vm22334_vm12, %v11223_v24  ;;  %v11058_v60 = vadd.f32 %v20339_v2, %v11026_v25  ;;  %v11153_v43 = vsel %vm22335_vm9, %v11097_v19, 0.0  ;;  %vm22336_vm0 = vmmov %vm22321_vm5 }
 0x5ba   : > { %v10966_v57 = vsel %vm22336_vm0, %v10964_v44, %v10965_v20  ;;  %vm22338_vm6 = vmmov %vm22336_vm0  ;;  %v11185_v54 = vadd.f32 %v11153_v43, %v11057_v42 }
 0x5bb   : > { %v10997_v34 = vsel %vm22338_vm6, %v10965_v20, %v22337_v32  ;;  %vm22339_vm5 = vmmov %vm22329_vm1  ;;  %v11061_v4 = vadd.f32 %v20337_v6, %v10966_v57 }
 0x5bc   : > { %11253 = vst.msk [vmem:[%s16379_s14 + $0x3c0] sm:$0xff] %vm22339_vm5, %v11221_v40  ;;  %vm22340_vm15 = vmmov %vm22329_vm1  ;;  %v10998_v2 = vsel %vm22342_vm2, %v10997_v34, 0.0  ;;  %v11224_v33 = vadd.f32 %v20373_v51, %v11185_v54 }
 0x5bd   : > { %11254 = vst.msk [vmem:[%s16379_s14 + $0x3c8] sm:$0xff] %vm22340_vm15, %v11222_v5  ;;  %vm22343_vm7 = vmmov %vm22333_vm3  ;;  %v11030_v9 = vadd.f32 %v22344_v48, %v10998_v2 }
 0x5be   : > { %v11094_v39 = vsel %vm22343_vm7, %v11092_v8, %v11093_v31  ;;  %vm22346_vm11 = vmmov %vm22333_vm3  ;;  %11256 = vst.msk [vmem:[%s16379_s14 + $0x3d8] sm:$0xff] %vm22329_vm1, %v11224_v33 }
 0x5bf   : > { %v11125_v13 = vsel %vm22346_vm11, %v11093_v31, %v22345_v18  ;;  %vm22347_vm8 = vmmov %vm22336_vm0  ;;  %v11158_v63 = vadd.f32 %v22351_v22, %v11030_v9 }
 0x5c0   : > { %v10967_v3 = vsel %vm22347_vm8, %v10963_v7, %v10964_v44  ;;  %vm22348_vm13 = vmmov %vm22336_vm0  ;;  %v11157_v6 = vsel %vm22349_vm4, %v11125_v13, 0.0 }
 0x5c1   : > { %v10968_v45 = vsel %vm22348_vm13, %v10962_v1, %v10963_v7  ;;  %v11060_v15 = vadd.f32 %v22350_v38, %v10967_v3  ;;  %v11189_v12 = vadd.f32 %v11157_v6, %v11061_v4  ;;  %v11197_v42 = vadd.f32 %v20373_v51, %v11158_v63  ;;  %vm22352_vm10 = vmmov %vm22333_vm3 }
 0x5c2   : > { %v11059_v27 = vadd.f32 %v20345_v30, %v10968_v45  ;;  %v11095_v16 = vsel %vm22352_vm10, %v11091_v50, %v11092_v8  ;;  %vm22353_vm14 = vmmov %vm22333_vm3 }
 0x5c3   : > { %v11188_v41 = vadd.f32 %v11094_v39, %v11060_v15  ;;  %v11228_v62 = vadd.f32 %v20373_v51, %v11189_v12  ;;  %v11096_v30 = vsel %vm22353_vm14, %v11090_v36, %v11091_v50  ;;  %vm22354_vm3 = vmmov %vm22329_vm1 }
 0x5c4   : > { %v11186_v56 = vadd.f32 %v11096_v30, %v11058_v60  ;;  %v11187_v26 = vadd.f32 %v11095_v16, %v11059_v27  ;;  %11229 = vst.msk [vmem:[%s16379_s14 + $0x300] sm:$0xff] %vm22354_vm3, %v11197_v42  ;;  %vm22355_vm12 = vmmov %vm22329_vm1 }
 0x5c5   : > { %v11227_v47 = vadd.f32 %v20373_v51, %v11188_v41  ;;  %11260 = vst.msk [vmem:[%s16379_s14 + $0x3f8] sm:$0xff] %vm22355_vm12, %v11228_v62  ;;  %vm22356_vm9 = vmmov %vm22329_vm1 }
 0x5c6   : > { %v11225_v53 = vadd.f32 %v20373_v51, %v11186_v56  ;;  %v11226_v17 = vadd.f32 %v20373_v51, %v11187_v26  ;;  %vm22357_vm0 = vmmov %vm22329_vm1 }
 0x5c7   : > { %11259 = vst.msk [vmem:[%s16379_s14 + $0x3f0] sm:$0xff] %vm22356_vm9, %v11227_v47  ;;  %vm22358_vm6 = vmmov %vm22357_vm0 }
 0x5c8   : > { %11257 = vst.msk [vmem:[%s16379_s14 + $0x3e0] sm:$0xff] %vm22357_vm0, %v11225_v53 }
 0x5c9   : > { %11258 = vst.msk [vmem:[%s16379_s14 + $0x3e8] sm:$0xff] %vm22358_vm6, %v11226_v17 }
 0x5ca PF: > { %s13_s12 = sadd.s32 1, %s14603_s12  }
 0x5cb   : > { %p10_p4 = scmp.ge.s32.totalorder %s13_s12, 4  }
 0x5cd   :  { %12 = sbr.rel (!%p10_p4) target bundleno = 1 (0x1), region = 82 }

</bundles_post_ra>
